<compile_context>
chip_gen: v7x
topology: tpu7x:2x2x1
jax: 0.10.0
libtpu: 0.0.40
codegen_flags: <defaults>
</compile_context>

<pallas_src>
import functools

import jax
import jax.numpy as jnp
from jax import lax
from jax.experimental import pallas as pl
from jax.experimental.pallas import tpu as pltpu

# ---------------- model hyper-parameters (small, consistent with the module) ----
B = 2          # batch
N = 256        # sequence length (> 128 so the band mask actually masks something)
DIM = 32       # model dim
HEADS = 2
DIM_HEAD = 32
INNER = HEADS * DIM_HEAD          # 64  (!= DIM, so to_out is a real Linear)
BAND = 128                        # mask band half-width from the module
LN_EPS = 1e-5
NEG_FILL = -10000.0


def _masked_attn_kernel(x_ref, g_ref, b_ref, wqkv_ref, wout_ref, o_ref,
                        *, bb, n, d, heads, dim_head, lane_dense):
    """One grid step == `bb` batch elements. Everything fits in VMEM."""
    inner = heads * dim_head

    x = x_ref[...].reshape(bb * n, d)              # collapse batch into rows

    # ---- LayerNorm(dim), f32 ---------------------------------------------
    mu = jnp.mean(x, axis=-1, keepdims=True)
    xc = x - mu
    var = jnp.mean(xc * xc, axis=-1, keepdims=True)
    xn = (xc * lax.rsqrt(var + LN_EPS)) * g_ref[...] + b_ref[...]

    # ---- QKV projection (no bias): bf16 MXU operands, f32 accumulate ------
    w_qkv = wqkv_ref[...].astype(jnp.bfloat16)
    w_out = wout_ref[...].astype(jnp.bfloat16)
    qkv = jnp.dot(xn.astype(jnp.bfloat16), w_qkv,
                  preferred_element_type=jnp.float32)        # (bb*n, 3*inner)

    # ---- additive band mask (built once, reused for all heads/batches) ----
    row = lax.broadcasted_iota(jnp.int32, (n, n), 0)
    col = lax.broadcasted_iota(jnp.int32, (n, n), 1)
    diff = col - row
    band = jnp.logical_and(diff >= -BAND, diff < BAND)       # -128 <= col-row <= 127
    mask_add = jnp.where(band, 0.0, NEG_FILL).astype(jnp.float32)

    contract_last = (((1,), (1,)), ((), ()))   # q @ k^T without materializing k.T
    rows_b = (n * d) // 128

    for b in range(bb):                                   # static unroll (bb <= 2)
        q_b = qkv[b * n:(b + 1) * n, 0 * inner:1 * inner]
        k_b = qkv[b * n:(b + 1) * n, 1 * inner:2 * inner]
        v_b = qkv[b * n:(b + 1) * n, 2 * inner:3 * inner].astype(jnp.bfloat16)

        acc = jnp.zeros((n, d), jnp.float32)
        for h in range(heads):                            # static unroll, heads small
            qh = q_b[:, h * dim_head:(h + 1) * dim_head]  # (n, dh) f32
            kh = k_b[:, h * dim_head:(h + 1) * dim_head]
            vh = v_b[:, h * dim_head:(h + 1) * dim_head]  # (n, dh) bf16

            # NOTE: reference forward does NOT apply self.scale.
            s = lax.dot_general(qh, kh, contract_last,
                                preferred_element_type=jnp.float32)   # (n, n)
            s = s + mask_add

            m = jnp.max(s, axis=-1, keepdims=True)
            e = jnp.exp(s - m)
            p = e * pl.reciprocal(jnp.sum(e, axis=-1, keepdims=True), approx=True)

            ho = jnp.dot(p.astype(jnp.bfloat16), vh,
                         preferred_element_type=jnp.float32)          # (n, dh)
            # accumulate through the matching w_out rows (no head concat)
            acc = acc + jnp.dot(ho.astype(jnp.bfloat16),
                                w_out[h * dim_head:(h + 1) * dim_head, :],
                                preferred_element_type=jnp.float32)   # (n, d)

        if lane_dense:
            # lane-dense store: (n, d) -> (n*d/128, 128), every vst unmasked
            o_ref[b * rows_b:(b + 1) * rows_b, :] = acc.reshape(rows_b, 128)
        else:
            o_ref[b] = acc


def _build_call(b, n, d, heads, dim_head, bb, lane_dense):
    inner = heads * dim_head
    grid = (b // bb,)
    kernel = functools.partial(_masked_attn_kernel, bb=bb, n=n, d=d,
                               heads=heads, dim_head=dim_head,
                               lane_dense=lane_dense)
    in_specs = [
        pl.BlockSpec((bb, n, d), lambda i: (i, 0, 0)),          # x
        pl.BlockSpec((1, d), lambda i: (0, 0)),                 # gamma
        pl.BlockSpec((1, d), lambda i: (0, 0)),                 # beta
        pl.BlockSpec((d, 3 * inner), lambda i: (0, 0)),         # w_qkv
        pl.BlockSpec((inner, d), lambda i: (0, 0)),             # w_out
    ]
    if lane_dense:
        rows_b = (n * d) // 128
        out_shape = jax.ShapeDtypeStruct((b * rows_b, 128), jnp.float32)
        out_specs = pl.BlockSpec((bb * rows_b, 128), lambda i: (i, 0))
    else:
        out_shape = jax.ShapeDtypeStruct((b, n, d), jnp.float32)
        out_specs = pl.BlockSpec((bb, n, d), lambda i: (i, 0, 0))
    sem = ("arbitrary",) if (b // bb) == 1 else ("parallel",)
    return pl.pallas_call(
        kernel,
        out_shape=out_shape,
        grid_spec=pltpu.PrefetchScalarGridSpec(
            num_scalar_prefetch=0,
            grid=grid,
            in_specs=in_specs,
            out_specs=out_specs,
        ),
        compiler_params=pltpu.CompilerParams(dimension_semantics=sem),
    )


def masked_attention(x, gamma, beta, w_qkv, w_out, *, heads, dim_head,
                     fuse_batch=None, lane_dense=True):
    b, n, d = x.shape
    assert (n * d) % 128 == 0

    if fuse_batch is None:
        # Single-TC chips (v5e/v6e): fuse the whole batch into one grid step
        # (fatter QKV matmul, no per-step overhead).  v7x has 2 TensorCores:
        # keep grid=(B,) parallel so each core takes one batch element.
        try:
            kind = jax.devices()[0].device_kind.lower()
        except Exception:
            kind = ""
        fuse_batch = "7" not in kind
    bb = b if fuse_batch else 1

    def run(ld):
        out = _build_call(b, n, d, heads, dim_head, bb, ld)(
            x, gamma, beta, w_qkv, w_out)
        return out.reshape(b, n, d) if ld else out

    if lane_dense:
        try:
            return run(True)
        except Exception:
            # TODO(synk): in-kernel (n,d)->(n*d/128,128) repack not supported by
            # this Mosaic build; falling back to direct (masked) (n,d) stores.
            return run(False)
    return run(False)


# ----------------------------- pure-JAX reference ------------------------------
def reference(x, gamma, beta, w_qkv, w_out, *, heads, dim_head):
    b, n, d = x.shape
    inner = heads * dim_head
    mu = jnp.mean(x, axis=-1, keepdims=True)
    var = jnp.mean((x - mu) ** 2, axis=-1, keepdims=True)
    xn = (x - mu) / jnp.sqrt(var + LN_EPS) * gamma[0] + beta[0]
    qkv = xn @ w_qkv                                        # (b, n, 3*inner)
    q, k, v = jnp.split(qkv, 3, axis=-1)
    def to_heads(t):  # 'b n (h d) -> b h n d'
        return t.reshape(b, n, heads, dim_head).transpose(0, 2, 1, 3)
    q, k, v = map(to_heads, (q, k, v))
    attn = jnp.einsum('bhqd,bhkd->bhqk', q, k)
    diff = jnp.arange(n)[None, :] - jnp.arange(n)[:, None]
    band = (diff >= -BAND) & (diff < BAND)
    attn = jnp.where(band[None, None], attn, NEG_FILL)
    p = jax.nn.softmax(attn, axis=-1)
    out = jnp.einsum('bhqk,bhkd->bhqd', p, v)
    out = out.transpose(0, 2, 1, 3).reshape(b, n, inner)    # 'b h n d -> b n (h d)'
    return out @ w_out


if __name__ == "__main__":
    key = jax.random.PRNGKey(0)
    kx, kq, ko = jax.random.split(key, 3)

    x = jax.random.normal(kx, (B, N, DIM), dtype=jnp.float32)
    gamma = jnp.ones((1, DIM), dtype=jnp.float32)            # LayerNorm default init
    beta = jnp.zeros((1, DIM), dtype=jnp.float32)
    w_qkv = 0.02 * jax.random.normal(kq, (DIM, 3 * INNER), dtype=jnp.float32)
    w_out = 0.02 * jax.random.normal(ko, (INNER, DIM), dtype=jnp.float32)

    out = masked_attention(x, gamma, beta, w_qkv, w_out,
                           heads=HEADS, dim_head=DIM_HEAD)
    out = jax.block_until_ready(out)

    ref = reference(x, gamma, beta, w_qkv, w_out, heads=HEADS, dim_head=DIM_HEAD)
    assert out.shape == (B, N, DIM)
    # bf16 MXU operands + approx reciprocal -> slightly looser tolerance than f32.
    assert jnp.allclose(out, ref, atol=2e-3, rtol=2e-2), "mismatch vs reference"

    print("KERNEL_OK")
</pallas_src>

<mosaic_0001>
module attributes {stable_mosaic.version = 11 : i64} {
  func.func @_masked_attn_kernel(%arg0: i32, %arg1: memref<2x256x32xf32, #tpu.memory_space<vmem>>, %arg2: memref<1x32xf32, #tpu.memory_space<vmem>>, %arg3: memref<1x32xf32, #tpu.memory_space<vmem>>, %arg4: memref<32x192xf32, #tpu.memory_space<vmem>>, %arg5: memref<64x32xf32, #tpu.memory_space<vmem>>, %arg6: memref<128x128xf32, #tpu.memory_space<vmem>>) attributes {dimension_semantics = [#tpu.dimension_semantics<arbitrary>], iteration_bounds = array<i64: 1>, scalar_prefetch = 0 : i64, scratch_operands = 0 : i64, tpu.core_type = #tpu.core_type<tc>, window_params = [{transform_indices = @transform_0, window_bounds = array<i64: 2, 256, 32>}, {pipeline_mode = #tpu.pipeline_mode<synchronous>, transform_indices = @transform_1, window_bounds = array<i64: 1, 32>}, {pipeline_mode = #tpu.pipeline_mode<synchronous>, transform_indices = @transform_2, window_bounds = array<i64: 1, 32>}, {pipeline_mode = #tpu.pipeline_mode<synchronous>, transform_indices = @transform_3, window_bounds = array<i64: 32, 192>}, {pipeline_mode = #tpu.pipeline_mode<synchronous>, transform_indices = @transform_4, window_bounds = array<i64: 64, 32>}, {transform_indices = @transform_5, window_bounds = array<i64: 128, 128>}]} {
    %c0 = arith.constant 0 : index
    %c0_0 = arith.constant 0 : index
    %c0_1 = arith.constant 0 : index
    %0 = vector.load %arg1[%c0, %c0_0, %c0_1] : memref<2x256x32xf32, #tpu.memory_space<vmem>>, vector<2x256x32xf32>
    %1 = vector.shape_cast %0 : vector<2x256x32xf32> to vector<512x32xf32>
    %cst = arith.constant dense<0.000000e+00> : vector<512xf32>
    %2 = vector.multi_reduction <add>, %1, %cst [1] : vector<512x32xf32> to vector<512xf32>
    %3 = vector.shape_cast %2 : vector<512xf32> to vector<512x1xf32>
    %cst_2 = arith.constant 3.200000e+01 : f32
    %4 = vector.broadcast %cst_2 : f32 to vector<512x1xf32>
    %5 = arith.divf %3, %4 : vector<512x1xf32>
    %6 = vector.broadcast %5 : vector<512x1xf32> to vector<512x32xf32>
    %7 = arith.subf %1, %6 : vector<512x32xf32>
    %8 = arith.mulf %7, %7 : vector<512x32xf32>
    %cst_3 = arith.constant dense<0.000000e+00> : vector<512xf32>
    %9 = vector.multi_reduction <add>, %8, %cst_3 [1] : vector<512x32xf32> to vector<512xf32>
    %10 = vector.shape_cast %9 : vector<512xf32> to vector<512x1xf32>
    %cst_4 = arith.constant 3.200000e+01 : f32
    %11 = vector.broadcast %cst_4 : f32 to vector<512x1xf32>
    %12 = arith.divf %10, %11 : vector<512x1xf32>
    %cst_5 = arith.constant 9.99999974E-6 : f32
    %13 = vector.broadcast %cst_5 : f32 to vector<512x1xf32>
    %14 = arith.addf %12, %13 : vector<512x1xf32>
    %15 = math.rsqrt %14 : vector<512x1xf32>
    %16 = vector.broadcast %15 : vector<512x1xf32> to vector<512x32xf32>
    %17 = arith.mulf %7, %16 : vector<512x32xf32>
    %c0_6 = arith.constant 0 : index
    %c0_7 = arith.constant 0 : index
    %18 = vector.load %arg2[%c0_6, %c0_7] : memref<1x32xf32, #tpu.memory_space<vmem>>, vector<1x32xf32>
    %19 = vector.broadcast %18 : vector<1x32xf32> to vector<512x32xf32>
    %20 = arith.mulf %17, %19 : vector<512x32xf32>
    %c0_8 = arith.constant 0 : index
    %c0_9 = arith.constant 0 : index
    %21 = vector.load %arg3[%c0_8, %c0_9] : memref<1x32xf32, #tpu.memory_space<vmem>>, vector<1x32xf32>
    %22 = vector.broadcast %21 : vector<1x32xf32> to vector<512x32xf32>
    %23 = arith.addf %20, %22 : vector<512x32xf32>
    %c0_10 = arith.constant 0 : index
    %c0_11 = arith.constant 0 : index
    %24 = vector.load %arg4[%c0_10, %c0_11] : memref<32x192xf32, #tpu.memory_space<vmem>>, vector<32x192xf32>
    %25 = arith.truncf %24 : vector<32x192xf32> to vector<32x192xbf16>
    %c0_12 = arith.constant 0 : index
    %c0_13 = arith.constant 0 : index
    %26 = vector.load %arg5[%c0_12, %c0_13] : memref<64x32xf32, #tpu.memory_space<vmem>>, vector<64x32xf32>
    %27 = arith.truncf %26 : vector<64x32xf32> to vector<64x32xbf16>
    %28 = arith.truncf %23 : vector<512x32xf32> to vector<512x32xbf16>
    %cst_14 = arith.constant dense<0.000000e+00> : vector<512x192xf32>
    %29 = tpu.matmul %28, %25, %cst_14 {dimension_numbers = #tpu.dot_dimension_numbers<[1], [0], [0], [1], [0, 0, 1, 1], [], []>} : vector<512x32xbf16>, vector<32x192xbf16>, vector<512x192xf32> -> vector<512x192xf32>
    %30 = tpu.iota {dimensions = array<i32: 0>} : vector<256x256xi32>
    %31 = tpu.iota {dimensions = array<i32: 1>} : vector<256x256xi32>
    %32 = arith.subi %31, %30 : vector<256x256xi32>
    %c-128_i32 = arith.constant -128 : i32
    %33 = vector.broadcast %c-128_i32 : i32 to vector<256x256xi32>
    %34 = arith.cmpi sge, %32, %33 : vector<256x256xi32>
    %c128_i32 = arith.constant 128 : i32
    %35 = vector.broadcast %c128_i32 : i32 to vector<256x256xi32>
    %36 = arith.cmpi slt, %32, %35 : vector<256x256xi32>
    %37 = arith.andi %34, %36 : vector<256x256xi1>
    %cst_15 = arith.constant 0.000000e+00 : f32
    %cst_16 = arith.constant -1.000000e+04 : f32
    %38 = vector.broadcast %cst_15 : f32 to vector<256x256xf32>
    %39 = vector.broadcast %cst_16 : f32 to vector<256x256xf32>
    %40 = arith.select %37, %38, %39 : vector<256x256xi1>, vector<256x256xf32>
    %41 = vector.extract_strided_slice %29 {offsets = [0, 0], sizes = [256, 64], strides = [1, 1]} : vector<512x192xf32> to vector<256x64xf32>
    %42 = vector.extract_strided_slice %29 {offsets = [0, 64], sizes = [256, 64], strides = [1, 1]} : vector<512x192xf32> to vector<256x64xf32>
    %43 = vector.extract_strided_slice %29 {offsets = [0, 128], sizes = [256, 64], strides = [1, 1]} : vector<512x192xf32> to vector<256x64xf32>
    %44 = arith.truncf %43 : vector<256x64xf32> to vector<256x64xbf16>
    %cst_17 = arith.constant 0.000000e+00 : f32
    %45 = vector.broadcast %cst_17 : f32 to vector<256x32xf32>
    %46 = vector.extract_strided_slice %41 {offsets = [0, 0], sizes = [256, 32], strides = [1, 1]} : vector<256x64xf32> to vector<256x32xf32>
    %47 = vector.extract_strided_slice %42 {offsets = [0, 0], sizes = [256, 32], strides = [1, 1]} : vector<256x64xf32> to vector<256x32xf32>
    %48 = vector.extract_strided_slice %44 {offsets = [0, 0], sizes = [256, 32], strides = [1, 1]} : vector<256x64xbf16> to vector<256x32xbf16>
    %cst_18 = arith.constant dense<0.000000e+00> : vector<256x256xf32>
    %49 = tpu.matmul %46, %47, %cst_18 {dimension_numbers = #tpu.dot_dimension_numbers<[1], [1], [0], [0], [0, 0, 1, 0], [], []>} : vector<256x32xf32>, vector<256x32xf32>, vector<256x256xf32> -> vector<256x256xf32>
    %50 = arith.addf %49, %40 : vector<256x256xf32>
    %cst_19 = arith.constant dense<0xFF800000> : vector<256xf32>
    %51 = vector.multi_reduction <maximumf>, %50, %cst_19 [1] : vector<256x256xf32> to vector<256xf32>
    %52 = vector.shape_cast %51 : vector<256xf32> to vector<256x1xf32>
    %53 = vector.broadcast %52 : vector<256x1xf32> to vector<256x256xf32>
    %54 = arith.subf %50, %53 : vector<256x256xf32>
    %55 = math.exp %54 : vector<256x256xf32>
    %cst_20 = arith.constant dense<0.000000e+00> : vector<256xf32>
    %56 = vector.multi_reduction <add>, %55, %cst_20 [1] : vector<256x256xf32> to vector<256xf32>
    %57 = vector.shape_cast %56 : vector<256xf32> to vector<256x1xf32>
    %58 = tpu.reciprocal %57 {approx = true} : vector<256x1xf32> -> vector<256x1xf32>
    %59 = vector.broadcast %58 : vector<256x1xf32> to vector<256x256xf32>
    %60 = arith.mulf %55, %59 : vector<256x256xf32>
    %61 = arith.truncf %60 : vector<256x256xf32> to vector<256x256xbf16>
    %cst_21 = arith.constant dense<0.000000e+00> : vector<256x32xf32>
    %62 = tpu.matmul %61, %48, %cst_21 {dimension_numbers = #tpu.dot_dimension_numbers<[1], [0], [0], [1], [0, 0, 1, 1], [], []>} : vector<256x256xbf16>, vector<256x32xbf16>, vector<256x32xf32> -> vector<256x32xf32>
    %63 = arith.truncf %62 : vector<256x32xf32> to vector<256x32xbf16>
    %64 = vector.extract_strided_slice %27 {offsets = [0, 0], sizes = [32, 32], strides = [1, 1]} : vector<64x32xbf16> to vector<32x32xbf16>
    %cst_22 = arith.constant dense<0.000000e+00> : vector<256x32xf32>
    %65 = tpu.matmul %63, %64, %cst_22 {dimension_numbers = #tpu.dot_dimension_numbers<[1], [0], [0], [1], [0, 0, 1, 1], [], []>} : vector<256x32xbf16>, vector<32x32xbf16>, vector<256x32xf32> -> vector<256x32xf32>
    %66 = arith.addf %45, %65 : vector<256x32xf32>
    %67 = vector.extract_strided_slice %41 {offsets = [0, 32], sizes = [256, 32], strides = [1, 1]} : vector<256x64xf32> to vector<256x32xf32>
    %68 = vector.extract_strided_slice %42 {offsets = [0, 32], sizes = [256, 32], strides = [1, 1]} : vector<256x64xf32> to vector<256x32xf32>
    %69 = vector.extract_strided_slice %44 {offsets = [0, 32], sizes = [256, 32], strides = [1, 1]} : vector<256x64xbf16> to vector<256x32xbf16>
    %cst_23 = arith.constant dense<0.000000e+00> : vector<256x256xf32>
    %70 = tpu.matmul %67, %68, %cst_23 {dimension_numbers = #tpu.dot_dimension_numbers<[1], [1], [0], [0], [0, 0, 1, 0], [], []>} : vector<256x32xf32>, vector<256x32xf32>, vector<256x256xf32> -> vector<256x256xf32>
    %71 = arith.addf %70, %40 : vector<256x256xf32>
    %cst_24 = arith.constant dense<0xFF800000> : vector<256xf32>
    %72 = vector.multi_reduction <maximumf>, %71, %cst_24 [1] : vector<256x256xf32> to vector<256xf32>
    %73 = vector.shape_cast %72 : vector<256xf32> to vector<256x1xf32>
    %74 = vector.broadcast %73 : vector<256x1xf32> to vector<256x256xf32>
    %75 = arith.subf %71, %74 : vector<256x256xf32>
    %76 = math.exp %75 : vector<256x256xf32>
    %cst_25 = arith.constant dense<0.000000e+00> : vector<256xf32>
    %77 = vector.multi_reduction <add>, %76, %cst_25 [1] : vector<256x256xf32> to vector<256xf32>
    %78 = vector.shape_cast %77 : vector<256xf32> to vector<256x1xf32>
    %79 = tpu.reciprocal %78 {approx = true} : vector<256x1xf32> -> vector<256x1xf32>
    %80 = vector.broadcast %79 : vector<256x1xf32> to vector<256x256xf32>
    %81 = arith.mulf %76, %80 : vector<256x256xf32>
    %82 = arith.truncf %81 : vector<256x256xf32> to vector<256x256xbf16>
    %cst_26 = arith.constant dense<0.000000e+00> : vector<256x32xf32>
    %83 = tpu.matmul %82, %69, %cst_26 {dimension_numbers = #tpu.dot_dimension_numbers<[1], [0], [0], [1], [0, 0, 1, 1], [], []>} : vector<256x256xbf16>, vector<256x32xbf16>, vector<256x32xf32> -> vector<256x32xf32>
    %84 = arith.truncf %83 : vector<256x32xf32> to vector<256x32xbf16>
    %85 = vector.extract_strided_slice %27 {offsets = [32, 0], sizes = [32, 32], strides = [1, 1]} : vector<64x32xbf16> to vector<32x32xbf16>
    %cst_27 = arith.constant dense<0.000000e+00> : vector<256x32xf32>
    %86 = tpu.matmul %84, %85, %cst_27 {dimension_numbers = #tpu.dot_dimension_numbers<[1], [0], [0], [1], [0, 0, 1, 1], [], []>} : vector<256x32xbf16>, vector<32x32xbf16>, vector<256x32xf32> -> vector<256x32xf32>
    %87 = arith.addf %66, %86 : vector<256x32xf32>
    %88 = vector.shape_cast %87 : vector<256x32xf32> to vector<64x128xf32>
    %c0_28 = arith.constant 0 : index
    %c0_29 = arith.constant 0 : index
    %89 = vector.load %arg6[%c0_28, %c0_29] : memref<128x128xf32, #tpu.memory_space<vmem>>, vector<64x128xf32>
    tpu.vector_store %arg6[%c0_28, %c0_29], %88 {strides = array<i32>} : memref<128x128xf32, #tpu.memory_space<vmem>>, vector<64x128xf32>,
    %90 = vector.extract_strided_slice %29 {offsets = [256, 0], sizes = [256, 64], strides = [1, 1]} : vector<512x192xf32> to vector<256x64xf32>
    %91 = vector.extract_strided_slice %29 {offsets = [256, 64], sizes = [256, 64], strides = [1, 1]} : vector<512x192xf32> to vector<256x64xf32>
    %92 = vector.extract_strided_slice %29 {offsets = [256, 128], sizes = [256, 64], strides = [1, 1]} : vector<512x192xf32> to vector<256x64xf32>
    %93 = arith.truncf %92 : vector<256x64xf32> to vector<256x64xbf16>
    %cst_30 = arith.constant 0.000000e+00 : f32
    %94 = vector.broadcast %cst_30 : f32 to vector<256x32xf32>
    %95 = vector.extract_strided_slice %90 {offsets = [0, 0], sizes = [256, 32], strides = [1, 1]} : vector<256x64xf32> to vector<256x32xf32>
    %96 = vector.extract_strided_slice %91 {offsets = [0, 0], sizes = [256, 32], strides = [1, 1]} : vector<256x64xf32> to vector<256x32xf32>
    %97 = vector.extract_strided_slice %93 {offsets = [0, 0], sizes = [256, 32], strides = [1, 1]} : vector<256x64xbf16> to vector<256x32xbf16>
    %cst_31 = arith.constant dense<0.000000e+00> : vector<256x256xf32>
    %98 = tpu.matmul %95, %96, %cst_31 {dimension_numbers = #tpu.dot_dimension_numbers<[1], [1], [0], [0], [0, 0, 1, 0], [], []>} : vector<256x32xf32>, vector<256x32xf32>, vector<256x256xf32> -> vector<256x256xf32>
    %99 = arith.addf %98, %40 : vector<256x256xf32>
    %cst_32 = arith.constant dense<0xFF800000> : vector<256xf32>
    %100 = vector.multi_reduction <maximumf>, %99, %cst_32 [1] : vector<256x256xf32> to vector<256xf32>
    %101 = vector.shape_cast %100 : vector<256xf32> to vector<256x1xf32>
    %102 = vector.broadcast %101 : vector<256x1xf32> to vector<256x256xf32>
    %103 = arith.subf %99, %102 : vector<256x256xf32>
    %104 = math.exp %103 : vector<256x256xf32>
    %cst_33 = arith.constant dense<0.000000e+00> : vector<256xf32>
    %105 = vector.multi_reduction <add>, %104, %cst_33 [1] : vector<256x256xf32> to vector<256xf32>
    %106 = vector.shape_cast %105 : vector<256xf32> to vector<256x1xf32>
    %107 = tpu.reciprocal %106 {approx = true} : vector<256x1xf32> -> vector<256x1xf32>
    %108 = vector.broadcast %107 : vector<256x1xf32> to vector<256x256xf32>
    %109 = arith.mulf %104, %108 : vector<256x256xf32>
    %110 = arith.truncf %109 : vector<256x256xf32> to vector<256x256xbf16>
    %cst_34 = arith.constant dense<0.000000e+00> : vector<256x32xf32>
    %111 = tpu.matmul %110, %97, %cst_34 {dimension_numbers = #tpu.dot_dimension_numbers<[1], [0], [0], [1], [0, 0, 1, 1], [], []>} : vector<256x256xbf16>, vector<256x32xbf16>, vector<256x32xf32> -> vector<256x32xf32>
    %112 = arith.truncf %111 : vector<256x32xf32> to vector<256x32xbf16>
    %113 = vector.extract_strided_slice %27 {offsets = [0, 0], sizes = [32, 32], strides = [1, 1]} : vector<64x32xbf16> to vector<32x32xbf16>
    %cst_35 = arith.constant dense<0.000000e+00> : vector<256x32xf32>
    %114 = tpu.matmul %112, %113, %cst_35 {dimension_numbers = #tpu.dot_dimension_numbers<[1], [0], [0], [1], [0, 0, 1, 1], [], []>} : vector<256x32xbf16>, vector<32x32xbf16>, vector<256x32xf32> -> vector<256x32xf32>
    %115 = arith.addf %94, %114 : vector<256x32xf32>
    %116 = vector.extract_strided_slice %90 {offsets = [0, 32], sizes = [256, 32], strides = [1, 1]} : vector<256x64xf32> to vector<256x32xf32>
    %117 = vector.extract_strided_slice %91 {offsets = [0, 32], sizes = [256, 32], strides = [1, 1]} : vector<256x64xf32> to vector<256x32xf32>
    %118 = vector.extract_strided_slice %93 {offsets = [0, 32], sizes = [256, 32], strides = [1, 1]} : vector<256x64xbf16> to vector<256x32xbf16>
    %cst_36 = arith.constant dense<0.000000e+00> : vector<256x256xf32>
    %119 = tpu.matmul %116, %117, %cst_36 {dimension_numbers = #tpu.dot_dimension_numbers<[1], [1], [0], [0], [0, 0, 1, 0], [], []>} : vector<256x32xf32>, vector<256x32xf32>, vector<256x256xf32> -> vector<256x256xf32>
    %120 = arith.addf %119, %40 : vector<256x256xf32>
    %cst_37 = arith.constant dense<0xFF800000> : vector<256xf32>
    %121 = vector.multi_reduction <maximumf>, %120, %cst_37 [1] : vector<256x256xf32> to vector<256xf32>
    %122 = vector.shape_cast %121 : vector<256xf32> to vector<256x1xf32>
    %123 = vector.broadcast %122 : vector<256x1xf32> to vector<256x256xf32>
    %124 = arith.subf %120, %123 : vector<256x256xf32>
    %125 = math.exp %124 : vector<256x256xf32>
    %cst_38 = arith.constant dense<0.000000e+00> : vector<256xf32>
    %126 = vector.multi_reduction <add>, %125, %cst_38 [1] : vector<256x256xf32> to vector<256xf32>
    %127 = vector.shape_cast %126 : vector<256xf32> to vector<256x1xf32>
    %128 = tpu.reciprocal %127 {approx = true} : vector<256x1xf32> -> vector<256x1xf32>
    %129 = vector.broadcast %128 : vector<256x1xf32> to vector<256x256xf32>
    %130 = arith.mulf %125, %129 : vector<256x256xf32>
    %131 = arith.truncf %130 : vector<256x256xf32> to vector<256x256xbf16>
    %cst_39 = arith.constant dense<0.000000e+00> : vector<256x32xf32>
    %132 = tpu.matmul %131, %118, %cst_39 {dimension_numbers = #tpu.dot_dimension_numbers<[1], [0], [0], [1], [0, 0, 1, 1], [], []>} : vector<256x256xbf16>, vector<256x32xbf16>, vector<256x32xf32> -> vector<256x32xf32>
    %133 = arith.truncf %132 : vector<256x32xf32> to vector<256x32xbf16>
    %134 = vector.extract_strided_slice %27 {offsets = [32, 0], sizes = [32, 32], strides = [1, 1]} : vector<64x32xbf16> to vector<32x32xbf16>
    %cst_40 = arith.constant dense<0.000000e+00> : vector<256x32xf32>
    %135 = tpu.matmul %133, %134, %cst_40 {dimension_numbers = #tpu.dot_dimension_numbers<[1], [0], [0], [1], [0, 0, 1, 1], [], []>} : vector<256x32xbf16>, vector<32x32xbf16>, vector<256x32xf32> -> vector<256x32xf32>
    %136 = arith.addf %115, %135 : vector<256x32xf32>
    %137 = vector.shape_cast %136 : vector<256x32xf32> to vector<64x128xf32>
    %c64 = arith.constant 64 : index
    %c0_41 = arith.constant 0 : index
    %138 = vector.load %arg6[%c64, %c0_41] : memref<128x128xf32, #tpu.memory_space<vmem>>, vector<64x128xf32>
    tpu.vector_store %arg6[%c64, %c0_41], %137 {strides = array<i32>} : memref<128x128xf32, #tpu.memory_space<vmem>>, vector<64x128xf32>,
    return
  }
  func.func @transform_0(%arg0: i32) -> (i32, i32, i32) {
    %c0_i32 = arith.constant 0 : i32
    %c0_i32_0 = arith.constant 0 : i32
    %c0_i32_1 = arith.constant 0 : i32
    return %arg0, %c0_i32, %c0_i32_0 : i32, i32, i32
  }
  func.func @transform_1(%arg0: i32) -> (i32, i32) {
    %c0_i32 = arith.constant 0 : i32
    %c0_i32_0 = arith.constant 0 : i32
    %c0_i32_1 = arith.constant 0 : i32
    return %c0_i32, %c0_i32_0 : i32, i32
  }
  func.func @transform_2(%arg0: i32) -> (i32, i32) {
    %c0_i32 = arith.constant 0 : i32
    %c0_i32_0 = arith.constant 0 : i32
    %c0_i32_1 = arith.constant 0 : i32
    return %c0_i32, %c0_i32_0 : i32, i32
  }
  func.func @transform_3(%arg0: i32) -> (i32, i32) {
    %c0_i32 = arith.constant 0 : i32
    %c0_i32_0 = arith.constant 0 : i32
    %c0_i32_1 = arith.constant 0 : i32
    return %c0_i32, %c0_i32_0 : i32, i32
  }
  func.func @transform_4(%arg0: i32) -> (i32, i32) {
    %c0_i32 = arith.constant 0 : i32
    %c0_i32_0 = arith.constant 0 : i32
    %c0_i32_1 = arith.constant 0 : i32
    return %c0_i32, %c0_i32_0 : i32, i32
  }
  func.func @transform_5(%arg0: i32) -> (i32, i32) {
    %c0_i32 = arith.constant 0 : i32
    %c0_i32_0 = arith.constant 0 : i32
    return %arg0, %c0_i32 : i32, i32
  }
}

module attributes {stable_mosaic.version = 11 : i64} {
  func.func @_masked_attn_kernel(%arg0: i32, %arg1: memref<2x256x32xf32, #tpu.memory_space<vmem>>, %arg2: memref<1x32xf32, #tpu.memory_space<vmem>>, %arg3: memref<1x32xf32, #tpu.memory_space<vmem>>, %arg4: memref<32x192xf32, #tpu.memory_space<vmem>>, %arg5: memref<64x32xf32, #tpu.memory_space<vmem>>, %arg6: memref<2x256x32xf32, #tpu.memory_space<vmem>>) attributes {dimension_semantics = [#tpu.dimension_semantics<arbitrary>], iteration_bounds = array<i64: 1>, scalar_prefetch = 0 : i64, scratch_operands = 0 : i64, tpu.core_type = #tpu.core_type<tc>, window_params = [{transform_indices = @transform_0, window_bounds = array<i64: 2, 256, 32>}, {pipeline_mode = #tpu.pipeline_mode<synchronous>, transform_indices = @transform_1, window_bounds = array<i64: 1, 32>}, {pipeline_mode = #tpu.pipeline_mode<synchronous>, transform_indices = @transform_2, window_bounds = array<i64: 1, 32>}, {pipeline_mode = #tpu.pipeline_mode<synchronous>, transform_indices = @transform_3, window_bounds = array<i64: 32, 192>}, {pipeline_mode = #tpu.pipeline_mode<synchronous>, transform_indices = @transform_4, window_bounds = array<i64: 64, 32>}, {transform_indices = @transform_5, window_bounds = array<i64: 2, 256, 32>}]} {
    %c0 = arith.constant 0 : index
    %c0_0 = arith.constant 0 : index
    %c0_1 = arith.constant 0 : index
    %0 = vector.load %arg1[%c0, %c0_0, %c0_1] : memref<2x256x32xf32, #tpu.memory_space<vmem>>, vector<2x256x32xf32>
    %1 = vector.shape_cast %0 : vector<2x256x32xf32> to vector<512x32xf32>
    %cst = arith.constant dense<0.000000e+00> : vector<512xf32>
    %2 = vector.multi_reduction <add>, %1, %cst [1] : vector<512x32xf32> to vector<512xf32>
    %3 = vector.shape_cast %2 : vector<512xf32> to vector<512x1xf32>
    %cst_2 = arith.constant 3.200000e+01 : f32
    %4 = vector.broadcast %cst_2 : f32 to vector<512x1xf32>
    %5 = arith.divf %3, %4 : vector<512x1xf32>
    %6 = vector.broadcast %5 : vector<512x1xf32> to vector<512x32xf32>
    %7 = arith.subf %1, %6 : vector<512x32xf32>
    %8 = arith.mulf %7, %7 : vector<512x32xf32>
    %cst_3 = arith.constant dense<0.000000e+00> : vector<512xf32>
    %9 = vector.multi_reduction <add>, %8, %cst_3 [1] : vector<512x32xf32> to vector<512xf32>
    %10 = vector.shape_cast %9 : vector<512xf32> to vector<512x1xf32>
    %cst_4 = arith.constant 3.200000e+01 : f32
    %11 = vector.broadcast %cst_4 : f32 to vector<512x1xf32>
    %12 = arith.divf %10, %11 : vector<512x1xf32>
    %cst_5 = arith.constant 9.99999974E-6 : f32
    %13 = vector.broadcast %cst_5 : f32 to vector<512x1xf32>
    %14 = arith.addf %12, %13 : vector<512x1xf32>
    %15 = math.rsqrt %14 : vector<512x1xf32>
    %16 = vector.broadcast %15 : vector<512x1xf32> to vector<512x32xf32>
    %17 = arith.mulf %7, %16 : vector<512x32xf32>
    %c0_6 = arith.constant 0 : index
    %c0_7 = arith.constant 0 : index
    %18 = vector.load %arg2[%c0_6, %c0_7] : memref<1x32xf32, #tpu.memory_space<vmem>>, vector<1x32xf32>
    %19 = vector.broadcast %18 : vector<1x32xf32> to vector<512x32xf32>
    %20 = arith.mulf %17, %19 : vector<512x32xf32>
    %c0_8 = arith.constant 0 : index
    %c0_9 = arith.constant 0 : index
    %21 = vector.load %arg3[%c0_8, %c0_9] : memref<1x32xf32, #tpu.memory_space<vmem>>, vector<1x32xf32>
    %22 = vector.broadcast %21 : vector<1x32xf32> to vector<512x32xf32>
    %23 = arith.addf %20, %22 : vector<512x32xf32>
    %c0_10 = arith.constant 0 : index
    %c0_11 = arith.constant 0 : index
    %24 = vector.load %arg4[%c0_10, %c0_11] : memref<32x192xf32, #tpu.memory_space<vmem>>, vector<32x192xf32>
    %25 = arith.truncf %24 : vector<32x192xf32> to vector<32x192xbf16>
    %c0_12 = arith.constant 0 : index
    %c0_13 = arith.constant 0 : index
    %26 = vector.load %arg5[%c0_12, %c0_13] : memref<64x32xf32, #tpu.memory_space<vmem>>, vector<64x32xf32>
    %27 = arith.truncf %26 : vector<64x32xf32> to vector<64x32xbf16>
    %28 = arith.truncf %23 : vector<512x32xf32> to vector<512x32xbf16>
    %cst_14 = arith.constant dense<0.000000e+00> : vector<512x192xf32>
    %29 = tpu.matmul %28, %25, %cst_14 {dimension_numbers = #tpu.dot_dimension_numbers<[1], [0], [0], [1], [0, 0, 1, 1], [], []>} : vector<512x32xbf16>, vector<32x192xbf16>, vector<512x192xf32> -> vector<512x192xf32>
    %30 = tpu.iota {dimensions = array<i32: 0>} : vector<256x256xi32>
    %31 = tpu.iota {dimensions = array<i32: 1>} : vector<256x256xi32>
    %32 = arith.subi %31, %30 : vector<256x256xi32>
    %c-128_i32 = arith.constant -128 : i32
    %33 = vector.broadcast %c-128_i32 : i32 to vector<256x256xi32>
    %34 = arith.cmpi sge, %32, %33 : vector<256x256xi32>
    %c128_i32 = arith.constant 128 : i32
    %35 = vector.broadcast %c128_i32 : i32 to vector<256x256xi32>
    %36 = arith.cmpi slt, %32, %35 : vector<256x256xi32>
    %37 = arith.andi %34, %36 : vector<256x256xi1>
    %cst_15 = arith.constant 0.000000e+00 : f32
    %cst_16 = arith.constant -1.000000e+04 : f32
    %38 = vector.broadcast %cst_15 : f32 to vector<256x256xf32>
    %39 = vector.broadcast %cst_16 : f32 to vector<256x256xf32>
    %40 = arith.select %37, %38, %39 : vector<256x256xi1>, vector<256x256xf32>
    %41 = vector.extract_strided_slice %29 {offsets = [0, 0], sizes = [256, 64], strides = [1, 1]} : vector<512x192xf32> to vector<256x64xf32>
    %42 = vector.extract_strided_slice %29 {offsets = [0, 64], sizes = [256, 64], strides = [1, 1]} : vector<512x192xf32> to vector<256x64xf32>
    %43 = vector.extract_strided_slice %29 {offsets = [0, 128], sizes = [256, 64], strides = [1, 1]} : vector<512x192xf32> to vector<256x64xf32>
    %44 = arith.truncf %43 : vector<256x64xf32> to vector<256x64xbf16>
    %cst_17 = arith.constant 0.000000e+00 : f32
    %45 = vector.broadcast %cst_17 : f32 to vector<256x32xf32>
    %46 = vector.extract_strided_slice %41 {offsets = [0, 0], sizes = [256, 32], strides = [1, 1]} : vector<256x64xf32> to vector<256x32xf32>
    %47 = vector.extract_strided_slice %42 {offsets = [0, 0], sizes = [256, 32], strides = [1, 1]} : vector<256x64xf32> to vector<256x32xf32>
    %48 = vector.extract_strided_slice %44 {offsets = [0, 0], sizes = [256, 32], strides = [1, 1]} : vector<256x64xbf16> to vector<256x32xbf16>
    %cst_18 = arith.constant dense<0.000000e+00> : vector<256x256xf32>
    %49 = tpu.matmul %46, %47, %cst_18 {dimension_numbers = #tpu.dot_dimension_numbers<[1], [1], [0], [0], [0, 0, 1, 0], [], []>} : vector<256x32xf32>, vector<256x32xf32>, vector<256x256xf32> -> vector<256x256xf32>
    %50 = arith.addf %49, %40 : vector<256x256xf32>
    %cst_19 = arith.constant dense<0xFF800000> : vector<256xf32>
    %51 = vector.multi_reduction <maximumf>, %50, %cst_19 [1] : vector<256x256xf32> to vector<256xf32>
    %52 = vector.shape_cast %51 : vector<256xf32> to vector<256x1xf32>
    %53 = vector.broadcast %52 : vector<256x1xf32> to vector<256x256xf32>
    %54 = arith.subf %50, %53 : vector<256x256xf32>
    %55 = math.exp %54 : vector<256x256xf32>
    %cst_20 = arith.constant dense<0.000000e+00> : vector<256xf32>
    %56 = vector.multi_reduction <add>, %55, %cst_20 [1] : vector<256x256xf32> to vector<256xf32>
    %57 = vector.shape_cast %56 : vector<256xf32> to vector<256x1xf32>
    %58 = tpu.reciprocal %57 {approx = true} : vector<256x1xf32> -> vector<256x1xf32>
    %59 = vector.broadcast %58 : vector<256x1xf32> to vector<256x256xf32>
    %60 = arith.mulf %55, %59 : vector<256x256xf32>
    %61 = arith.truncf %60 : vector<256x256xf32> to vector<256x256xbf16>
    %cst_21 = arith.constant dense<0.000000e+00> : vector<256x32xf32>
    %62 = tpu.matmul %61, %48, %cst_21 {dimension_numbers = #tpu.dot_dimension_numbers<[1], [0], [0], [1], [0, 0, 1, 1], [], []>} : vector<256x256xbf16>, vector<256x32xbf16>, vector<256x32xf32> -> vector<256x32xf32>
    %63 = arith.truncf %62 : vector<256x32xf32> to vector<256x32xbf16>
    %64 = vector.extract_strided_slice %27 {offsets = [0, 0], sizes = [32, 32], strides = [1, 1]} : vector<64x32xbf16> to vector<32x32xbf16>
    %cst_22 = arith.constant dense<0.000000e+00> : vector<256x32xf32>
    %65 = tpu.matmul %63, %64, %cst_22 {dimension_numbers = #tpu.dot_dimension_numbers<[1], [0], [0], [1], [0, 0, 1, 1], [], []>} : vector<256x32xbf16>, vector<32x32xbf16>, vector<256x32xf32> -> vector<256x32xf32>
    %66 = arith.addf %45, %65 : vector<256x32xf32>
    %67 = vector.extract_strided_slice %41 {offsets = [0, 32], sizes = [256, 32], strides = [1, 1]} : vector<256x64xf32> to vector<256x32xf32>
    %68 = vector.extract_strided_slice %42 {offsets = [0, 32], sizes = [256, 32], strides = [1, 1]} : vector<256x64xf32> to vector<256x32xf32>
    %69 = vector.extract_strided_slice %44 {offsets = [0, 32], sizes = [256, 32], strides = [1, 1]} : vector<256x64xbf16> to vector<256x32xbf16>
    %cst_23 = arith.constant dense<0.000000e+00> : vector<256x256xf32>
    %70 = tpu.matmul %67, %68, %cst_23 {dimension_numbers = #tpu.dot_dimension_numbers<[1], [1], [0], [0], [0, 0, 1, 0], [], []>} : vector<256x32xf32>, vector<256x32xf32>, vector<256x256xf32> -> vector<256x256xf32>
    %71 = arith.addf %70, %40 : vector<256x256xf32>
    %cst_24 = arith.constant dense<0xFF800000> : vector<256xf32>
    %72 = vector.multi_reduction <maximumf>, %71, %cst_24 [1] : vector<256x256xf32> to vector<256xf32>
    %73 = vector.shape_cast %72 : vector<256xf32> to vector<256x1xf32>
    %74 = vector.broadcast %73 : vector<256x1xf32> to vector<256x256xf32>
    %75 = arith.subf %71, %74 : vector<256x256xf32>
    %76 = math.exp %75 : vector<256x256xf32>
    %cst_25 = arith.constant dense<0.000000e+00> : vector<256xf32>
    %77 = vector.multi_reduction <add>, %76, %cst_25 [1] : vector<256x256xf32> to vector<256xf32>
    %78 = vector.shape_cast %77 : vector<256xf32> to vector<256x1xf32>
    %79 = tpu.reciprocal %78 {approx = true} : vector<256x1xf32> -> vector<256x1xf32>
    %80 = vector.broadcast %79 : vector<256x1xf32> to vector<256x256xf32>
    %81 = arith.mulf %76, %80 : vector<256x256xf32>
    %82 = arith.truncf %81 : vector<256x256xf32> to vector<256x256xbf16>
    %cst_26 = arith.constant dense<0.000000e+00> : vector<256x32xf32>
    %83 = tpu.matmul %82, %69, %cst_26 {dimension_numbers = #tpu.dot_dimension_numbers<[1], [0], [0], [1], [0, 0, 1, 1], [], []>} : vector<256x256xbf16>, vector<256x32xbf16>, vector<256x32xf32> -> vector<256x32xf32>
    %84 = arith.truncf %83 : vector<256x32xf32> to vector<256x32xbf16>
    %85 = vector.extract_strided_slice %27 {offsets = [32, 0], sizes = [32, 32], strides = [1, 1]} : vector<64x32xbf16> to vector<32x32xbf16>
    %cst_27 = arith.constant dense<0.000000e+00> : vector<256x32xf32>
    %86 = tpu.matmul %84, %85, %cst_27 {dimension_numbers = #tpu.dot_dimension_numbers<[1], [0], [0], [1], [0, 0, 1, 1], [], []>} : vector<256x32xbf16>, vector<32x32xbf16>, vector<256x32xf32> -> vector<256x32xf32>
    %87 = arith.addf %66, %86 : vector<256x32xf32>
    %c0_28 = arith.constant 0 : index
    %c0_29 = arith.constant 0 : index
    %c0_30 = arith.constant 0 : index
    %88 = vector.load %arg6[%c0_28, %c0_29, %c0_30] : memref<2x256x32xf32, #tpu.memory_space<vmem>>, vector<1x256x32xf32>
    %89 = vector.shape_cast %88 : vector<1x256x32xf32> to vector<256x32xf32>
    %90 = vector.shape_cast %87 : vector<256x32xf32> to vector<1x256x32xf32>
    tpu.vector_store %arg6[%c0_28, %c0_29, %c0_30], %90 {strides = array<i32>} : memref<2x256x32xf32, #tpu.memory_space<vmem>>, vector<1x256x32xf32>,
    %91 = vector.extract_strided_slice %29 {offsets = [256, 0], sizes = [256, 64], strides = [1, 1]} : vector<512x192xf32> to vector<256x64xf32>
    %92 = vector.extract_strided_slice %29 {offsets = [256, 64], sizes = [256, 64], strides = [1, 1]} : vector<512x192xf32> to vector<256x64xf32>
    %93 = vector.extract_strided_slice %29 {offsets = [256, 128], sizes = [256, 64], strides = [1, 1]} : vector<512x192xf32> to vector<256x64xf32>
    %94 = arith.truncf %93 : vector<256x64xf32> to vector<256x64xbf16>
    %cst_31 = arith.constant 0.000000e+00 : f32
    %95 = vector.broadcast %cst_31 : f32 to vector<256x32xf32>
    %96 = vector.extract_strided_slice %91 {offsets = [0, 0], sizes = [256, 32], strides = [1, 1]} : vector<256x64xf32> to vector<256x32xf32>
    %97 = vector.extract_strided_slice %92 {offsets = [0, 0], sizes = [256, 32], strides = [1, 1]} : vector<256x64xf32> to vector<256x32xf32>
    %98 = vector.extract_strided_slice %94 {offsets = [0, 0], sizes = [256, 32], strides = [1, 1]} : vector<256x64xbf16> to vector<256x32xbf16>
    %cst_32 = arith.constant dense<0.000000e+00> : vector<256x256xf32>
    %99 = tpu.matmul %96, %97, %cst_32 {dimension_numbers = #tpu.dot_dimension_numbers<[1], [1], [0], [0], [0, 0, 1, 0], [], []>} : vector<256x32xf32>, vector<256x32xf32>, vector<256x256xf32> -> vector<256x256xf32>
    %100 = arith.addf %99, %40 : vector<256x256xf32>
    %cst_33 = arith.constant dense<0xFF800000> : vector<256xf32>
    %101 = vector.multi_reduction <maximumf>, %100, %cst_33 [1] : vector<256x256xf32> to vector<256xf32>
    %102 = vector.shape_cast %101 : vector<256xf32> to vector<256x1xf32>
    %103 = vector.broadcast %102 : vector<256x1xf32> to vector<256x256xf32>
    %104 = arith.subf %100, %103 : vector<256x256xf32>
    %105 = math.exp %104 : vector<256x256xf32>
    %cst_34 = arith.constant dense<0.000000e+00> : vector<256xf32>
    %106 = vector.multi_reduction <add>, %105, %cst_34 [1] : vector<256x256xf32> to vector<256xf32>
    %107 = vector.shape_cast %106 : vector<256xf32> to vector<256x1xf32>
    %108 = tpu.reciprocal %107 {approx = true} : vector<256x1xf32> -> vector<256x1xf32>
    %109 = vector.broadcast %108 : vector<256x1xf32> to vector<256x256xf32>
    %110 = arith.mulf %105, %109 : vector<256x256xf32>
    %111 = arith.truncf %110 : vector<256x256xf32> to vector<256x256xbf16>
    %cst_35 = arith.constant dense<0.000000e+00> : vector<256x32xf32>
    %112 = tpu.matmul %111, %98, %cst_35 {dimension_numbers = #tpu.dot_dimension_numbers<[1], [0], [0], [1], [0, 0, 1, 1], [], []>} : vector<256x256xbf16>, vector<256x32xbf16>, vector<256x32xf32> -> vector<256x32xf32>
    %113 = arith.truncf %112 : vector<256x32xf32> to vector<256x32xbf16>
    %114 = vector.extract_strided_slice %27 {offsets = [0, 0], sizes = [32, 32], strides = [1, 1]} : vector<64x32xbf16> to vector<32x32xbf16>
    %cst_36 = arith.constant dense<0.000000e+00> : vector<256x32xf32>
    %115 = tpu.matmul %113, %114, %cst_36 {dimension_numbers = #tpu.dot_dimension_numbers<[1], [0], [0], [1], [0, 0, 1, 1], [], []>} : vector<256x32xbf16>, vector<32x32xbf16>, vector<256x32xf32> -> vector<256x32xf32>
    %116 = arith.addf %95, %115 : vector<256x32xf32>
    %117 = vector.extract_strided_slice %91 {offsets = [0, 32], sizes = [256, 32], strides = [1, 1]} : vector<256x64xf32> to vector<256x32xf32>
    %118 = vector.extract_strided_slice %92 {offsets = [0, 32], sizes = [256, 32], strides = [1, 1]} : vector<256x64xf32> to vector<256x32xf32>
    %119 = vector.extract_strided_slice %94 {offsets = [0, 32], sizes = [256, 32], strides = [1, 1]} : vector<256x64xbf16> to vector<256x32xbf16>
    %cst_37 = arith.constant dense<0.000000e+00> : vector<256x256xf32>
    %120 = tpu.matmul %117, %118, %cst_37 {dimension_numbers = #tpu.dot_dimension_numbers<[1], [1], [0], [0], [0, 0, 1, 0], [], []>} : vector<256x32xf32>, vector<256x32xf32>, vector<256x256xf32> -> vector<256x256xf32>
    %121 = arith.addf %120, %40 : vector<256x256xf32>
    %cst_38 = arith.constant dense<0xFF800000> : vector<256xf32>
    %122 = vector.multi_reduction <maximumf>, %121, %cst_38 [1] : vector<256x256xf32> to vector<256xf32>
    %123 = vector.shape_cast %122 : vector<256xf32> to vector<256x1xf32>
    %124 = vector.broadcast %123 : vector<256x1xf32> to vector<256x256xf32>
    %125 = arith.subf %121, %124 : vector<256x256xf32>
    %126 = math.exp %125 : vector<256x256xf32>
    %cst_39 = arith.constant dense<0.000000e+00> : vector<256xf32>
    %127 = vector.multi_reduction <add>, %126, %cst_39 [1] : vector<256x256xf32> to vector<256xf32>
    %128 = vector.shape_cast %127 : vector<256xf32> to vector<256x1xf32>
    %129 = tpu.reciprocal %128 {approx = true} : vector<256x1xf32> -> vector<256x1xf32>
    %130 = vector.broadcast %129 : vector<256x1xf32> to vector<256x256xf32>
    %131 = arith.mulf %126, %130 : vector<256x256xf32>
    %132 = arith.truncf %131 : vector<256x256xf32> to vector<256x256xbf16>
    %cst_40 = arith.constant dense<0.000000e+00> : vector<256x32xf32>
    %133 = tpu.matmul %132, %119, %cst_40 {dimension_numbers = #tpu.dot_dimension_numbers<[1], [0], [0], [1], [0, 0, 1, 1], [], []>} : vector<256x256xbf16>, vector<256x32xbf16>, vector<256x32xf32> -> vector<256x32xf32>
    %134 = arith.truncf %133 : vector<256x32xf32> to vector<256x32xbf16>
    %135 = vector.extract_strided_slice %27 {offsets = [32, 0], sizes = [32, 32], strides = [1, 1]} : vector<64x32xbf16> to vector<32x32xbf16>
    %cst_41 = arith.constant dense<0.000000e+00> : vector<256x32xf32>
    %136 = tpu.matmul %134, %135, %cst_41 {dimension_numbers = #tpu.dot_dimension_numbers<[1], [0], [0], [1], [0, 0, 1, 1], [], []>} : vector<256x32xbf16>, vector<32x32xbf16>, vector<256x32xf32> -> vector<256x32xf32>
    %137 = arith.addf %116, %136 : vector<256x32xf32>
    %c1 = arith.constant 1 : index
    %c0_42 = arith.constant 0 : index
    %c0_43 = arith.constant 0 : index
    %138 = vector.load %arg6[%c1, %c0_42, %c0_43] : memref<2x256x32xf32, #tpu.memory_space<vmem>>, vector<1x256x32xf32>
    %139 = vector.shape_cast %138 : vector<1x256x32xf32> to vector<256x32xf32>
    %140 = vector.shape_cast %137 : vector<256x32xf32> to vector<1x256x32xf32>
    tpu.vector_store %arg6[%c1, %c0_42, %c0_43], %140 {strides = array<i32>} : memref<2x256x32xf32, #tpu.memory_space<vmem>>, vector<1x256x32xf32>,
    return
  }
  func.func @transform_0(%arg0: i32) -> (i32, i32, i32) {
    %c0_i32 = arith.constant 0 : i32
    %c0_i32_0 = arith.constant 0 : i32
    %c0_i32_1 = arith.constant 0 : i32
    return %arg0, %c0_i32, %c0_i32_0 : i32, i32, i32
  }
  func.func @transform_1(%arg0: i32) -> (i32, i32) {
    %c0_i32 = arith.constant 0 : i32
    %c0_i32_0 = arith.constant 0 : i32
    %c0_i32_1 = arith.constant 0 : i32
    return %c0_i32, %c0_i32_0 : i32, i32
  }
  func.func @transform_2(%arg0: i32) -> (i32, i32) {
    %c0_i32 = arith.constant 0 : i32
    %c0_i32_0 = arith.constant 0 : i32
    %c0_i32_1 = arith.constant 0 : i32
    return %c0_i32, %c0_i32_0 : i32, i32
  }
  func.func @transform_3(%arg0: i32) -> (i32, i32) {
    %c0_i32 = arith.constant 0 : i32
    %c0_i32_0 = arith.constant 0 : i32
    %c0_i32_1 = arith.constant 0 : i32
    return %c0_i32, %c0_i32_0 : i32, i32
  }
  func.func @transform_4(%arg0: i32) -> (i32, i32) {
    %c0_i32 = arith.constant 0 : i32
    %c0_i32_0 = arith.constant 0 : i32
    %c0_i32_1 = arith.constant 0 : i32
    return %c0_i32, %c0_i32_0 : i32, i32
  }
  func.func @transform_5(%arg0: i32) -> (i32, i32, i32) {
    %c0_i32 = arith.constant 0 : i32
    %c0_i32_0 = arith.constant 0 : i32
    %c0_i32_1 = arith.constant 0 : i32
    return %arg0, %c0_i32, %c0_i32_0 : i32, i32, i32
  }
}

</mosaic_0001>

<bundles_post_ra>
// kernel: tpu_custom_call.1
= control target key start
LH: loop header
LB: loop body
LE: loop exit
PB: predicated region body
PF: predicated region fallthrough
CT: control target
= control target key end

     0   :  { %vm85_vm0 = vcmask 261120   ;;  %s10673_s14 = smov 64   ;;  %s10674_s26 = smov 32   ;;  %s16916_s0 = inlined_call_operand.vmem [shape: f32[2,256,32], index: 0, kind: input, shape index: {}]   ;;  %s16917_s3 = inlined_call_operand.vmem [shape: f32[32,192], index: 3, kind: input, shape index: {}]   ;;  %s16918_s1 = inlined_call_operand.vmem [shape: f32[1,32], index: 1, kind: input, shape index: {}]   ;;  %s16919_s2 = inlined_call_operand.vmem [shape: f32[1,32], index: 2, kind: input, shape index: {}]   ;;  %s16920_s4 = inlined_call_operand.vmem [shape: f32[64,32], index: 4, kind: input, shape index: {}]   ;;  %s16921_s5 = inlined_call_operand.vmem [shape: f32[2,256,32], index: 5, kind: output, shape index: {}]  }
   0x1   :  { %v10710_v0 = vld [vmem:[%s16916_s0] sm:$0xff]  ;;  %v10715_v1 = vld [vmem:[%s16916_s0 + $0x10] sm:$0xff]  ;;  %v10720_v2 = vld [vmem:[%s16916_s0 + $0x8] sm:$0xff] }
   0x2   :  { %v86_v3 = vsel %vm85_vm0, %v10710_v0, 0.0  ;;  %v92_v4 = vsel %vm85_vm0, %v10715_v1, 0.0  ;;  %v10729_v5 = vld [vmem:[%s16916_s0 + $0x18] sm:$0xff]  ;;  %v89_v6 = vsel %vm85_vm0, %v10720_v2, 0.0  ;;  %v10738_v8 = vld [vmem:[%s16916_s0 + $0x20] sm:$0xff]  ;;  %v10743_v9 = vld [vmem:[%s16916_s0 + $0x28] sm:$0xff] }
   0x3   :  { %87 = vadd.xlane.f32.xlu0 %v86_v3  ;;  %93 = vadd.xlane.f32.xlu1 %v92_v4  ;;  %v95_v7 = vsel %vm85_vm0, %v10729_v5, 0.0  ;;  %v98_v10 = vsel %vm85_vm0, %v10738_v8, 0.0  ;;  %v101_v11 = vsel %vm85_vm0, %v10743_v9, 0.0  ;;  %v10752_v12 = vld [vmem:[%s16916_s0 + $0x30] sm:$0xff]  ;;  %v10757_v13 = vld [vmem:[%s16916_s0 + $0x38] sm:$0xff]  ;;  %v10766_v16 = vld [vmem:[%s16916_s0 + $0x40] sm:$0xff] }
   0x4   :  { %v104_v14 = vsel %vm85_vm0, %v10752_v12, 0.0  ;;  %v107_v15 = vsel %vm85_vm0, %v10757_v13, 0.0  ;;  %v10771_v17 = vld [vmem:[%s16916_s0 + $0x48] sm:$0xff]  ;;  %v110_v18 = vsel %vm85_vm0, %v10766_v16, 0.0  ;;  %v10780_v20 = vld [vmem:[%s16916_s0 + $0x50] sm:$0xff]  ;;  %v10785_v21 = vld [vmem:[%s16916_s0 + $0x58] sm:$0xff] }
   0x5   :  { %v113_v19 = vsel %vm85_vm0, %v10771_v17, 0.0  ;;  %v116_v22 = vsel %vm85_vm0, %v10780_v20, 0.0  ;;  %v119_v23 = vsel %vm85_vm0, %v10785_v21, 0.0  ;;  %v10794_v24 = vld [vmem:[%s16916_s0 + $0x60] sm:$0xff]  ;;  %v10799_v25 = vld [vmem:[%s16916_s0 + $0x68] sm:$0xff]  ;;  %v10808_v28 = vld [vmem:[%s16916_s0 + $0x70] sm:$0xff] }
   0x6   :  { %v122_v26 = vsel %vm85_vm0, %v10794_v24, 0.0  ;;  %v125_v27 = vsel %vm85_vm0, %v10799_v25, 0.0  ;;  %v10813_v29 = vld [vmem:[%s16916_s0 + $0x78] sm:$0xff]  ;;  %v128_v30 = vsel %vm85_vm0, %v10808_v28, 0.0  ;;  %v10822_v32 = vld [vmem:[%s16916_s0 + $0x80] sm:$0xff]  ;;  %v10827_v33 = vld [vmem:[%s16916_s0 + $0x88] sm:$0xff] }
   0x7   :  { %90 = vadd.xlane.f32.xlu0 %v89_v6  ;;  %96 = vadd.xlane.f32.xlu1 %v95_v7  ;;  %v131_v31 = vsel %vm85_vm0, %v10813_v29, 0.0  ;;  %v134_v34 = vsel %vm85_vm0, %v10822_v32, 0.0  ;;  %v137_v35 = vsel %vm85_vm0, %v10827_v33, 0.0  ;;  %v10836_v36 = vld [vmem:[%s16916_s0 + $0x90] sm:$0xff]  ;;  %v10841_v37 = vld [vmem:[%s16916_s0 + $0x98] sm:$0xff]  ;;  %v10850_v40 = vld [vmem:[%s16916_s0 + $0xa0] sm:$0xff] }
   0x8   :  { %v140_v38 = vsel %vm85_vm0, %v10836_v36, 0.0  ;;  %v143_v39 = vsel %vm85_vm0, %v10841_v37, 0.0  ;;  %v10855_v41 = vld [vmem:[%s16916_s0 + $0xa8] sm:$0xff]  ;;  %v146_v42 = vsel %vm85_vm0, %v10850_v40, 0.0  ;;  %v10864_v44 = vld [vmem:[%s16916_s0 + $0xb0] sm:$0xff]  ;;  %v10869_v45 = vld [vmem:[%s16916_s0 + $0xb8] sm:$0xff] }
   0x9   :  { %v149_v43 = vsel %vm85_vm0, %v10855_v41, 0.0  ;;  %v152_v46 = vsel %vm85_vm0, %v10864_v44, 0.0  ;;  %v155_v47 = vsel %vm85_vm0, %v10869_v45, 0.0  ;;  %v10878_v48 = vld [vmem:[%s16916_s0 + $0xc0] sm:$0xff]  ;;  %v10883_v49 = vld [vmem:[%s16916_s0 + $0xc8] sm:$0xff]  ;;  %v10892_v52 = vld [vmem:[%s16916_s0 + $0xd0] sm:$0xff] }
   0xa   :  { %v158_v50 = vsel %vm85_vm0, %v10878_v48, 0.0  ;;  %v161_v51 = vsel %vm85_vm0, %v10883_v49, 0.0  ;;  %v10897_v53 = vld [vmem:[%s16916_s0 + $0xd8] sm:$0xff]  ;;  %v164_v54 = vsel %vm85_vm0, %v10892_v52, 0.0  ;;  %v10906_v56 = vld [vmem:[%s16916_s0 + $0xe0] sm:$0xff]  ;;  %v10911_v57 = vld [vmem:[%s16916_s0 + $0xe8] sm:$0xff] }
   0xb   :  { %99 = vadd.xlane.f32.xlu0 %v98_v10  ;;  %102 = vadd.xlane.f32.xlu1 %v101_v11  ;;  %v167_v55 = vsel %vm85_vm0, %v10897_v53, 0.0  ;;  %v170_v58 = vsel %vm85_vm0, %v10906_v56, 0.0  ;;  %v173_v59 = vsel %vm85_vm0, %v10911_v57, 0.0  ;;  %v10920_v60 = vld [vmem:[%s16916_s0 + $0xf0] sm:$0xff]  ;;  %v10925_v61 = vld [vmem:[%s16916_s0 + $0xf8] sm:$0xff]  ;;  %v10934_v3 = vld [vmem:[%s16916_s0 + $0x108] sm:$0xff] }
   0xc   :  { %v176_v62 = vsel %vm85_vm0, %v10920_v60, 0.0  ;;  %v179_v63 = vsel %vm85_vm0, %v10925_v61, 0.0  ;;  %v10939_v4 = vld [vmem:[%s16916_s0 + $0x100] sm:$0xff]  ;;  %v185_v6 = vsel %vm85_vm0, %v10934_v3, 0.0  ;;  %v10948_v10 = vld [vmem:[%s16916_s0 + $0x118] sm:$0xff]  ;;  %v10953_v11 = vld [vmem:[%s16916_s0 + $0x110] sm:$0xff] }
   0xd   :  { %v182_v7 = vsel %vm85_vm0, %v10939_v4, 0.0  ;;  %vm12087_vm1 = vmpackc.low %vm85_vm0, %vm85_vm0 }
   0xf   :  { %105 = vadd.xlane.f32.xlu0 %v104_v14  ;;  %108 = vadd.xlane.f32.xlu1 %v107_v15  ;;  %v191_v14 = vsel %vm85_vm0, %v10948_v10, 0.0  ;;  %v188_v15 = vsel %vm85_vm0, %v10953_v11, 0.0 }
  0x13   :  { %111 = vadd.xlane.f32.xlu0 %v110_v18  ;;  %114 = vadd.xlane.f32.xlu1 %v113_v19  ;;  %v10962_v18 = vld [vmem:[%s16916_s0 + $0x128] sm:$0xff]  ;;  %v10967_v19 = vld [vmem:[%s16916_s0 + $0x120] sm:$0xff] }
  0x17   :  { %117 = vadd.xlane.f32.xlu0 %v116_v22  ;;  %120 = vadd.xlane.f32.xlu1 %v119_v23  ;;  %v197_v22 = vsel %vm85_vm0, %v10962_v18, 0.0  ;;  %v194_v23 = vsel %vm85_vm0, %v10967_v19, 0.0 }
  0x1b   :  { %123 = vadd.xlane.f32.xlu0 %v122_v26  ;;  %126 = vadd.xlane.f32.xlu1 %v125_v27  ;;  %v10976_v26 = vld [vmem:[%s16916_s0 + $0x138] sm:$0xff]  ;;  %v10981_v27 = vld [vmem:[%s16916_s0 + $0x130] sm:$0xff] }
  0x1f   :  { %129 = vadd.xlane.f32.xlu0 %v128_v30  ;;  %132 = vadd.xlane.f32.xlu1 %v131_v31  ;;  %v203_v30 = vsel %vm85_vm0, %v10976_v26, 0.0  ;;  %v200_v31 = vsel %vm85_vm0, %v10981_v27, 0.0 }
  0x23   :  { %135 = vadd.xlane.f32.xlu0 %v134_v34  ;;  %138 = vadd.xlane.f32.xlu1 %v137_v35  ;;  %v10990_v34 = vld [vmem:[%s16916_s0 + $0x148] sm:$0xff]  ;;  %v10995_v35 = vld [vmem:[%s16916_s0 + $0x140] sm:$0xff] }
  0x27   :  { %141 = vadd.xlane.f32.xlu0 %v140_v38  ;;  %144 = vadd.xlane.f32.xlu1 %v143_v39  ;;  %v209_v38 = vsel %vm85_vm0, %v10990_v34, 0.0  ;;  %v206_v39 = vsel %vm85_vm0, %v10995_v35, 0.0 }
  0x2b   :  { %147 = vadd.xlane.f32.xlu0 %v146_v42  ;;  %150 = vadd.xlane.f32.xlu1 %v149_v43  ;;  %v11004_v42 = vld [vmem:[%s16916_s0 + $0x158] sm:$0xff]  ;;  %v11009_v43 = vld [vmem:[%s16916_s0 + $0x150] sm:$0xff] }
  0x2f   :  { %153 = vadd.xlane.f32.xlu0 %v152_v46  ;;  %156 = vadd.xlane.f32.xlu1 %v155_v47  ;;  %v215_v46 = vsel %vm85_vm0, %v11004_v42, 0.0  ;;  %v212_v47 = vsel %vm85_vm0, %v11009_v43, 0.0 }
  0x33   :  { %159 = vadd.xlane.f32.xlu0 %v158_v50  ;;  %162 = vadd.xlane.f32.xlu1 %v161_v51  ;;  %v11018_v50 = vld [vmem:[%s16916_s0 + $0x168] sm:$0xff]  ;;  %v11023_v51 = vld [vmem:[%s16916_s0 + $0x160] sm:$0xff] }
  0x37   :  { %165 = vadd.xlane.f32.xlu0 %v164_v54  ;;  %168 = vadd.xlane.f32.xlu1 %v167_v55  ;;  %v221_v54 = vsel %vm85_vm0, %v11018_v50, 0.0  ;;  %v218_v55 = vsel %vm85_vm0, %v11023_v51, 0.0 }
  0x3b   :  { %171 = vadd.xlane.f32.xlu0 %v170_v58  ;;  %174 = vadd.xlane.f32.xlu1 %v173_v59 }
  0x3f   :  { %177 = vadd.xlane.f32.xlu0 %v176_v62  ;;  %180 = vadd.xlane.f32.xlu1 %v179_v63 }
  0x43   :  { %186 = vadd.xlane.f32.xlu1 %v185_v6  ;;  %183 = vadd.xlane.f32.xlu0 %v182_v7 }
  0x47   :  { %192 = vadd.xlane.f32.xlu1 %v191_v14  ;;  %189 = vadd.xlane.f32.xlu0 %v188_v15 }
  0x4b   :  { %198 = vadd.xlane.f32.xlu1 %v197_v22  ;;  %195 = vadd.xlane.f32.xlu0 %v194_v23 }
  0x4f   :  { %204 = vadd.xlane.f32.xlu1 %v203_v30  ;;  %201 = vadd.xlane.f32.xlu0 %v200_v31 }
  0x53   :  { %210 = vadd.xlane.f32.xlu1 %v209_v38  ;;  %207 = vadd.xlane.f32.xlu0 %v206_v39 }
  0x57   :  { %216 = vadd.xlane.f32.xlu1 %v215_v46  ;;  %213 = vadd.xlane.f32.xlu0 %v212_v47 }
  0x5b   :  { %222 = vadd.xlane.f32.xlu1 %v221_v54  ;;  %219 = vadd.xlane.f32.xlu0 %v218_v55 }
  0x90   :  { %v88_v58 = vpop.xlane.xlu0 %87  ;;  %v94_v59 = vpop.xlane.xlu1 %93 }
  0x91   :  { %v279_v62 = vmul.f32 0.03125, %v88_v58  ;;  %v281_v63 = vmul.f32 0.03125, %v94_v59 }
  0x93   :  { %v11030_v6 = vsub.f32 %v10710_v0, %v279_v62  ;;  %v11033_v7 = vsub.f32 %v10715_v1, %v281_v63 }
  0x94   :  { %v91_v14 = vpop.xlane.xlu0 %90  ;;  %v97_v15 = vpop.xlane.xlu1 %96 }
  0x95   :  { %v280_v22 = vmul.f32 0.03125, %v91_v14  ;;  %v282_v23 = vmul.f32 0.03125, %v97_v15  ;;  %v407_v30 = vmul.f32 %v11030_v6, %v11030_v6  ;;  %v409_v31 = vmul.f32 %v11033_v7, %v11033_v7 }
  0x97   :  { %v11040_v38 = vsub.f32 %v10720_v2, %v280_v22  ;;  %v11043_v39 = vsub.f32 %v10729_v5, %v282_v23  ;;  %v471_v0 = vsel %vm85_vm0, %v407_v30, 0.0  ;;  %v477_v47 = vsel %vm85_vm0, %v409_v31, 0.0 }
  0x98   :  { %472 = vadd.xlane.f32.xlu0 %v471_v0  ;;  %v100_v1 = vpop.xlane.xlu0 %99  ;;  %v103_v46 = vpop.xlane.xlu1 %102 }
  0x99   :  { %v283_v54 = vmul.f32 0.03125, %v100_v1  ;;  %v284_v55 = vmul.f32 0.03125, %v103_v46  ;;  %v408_v58 = vmul.f32 %v11040_v38, %v11040_v38  ;;  %v410_v59 = vmul.f32 %v11043_v39, %v11043_v39 }
  0x9b   :  { %v11052_v2 = vsub.f32 %v10738_v8, %v283_v54  ;;  %v11055_v5 = vsub.f32 %v10743_v9, %v284_v55  ;;  %v474_v62 = vsel %vm85_vm0, %v408_v58, 0.0  ;;  %v480_v15 = vsel %vm85_vm0, %v410_v59, 0.0 }
  0x9c   :  { %478 = vadd.xlane.f32.xlu0 %v477_v47  ;;  %475 = vadd.xlane.f32.xlu1 %v474_v62  ;;  %v106_v63 = vpop.xlane.xlu0 %105  ;;  %v109_v14 = vpop.xlane.xlu1 %108 }
  0x9d   :  { %v285_v22 = vmul.f32 0.03125, %v106_v63  ;;  %v286_v23 = vmul.f32 0.03125, %v109_v14  ;;  %v411_v30 = vmul.f32 %v11052_v2, %v11052_v2  ;;  %v412_v8 = vmul.f32 %v11055_v5, %v11055_v5 }
  0x9f   :  { %v11064_v31 = vsub.f32 %v10752_v12, %v285_v22  ;;  %v11067_v9 = vsub.f32 %v10757_v13, %v286_v23  ;;  %v483_v0 = vsel %vm85_vm0, %v411_v30, 0.0  ;;  %v486_v47 = vsel %vm85_vm0, %v412_v8, 0.0 }
  0xa0   :  { %481 = vadd.xlane.f32.xlu1 %v480_v15  ;;  %484 = vadd.xlane.f32.xlu0 %v483_v0  ;;  %v112_v1 = vpop.xlane.xlu0 %111  ;;  %v115_v46 = vpop.xlane.xlu1 %114 }
  0xa1   :  { %v287_v54 = vmul.f32 0.03125, %v112_v1  ;;  %v288_v55 = vmul.f32 0.03125, %v115_v46  ;;  %v413_v58 = vmul.f32 %v11064_v31, %v11064_v31  ;;  %v414_v12 = vmul.f32 %v11067_v9, %v11067_v9 }
  0xa3   :  { %v11076_v59 = vsub.f32 %v10766_v16, %v287_v54  ;;  %v11079_v13 = vsub.f32 %v10771_v17, %v288_v55  ;;  %v489_v62 = vsel %vm85_vm0, %v413_v58, 0.0  ;;  %v492_v15 = vsel %vm85_vm0, %v414_v12, 0.0 }
  0xa4   :  { %487 = vadd.xlane.f32.xlu1 %v486_v47  ;;  %490 = vadd.xlane.f32.xlu0 %v489_v62  ;;  %v118_v63 = vpop.xlane.xlu0 %117  ;;  %v121_v14 = vpop.xlane.xlu1 %120 }
  0xa5   :  { %v289_v22 = vmul.f32 0.03125, %v118_v63  ;;  %v290_v23 = vmul.f32 0.03125, %v121_v14  ;;  %v415_v30 = vmul.f32 %v11076_v59, %v11076_v59  ;;  %v416_v16 = vmul.f32 %v11079_v13, %v11079_v13 }
  0xa7   :  { %v11088_v8 = vsub.f32 %v10780_v20, %v289_v22  ;;  %v11091_v17 = vsub.f32 %v10785_v21, %v290_v23  ;;  %v495_v0 = vsel %vm85_vm0, %v415_v30, 0.0  ;;  %v498_v47 = vsel %vm85_vm0, %v416_v16, 0.0 }
  0xa8   :  { %493 = vadd.xlane.f32.xlu1 %v492_v15  ;;  %496 = vadd.xlane.f32.xlu0 %v495_v0  ;;  %v124_v1 = vpop.xlane.xlu0 %123  ;;  %v127_v46 = vpop.xlane.xlu1 %126 }
  0xa9   :  { %v291_v54 = vmul.f32 0.03125, %v124_v1  ;;  %v292_v55 = vmul.f32 0.03125, %v127_v46  ;;  %v417_v58 = vmul.f32 %v11088_v8, %v11088_v8  ;;  %v418_v20 = vmul.f32 %v11091_v17, %v11091_v17 }
  0xab   :  { %v11100_v12 = vsub.f32 %v10794_v24, %v291_v54  ;;  %v11103_v21 = vsub.f32 %v10799_v25, %v292_v55  ;;  %v501_v62 = vsel %vm85_vm0, %v417_v58, 0.0  ;;  %v504_v15 = vsel %vm85_vm0, %v418_v20, 0.0 }
  0xac   :  { %499 = vadd.xlane.f32.xlu1 %v498_v47  ;;  %502 = vadd.xlane.f32.xlu0 %v501_v62  ;;  %v130_v63 = vpop.xlane.xlu0 %129  ;;  %v133_v14 = vpop.xlane.xlu1 %132 }
  0xad   :  { %v293_v22 = vmul.f32 0.03125, %v130_v63  ;;  %v294_v23 = vmul.f32 0.03125, %v133_v14  ;;  %v419_v30 = vmul.f32 %v11100_v12, %v11100_v12  ;;  %v420_v24 = vmul.f32 %v11103_v21, %v11103_v21 }
  0xaf   :  { %v11112_v16 = vsub.f32 %v10808_v28, %v293_v22  ;;  %v11115_v25 = vsub.f32 %v10813_v29, %v294_v23  ;;  %v507_v0 = vsel %vm85_vm0, %v419_v30, 0.0  ;;  %v510_v47 = vsel %vm85_vm0, %v420_v24, 0.0 }
  0xb0   :  { %505 = vadd.xlane.f32.xlu1 %v504_v15  ;;  %508 = vadd.xlane.f32.xlu0 %v507_v0  ;;  %v136_v1 = vpop.xlane.xlu0 %135  ;;  %v139_v46 = vpop.xlane.xlu1 %138 }
  0xb1   :  { %v295_v54 = vmul.f32 0.03125, %v136_v1  ;;  %v296_v55 = vmul.f32 0.03125, %v139_v46  ;;  %v421_v58 = vmul.f32 %v11112_v16, %v11112_v16  ;;  %v422_v28 = vmul.f32 %v11115_v25, %v11115_v25  ;;  %v1062_v1 = vld [vmem:[%s16917_s3 + $0x8] sm:$0xff]  ;;  %v1064_v46 = vld [vmem:[%s16917_s3 + $0x18] sm:$0xff] }
  0xb3   :  { %v11124_v20 = vsub.f32 %v10822_v32, %v295_v54  ;;  %v11127_v29 = vsub.f32 %v10827_v33, %v296_v55  ;;  %v513_v62 = vsel %vm85_vm0, %v421_v58, 0.0  ;;  %v516_v15 = vsel %vm85_vm0, %v422_v28, 0.0  ;;  %v1063_v58 = vld [vmem:[%s16917_s3 + $0x10] sm:$0xff] }
  0xb4   :  { %511 = vadd.xlane.f32.xlu1 %v510_v47  ;;  %514 = vadd.xlane.f32.xlu0 %v513_v62  ;;  %v142_v63 = vpop.xlane.xlu0 %141  ;;  %v145_v14 = vpop.xlane.xlu1 %144  ;;  %v1070_v55 = vpack.c.bf16 %v1064_v46, %v1062_v1 }
  0xb5   :  { %v297_v22 = vmul.f32 0.03125, %v142_v63  ;;  %v298_v23 = vmul.f32 0.03125, %v145_v14  ;;  %v423_v30 = vmul.f32 %v11124_v20, %v11124_v20  ;;  %v424_v32 = vmul.f32 %v11127_v29, %v11127_v29 }
  0xb6   :  { %1213 = vmatprep.subr.bf16.mxu0 %v1070_v55 }
  0xb7   :  { %v11136_v24 = vsub.f32 %v10836_v36, %v297_v22  ;;  %v11139_v33 = vsub.f32 %v10841_v37, %v298_v23  ;;  %v519_v0 = vsel %vm85_vm0, %v423_v30, 0.0  ;;  %v522_v36 = vsel %vm85_vm0, %v424_v32, 0.0  ;;  %v1061_v37 = vld [vmem:[%s16917_s3] sm:$0xff]  ;;  %v1066_v32 = vld [vmem:[%s16917_s3 + $0x28] sm:$0xff] }
  0xb8   :  { %517 = vadd.xlane.f32.xlu1 %v516_v15  ;;  %520 = vadd.xlane.f32.xlu0 %v519_v0  ;;  %v148_v47 = vpop.xlane.xlu0 %147  ;;  %v151_v54 = vpop.xlane.xlu1 %150  ;;  %v1069_v15 = vpack.c.bf16 %v1063_v58, %v1061_v37  ;;  %v1068_v0 = vld [vmem:[%s16917_s3 + $0x38] sm:$0xff] }
  0xb9   :  { %v299_v28 = vmul.f32 0.03125, %v148_v47  ;;  %v300_v62 = vmul.f32 0.03125, %v151_v54  ;;  %v425_v63 = vmul.f32 %v11136_v24, %v11136_v24  ;;  %v426_v14 = vmul.f32 %v11139_v33, %v11139_v33  ;;  %v1067_v54 = vld [vmem:[%s16917_s3 + $0x30] sm:$0xff] }
  0xba   :  { %v1072_v47 = vpack.c.bf16 %v1068_v0, %v1066_v32  ;;  %1214 = vmatpush1.bf16.msra.mxu0 %v1069_v15 }
  0xbb   :  { %v11160_v22 = vsub.f32 %v10850_v40, %v299_v28  ;;  %v11163_v23 = vsub.f32 %v10855_v41, %v300_v62  ;;  %v525_v30 = vsel %vm85_vm0, %v425_v63, 0.0  ;;  %v528_v40 = vsel %vm85_vm0, %v426_v14, 0.0  ;;  %v1065_v41 = vld [vmem:[%s16917_s3 + $0x20] sm:$0xff] }
  0xbc   :  { %523 = vadd.xlane.f32.xlu1 %v522_v36  ;;  %526 = vadd.xlane.f32.xlu0 %v525_v30  ;;  %v154_v1 = vpop.xlane.xlu0 %153  ;;  %v157_v46 = vpop.xlane.xlu1 %156  ;;  %v1071_v28 = vpack.c.bf16 %v1067_v54, %v1065_v41 }
  0xbd   :  { %v301_v55 = vmul.f32 0.03125, %v154_v1  ;;  %v302_v37 = vmul.f32 0.03125, %v157_v46  ;;  %v427_v58 = vmul.f32 %v11160_v22, %v11160_v22  ;;  %v428_v36 = vmul.f32 %v11163_v23, %v11163_v23  ;;  %1215 = vmatprep.subr.bf16.mxu0 %v1072_v47 }
  0xbe   :  { %1216 = vmatpush1.bf16.msra.mxu0 %v1071_v28  ;;  %v16922_v47 = vmov 0  }
  0xbf   :  { %v11184_v62 = vsub.f32 %v10864_v44, %v301_v55  ;;  %v11187_v63 = vsub.f32 %v10869_v45, %v302_v37  ;;  %v531_v14 = vsel %vm85_vm0, %v427_v58, 0.0  ;;  %v534_v0 = vsel %vm85_vm0, %v428_v36, 0.0  ;;  %1245 = vmatprep.mubr.bf16.mxu0 %v16922_v47 }
  0xc0   :  { %529 = vadd.xlane.f32.xlu1 %v528_v40  ;;  %532 = vadd.xlane.f32.xlu0 %v531_v14  ;;  %v160_v30 = vpop.xlane.xlu0 %159  ;;  %v163_v32 = vpop.xlane.xlu1 %162 }
  0xc1   :  { %v303_v1 = vmul.f32 0.03125, %v160_v30  ;;  %v304_v46 = vmul.f32 0.03125, %v163_v32  ;;  %v429_v15 = vmul.f32 %v11184_v62, %v11184_v62  ;;  %v430_v44 = vmul.f32 %v11187_v63, %v11187_v63 }
  0xc3   :  { %v11197_v45 = vsub.f32 %v10878_v48, %v303_v1  ;;  %v11200_v40 = vsub.f32 %v10883_v49, %v304_v46  ;;  %v537_v41 = vsel %vm85_vm0, %v429_v15, 0.0  ;;  %v540_v37 = vsel %vm85_vm0, %v430_v44, 0.0 }
  0xc4   :  { %535 = vadd.xlane.f32.xlu1 %v534_v0  ;;  %538 = vadd.xlane.f32.xlu0 %v537_v41  ;;  %v166_v54 = vpop.xlane.xlu0 %165  ;;  %v169_v55 = vpop.xlane.xlu1 %168 }
  0xc5   :  { %v305_v58 = vmul.f32 0.03125, %v166_v54  ;;  %v306_v36 = vmul.f32 0.03125, %v169_v55  ;;  %v431_v28 = vmul.f32 %v11197_v45, %v11197_v45  ;;  %v432_v48 = vmul.f32 %v11200_v40, %v11200_v40 }
  0xc7   :  { %v11209_v14 = vsub.f32 %v10892_v52, %v305_v58  ;;  %v11212_v49 = vsub.f32 %v10897_v53, %v306_v36  ;;  %v543_v30 = vsel %vm85_vm0, %v431_v28, 0.0  ;;  %v546_v1 = vsel %vm85_vm0, %v432_v48, 0.0 }
  0xc8   :  { %541 = vadd.xlane.f32.xlu1 %v540_v37  ;;  %544 = vadd.xlane.f32.xlu0 %v543_v30  ;;  %v172_v32 = vpop.xlane.xlu0 %171  ;;  %v175_v0 = vpop.xlane.xlu1 %174 }
  0xc9   :  { %v307_v46 = vmul.f32 0.03125, %v172_v32  ;;  %v308_v15 = vmul.f32 0.03125, %v175_v0  ;;  %v433_v44 = vmul.f32 %v11209_v14, %v11209_v14  ;;  %v434_v52 = vmul.f32 %v11212_v49, %v11212_v49 }
  0xcb   :  { %v11221_v41 = vsub.f32 %v10906_v56, %v307_v46  ;;  %v11224_v53 = vsub.f32 %v10911_v57, %v308_v15  ;;  %v549_v54 = vsel %vm85_vm0, %v433_v44, 0.0  ;;  %v552_v58 = vsel %vm85_vm0, %v434_v52, 0.0 }
  0xcc   :  { %547 = vadd.xlane.f32.xlu1 %v546_v1  ;;  %550 = vadd.xlane.f32.xlu0 %v549_v54  ;;  %v178_v55 = vpop.xlane.xlu0 %177  ;;  %v181_v37 = vpop.xlane.xlu1 %180 }
  0xcd   :  { %v309_v36 = vmul.f32 0.03125, %v178_v55  ;;  %v310_v28 = vmul.f32 0.03125, %v181_v37  ;;  %v435_v48 = vmul.f32 %v11221_v41, %v11221_v41  ;;  %v436_v56 = vmul.f32 %v11224_v53, %v11224_v53  ;;  %v11253_v55 = vld [vmem:[%s16916_s0 + $0x178] sm:$0xff]  ;;  %v11258_v37 = vld [vmem:[%s16916_s0 + $0x180] sm:$0xff] }
  0xcf   :  { %v11233_v30 = vsub.f32 %v10920_v60, %v309_v36  ;;  %v11236_v57 = vsub.f32 %v10925_v61, %v310_v28  ;;  %v555_v32 = vsel %vm85_vm0, %v435_v48, 0.0  ;;  %v558_v0 = vsel %vm85_vm0, %v436_v56, 0.0  ;;  %v67_v60 = vld [vmem:[%s16916_s0 + $0x170] sm:$0xff]  ;;  %v70_v56 = vld [vmem:[%s16916_s0 + $0x188] sm:$0xff] }
  0xd0   :  { %553 = vadd.xlane.f32.xlu1 %v552_v58  ;;  %556 = vadd.xlane.f32.xlu0 %v555_v32  ;;  %v187_v15 = vpop.xlane.xlu1 %186  ;;  %v224_v52 = vsel %vm85_vm0, %v67_v60, 0.0  ;;  %v184_v58 = vpop.xlane.xlu0 %183  ;;  %v227_v28 = vsel %vm85_vm0, %v11253_v55, 0.0  ;;  %v230_v48 = vsel %vm85_vm0, %v11258_v37, 0.0 }
  0xd1   :  { %v437_v1 = vmul.f32 %v11233_v30, %v11233_v30  ;;  %v438_v46 = vmul.f32 %v11236_v57, %v11236_v57  ;;  %v312_v54 = vmul.f32 0.03125, %v187_v15  ;;  %v311_v32 = vmul.f32 0.03125, %v184_v58 }
  0xd3   :  { %v561_v61 = vsel %vm85_vm0, %v437_v1, 0.0  ;;  %v564_v44 = vsel %vm85_vm0, %v438_v46, 0.0  ;;  %v11261_v36 = vsub.f32 %v10934_v3, %v312_v54  ;;  %v233_v3 = vsel %vm85_vm0, %v70_v56, 0.0 }
  0xd4   :  { %559 = vadd.xlane.f32.xlu1 %v558_v0  ;;  %562 = vadd.xlane.f32.xlu0 %v561_v61  ;;  %v11273_v0 = vld [vmem:[%s16916_s0 + $0x190] sm:$0xff]  ;;  %v193_v1 = vpop.xlane.xlu1 %192  ;;  %v11279_v60 = vsub.f32 %v10939_v4, %v311_v32  ;;  %v72_v61 = vld [vmem:[%s16916_s0 + $0x198] sm:$0xff]  ;;  %v11294_v4 = vld [vmem:[%s16916_s0 + $0x1a0] sm:$0xff] }
  0xd5   :  { %v236_v46 = vsel %vm85_vm0, %v11273_v0, 0.0  ;;  %v314_v15 = vmul.f32 0.03125, %v193_v1  ;;  %v239_v54 = vsel %vm85_vm0, %v72_v61, 0.0  ;;  %v242_v1 = vsel %vm85_vm0, %v11294_v4, 0.0  ;;  %v74_v61 = vld [vmem:[%s16916_s0 + $0x1a8] sm:$0xff] }
  0xd7   :  { %v11288_v58 = vsub.f32 %v10948_v10, %v314_v15 }
  0xd8   :  { %565 = vadd.xlane.f32.xlu1 %v564_v44  ;;  %225 = vadd.xlane.f32.xlu0 %v224_v52  ;;  %v440_v44 = vmul.f32 %v11261_v36, %v11261_v36  ;;  %v190_v52 = vpop.xlane.xlu0 %189  ;;  %v199_v32 = vpop.xlane.xlu1 %198 }
  0xd9   :  { %17539 = vst [vmem:[#allocation2_spill] sm:$0xff] %v11288_v58  ;;  %v313_v56 = vmul.f32 0.03125, %v190_v52  ;;  %v442_v15 = vmul.f32 %v11288_v58, %v11288_v58  ;;  %v245_v52 = vsel %vm85_vm0, %v74_v61, 0.0  ;;  %v76_v61 = vld [vmem:[%s16916_s0 + $0x1b8] sm:$0xff] }
  0xdc   :  { %228 = vadd.xlane.f32.xlu1 %v227_v28  ;;  %231 = vadd.xlane.f32.xlu0 %v230_v48  ;;  %v570_v28 = vsel %vm85_vm0, %v440_v44, 0.0  ;;  %v439_v48 = vmul.f32 %v11279_v60, %v11279_v60  ;;  %v196_v44 = vpop.xlane.xlu0 %195 }
  0xde   :  { %v567_v10 = vsel %vm85_vm0, %v439_v48, 0.0 }
  0xe0   :  { %234 = vadd.xlane.f32.xlu1 %v233_v3  ;;  %237 = vadd.xlane.f32.xlu0 %v236_v46  ;;  %v11302_v3 = vsub.f32 %v10953_v11, %v313_v56  ;;  %v316_v46 = vmul.f32 0.03125, %v199_v32  ;;  %v11317_v11 = vld [vmem:[%s16916_s0 + $0x1b0] sm:$0xff]  ;;  %v315_v56 = vmul.f32 0.03125, %v196_v44  ;;  %v205_v32 = vpop.xlane.xlu1 %204  ;;  %v202_v44 = vpop.xlane.xlu0 %201 }
  0xe2   :  { %17540 = vst [vmem:[#allocation3_spill] sm:$0xff] %v11302_v3  ;;  %v441_v48 = vmul.f32 %v11302_v3, %v11302_v3  ;;  %v17551_v3 = vmov 0  }
  0xe4   :  { %240 = vadd.xlane.f32.xlu1 %v239_v54  ;;  %571 = vadd.xlane.f32.xlu0 %v570_v28  ;;  %v11311_v54 = vsub.f32 %v10962_v18, %v316_v46  ;;  %v576_v28 = vsel %vm85_vm0, %v442_v15, 0.0  ;;  %v573_v18 = vsel %vm85_vm0, %v441_v48, 0.0  ;;  %v318_v46 = vmul.f32 0.03125, %v205_v32  ;;  %v211_v47 = vpop.xlane.xlu1 %210 }
  0xe5   :  { %v317_v32 = vmul.f32 0.03125, %v202_v44  ;;  %v208_v44 = vpop.xlane.xlu0 %207 }
  0xe6   :  { %17541 = vst [vmem:[#allocation4_spill] sm:$0xff] %v11311_v54  ;;  %v444_v15 = vmul.f32 %v11311_v54, %v11311_v54 }
  0xe8   :  { %243 = vadd.xlane.f32.xlu0 %v242_v1  ;;  %568 = vadd.xlane.f32.xlu1 %v567_v10  ;;  %v248_v1 = vsel %vm85_vm0, %v11317_v11, 0.0  ;;  %v11325_v10 = vsub.f32 %v10967_v19, %v315_v56  ;;  %v582_v48 = vsel %vm85_vm0, %v444_v15, 0.0  ;;  %v11340_v19 = vld [vmem:[%s16916_s0 + $0x1c0] sm:$0xff] }
  0xea   :  { %17542 = vst [vmem:[#allocation5_spill] sm:$0xff] %v11325_v10  ;;  %v443_v56 = vmul.f32 %v11325_v10, %v11325_v10 }
  0xec   :  { %577 = vadd.xlane.f32.xlu0 %v576_v28  ;;  %246 = vadd.xlane.f32.xlu1 %v245_v52  ;;  %v251_v52 = vsel %vm85_vm0, %v76_v61, 0.0  ;;  %v11334_v28 = vsub.f32 %v10976_v26, %v318_v46  ;;  %v579_v26 = vsel %vm85_vm0, %v443_v56, 0.0  ;;  %v320_v46 = vmul.f32 0.03125, %v211_v47  ;;  %v78_v61 = vld [vmem:[%s16916_s0 + $0x1c8] sm:$0xff] }
  0xee   :  { %17543 = vst [vmem:[#allocation6_spill] sm:$0xff] %v11334_v28  ;;  %v446_v15 = vmul.f32 %v11334_v28, %v11334_v28  ;;  %v217_v28 = vpop.xlane.xlu1 %216 }
  0xf0   :  { %249 = vadd.xlane.f32.xlu0 %v248_v1  ;;  %574 = vadd.xlane.f32.xlu1 %v573_v18  ;;  %v254_v1 = vsel %vm85_vm0, %v11340_v19, 0.0  ;;  %v11348_v18 = vsub.f32 %v10981_v27, %v317_v32  ;;  %v588_v56 = vsel %vm85_vm0, %v446_v15, 0.0  ;;  %v79_v27 = vld [vmem:[%s16916_s0 + $0x1d0] sm:$0xff]  ;;  %v319_v32 = vmul.f32 0.03125, %v208_v44 }
  0xf2   :  { %17544 = vst [vmem:[#allocation7_spill] sm:$0xff] %v11348_v18  ;;  %v445_v47 = vmul.f32 %v11348_v18, %v11348_v18  ;;  %v214_v18 = vpop.xlane.xlu0 %213 }
  0xf4   :  { %583 = vadd.xlane.f32.xlu0 %v582_v48  ;;  %252 = vadd.xlane.f32.xlu1 %v251_v52  ;;  %v257_v52 = vsel %vm85_vm0, %v78_v61, 0.0  ;;  %v11357_v48 = vsub.f32 %v10990_v34, %v320_v46  ;;  %v11368_v34 = vsub.f32 %v10995_v35, %v319_v32  ;;  %v322_v46 = vmul.f32 0.03125, %v217_v28  ;;  %v80_v61 = vld [vmem:[%s16916_s0 + $0x1d8] sm:$0xff]  ;;  %v81_v35 = vld [vmem:[%s16916_s0 + $0x1e0] sm:$0xff] }
  0xf5   :  { %v263_v44 = vsel %vm85_vm0, %v80_v61, 0.0  ;;  %v266_v32 = vsel %vm85_vm0, %v81_v35, 0.0 }
  0xf6   :  { %17545 = vst [vmem:[#allocation8_spill] sm:$0xff] %v11357_v48  ;;  %17546 = vst [vmem:[#allocation9_spill] sm:$0xff] %v11368_v34  ;;  %v448_v15 = vmul.f32 %v11357_v48, %v11357_v48  ;;  %v447_v28 = vmul.f32 %v11368_v34, %v11368_v34  ;;  %v220_v61 = vpop.xlane.xlu0 %219 }
  0xf7   :  { %v323_v35 = vmul.f32 0.03125, %v220_v61 }
  0xf8   :  { %255 = vadd.xlane.f32.xlu0 %v254_v1  ;;  %580 = vadd.xlane.f32.xlu1 %v579_v26  ;;  %v260_v1 = vsel %vm85_vm0, %v79_v27, 0.0  ;;  %v585_v26 = vsel %vm85_vm0, %v445_v47, 0.0  ;;  %v321_v27 = vmul.f32 0.03125, %v214_v18  ;;  %v223_v47 = vpop.xlane.xlu1 %222 }
  0xfc   :  { %589 = vadd.xlane.f32.xlu0 %v588_v56  ;;  %258 = vadd.xlane.f32.xlu1 %v257_v52  ;;  %v11377_v52 = vsub.f32 %v11004_v42, %v322_v46  ;;  %v594_v56 = vsel %vm85_vm0, %v448_v15, 0.0  ;;  %v11388_v42 = vsub.f32 %v11009_v43, %v321_v27  ;;  %v82_v15 = vld [vmem:[%s16916_s0 + $0x1e8] sm:$0xff] }
  0xfd   :  { %v269_v18 = vsel %vm85_vm0, %v82_v15, 0.0 }
  0xfe   :  { %17547 = vst [vmem:[#allocation10_spill] sm:$0xff] %v11377_v52  ;;  %17548 = vst [vmem:[#allocation11_spill] sm:$0xff] %v11388_v42  ;;  %v450_v46 = vmul.f32 %v11377_v52, %v11377_v52  ;;  %v449_v43 = vmul.f32 %v11388_v42, %v11388_v42 }
 0x100   :  { %261 = vadd.xlane.f32.xlu0 %v260_v1  ;;  %586 = vadd.xlane.f32.xlu1 %v585_v26  ;;  %v591_v1 = vsel %vm85_vm0, %v447_v28, 0.0  ;;  %v324_v26 = vmul.f32 0.03125, %v223_v47  ;;  %v83_v28 = vld [vmem:[%s16916_s0 + $0x1f0] sm:$0xff]  ;;  %v597_v47 = vsel %vm85_vm0, %v449_v43, 0.0 }
 0x101   :  { %v272_v27 = vsel %vm85_vm0, %v83_v28, 0.0 }
 0x104   :  { %595 = vadd.xlane.f32.xlu0 %v594_v56  ;;  %264 = vadd.xlane.f32.xlu1 %v263_v44  ;;  %v11397_v44 = vsub.f32 %v11018_v50, %v324_v26  ;;  %v600_v56 = vsel %vm85_vm0, %v450_v46, 0.0 }
 0x106   :  { %17549 = vst [vmem:[#allocation12_spill] sm:$0xff] %v11397_v44  ;;  %v452_v50 = vmul.f32 %v11397_v44, %v11397_v44 }
 0x108   :  { %267 = vadd.xlane.f32.xlu0 %v266_v32  ;;  %592 = vadd.xlane.f32.xlu1 %v591_v1  ;;  %v11408_v32 = vsub.f32 %v11023_v51, %v323_v35  ;;  %v84_v1 = vld [vmem:[%s16916_s0 + $0x1f8] sm:$0xff]  ;;  %v606_v26 = vsel %vm85_vm0, %v452_v50, 0.0 }
 0x109   :  { %v275_v46 = vsel %vm85_vm0, %v84_v1, 0.0 }
 0x10a   :  { %17550 = vst [vmem:[#allocation13_spill] sm:$0xff] %v11408_v32  ;;  %v451_v15 = vmul.f32 %v11408_v32, %v11408_v32 }
 0x10c   :  { %601 = vadd.xlane.f32.xlu0 %v600_v56  ;;  %270 = vadd.xlane.f32.xlu1 %v269_v18  ;;  %v603_v51 = vsel %vm85_vm0, %v451_v15, 0.0 }
 0x110   :  { %273 = vadd.xlane.f32.xlu0 %v272_v27  ;;  %598 = vadd.xlane.f32.xlu1 %v597_v47 }
 0x114   :  { %607 = vadd.xlane.f32.xlu0 %v606_v26  ;;  %276 = vadd.xlane.f32.xlu1 %v275_v46 }
 0x118   :  { %604 = vadd.xlane.f32.xlu1 %v603_v51 }
 0x125   :  { %v473_v61 = vpop.xlane.xlu0 %472 }
 0x126   :  { %v663_v18 = vmul.f32 0.03125, %v473_v61 }
 0x128   :  { %v727_v56 = vadd.f32 1e-05, %v663_v18 }
 0x129   :  { %v476_v43 = vpop.xlane.xlu1 %475  ;;  %v479_v35 = vpop.xlane.xlu0 %478 }
 0x12a   :  { %9762 = vrsqrt.f32 %v727_v56  ;;  %v664_v28 = vmul.f32 0.03125, %v476_v43  ;;  %v665_v27 = vmul.f32 0.03125, %v479_v35 }
 0x12c   :  { %v728_v47 = vadd.f32 1e-05, %v664_v28  ;;  %v729_v50 = vadd.f32 1e-05, %v665_v27 }
 0x12d   :  { %v482_v44 = vpop.xlane.xlu1 %481  ;;  %v485_v1 = vpop.xlane.xlu0 %484 }
 0x12e   :  { %9764 = vrsqrt.f32 %v728_v47  ;;  %v666_v52 = vmul.f32 0.03125, %v482_v44  ;;  %v667_v46 = vmul.f32 0.03125, %v485_v1  ;;  %v11424_v44 = vld [vmem:[%s16918_s1] ss:$0 sm:$0xff] }
 0x12f   :  { %9766 = vrsqrt.f32 %v729_v50 }
 0x130   :  { %v730_v26 = vadd.f32 1e-05, %v666_v52  ;;  %v731_v18 = vadd.f32 1e-05, %v667_v46 }
 0x131   :  { %v488_v32 = vpop.xlane.xlu1 %487  ;;  %v491_v15 = vpop.xlane.xlu0 %490 }
 0x132   :  { %9768 = vrsqrt.f32 %v730_v26  ;;  %v668_v51 = vmul.f32 0.03125, %v488_v32  ;;  %v669_v28 = vmul.f32 0.03125, %v491_v15 }
 0x134   :  { %v9763_v61 = vpop.eup %9762  ;;  %v732_v42 = vadd.f32 1e-05, %v668_v51  ;;  %v733_v46 = vadd.f32 1e-05, %v669_v28 }
 0x135   :  { %v494_v48 = vpop.xlane.xlu1 %493  ;;  %v497_v56 = vpop.xlane.xlu0 %496  ;;  %v855_v43 = vmul.f32 %v9763_v61, %v11030_v6  ;;  %v11431_v6 = vld [vmem:[%s16919_s2] ss:$0 sm:$0xff] }
 0x136   :  { %9770 = vrsqrt.f32 %v732_v42  ;;  %v670_v35 = vmul.f32 0.03125, %v494_v48 }
 0x137   :  { %9772 = vrsqrt.f32 %v731_v18  ;;  %v926_v50 = vmul.f32 %v11424_v44, %v855_v43 }
 0x138   :  { %v9765_v52 = vpop.eup %9764  ;;  %v734_v26 = vadd.f32 1e-05, %v670_v35 }
 0x139   :  { %v500_v27 = vpop.xlane.xlu1 %499  ;;  %v503_v47 = vpop.xlane.xlu0 %502  ;;  %v856_v32 = vmul.f32 %v9765_v52, %v11040_v38  ;;  %v997_v15 = vadd.f32 %v11431_v6, %v926_v50 }
 0x13a   :  { %v9767_v1 = vpop.eup %9766  ;;  %9774 = vrsqrt.f32 %v734_v26  ;;  %v672_v35 = vmul.f32 0.03125, %v500_v27 }
 0x13b   :  { %v927_v48 = vmul.f32 %v11424_v44, %v856_v32  ;;  %v857_v38 = vmul.f32 %v9767_v1, %v11033_v7  ;;  %9776 = vrsqrt.f32 %v733_v46  ;;  %v671_v32 = vmul.f32 0.03125, %v497_v56 }
 0x13c   :  { %v9769_v42 = vpop.eup %9768 }
 0x13d   :  { %v506_v51 = vpop.xlane.xlu1 %505  ;;  %v509_v61 = vpop.xlane.xlu0 %508  ;;  %v998_v18 = vadd.f32 %v11431_v6, %v927_v48  ;;  %v858_v43 = vmul.f32 %v9769_v42, %v11043_v39  ;;  %v928_v50 = vmul.f32 %v11424_v44, %v857_v38  ;;  %v736_v48 = vadd.f32 1e-05, %v672_v35 }
 0x13e   :  { %v735_v27 = vadd.f32 1e-05, %v671_v32  ;;  %v674_v46 = vmul.f32 0.03125, %v506_v51 }
 0x13f   :  { %v1085_v52 = vpack.c.bf16 %v998_v18, %v997_v15  ;;  %v929_v34 = vmul.f32 %v11424_v44, %v858_v43  ;;  %v999_v56 = vadd.f32 %v11431_v6, %v928_v50  ;;  %9778 = vrsqrt.f32 %v736_v48 }
 0x140   :  { %v9771_v54 = vpop.eup %9770  ;;  %9780 = vrsqrt.f32 %v735_v27  ;;  %v673_v43 = vmul.f32 0.03125, %v503_v47 }
 0x141   :  { %v512_v10 = vpop.xlane.xlu1 %511  ;;  %7733 = vmatmul.mubr.msk.bf16.vlgmr.msra.gmra.mrb[0].mxu0 %vm85_vm0, %v1085_v52  ;;  %v515_v28 = vpop.xlane.xlu0 %514  ;;  %v1000_v7 = vadd.f32 %v11431_v6, %v929_v34  ;;  %v860_v39 = vmul.f32 %v9771_v54, %v11055_v5  ;;  %v738_v52 = vadd.f32 1e-05, %v674_v46 }
 0x142   :  { %v9773_v58 = vpop.eup %9772  ;;  %1255 = vmatprep.mubr.bf16.mxu0 %v17551_v3  ;;  %v737_v51 = vadd.f32 1e-05, %v673_v43 }
 0x143   :  { %v859_v42 = vmul.f32 %v9773_v58, %v11052_v2  ;;  %v1086_v15 = vpack.c.bf16 %v1000_v7, %v999_v56  ;;  %v931_v18 = vmul.f32 %v11424_v44, %v860_v39  ;;  %9782 = vrsqrt.f32 %v738_v52 }
 0x144   :  { %v9775_v38 = vpop.eup %9774  ;;  %v676_v7 = vmul.f32 0.03125, %v512_v10  ;;  %9784 = vrsqrt.f32 %v737_v51 }
 0x145   :  { %v518_v1 = vpop.xlane.xlu1 %517  ;;  %v11444_v26 = vpop.xlane.xlu0 %520  ;;  %v930_v54 = vmul.f32 %v11424_v44, %v859_v42  ;;  %v1002_v2 = vadd.f32 %v11431_v6, %v931_v18  ;;  %v862_v58 = vmul.f32 %v9775_v38, %v11067_v9  ;;  %v675_v42 = vmul.f32 0.03125, %v509_v61 }
 0x146   :  { %v9777_v34 = vpop.eup %9776  ;;  %v740_v38 = vadd.f32 1e-05, %v676_v7 }
 0x147   :  { %v1001_v47 = vadd.f32 %v11431_v6, %v930_v54  ;;  %v861_v48 = vmul.f32 %v9777_v34, %v11064_v31  ;;  %v933_v27 = vmul.f32 %v11424_v44, %v862_v58  ;;  %v739_v43 = vadd.f32 1e-05, %v675_v42 }
 0x148   :  { %9786 = vrsqrt.f32 %v740_v38 }
 0x149   :  { %v524_v35 = vpop.xlane.xlu1 %523  ;;  %7734 = vmatmul.mubr.msk.bf16.gmra.mrb[4].mxu0 %vm85_vm0, %v1086_v15  ;;  %v11450_v5 = vpop.xlane.xlu0 %526  ;;  %v1087_v39 = vpack.c.bf16 %v1002_v2, %v1001_v47  ;;  %v932_v15 = vmul.f32 %v11424_v44, %v861_v48  ;;  %v1004_v31 = vadd.f32 %v11431_v6, %v933_v27  ;;  %v678_v2 = vmul.f32 0.03125, %v518_v1 }
 0x14a   :  { %1265 = vmatprep.mubr.bf16.mxu0 %v17551_v3  ;;  %v9779_v56 = vpop.eup %9778  ;;  %9788 = vrsqrt.f32 %v739_v43  ;;  %v677_v48 = vmul.f32 0.03125, %v515_v28 }
 0x14b   :  { %v9781_v18 = vpop.eup %9780  ;;  %v864_v10 = vmul.f32 %v9779_v56, %v11079_v13  ;;  %v1003_v34 = vadd.f32 %v11431_v6, %v932_v15  ;;  %v742_v56 = vadd.f32 1e-05, %v678_v2 }
 0x14c   :  { %v863_v52 = vmul.f32 %v9781_v18, %v11076_v59  ;;  %v741_v42 = vadd.f32 1e-05, %v677_v48 }
 0x14d   :  { %v11456_v32 = vpop.xlane.xlu1 %529  ;;  %v11458_v50 = vpop.xlane.xlu0 %532  ;;  %v1088_v58 = vpack.c.bf16 %v1004_v31, %v1003_v34  ;;  %v935_v51 = vmul.f32 %v11424_v44, %v864_v10  ;;  %9790 = vrsqrt.f32 %v742_v56  ;;  %v680_v31 = vmul.f32 0.03125, %v524_v35 }
 0x14e   :  { %v9783_v47 = vpop.eup %9782  ;;  %9792 = vrsqrt.f32 %v741_v42 }
 0x14f   :  { %v9785_v27 = vpop.eup %9784  ;;  %v1006_v59 = vadd.f32 %v11431_v6, %v935_v51  ;;  %v866_v1 = vmul.f32 %v9783_v47, %v11091_v17  ;;  %v744_v47 = vadd.f32 1e-05, %v680_v31 }
 0x150   :  { %v865_v38 = vmul.f32 %v9785_v27, %v11088_v8 }
 0x151   :  { %v11463_v46 = vpop.xlane.xlu1 %535  ;;  %7735 = vmatmul.mubr.msk.bf16.gmra.mrb[8].mxu0 %vm85_vm0, %v1087_v39  ;;  %v11466_v9 = vpop.xlane.xlu0 %538  ;;  %v934_v39 = vmul.f32 %v11424_v44, %v863_v52  ;;  %v937_v43 = vmul.f32 %v11424_v44, %v866_v1  ;;  %v679_v52 = vmul.f32 0.03125, %v11444_v26  ;;  %9794 = vrsqrt.f32 %v744_v47 }
 0x152   :  { %1275 = vmatprep.mubr.bf16.mxu0 %v17551_v3  ;;  %v9787_v34 = vpop.eup %9786 }
 0x153   :  { %v1005_v18 = vadd.f32 %v11431_v6, %v934_v39  ;;  %v1008_v8 = vadd.f32 %v11431_v6, %v937_v43  ;;  %v868_v35 = vmul.f32 %v9787_v34, %v11103_v21  ;;  %v743_v48 = vadd.f32 1e-05, %v679_v52 }
 0x154   :  { %v9789_v51 = vpop.eup %9788 }
 0x155   :  { %v11472_v54 = vpop.xlane.xlu1 %541  ;;  %v11474_v61 = vpop.xlane.xlu0 %544  ;;  %v1089_v10 = vpack.c.bf16 %v1006_v59, %v1005_v18  ;;  %v867_v56 = vmul.f32 %v9789_v51, %v11100_v12  ;;  %v682_v59 = vmul.f32 0.03125, %v11456_v32  ;;  %v939_v42 = vmul.f32 %v11424_v44, %v868_v35 }
 0x156   :  { %9796 = vrsqrt.f32 %v743_v48 }
 0x157   :  { %v9791_v18 = vpop.eup %9790  ;;  %v746_v34 = vadd.f32 1e-05, %v682_v59  ;;  %v1010_v32 = vadd.f32 %v11431_v6, %v939_v42  ;;  %v683_v42 = vmul.f32 0.03125, %v11458_v50 }
 0x158   :  { %v9793_v43 = vpop.eup %9792 }
 0x159   :  { %v11479_v7 = vpop.xlane.xlu1 %547  ;;  %7736 = vmatmul.mubr.msk.bf16.gmra.mrb[12].mxu0 %vm85_vm0, %v1088_v58  ;;  %v11482_v13 = vpop.xlane.xlu0 %550  ;;  %v936_v58 = vmul.f32 %v11424_v44, %v865_v38  ;;  %v681_v38 = vmul.f32 0.03125, %v11450_v5  ;;  %v869_v48 = vmul.f32 %v9793_v43, %v11112_v16  ;;  %9798 = vrsqrt.f32 %v746_v34 }
 0x15a   :  { %1285 = vmatprep.mubr.bf16.mxu0 %v17551_v3  ;;  %v747_v34 = vadd.f32 1e-05, %v683_v42 }
 0x15b   :  { %v1007_v27 = vadd.f32 %v11431_v6, %v936_v58  ;;  %v870_v58 = vmul.f32 %v9791_v18, %v11115_v25  ;;  %v745_v51 = vadd.f32 1e-05, %v681_v38  ;;  %v940_v38 = vmul.f32 %v11424_v44, %v869_v48 }
 0x15d   :  { %v11488_v15 = vpop.xlane.xlu1 %553  ;;  %v11490_v28 = vpop.xlane.xlu0 %556  ;;  %v1090_v1 = vpack.c.bf16 %v1008_v8, %v1007_v27  ;;  %v684_v27 = vmul.f32 0.03125, %v11463_v46  ;;  %9800 = vrsqrt.f32 %v745_v51 }
 0x161   :  { %v11496_v2 = vpop.xlane.xlu1 %559  ;;  %7737 = vmatmul.mubr.msk.bf16.gmra.mrb[16].mxu0 %vm85_vm0, %v1089_v10  ;;  %v11499_v17 = vpop.xlane.xlu0 %562  ;;  %v938_v10 = vmul.f32 %v11424_v44, %v867_v56 }
 0x162   :  { %1295 = vmatprep.mubr.bf16.mxu0 %v17551_v3 }
 0x163   :  { %v1009_v35 = vadd.f32 %v11431_v6, %v938_v10 }
 0x165   :  { %v11505_v39 = vpop.xlane.xlu1 %565  ;;  %v11507_v26 = vpop.xlane.xlu0 %225  ;;  %v1091_v25 = vpack.c.bf16 %v1010_v32, %v1009_v35 }
 0x169   :  { %v229_v21 = vpop.xlane.xlu1 %228  ;;  %7738 = vmatmul.mubr.msk.bf16.gmra.mrb[20].mxu0 %vm85_vm0, %v1090_v1  ;;  %v232_v31 = vpop.xlane.xlu0 %231  ;;  %v941_v1 = vmul.f32 %v11424_v44, %v870_v58  ;;  %v686_v58 = vmul.f32 0.03125, %v11472_v54 }
 0x16a   :  { %v326_v52 = vmul.f32 0.03125, %v229_v21  ;;  %v327_v12 = vmul.f32 0.03125, %v232_v31  ;;  %1305 = vmatprep.mubr.bf16.mxu0 %v17551_v3  ;;  %v748_v31 = vadd.f32 1e-05, %v684_v27 }
 0x16c   :  { %v11520_v47 = vsub.f32 %v11253_v55, %v326_v52  ;;  %v11523_v5 = vsub.f32 %v11258_v37, %v327_v12  ;;  %v9795_v37 = vpop.eup %9794  ;;  %v1011_v12 = vadd.f32 %v11431_v6, %v940_v38  ;;  %9802 = vrsqrt.f32 %v748_v31 }
 0x16d   :  { %v238_v8 = vpop.xlane.xlu0 %237  ;;  %v9797_v21 = vpop.eup %9796  ;;  %v872_v43 = vmul.f32 %v9795_v37, %v11127_v29  ;;  %9804 = vrsqrt.f32 %v747_v34  ;;  %v685_v29 = vmul.f32 0.03125, %v11466_v9 }
 0x16e   :  { %v329_v56 = vmul.f32 0.03125, %v238_v8  ;;  %v454_v59 = vmul.f32 %v11520_v47, %v11520_v47  ;;  %v455_v55 = vmul.f32 %v11523_v5, %v11523_v5  ;;  %v871_v32 = vmul.f32 %v9797_v21, %v11124_v20  ;;  %v11552_v35 = vpop.xlane.xlu1 %234 }
 0x16f   :  { %v943_v27 = vmul.f32 %v11424_v44, %v872_v43 }
 0x170   :  { %v11535_v18 = vsub.f32 %v11273_v0, %v329_v56  ;;  %v612_v16 = vsel %vm85_vm0, %v454_v59, 0.0  ;;  %v615_v10 = vsel %vm85_vm0, %v455_v55, 0.0  ;;  %v1012_v0 = vadd.f32 %v11431_v6, %v941_v1  ;;  %v9799_v56 = vpop.eup %9798 }
 0x171   :  { %7739 = vmatmul.mubr.msk.bf16.gmra.mrb[24].mxu0 %vm85_vm0, %v1091_v25  ;;  %v11539_v46 = vpop.xlane.xlu0 %571  ;;  %613 = vadd.xlane.f32.xlu0 %v612_v16  ;;  %v942_v54 = vmul.f32 %v11424_v44, %v871_v32  ;;  %v9801_v25 = vpop.eup %9800  ;;  %v750_v1 = vadd.f32 1e-05, %v686_v58  ;;  %v1014_v37 = vadd.f32 %v11431_v6, %v943_v27  ;;  %v874_v9 = vmul.f32 %v9799_v56, %v11139_v33 }
 0x172   :  { %1315 = vmatprep.mubr.bf16.mxu0 %v17551_v3  ;;  %v457_v50 = vmul.f32 %v11535_v18, %v11535_v18  ;;  %v1092_v48 = vpack.c.bf16 %v1012_v0, %v1011_v12  ;;  %v11569_v16 = vpop.xlane.xlu1 %240  ;;  %v873_v31 = vmul.f32 %v9801_v25, %v11136_v24  ;;  %v687_v33 = vmul.f32 0.03125, %v11474_v61 }
 0x173   :  { %v1013_v21 = vadd.f32 %v11431_v6, %v942_v54  ;;  %9806 = vrsqrt.f32 %v750_v1  ;;  %v945_v43 = vmul.f32 %v11424_v44, %v874_v9  ;;  %v690_v54 = vmul.f32 0.03125, %v11488_v15 }
 0x174   :  { %v621_v8 = vsel %vm85_vm0, %v457_v50, 0.0  ;;  %v944_v24 = vmul.f32 %v11424_v44, %v873_v31 }
 0x175   :  { %v244_v52 = vpop.xlane.xlu0 %243  ;;  %616 = vadd.xlane.f32.xlu0 %v615_v10  ;;  %v688_v10 = vmul.f32 0.03125, %v11479_v7  ;;  %v1093_v0 = vpack.c.bf16 %v1014_v37, %v1013_v21  ;;  %v1016_v61 = vadd.f32 %v11431_v6, %v945_v43 }
 0x176   :  { %v331_v51 = vmul.f32 0.03125, %v244_v52  ;;  %v9803_v34 = vpop.eup %9802  ;;  %v1015_v56 = vadd.f32 %v11431_v6, %v944_v24 }
 0x177   :  { %v9805_v32 = vpop.eup %9804  ;;  %v752_v58 = vadd.f32 1e-05, %v688_v10 }
 0x178   :  { %v11557_v59 = vsub.f32 %v11294_v4, %v331_v51  ;;  %v749_v4 = vadd.f32 1e-05, %v685_v29  ;;  %v11586_v51 = vpop.xlane.xlu1 %568  ;;  %v875_v29 = vmul.f32 %v9805_v32, %v11160_v22  ;;  %v1094_v1 = vpack.c.bf16 %v1016_v61, %v1015_v56 }
 0x179   :  { %7740 = vmatmul.mubr.msk.bf16.gmra.mrb[28].mxu0 %vm85_vm0, %v1092_v48  ;;  %v11560_v20 = vpop.xlane.xlu0 %577  ;;  %622 = vadd.xlane.f32.xlu0 %v621_v8  ;;  %v751_v8 = vadd.f32 1e-05, %v687_v33  ;;  %v691_v32 = vmul.f32 0.03125, %v11490_v28  ;;  %v694_v28 = vmul.f32 0.03125, %v11505_v39 }
 0x17a   :  { %1325 = vmatprep.mubr.bf16.mxu0 %v17551_v3  ;;  %v459_v55 = vmul.f32 %v11557_v59, %v11557_v59  ;;  %9808 = vrsqrt.f32 %v749_v4  ;;  %v946_v22 = vmul.f32 %v11424_v44, %v875_v29 }
 0x17b   :  { %9810 = vrsqrt.f32 %v752_v58  ;;  %v755_v61 = vadd.f32 1e-05, %v691_v32 }
 0x17c   :  { %v627_v42 = vsel %vm85_vm0, %v459_v55, 0.0  ;;  %9812 = vrsqrt.f32 %v751_v8  ;;  %v11599_v4 = vpop.xlane.xlu1 %246  ;;  %v1017_v10 = vadd.f32 %v11431_v6, %v946_v22 }
 0x17d   :  { %v250_v38 = vpop.xlane.xlu0 %249  ;;  %628 = vadd.xlane.f32.xlu0 %v627_v42  ;;  %v9807_v37 = vpop.eup %9806 }
 0x17e   :  { %v333_v50 = vmul.f32 0.03125, %v250_v38  ;;  %v754_v38 = vadd.f32 1e-05, %v690_v54  ;;  %v693_v54 = vmul.f32 0.03125, %v11499_v17  ;;  %v695_v17 = vmul.f32 0.03125, %v11586_v51 }
 0x180   :  { %v11577_v52 = vsub.f32 %v11317_v11, %v333_v50  ;;  %v876_v11 = vmul.f32 %v9803_v34, %v11163_v23  ;;  %v689_v23 = vmul.f32 0.03125, %v11482_v13  ;;  %v878_v13 = vmul.f32 %v9807_v37, %v11187_v63  ;;  %v575_v43 = vpop.xlane.xlu1 %574 }
 0x181   :  { %7741 = vmatmul.mubr.msk.bf16.gmra.mrb[32].mxu0 %vm85_vm0, %v1093_v0  ;;  %v11580_v12 = vpop.xlane.xlu0 %583  ;;  %9814 = vrsqrt.f32 %v754_v38  ;;  %v692_v0 = vmul.f32 0.03125, %v11496_v2  ;;  %v757_v37 = vadd.f32 1e-05, %v693_v54 }
 0x182   :  { %17552 = vst [vmem:[#allocation14_spill] sm:$0xff] %v11577_v52  ;;  %1335 = vmatprep.mubr.bf16.mxu0 %v17551_v3  ;;  %v461_v7 = vmul.f32 %v11577_v52, %v11577_v52  ;;  %v947_v55 = vmul.f32 %v11424_v44, %v876_v11  ;;  %v753_v31 = vadd.f32 1e-05, %v689_v23  ;;  %v949_v33 = vmul.f32 %v11424_v44, %v878_v13 }
 0x183   :  { %v700_v54 = vmul.f32 0.03125, %v11580_v12 }
 0x184   :  { %v633_v48 = vsel %vm85_vm0, %v461_v7, 0.0  ;;  %v9809_v42 = vpop.eup %9808  ;;  %v1018_v21 = vadd.f32 %v11431_v6, %v947_v55  ;;  %9816 = vrsqrt.f32 %v753_v31  ;;  %v756_v7 = vadd.f32 1e-05, %v692_v0  ;;  %v11619_v11 = vpop.xlane.xlu1 %252 }
 0x185   :  { %v256_v27 = vpop.xlane.xlu0 %255  ;;  %634 = vadd.xlane.f32.xlu0 %v633_v48  ;;  %v877_v50 = vmul.f32 %v9809_v42, %v11184_v62  ;;  %v9811_v24 = vpop.eup %9810  ;;  %v1020_v62 = vadd.f32 %v11431_v6, %v949_v33 }
 0x186   :  { %v335_v25 = vmul.f32 0.03125, %v256_v27  ;;  %v1095_v34 = vpack.c.bf16 %v1018_v21, %v1017_v10  ;;  %v9813_v58 = vpop.eup %9812  ;;  %v880_v2 = vmul.f32 %v9811_v24, %v11200_v40  ;;  %9818 = vrsqrt.f32 %v756_v7 }
 0x187   :  { %v948_v63 = vmul.f32 %v11424_v44, %v877_v50  ;;  %v879_v48 = vmul.f32 %v9813_v58, %v11197_v45  ;;  %9820 = vrsqrt.f32 %v755_v61  ;;  %v696_v21 = vmul.f32 0.03125, %v11539_v46 }
 0x188   :  { %v11597_v9 = vsub.f32 %v11340_v19, %v335_v25  ;;  %v951_v56 = vmul.f32 %v11424_v44, %v880_v2  ;;  %v581_v55 = vpop.xlane.xlu1 %580  ;;  %v697_v46 = vmul.f32 0.03125, %v575_v43 }
 0x189   :  { %7742 = vmatmul.mubr.msk.bf16.gmra.mrb[36].mxu0 %vm85_vm0, %v1094_v1  ;;  %v1019_v8 = vadd.f32 %v11431_v6, %v948_v63  ;;  %v950_v40 = vmul.f32 %v11424_v44, %v879_v48  ;;  %v758_v1 = vadd.f32 1e-05, %v694_v28  ;;  %v760_v10 = vadd.f32 1e-05, %v696_v21  ;;  %v590_v58 = vpop.xlane.xlu0 %589 }
 0x18a   :  { %17553 = vst [vmem:[#allocation15_spill] sm:$0xff] %v11597_v9  ;;  %1345 = vmatprep.mubr.bf16.mxu0 %v17551_v3  ;;  %v463_v15 = vmul.f32 %v11597_v9, %v11597_v9  ;;  %v1022_v45 = vadd.f32 %v11431_v6, %v951_v56  ;;  %v698_v63 = vmul.f32 0.03125, %v11560_v20  ;;  %v699_v48 = vmul.f32 0.03125, %v581_v55 }
 0x18b   :  { %v1096_v27 = vpack.c.bf16 %v1020_v62, %v1019_v8  ;;  %v9815_v29 = vpop.eup %9814  ;;  %v1021_v23 = vadd.f32 %v11431_v6, %v950_v40  ;;  %9822 = vrsqrt.f32 %v758_v1  ;;  %v761_v62 = vadd.f32 1e-05, %v697_v46 }
 0x18c   :  { %v639_v19 = vsel %vm85_vm0, %v463_v15, 0.0  ;;  %v882_v39 = vmul.f32 %v9815_v29, %v11212_v49  ;;  %9824 = vrsqrt.f32 %v757_v37  ;;  %v11636_v13 = vpop.xlane.xlu1 %258  ;;  %v762_v2 = vadd.f32 1e-05, %v698_v63 }
 0x18d   :  { %640 = vadd.xlane.f32.xlu0 %v639_v19  ;;  %v1097_v42 = vpack.c.bf16 %v1022_v45, %v1021_v23  ;;  %v759_v19 = vadd.f32 1e-05, %v695_v17  ;;  %v11656_v28 = vpop.xlane.xlu0 %261  ;;  %v764_v45 = vadd.f32 1e-05, %v700_v54 }
 0x18e   :  { %v9817_v25 = vpop.eup %9816  ;;  %v953_v38 = vmul.f32 %v11424_v44, %v882_v39 }
 0x18f   :  { %v881_v22 = vmul.f32 %v9817_v25, %v11209_v14  ;;  %9826 = vrsqrt.f32 %v759_v19  ;;  %v763_v25 = vadd.f32 1e-05, %v699_v48  ;;  %v17554_v19 = vld [vmem:[#allocation3_spill] sm:$0xff] }
 0x190   :  { %v9819_v15 = vpop.eup %9818  ;;  %v1024_v14 = vadd.f32 %v11431_v6, %v953_v38  ;;  %9828 = vrsqrt.f32 %v760_v10  ;;  %v702_v38 = vmul.f32 0.03125, %v590_v58 }
 0x191   :  { %7743 = vmatmul.mubr.msk.bf16.gmra.mrb[40].mxu0 %vm85_vm0, %v1095_v34  ;;  %v952_v49 = vmul.f32 %v11424_v44, %v881_v22  ;;  %v9821_v31 = vpop.eup %9820  ;;  %v884_v51 = vmul.f32 %v9819_v15, %v11224_v53  ;;  %v587_v34 = vpop.xlane.xlu1 %586  ;;  %9830 = vrsqrt.f32 %v761_v62 }
 0x192   :  { %1355 = vmatprep.mubr.bf16.mxu0 %v17551_v3  ;;  %v883_v0 = vmul.f32 %v9821_v31, %v11221_v41  ;;  %9832 = vrsqrt.f32 %v762_v2  ;;  %v596_v39 = vpop.xlane.xlu0 %595  ;;  %v701_v12 = vmul.f32 0.03125, %v587_v34 }
 0x193   :  { %v1023_v50 = vadd.f32 %v11431_v6, %v952_v49  ;;  %v955_v24 = vmul.f32 %v11424_v44, %v884_v51  ;;  %9834 = vrsqrt.f32 %v763_v25  ;;  %v766_v51 = vadd.f32 1e-05, %v702_v38  ;;  %v17559_v38 = vld [vmem:[#allocation6_spill] sm:$0xff] }
 0x194   :  { %v954_v53 = vmul.f32 %v11424_v44, %v883_v0  ;;  %9836 = vrsqrt.f32 %v764_v45  ;;  %v765_v49 = vadd.f32 1e-05, %v701_v12  ;;  %v704_v63 = vmul.f32 0.03125, %v596_v39 }
 0x195   :  { %v1098_v33 = vpack.c.bf16 %v1024_v14, %v1023_v50  ;;  %v9823_v32 = vpop.eup %9822  ;;  %v1026_v41 = vadd.f32 %v11431_v6, %v955_v24  ;;  %v11652_v61 = vpop.xlane.xlu1 %264  ;;  %v17555_v50 = vld [vmem:[#allocation2_spill] sm:$0xff] }
 0x196   :  { %v9825_v7 = vpop.eup %9824  ;;  %v886_v43 = vmul.f32 %v9823_v32, %v11236_v57  ;;  %v1025_v8 = vadd.f32 %v11431_v6, %v954_v53  ;;  %v11673_v31 = vpop.xlane.xlu0 %267  ;;  %9838 = vrsqrt.f32 %v765_v49 }
 0x197   :  { %v885_v20 = vmul.f32 %v9825_v7, %v11233_v30  ;;  %9840 = vrsqrt.f32 %v766_v51 }
 0x198   :  { %v957_v56 = vmul.f32 %v11424_v44, %v886_v43  ;;  %v17556_v43 = vld [vmem:[#allocation5_spill] sm:$0xff] }
 0x199   :  { %7744 = vmatmul.mubr.msk.bf16.gmra.mrb[44].mxu0 %vm85_vm0, %v1096_v27  ;;  %v1099_v27 = vpack.c.bf16 %v1026_v41, %v1025_v8  ;;  %v9827_v29 = vpop.eup %9826  ;;  %v956_v57 = vmul.f32 %v11424_v44, %v885_v20  ;;  %v593_v30 = vpop.xlane.xlu1 %592  ;;  %v768_v8 = vadd.f32 1e-05, %v704_v63 }
 0x19a   :  { %1365 = vmatprep.mubr.bf16.mxu0 %v17551_v3  ;;  %v9829_v40 = vpop.eup %9828  ;;  %v1028_v1 = vadd.f32 %v11431_v6, %v957_v56  ;;  %v887_v55 = vmul.f32 %v9827_v29, %v11279_v60  ;;  %v703_v46 = vmul.f32 0.03125, %v593_v30  ;;  %v602_v58 = vpop.xlane.xlu0 %601 }
 0x19b   :  { %v1027_v37 = vadd.f32 %v11431_v6, %v956_v57  ;;  %v888_v23 = vmul.f32 %v9829_v40, %v11261_v36  ;;  %v706_v30 = vmul.f32 0.03125, %v602_v58 }
 0x19c   :  { %v958_v17 = vmul.f32 %v11424_v44, %v887_v55  ;;  %v767_v62 = vadd.f32 1e-05, %v703_v46  ;;  %v17560_v46 = vld [vmem:[#allocation9_spill] sm:$0xff] }
 0x19d   :  { %v1100_v22 = vpack.c.bf16 %v1028_v1, %v1027_v37  ;;  %v11668_v15 = vpop.xlane.xlu1 %270  ;;  %v959_v60 = vmul.f32 %v11424_v44, %v888_v23  ;;  %v17558_v23 = vld [vmem:[#allocation7_spill] sm:$0xff] }
 0x19e   :  { %v1029_v36 = vadd.f32 %v11431_v6, %v958_v17  ;;  %9842 = vrsqrt.f32 %v767_v62  ;;  %v11689_v54 = vpop.xlane.xlu0 %273 }
 0x19f   :  { %v1030_v10 = vadd.f32 %v11431_v6, %v959_v60  ;;  %9844 = vrsqrt.f32 %v768_v8 }
 0x1a1   :  { %7745 = vmatmul.mubr.msk.bf16.gmra.mrb[48].mxu0 %vm85_vm0, %v1097_v42  ;;  %v9831_v42 = vpop.eup %9830  ;;  %v599_v34 = vpop.xlane.xlu1 %598 }
 0x1a2   :  { %1375 = vmatprep.mubr.bf16.mxu0 %v17551_v3  ;;  %v9833_v21 = vpop.eup %9832  ;;  %v889_v14 = vmul.f32 %v9831_v42, %v17554_v19  ;;  %v705_v29 = vmul.f32 0.03125, %v599_v34  ;;  %v608_v17 = vpop.xlane.xlu0 %607 }
 0x1a3   :  { %v890_v0 = vmul.f32 %v9833_v21, %v17555_v50  ;;  %v9835_v32 = vpop.eup %9834 }
 0x1a4   :  { %v960_v24 = vmul.f32 %v11424_v44, %v889_v14  ;;  %v9837_v7 = vpop.eup %9836  ;;  %v891_v2 = vmul.f32 %v9835_v32, %v17556_v43  ;;  %v769_v45 = vadd.f32 1e-05, %v705_v29  ;;  %v708_v14 = vmul.f32 0.03125, %v608_v17  ;;  %v17561_v32 = vld [vmem:[#allocation8_spill] sm:$0xff] }
 0x1a5   :  { %v961_v53 = vmul.f32 %v11424_v44, %v890_v0  ;;  %v11685_v20 = vpop.xlane.xlu1 %276  ;;  %v9839_v25 = vpop.eup %9838 }
 0x1a6   :  { %v1031_v41 = vadd.f32 %v11431_v6, %v960_v24  ;;  %v962_v40 = vmul.f32 %v11424_v44, %v891_v2  ;;  %v9841_v55 = vpop.eup %9840  ;;  %v893_v12 = vmul.f32 %v9839_v25, %v17558_v23  ;;  %9846 = vrsqrt.f32 %v769_v45  ;;  %v17562_v2 = vld [vmem:[#allocation11_spill] sm:$0xff] }
 0x1a7   :  { %v1032_v48 = vadd.f32 %v11431_v6, %v961_v53  ;;  %v894_v60 = vmul.f32 %v9841_v55, %v17559_v38  ;;  %v17564_v55 = vld [vmem:[#allocation13_spill] sm:$0xff] }
 0x1a8   :  { %v1033_v37 = vadd.f32 %v11431_v6, %v962_v40  ;;  %v9843_v19 = vpop.eup %9842 }
 0x1a9   :  { %7746 = vmatmul.mubr.msk.bf16.gmra.mrb[52].mxu0 %vm85_vm0, %v1098_v33  ;;  %v1101_v33 = vpack.c.bf16 %v1030_v10, %v1029_v36  ;;  %v1102_v57 = vpack.c.bf16 %v1032_v48, %v1031_v41  ;;  %v605_v39 = vpop.xlane.xlu1 %604  ;;  %v964_v36 = vmul.f32 %v11424_v44, %v893_v12  ;;  %v965_v51 = vmul.f32 %v11424_v44, %v894_v60  ;;  %v9845_v10 = vpop.eup %9844 }
 0x1aa   :  { %1385 = vmatprep.mubr.bf16.mxu0 %v17551_v3  ;;  %v707_v21 = vmul.f32 0.03125, %v605_v39  ;;  %v895_v34 = vmul.f32 %v9843_v19, %v17560_v46  ;;  %v896_v63 = vmul.f32 %v9845_v10, %v17561_v32 }
 0x1ab   :  { %v1035_v0 = vadd.f32 %v11431_v6, %v964_v36  ;;  %v1036_v24 = vadd.f32 %v11431_v6, %v965_v51 }
 0x1ac   :  { %v771_v50 = vadd.f32 1e-05, %v707_v21  ;;  %v966_v53 = vmul.f32 %v11424_v44, %v895_v34  ;;  %v967_v62 = vmul.f32 %v11424_v44, %v896_v63 }
 0x1ad   :  { %v1104_v58 = vpack.c.bf16 %v1036_v24, %v1035_v0 }
 0x1ae   :  { %v1037_v43 = vadd.f32 %v11431_v6, %v966_v53  ;;  %v1038_v48 = vadd.f32 %v11431_v6, %v967_v62 }
 0x1b0   :  { %v1105_v29 = vpack.c.bf16 %v1038_v48, %v1037_v43 }
 0x1b1   :  { %7747 = vmatmul.mubr.msk.bf16.gmra.mrb[56].mxu0 %vm85_vm0, %v1099_v27  ;;  %v17557_v27 = vld [vmem:[#allocation4_spill] sm:$0xff] }
 0x1b2   :  { %1395 = vmatprep.mubr.bf16.mxu0 %v17551_v3  ;;  %v892_v56 = vmul.f32 %v9837_v7, %v17557_v27  ;;  %v9847_v7 = vpop.eup %9846  ;;  %v17563_v27 = vld [vmem:[#allocation10_spill] sm:$0xff] }
 0x1b3   :  { %v897_v8 = vmul.f32 %v9847_v7, %v17562_v2 }
 0x1b4   :  { %v963_v1 = vmul.f32 %v11424_v44, %v892_v56 }
 0x1b6   :  { %v1034_v42 = vadd.f32 %v11431_v6, %v963_v1 }
 0x1b8   :  { %v1103_v49 = vpack.c.bf16 %v1034_v42, %v1033_v37  ;;  %v17565_v37 = vld [vmem:[#allocation12_spill] sm:$0xff] }
 0x1b9   :  { %7748 = vmatmul.mubr.msk.bf16.gmra.mrb[60].mxu0 %vm85_vm0, %v1100_v22  ;;  %v770_v22 = vadd.f32 1e-05, %v706_v30 }
 0x1ba   :  { %1405 = vmatprep.mubr.bf16.mxu0 %v17551_v3 }
 0x1bb   :  { %9848 = vrsqrt.f32 %v770_v22 }
 0x1bc   :  { %9850 = vrsqrt.f32 %v771_v50 }
 0x1c1   :  { %7749 = vmatmul.mubr.msk.bf16.gmra.mrb[64].mxu0 %vm85_vm0, %v1101_v33  ;;  %v772_v33 = vadd.f32 1e-05, %v708_v14 }
 0x1c2   :  { %1415 = vmatprep.mubr.bf16.mxu0 %v17551_v3 }
 0x1c3   :  { %9852 = vrsqrt.f32 %v772_v33 }
 0x1c5   :  { %v9849_v41 = vpop.eup %9848 }
 0x1c6   :  { %v898_v56 = vmul.f32 %v9849_v41, %v17563_v27  ;;  %v9851_v40 = vpop.eup %9850 }
 0x1c7   :  { %v899_v45 = vmul.f32 %v9851_v40, %v17564_v55 }
 0x1c8   :  { %v969_v25 = vmul.f32 %v11424_v44, %v898_v56 }
 0x1c9   :  { %7750 = vmatmul.mubr.msk.bf16.gmra.mrb[68].mxu0 %vm85_vm0, %v1102_v57  ;;  %v968_v57 = vmul.f32 %v11424_v44, %v897_v8  ;;  %v970_v22 = vmul.f32 %v11424_v44, %v899_v45 }
 0x1ca   :  { %1425 = vmatprep.mubr.bf16.mxu0 %v17551_v3  ;;  %v1040_v39 = vadd.f32 %v11431_v6, %v969_v25 }
 0x1cb   :  { %v1039_v1 = vadd.f32 %v11431_v6, %v968_v57  ;;  %v1041_v42 = vadd.f32 %v11431_v6, %v970_v22 }
 0x1cd   :  { %v9853_v30 = vpop.eup %9852  ;;  %v1106_v12 = vpack.c.bf16 %v1040_v39, %v1039_v1 }
 0x1ce   :  { %v900_v23 = vmul.f32 %v9853_v30, %v17565_v37 }
 0x1d0   :  { %v971_v17 = vmul.f32 %v11424_v44, %v900_v23 }
 0x1d1   :  { %7751 = vmatmul.mubr.msk.bf16.gmra.mrb[72].mxu0 %vm85_vm0, %v1103_v49 }
 0x1d2   :  { %1435 = vmatprep.mubr.bf16.mxu0 %v17551_v3  ;;  %v1042_v38 = vadd.f32 %v11431_v6, %v971_v17 }
 0x1d4   :  { %v1107_v60 = vpack.c.bf16 %v1042_v38, %v1041_v42 }
 0x1d9   :  { %7752 = vmatmul.mubr.msk.bf16.gmra.mrb[76].mxu0 %vm85_vm0, %v1104_v58 }
 0x1da   :  { %1445 = vmatprep.mubr.bf16.mxu0 %v17551_v3 }
 0x1e1   :  { %7753 = vmatmul.mubr.msk.bf16.gmra.mrb[80].mxu0 %vm85_vm0, %v1105_v29 }
 0x1e2   :  { %1455 = vmatprep.mubr.bf16.mxu0 %v17551_v3 }
 0x1e9   :  { %7754 = vmatmul.mubr.msk.bf16.gmra.mrb[84].mxu0 %vm85_vm0, %v1106_v12 }
 0x1ea   :  { %1465 = vmatprep.mubr.bf16.mxu0 %v17551_v3 }
 0x1f1   :  { %7755 = vmatmul.mubr.msk.bf16.gmra.mrb[88].mxu0 %vm85_vm0, %v1107_v60 }
 0x1f2   :  { %1475 = vmatprep.mubr.bf16.mxu0 %v17551_v3 }
 0x214   :  { %v11731_v21 = vpop.f32.mrb[0].mxu0 }
 0x215   :  { %v1249_v49 = vpop.f32.mrb[1].mxu0  ;;  %8149 = vmatprep.mubr.msk.f32.mxu1 %vm85_vm0, %v11731_v21 }
 0x216   :  { %v11735_v36 = vpop.f32.mrb[2].mxu0 }
 0x217   :  { %v1253_v44 = vpop.f32.mrb[3].mxu0  ;;  %v11739_v19 = vpack.i.bf16 %v11735_v36, %v11731_v21 }
 0x218   :  { %v11741_v14 = vpack.c.bf16 %v1253_v44, %v1249_v49 }
 0x219   :  { %9443 = vrot.lane.b32.xlu1 %v11739_v19, %s10673_s14 }
 0x21c   :  { %v11745_v6 = vpop.f32.mrb[4].mxu0 }
 0x21d   :  { %v1259_v51 = vpop.f32.mrb[5].mxu0 }
 0x21e   :  { %v11747_v10 = vpop.f32.mrb[6].mxu0 }
 0x21f   :  { %v1263_v50 = vpop.f32.mrb[7].mxu0  ;;  %v11751_v0 = vpack.i.bf16 %v11747_v10, %v11745_v6 }
 0x220   :  { %v11753_v46 = vpack.c.bf16 %v1263_v50, %v1259_v51 }
 0x221   :  { %9448 = vrot.lane.b32.xlu1 %v11751_v0, %s10673_s14 }
 0x224   :  { %v11757_v34 = vpop.f32.mrb[8].mxu0 }
 0x225   :  { %v1269_v33 = vpop.f32.mrb[9].mxu0 }
 0x226   :  { %v11759_v24 = vpop.f32.mrb[10].mxu0 }
 0x227   :  { %v1273_v32 = vpop.f32.mrb[11].mxu0  ;;  %v11763_v63 = vpack.i.bf16 %v11759_v24, %v11757_v34 }
 0x228   :  { %v11765_v58 = vpack.c.bf16 %v1273_v32, %v1269_v33 }
 0x229   :  { %9453 = vrot.lane.b32.xlu1 %v11763_v63, %s10673_s14 }
 0x22a   :  { %17566 = vst [vmem:[#allocation3_spill] sm:$0xff] %v11765_v58 }
 0x22c   :  { %v11769_v53 = vpop.f32.mrb[12].mxu0 }
 0x22d   :  { %v1279_v7 = vpop.f32.mrb[13].mxu0 }
 0x22e   :  { %v11771_v62 = vpop.f32.mrb[14].mxu0 }
 0x22f   :  { %v1283_v41 = vpop.f32.mrb[15].mxu0  ;;  %v11775_v43 = vpack.i.bf16 %v11771_v62, %v11769_v53 }
 0x230   :  { %v11777_v2 = vpack.c.bf16 %v1283_v41, %v1279_v7 }
 0x231   :  { %17567 = vst [vmem:[#allocation2_spill] sm:$0xff] %v11775_v43  ;;  %9458 = vrot.lane.b32.xlu1 %v11775_v43, %s10673_s14 }
 0x232   :  { %17568 = vst [vmem:[#allocation5_spill] sm:$0xff] %v11777_v2 }
 0x234   :  { %v11781_v8 = vpop.f32.mrb[16].mxu0 }
 0x235   :  { %v1289_v48 = vpop.f32.mrb[17].mxu0 }
 0x236   :  { %v11783_v27 = vpop.f32.mrb[18].mxu0 }
 0x237   :  { %17569 = vst [vmem:[#allocation4_spill] sm:$0xff] %v11783_v27  ;;  %v1293_v56 = vpop.f32.mrb[19].mxu0  ;;  %v11787_v29 = vpack.i.bf16 %v11783_v27, %v11781_v8 }
 0x238   :  { %v11789_v57 = vpack.c.bf16 %v1293_v56, %v1289_v48 }
 0x239   :  { %17570 = vst [vmem:[#allocation7_spill] sm:$0xff] %v11787_v29  ;;  %9463 = vrot.lane.b32.xlu1 %v11787_v29, %s10673_s14 }
 0x23a   :  { %17571 = vst [vmem:[#allocation6_spill] sm:$0xff] %v11789_v57 }
 0x23c   :  { %v11793_v40 = vpop.f32.mrb[20].mxu0 }
 0x23d   :  { %17572 = vst [vmem:[#allocation9_spill] sm:$0xff] %v11793_v40  ;;  %v1299_v25 = vpop.f32.mrb[21].mxu0 }
 0x23e   :  { %v11795_v30 = vpop.f32.mrb[22].mxu0 }
 0x23f   :  { %17573 = vst [vmem:[#allocation8_spill] sm:$0xff] %v11795_v30  ;;  %v1303_v1 = vpop.f32.mrb[23].mxu0  ;;  %v11799_v55 = vpack.i.bf16 %v11795_v30, %v11793_v40 }
 0x240   :  { %v11801_v45 = vpack.c.bf16 %v1303_v1, %v1299_v25 }
 0x241   :  { %17574 = vst [vmem:[#allocation11_spill] sm:$0xff] %v11799_v55  ;;  %9468 = vrot.lane.b32.xlu1 %v11799_v55, %s10673_s14 }
 0x242   :  { %17575 = vst [vmem:[#allocation10_spill] sm:$0xff] %v11801_v45 }
 0x244   :  { %v11805_v39 = vpop.f32.mrb[24].mxu0 }
 0x245   :  { %17576 = vst [vmem:[#allocation13_spill] sm:$0xff] %v11805_v39  ;;  %v1309_v37 = vpop.f32.mrb[25].mxu0 }
 0x246   :  { %v11807_v23 = vpop.f32.mrb[26].mxu0 }
 0x247   :  { %17577 = vst [vmem:[#allocation12_spill] sm:$0xff] %v11807_v23  ;;  %v1313_v12 = vpop.f32.mrb[27].mxu0  ;;  %v11811_v22 = vpack.i.bf16 %v11807_v23, %v11805_v39 }
 0x248   :  { %v11813_v17 = vpack.c.bf16 %v1313_v12, %v1309_v37 }
 0x249   :  { %17578 = vst [vmem:[#allocation16_spill] sm:$0xff] %v11811_v22  ;;  %9473 = vrot.lane.b32.xlu1 %v11811_v22, %s10673_s14 }
 0x24a   :  { %17579 = vst [vmem:[#allocation17_spill] sm:$0xff] %v11813_v17 }
 0x24c   :  { %v11817_v42 = vpop.f32.mrb[28].mxu0 }
 0x24d   :  { %17580 = vst [vmem:[#allocation18_spill] sm:$0xff] %v11817_v42  ;;  %v1319_v38 = vpop.f32.mrb[29].mxu0 }
 0x24e   :  { %v11819_v60 = vpop.f32.mrb[30].mxu0 }
 0x24f   :  { %17581 = vst [vmem:[#allocation19_spill] sm:$0xff] %v11819_v60  ;;  %v1323_v49 = vpop.f32.mrb[31].mxu0  ;;  %v11823_v44 = vpack.i.bf16 %v11819_v60, %v11817_v42  ;;  %v332_v42 = vmul.f32 0.03125, %v11599_v4  ;;  %v10661_v4 = vld [vmem:[%s16916_s0 + $0x1a8] sm:$0xff] }
 0x250   :  { %v11825_v51 = vpack.c.bf16 %v1323_v49, %v1319_v38 }
 0x251   :  { %17582 = vst [vmem:[#allocation20_spill] sm:$0xff] %v11823_v44  ;;  %9478 = vrot.lane.b32.xlu1 %v11823_v44, %s10673_s14  ;;  %v325_v44 = vmul.f32 0.03125, %v11507_v26  ;;  %v11908_v55 = vsub.f32 %v10661_v4, %v332_v42  ;;  %v336_v42 = vmul.f32 0.03125, %v11636_v13  ;;  %v10662_v4 = vld [vmem:[%s16916_s0 + $0x1b8] sm:$0xff] }
 0x252   :  { %17583 = vst [vmem:[#allocation21_spill] sm:$0xff] %v11825_v51 }
 0x254   :  { %v11829_v50 = vpop.f32.mrb[32].mxu0 }
 0x255   :  { %17584 = vst [vmem:[#allocation22_spill] sm:$0xff] %v11829_v50  ;;  %v1329_v33 = vpop.f32.mrb[33].mxu0 }
 0x256   :  { %v11831_v32 = vpop.f32.mrb[34].mxu0 }
 0x257   :  { %17585 = vst [vmem:[#allocation23_spill] sm:$0xff] %v11831_v32  ;;  %v1333_v7 = vpop.f32.mrb[35].mxu0  ;;  %v11835_v41 = vpack.i.bf16 %v11831_v32, %v11829_v50 }
 0x258   :  { %v11837_v48 = vpack.c.bf16 %v1333_v7, %v1329_v33 }
 0x259   :  { %9483 = vrot.lane.b32.xlu0 %v11835_v41, %s10673_s14 }
 0x25c   :  { %v11841_v56 = vpop.f32.mrb[36].mxu0 }
 0x25d   :  { %17586 = vst [vmem:[#allocation24_spill] sm:$0xff] %v11841_v56  ;;  %v1339_v25 = vpop.f32.mrb[37].mxu0 }
 0x25e   :  { %v11843_v1 = vpop.f32.mrb[38].mxu0 }
 0x25f   :  { %17587 = vst [vmem:[#allocation25_spill] sm:$0xff] %v11843_v1  ;;  %v1343_v37 = vpop.f32.mrb[39].mxu0  ;;  %v11847_v12 = vpack.i.bf16 %v11843_v1, %v11841_v56  ;;  %v328_v1 = vmul.f32 0.03125, %v11552_v35 }
 0x260   :  { %v11849_v38 = vpack.c.bf16 %v1343_v37, %v1339_v25  ;;  %v10658_v25 = vld [vmem:[%s16916_s0 + $0x170] sm:$0xff] }
 0x261   :  { %9488 = vrot.lane.b32.xlu0 %v11847_v12, %s10673_s14  ;;  %v11869_v37 = vsub.f32 %v10658_v25, %v325_v44  ;;  %v330_v44 = vmul.f32 0.03125, %v11569_v16 }
 0x263   :  { %v453_v35 = vmul.f32 %v11869_v37, %v11869_v37 }
 0x264   :  { %v11853_v49 = vpop.f32.mrb[40].mxu0 }
 0x265   :  { %17588 = vst [vmem:[#allocation26_spill] sm:$0xff] %v11853_v49  ;;  %v1349_v33 = vpop.f32.mrb[41].mxu0  ;;  %v609_v16 = vsel %vm85_vm0, %v453_v35, 0.0 }
 0x266   :  { %v11855_v7 = vpop.f32.mrb[42].mxu0 }
 0x267   :  { %17589 = vst [vmem:[#allocation27_spill] sm:$0xff] %v11855_v7  ;;  %v1353_v32 = vpop.f32.mrb[43].mxu0  ;;  %v11859_v50 = vpack.i.bf16 %v11855_v7, %v11853_v49 }
 0x268   :  { %v11862_v60 = vpack.c.bf16 %v1353_v32, %v1349_v33  ;;  %v10659_v32 = vld [vmem:[%s16916_s0 + $0x188] sm:$0xff] }
 0x269   :  { %9493 = vrot.lane.b32.xlu0 %v11859_v50, %s10673_s14  ;;  %v11883_v33 = vsub.f32 %v10659_v32, %v328_v1 }
 0x26c   :  { %v11872_v56 = vpop.f32.mrb[44].mxu0 }
 0x26d   :  { %17590 = vst [vmem:[#allocation28_spill] sm:$0xff] %v11872_v56  ;;  %v1359_v22 = vpop.f32.mrb[45].mxu0 }
 0x26e   :  { %v11874_v7 = vpop.f32.mrb[46].mxu0 }
 0x26f   :  { %17591 = vst [vmem:[#allocation29_spill] sm:$0xff] %v11874_v7  ;;  %v1363_v49 = vpop.f32.mrb[47].mxu0  ;;  %v11878_v26 = vpack.i.bf16 %v11874_v7, %v11872_v56  ;;  %v10660_v7 = vld [vmem:[%s16916_s0 + $0x198] sm:$0xff] }
 0x270   :  { %v11886_v25 = vpack.c.bf16 %v1363_v49, %v1359_v22  ;;  %v11896_v56 = vsub.f32 %v10660_v7, %v330_v44  ;;  %v456_v22 = vmul.f32 %v11883_v33, %v11883_v33  ;;  %v334_v44 = vmul.f32 0.03125, %v11619_v11 }
 0x271   :  { %17592 = vst [vmem:[#allocation30_spill] sm:$0xff] %v11878_v26  ;;  %9498 = vrot.lane.b32.xlu0 %v11878_v26, %s10673_s14 }
 0x272   :  { %17593 = vst [vmem:[#allocation31_spill] sm:$0xff] %v11886_v25  ;;  %v618_v29 = vsel %vm85_vm0, %v456_v22, 0.0  ;;  %v460_v22 = vmul.f32 %v11908_v55, %v11908_v55 }
 0x274   :  { %v11898_v1 = vpop.f32.mrb[48].mxu0 }
 0x275   :  { %17594 = vst [vmem:[#allocation32_spill] sm:$0xff] %v11898_v1  ;;  %v1369_v49 = vpop.f32.mrb[49].mxu0  ;;  %610 = vadd.xlane.f32.xlu1 %v609_v16  ;;  %v458_v16 = vmul.f32 %v11896_v56, %v11896_v56 }
 0x276   :  { %v11903_v32 = vpop.f32.mrb[50].mxu0 }
 0x277   :  { %17595 = vst [vmem:[#allocation33_spill] sm:$0xff] %v11903_v32  ;;  %v1373_v23 = vpop.f32.mrb[51].mxu0  ;;  %v11912_v7 = vpack.i.bf16 %v11903_v32, %v11898_v1  ;;  %v11926_v32 = vsub.f32 %v10662_v4, %v334_v44 }
 0x278   :  { %v11915_v35 = vpack.c.bf16 %v1373_v23, %v1369_v49  ;;  %v624_v23 = vsel %vm85_vm0, %v458_v16, 0.0  ;;  %v630_v16 = vsel %vm85_vm0, %v460_v22, 0.0 }
 0x279   :  { %17596 = vst [vmem:[#allocation34_spill] sm:$0xff] %v11912_v7  ;;  %619 = vadd.xlane.f32.xlu1 %v618_v29  ;;  %9503 = vrot.lane.b32.xlu0 %v11912_v7, %s10673_s14  ;;  %v10663_v29 = vld [vmem:[%s16916_s0 + $0x1c8] sm:$0xff] }
 0x27a   :  { %17597 = vst [vmem:[#allocation35_spill] sm:$0xff] %v11915_v35  ;;  %v11936_v13 = vsub.f32 %v10663_v29, %v336_v42 }
 0x27c   :  { %v11928_v11 = vpop.f32.mrb[52].mxu0  ;;  %17599 = vst [vmem:[#allocation37_spill] sm:$0xff] %v11936_v13  ;;  %v464_v42 = vmul.f32 %v11936_v13, %v11936_v13 }
 0x27d   :  { %17598 = vst [vmem:[#allocation36_spill] sm:$0xff] %v11928_v11  ;;  %v1379_v49 = vpop.f32.mrb[53].mxu0  ;;  %625 = vadd.xlane.f32.xlu1 %v624_v23  ;;  %v462_v23 = vmul.f32 %v11926_v32, %v11926_v32 }
 0x27e   :  { %v11938_v1 = vpop.f32.mrb[54].mxu0  ;;  %v642_v22 = vsel %vm85_vm0, %v464_v42, 0.0 }
 0x27f   :  { %17600 = vst [vmem:[#allocation38_spill] sm:$0xff] %v11938_v1  ;;  %v1383_v39 = vpop.f32.mrb[55].mxu0  ;;  %v11942_v44 = vpack.i.bf16 %v11938_v1, %v11928_v11  ;;  %v636_v7 = vsel %vm85_vm0, %v462_v23, 0.0 }
 0x280   :  { %v11944_v4 = vpack.c.bf16 %v1383_v39, %v1379_v49 }
 0x281   :  { %17601 = vst [vmem:[#allocation39_spill] sm:$0xff] %v11942_v44  ;;  %631 = vadd.xlane.f32.xlu1 %v630_v16  ;;  %9508 = vrot.lane.b32.xlu0 %v11942_v44, %s10673_s14 }
 0x282   :  { %17602 = vst [vmem:[#allocation40_spill] sm:$0xff] %v11944_v4 }
 0x284   :  { %v11953_v29 = vpop.f32.mrb[56].mxu0 }
 0x285   :  { %17603 = vst [vmem:[#allocation41_spill] sm:$0xff] %v11953_v29  ;;  %v1389_v1 = vpop.f32.mrb[57].mxu0  ;;  %637 = vadd.xlane.f32.xlu1 %v636_v7 }
 0x286   :  { %v11956_v39 = vpop.f32.mrb[58].mxu0 }
 0x287   :  { %17604 = vst [vmem:[#allocation42_spill] sm:$0xff] %v11956_v39  ;;  %v1393_v49 = vpop.f32.mrb[59].mxu0  ;;  %v11961_v16 = vpack.i.bf16 %v11956_v39, %v11953_v29 }
 0x288   :  { %v11963_v11 = vpack.c.bf16 %v1393_v49, %v1389_v1 }
 0x289   :  { %17605 = vst [vmem:[#allocation43_spill] sm:$0xff] %v11961_v16  ;;  %643 = vadd.xlane.f32.xlu1 %v642_v22  ;;  %9513 = vrot.lane.b32.xlu0 %v11961_v16, %s10673_s14 }
 0x28a   :  { %17606 = vst [vmem:[#allocation44_spill] sm:$0xff] %v11963_v11 }
 0x28b   :  { %v9444_v13 = vpop.permute.xlu1 %9443 }
 0x28c   :  { %v11967_v30 = vpop.f32.mrb[60].mxu0 }
 0x28d   :  { %17607 = vst [vmem:[#allocation45_spill] sm:$0xff] %v11967_v30  ;;  %v1399_v23 = vpop.f32.mrb[61].mxu0 }
 0x28e   :  { %v11969_v43 = vpop.f32.mrb[62].mxu0 }
 0x28f   :  { %17608 = vst [vmem:[#allocation46_spill] sm:$0xff] %v11969_v43  ;;  %v1403_v7 = vpop.f32.mrb[63].mxu0  ;;  %v11973_v42 = vpack.i.bf16 %v11969_v43, %v11967_v30 }
 0x290   :  { %v11975_v44 = vpack.c.bf16 %v1403_v7, %v1399_v23 }
 0x291   :  { %17609 = vst [vmem:[#allocation47_spill] sm:$0xff] %v11973_v42  ;;  %9518 = vrot.lane.b32.xlu0 %v11973_v42, %s10673_s14 }
 0x292   :  { %17610 = vst [vmem:[#allocation48_spill] sm:$0xff] %v11975_v44 }
 0x294   :  { %v11979_v1 = vpop.f32.mrb[64].mxu0 }
 0x295   :  { %17611 = vst [vmem:[#allocation49_spill] sm:$0xff] %v11979_v1  ;;  %v1409_v22 = vpop.f32.mrb[65].mxu0  ;;  %9523 = vrot.lane.b32.xlu0 %v11835_v41, %s10674_s26 }
 0x296   :  { %v11983_v49 = vpop.f32.mrb[66].mxu0 }
 0x297   :  { %17612 = vst [vmem:[#allocation50_spill] sm:$0xff] %v11983_v49  ;;  %v1413_v39 = vpop.f32.mrb[67].mxu0  ;;  %v11987_v29 = vpack.i.bf16 %v11983_v49, %v11979_v1 }
 0x298   :  { %v11989_v43 = vpack.c.bf16 %v1413_v39, %v1409_v22  ;;  %v338_v22 = vmul.f32 0.03125, %v11652_v61  ;;  %v337_v61 = vmul.f32 0.03125, %v11656_v28 }
 0x299   :  { %17613 = vst [vmem:[#allocation51_spill] sm:$0xff] %v11987_v29 }
 0x29a   :  { %17614 = vst [vmem:[#allocation52_spill] sm:$0xff] %v11989_v43  ;;  %9528 = vrot.lane.b32.xlu1 %v11739_v19, %s10674_s26 }
 0x29c   :  { %v11993_v23 = vpop.f32.mrb[68].mxu0 }
 0x29d   :  { %17615 = vst [vmem:[#allocation53_spill] sm:$0xff] %v11993_v23  ;;  %v1419_v7 = vpop.f32.mrb[69].mxu0 }
 0x29e   :  { %v11995_v30 = vpop.f32.mrb[70].mxu0 }
 0x29f   :  { %17616 = vst [vmem:[#allocation54_spill] sm:$0xff] %v11995_v30  ;;  %v1423_v42 = vpop.f32.mrb[71].mxu0  ;;  %v11999_v41 = vpack.i.bf16 %v11995_v30, %v11993_v23  ;;  %v10664_v23 = vld [vmem:[%s16916_s0 + $0x1d8] sm:$0xff] }
 0x2a0   :  { %v12001_v16 = vpack.c.bf16 %v1423_v42, %v1419_v7  ;;  %v12017_v42 = vsub.f32 %v10664_v23, %v338_v22  ;;  %v10665_v23 = vld [vmem:[%s16916_s0 + $0x1d0] sm:$0xff] }
 0x2a1   :  { %17617 = vst [vmem:[#allocation55_spill] sm:$0xff] %v11999_v41  ;;  %v12024_v41 = vpop.xlane.xlu0 %613  ;;  %v12037_v22 = vsub.f32 %v10665_v23, %v337_v61 }
 0x2a2   :  { %17618 = vst [vmem:[#allocation56_spill] sm:$0xff] %v12001_v16  ;;  %17623 = vst [vmem:[#allocation61_spill] sm:$0xff] %v12017_v42 }
 0x2a3   :  { %17628 = vst [vmem:[#allocation66_spill] sm:$0xff] %v12037_v22 }
 0x2a4   :  { %v12003_v9 = vpop.f32.mrb[72].mxu0 }
 0x2a5   :  { %17619 = vst [vmem:[#allocation57_spill] sm:$0xff] %v12003_v9  ;;  %v1429_v1 = vpop.f32.mrb[73].mxu0 }
 0x2a6   :  { %v12005_v39 = vpop.f32.mrb[74].mxu0 }
 0x2a7   :  { %17620 = vst [vmem:[#allocation58_spill] sm:$0xff] %v12005_v39  ;;  %v1433_v19 = vpop.f32.mrb[75].mxu0  ;;  %v12010_v43 = vpack.i.bf16 %v12005_v39, %v12003_v9  ;;  %v12042_v39 = vpop.xlane.xlu0 %616 }
 0x2a8   :  { %v12012_v49 = vpack.c.bf16 %v1433_v19, %v1429_v1  ;;  %v466_v1 = vmul.f32 %v12017_v42, %v12017_v42 }
 0x2a9   :  { %17621 = vst [vmem:[#allocation59_spill] sm:$0xff] %v12010_v43 }
 0x2aa   :  { %17622 = vst [vmem:[#allocation60_spill] sm:$0xff] %v12012_v49  ;;  %v648_v28 = vsel %vm85_vm0, %v466_v1, 0.0 }
 0x2ab   :  { %v12054_v23 = vpop.xlane.xlu0 %622 }
 0x2ac   :  { %v12019_v7 = vpop.f32.mrb[76].mxu0 }
 0x2ad   :  { %17624 = vst [vmem:[#allocation62_spill] sm:$0xff] %v12019_v7  ;;  %v1439_v16 = vpop.f32.mrb[77].mxu0 }
 0x2ae   :  { %v12021_v30 = vpop.f32.mrb[78].mxu0 }
 0x2af   :  { %17625 = vst [vmem:[#allocation63_spill] sm:$0xff] %v12021_v30  ;;  %v1443_v29 = vpop.f32.mrb[79].mxu0  ;;  %v12030_v19 = vpack.i.bf16 %v12021_v30, %v12019_v7 }
 0x2b0   :  { %v12032_v49 = vpack.c.bf16 %v1443_v29, %v1439_v16  ;;  %v465_v29 = vmul.f32 %v12037_v22, %v12037_v22 }
 0x2b1   :  { %17626 = vst [vmem:[#allocation64_spill] sm:$0xff] %v12030_v19  ;;  %v12061_v19 = vpop.xlane.xlu0 %628 }
 0x2b2   :  { %17627 = vst [vmem:[#allocation65_spill] sm:$0xff] %v12032_v49  ;;  %v645_v1 = vsel %vm85_vm0, %v465_v29, 0.0 }
 0x2b4   :  { %649 = vadd.xlane.f32.xlu0 %v648_v28  ;;  %v12040_v9 = vpop.f32.mrb[80].mxu0 }
 0x2b5   :  { %17629 = vst [vmem:[#allocation67_spill] sm:$0xff] %v12040_v9  ;;  %v1449_v43 = vpop.f32.mrb[81].mxu0 }
 0x2b6   :  { %v12044_v42 = vpop.f32.mrb[82].mxu0 }
 0x2b7   :  { %17630 = vst [vmem:[#allocation68_spill] sm:$0xff] %v12044_v42  ;;  %v1453_v7 = vpop.f32.mrb[83].mxu0  ;;  %v12050_v16 = vpack.i.bf16 %v12044_v42, %v12040_v9 }
 0x2b8   :  { %v12052_v61 = vpack.c.bf16 %v1453_v7, %v1449_v43  ;;  %v12069_v43 = vpop.xlane.xlu0 %634 }
 0x2b9   :  { %17631 = vst [vmem:[#allocation69_spill] sm:$0xff] %v12050_v16 }
 0x2ba   :  { %17632 = vst [vmem:[#allocation70_spill] sm:$0xff] %v12052_v61 }
 0x2bc   :  { %v12057_v28 = vpop.f32.mrb[84].mxu0  ;;  %v12075_v42 = vpop.xlane.xlu0 %640 }
 0x2bd   :  { %17633 = vst [vmem:[#allocation71_spill] sm:$0xff] %v12057_v28  ;;  %v1459_v49 = vpop.f32.mrb[85].mxu0 }
 0x2be   :  { %646 = vadd.xlane.f32.xlu1 %v645_v1  ;;  %v12059_v30 = vpop.f32.mrb[86].mxu0 }
 0x2bf   :  { %17634 = vst [vmem:[#allocation72_spill] sm:$0xff] %v12059_v30  ;;  %v1463_v40 = vpop.f32.mrb[87].mxu0  ;;  %v12065_v22 = vpack.i.bf16 %v12059_v30, %v12057_v28 }
 0x2c0   :  { %v12067_v9 = vpack.c.bf16 %v1463_v40, %v1459_v49  ;;  %v9446_v40 = vunpack.i.h.bf16 %v9444_v13  ;;  %v9445_v49 = vunpack.i.l.bf16 %v9444_v13 }
 0x2c1   :  { %17635 = vst [vmem:[#allocation73_spill] sm:$0xff] %v12065_v22  ;;  %v17641_v22 = vmov 0 }
 0x2c2   :  { %17636 = vst [vmem:[#allocation74_spill] sm:$0xff] %v12067_v9  ;;  %v17642_v22 = vsel %vm12087_vm1, 4294967295, %v17641_v22 }
 0x2c3   :  { %17643 = vst [vmem:[#allocation79_spill] sm:$0xff] %v17642_v22 }
 0x2c4   :  { %v12071_v7 = vpop.f32.mrb[88].mxu0 }
 0x2c5   :  { %17637 = vst [vmem:[#allocation75_spill] sm:$0xff] %v12071_v7  ;;  %v1469_v29 = vpop.f32.mrb[89].mxu0 }
 0x2c6   :  { %v12073_v61 = vpop.f32.mrb[90].mxu0 }
 0x2c7   :  { %17638 = vst [vmem:[#allocation76_spill] sm:$0xff] %v12073_v61  ;;  %v1473_v1 = vpop.f32.mrb[91].mxu0  ;;  %v12079_v16 = vpack.i.bf16 %v12073_v61, %v12071_v7 }
 0x2c8   :  { %v12081_v26 = vpack.c.bf16 %v1473_v1, %v1469_v29  ;;  %v9168_v29 = vpack.c.bf16 %v9446_v40, %v9445_v49  ;;  %v9449_v1 = vpop.permute.xlu1 %9448 }
 0x2c9   :  { %17639 = vst [vmem:[#allocation77_spill] sm:$0xff] %v12079_v16 }
 0x2ca   :  { %17640 = vst [vmem:[#allocation78_spill] sm:$0xff] %v12081_v26  ;;  %9533 = vrot.lane.b32.xlu0 %v11847_v12, %s10674_s26  ;;  %v9451_v12 = vunpack.i.h.bf16 %v9449_v1 }
 0x2cb   :  { %v9484_v9 = vpop.permute.xlu0 %9483 }
 0x2cc   :  { %v9486_v28 = vunpack.i.h.bf16 %v9484_v9  ;;  %v9485_v30 = vunpack.i.l.bf16 %v9484_v9  ;;  %v9450_v9 = vunpack.i.l.bf16 %v9449_v1  ;;  %v9454_v52 = vpop.permute.xlu1 %9453 }
 0x2ce   :  { %v9165_v27 = vpack.c.bf16 %v9486_v28, %v9485_v30  ;;  %v9174_v16 = vpack.c.bf16 %v9451_v12, %v9450_v9  ;;  %v9455_v30 = vunpack.i.l.bf16 %v9454_v52  ;;  %v340_v28 = vmul.f32 0.03125, %v11668_v15 }
 0x2cf   :  { %9538 = vrot.lane.b32.xlu1 %v11751_v0, %s10674_s26  ;;  %v9456_v0 = vunpack.i.h.bf16 %v9454_v52 }
 0x2d0   :  { %9167 = vmatprep.subr.msk.bf16.mxu1 %vm12087_vm1, %v9165_v27  ;;  %v9459_v12 = vpop.permute.xlu1 %9458 }
 0x2d1   :  { %9170 = vmatpush3.bf16.xpose.msk.msra.mxu1 %vm12087_vm1, %v9168_v29  ;;  %v9180_v1 = vpack.c.bf16 %v9456_v0, %v9455_v30  ;;  %v9461_v52 = vunpack.i.h.bf16 %v9459_v12  ;;  %v339_v0 = vmul.f32 0.03125, %v11673_v31 }
 0x2d3   :  { %v9489_v13 = vpop.permute.xlu0 %9488 }
 0x2d4   :  { %v9491_v26 = vunpack.i.h.bf16 %v9489_v13  ;;  %v9490_v7 = vunpack.i.l.bf16 %v9489_v13 }
 0x2d6   :  { %v9171_v61 = vpack.c.bf16 %v9491_v26, %v9490_v7  ;;  %v10666_v26 = vld [vmem:[%s16916_s0 + $0x1e8] sm:$0xff] }
 0x2d7   :  { %v12105_v7 = vsub.f32 %v10666_v26, %v340_v28  ;;  %v9464_v28 = vpop.permute.xlu1 %9463 }
 0x2d8   :  { %9173 = vmatprep.subr.msk.bf16.mxu1 %vm12087_vm1, %v9171_v61  ;;  %v9465_v31 = vunpack.i.l.bf16 %v9464_v28 }
 0x2d9   :  { %9176 = vmatpush3.bf16.xpose.msk.msra.mxu1 %vm12087_vm1, %v9174_v16  ;;  %v9460_v16 = vunpack.i.l.bf16 %v9459_v12  ;;  %v468_v13 = vmul.f32 %v12105_v7, %v12105_v7 }
 0x2db   :  { %v9494_v27 = vpop.permute.xlu0 %9493 }
 0x2dc   :  { %v9496_v40 = vunpack.i.h.bf16 %v9494_v27  ;;  %v9495_v49 = vunpack.i.l.bf16 %v9494_v27  ;;  %v9186_v27 = vpack.c.bf16 %v9461_v52, %v9460_v16 }
 0x2de   :  { %v9177_v29 = vpack.c.bf16 %v9496_v40, %v9495_v49  ;;  %v654_v40 = vsel %vm85_vm0, %v468_v13, 0.0  ;;  %v10667_v49 = vld [vmem:[%s16916_s0 + $0x1e0] sm:$0xff] }
 0x2e0   :  { %9179 = vmatprep.subr.msk.bf16.mxu1 %vm12087_vm1, %v9177_v29  ;;  %v12122_v29 = vsub.f32 %v10667_v49, %v339_v0 }
 0x2e1   :  { %9182 = vmatpush3.bf16.xpose.msk.msra.mxu1 %vm12087_vm1, %v9180_v1  ;;  %v9466_v1 = vunpack.i.h.bf16 %v9464_v28 }
 0x2e2   :  { %17644 = vst [vmem:[#allocation80_spill] sm:$0xff] %v12122_v29 }
 0x2e3   :  { %v9499_v15 = vpop.permute.xlu0 %9498 }
 0x2e4   :  { %v9501_v61 = vunpack.i.h.bf16 %v9499_v15  ;;  %v9500_v9 = vunpack.i.l.bf16 %v9499_v15  ;;  %v467_v15 = vmul.f32 %v12122_v29, %v12122_v29 }
 0x2e6   :  { %v9183_v30 = vpack.c.bf16 %v9501_v61, %v9500_v9  ;;  %v9192_v61 = vpack.c.bf16 %v9466_v1, %v9465_v31  ;;  %v9469_v9 = vpop.permute.xlu1 %9468  ;;  %v651_v13 = vsel %vm85_vm0, %v467_v15, 0.0  ;;  %v710_v1 = vmul.f32 0.03125, %v12024_v41 }
 0x2e7   :  { %v9471_v0 = vunpack.i.h.bf16 %v9469_v9  ;;  %v711_v41 = vmul.f32 0.03125, %v12042_v39 }
 0x2e8   :  { %9185 = vmatprep.subr.msk.bf16.mxu1 %vm12087_vm1, %v9183_v30  ;;  %v9470_v30 = vunpack.i.l.bf16 %v9469_v9  ;;  %v774_v9 = vadd.f32 1e-05, %v710_v1 }
 0x2e9   :  { %655 = vadd.xlane.f32.xlu0 %v654_v40  ;;  %9188 = vmatpush3.bf16.xpose.msk.msra.mxu1 %vm12087_vm1, %v9186_v27 }
 0x2ea   :  { %9854 = vrsqrt.f32 %v774_v9  ;;  %v713_v9 = vmul.f32 0.03125, %v12054_v23 }
 0x2eb   :  { %v9504_v26 = vpop.permute.xlu0 %9503 }
 0x2ec   :  { %v9506_v12 = vunpack.i.h.bf16 %v9504_v26  ;;  %v9505_v52 = vunpack.i.l.bf16 %v9504_v26  ;;  %v9198_v26 = vpack.c.bf16 %v9471_v0, %v9470_v30 }
 0x2ee   :  { %v9189_v16 = vpack.c.bf16 %v9506_v12, %v9505_v52  ;;  %v9474_v12 = vpop.permute.xlu1 %9473 }
 0x2ef   :  { %v9476_v31 = vunpack.i.h.bf16 %v9474_v12  ;;  %v9475_v52 = vunpack.i.l.bf16 %v9474_v12 }
 0x2f0   :  { %9191 = vmatprep.subr.msk.bf16.mxu1 %vm12087_vm1, %v9189_v16 }
 0x2f1   :  { %9194 = vmatpush3.bf16.xpose.msk.msra.mxu1 %vm12087_vm1, %v9192_v61 }
 0x2f3   :  { %652 = vadd.xlane.f32.xlu1 %v651_v13  ;;  %v9509_v27 = vpop.permute.xlu0 %9508  ;;  %v9479_v13 = vpop.permute.xlu1 %9478 }
 0x2f4   :  { %v9511_v28 = vunpack.i.h.bf16 %v9509_v27  ;;  %v9510_v40 = vunpack.i.l.bf16 %v9509_v27  ;;  %v9204_v27 = vpack.c.bf16 %v9476_v31, %v9475_v52  ;;  %v9481_v30 = vunpack.i.h.bf16 %v9479_v13 }
 0x2f6   :  { %v9195_v49 = vpack.c.bf16 %v9511_v28, %v9510_v40  ;;  %v9480_v28 = vunpack.i.l.bf16 %v9479_v13 }
 0x2f8   :  { %9197 = vmatprep.subr.msk.bf16.mxu1 %vm12087_vm1, %v9195_v49  ;;  %v9210_v52 = vpack.c.bf16 %v9481_v30, %v9480_v28  ;;  %v777_v30 = vadd.f32 1e-05, %v713_v9  ;;  %v12184_v9 = vld [vmem:[%s16919_s2] ss:$0 sm:$0xff] }
 0x2f9   :  { %9200 = vmatpush3.bf16.xpose.msk.msra.mxu1 %vm12087_vm1, %v9198_v26 }
 0x2fb   :  { %v9514_v16 = vpop.permute.xlu0 %9513 }
 0x2fc   :  { %v9516_v15 = vunpack.i.h.bf16 %v9514_v16  ;;  %v9515_v61 = vunpack.i.l.bf16 %v9514_v16 }
 0x2fe   :  { %v9201_v29 = vpack.c.bf16 %v9516_v15, %v9515_v61 }
 0x2ff   :  { %9543 = vrot.lane.b32.xlu0 %v11859_v50, %s10674_s26  ;;  %v775_v50 = vadd.f32 1e-05, %v711_v41  ;;  %v9855_v41 = vpop.eup %9854 }
 0x300   :  { %9203 = vmatprep.subr.msk.bf16.mxu1 %vm12087_vm1, %v9201_v29 }
 0x301   :  { %9206 = vmatpush3.bf16.xpose.msk.msra.mxu1 %vm12087_vm1, %v9204_v27 }
 0x302   :  { %v611_v0 = vpop.xlane.xlu1 %610 }
 0x303   :  { %v709_v40 = vmul.f32 0.03125, %v611_v0  ;;  %v9519_v49 = vpop.permute.xlu0 %9518 }
 0x304   :  { %v9521_v26 = vunpack.i.h.bf16 %v9519_v49  ;;  %v9520_v12 = vunpack.i.l.bf16 %v9519_v49  ;;  %9548 = vrot.lane.b32.xlu1 %v11763_v63, %s10674_s26  ;;  %v902_v49 = vmul.f32 %v9855_v41, %v11520_v47 }
 0x305   :  { %v773_v1 = vadd.f32 1e-05, %v709_v40 }
 0x306   :  { %v9207_v31 = vpack.c.bf16 %v9521_v26, %v9520_v12  ;;  %v620_v29 = vpop.xlane.xlu1 %619  ;;  %v342_v12 = vmul.f32 0.03125, %v11685_v20 }
 0x307   :  { %9856 = vrsqrt.f32 %v773_v1  ;;  %v712_v39 = vmul.f32 0.03125, %v620_v29  ;;  %v9524_v16 = vpop.permute.xlu0 %9523 }
 0x308   :  { %v9526_v15 = vunpack.i.h.bf16 %v9524_v16  ;;  %v9525_v61 = vunpack.i.l.bf16 %v9524_v16  ;;  %9209 = vmatprep.subr.msk.bf16.mxu1 %vm12087_vm1, %v9207_v31  ;;  %9858 = vrsqrt.f32 %v775_v50  ;;  %v715_v50 = vmul.f32 0.03125, %v12061_v19  ;;  %v12166_v31 = vld [vmem:[%s16918_s1] ss:$0 sm:$0xff]  ;;  %v10669_v16 = vld [vmem:[%s16916_s0 + $0x1f8] sm:$0xff] }
 0x309   :  { %v776_v13 = vadd.f32 1e-05, %v712_v39  ;;  %9212 = vmatpush3.bf16.xpose.msk.msra.mxu1 %vm12087_vm1, %v9210_v52  ;;  %v973_v20 = vmul.f32 %v12166_v31, %v902_v49  ;;  %v717_v49 = vmul.f32 0.03125, %v12069_v43 }
 0x30a   :  { %v9213_v63 = vpack.c.bf16 %v9526_v15, %v9525_v61  ;;  %v626_v27 = vpop.xlane.xlu1 %625  ;;  %8213 = vmatprep.subr.bf16.mxu1 %v11837_v48  ;;  %v779_v15 = vadd.f32 1e-05, %v715_v50 }
 0x30b   :  { %9860 = vrsqrt.f32 %v776_v13  ;;  %v714_v0 = vmul.f32 0.03125, %v626_v27 }
 0x30c   :  { %9215 = vmatprep.subr.msk.bf16.mxu0 %vm12087_vm1, %v9213_v63  ;;  %v1044_v63 = vadd.f32 %v12184_v9, %v973_v20 }
 0x30d   :  { %v778_v28 = vadd.f32 1e-05, %v714_v0 }
 0x30e   :  { %v632_v40 = vpop.xlane.xlu1 %631 }
 0x30f   :  { %9862 = vrsqrt.f32 %v778_v28  ;;  %v716_v23 = vmul.f32 0.03125, %v632_v40 }
 0x310   :  { %8150 = vmatmul.mubr.msk.f32.vlgmr.msra.gmra.mrb[0].mxu1 %vm85_vm0, %v11731_v21  ;;  %9864 = vrsqrt.f32 %v777_v30 }
 0x311   :  { %v9857_v26 = vpop.eup %9856  ;;  %8151 = vmatprep.mubr.msk.f32.mxu1 %vm85_vm0, %v11735_v36  ;;  %8214 = vmatpush3.bf16.msra.mxu1 %v11741_v14  ;;  %v780_v52 = vadd.f32 1e-05, %v716_v23 }
 0x312   :  { %v638_v1 = vpop.xlane.xlu1 %637  ;;  %8215 = vmatprep.subr.bf16.mxu1 %v11849_v38  ;;  %v901_v47 = vmul.f32 %v9857_v26, %v11869_v37  ;;  %v9859_v29 = vpop.eup %9858  ;;  %v12175_v37 = vsub.f32 %v10669_v16, %v342_v12  ;;  %v341_v12 = vmul.f32 0.03125, %v11689_v54 }
 0x313   :  { %v903_v27 = vmul.f32 %v9859_v29, %v11523_v5  ;;  %9866 = vrsqrt.f32 %v780_v52  ;;  %v718_v0 = vmul.f32 0.03125, %v638_v1  ;;  %v781_v29 = vadd.f32 1e-05, %v717_v49 }
 0x314   :  { %8152 = vmatmul.mubr.msk.f32.gmra.mrb[2].mxu1 %vm85_vm0, %v11735_v36  ;;  %v972_v19 = vmul.f32 %v12166_v31, %v901_v47  ;;  %9868 = vrsqrt.f32 %v779_v15  ;;  %v470_v5 = vmul.f32 %v12175_v37, %v12175_v37 }
 0x315   :  { %v9861_v39 = vpop.eup %9860  ;;  %8153 = vmatprep.mubr.msk.f32.mxu1 %vm85_vm0, %v11745_v6  ;;  %8216 = vmatpush3.bf16.msra.mxu1 %v11753_v46  ;;  %v974_v23 = vmul.f32 %v12166_v31, %v903_v27  ;;  %v782_v50 = vadd.f32 1e-05, %v718_v0 }
 0x316   :  { %v644_v61 = vpop.xlane.xlu1 %643  ;;  %8217 = vmatprep.subr.bf16.mxu1 %v11862_v60  ;;  %v1043_v13 = vadd.f32 %v12184_v9, %v972_v19  ;;  %v904_v41 = vmul.f32 %v9861_v39, %v11883_v33  ;;  %v660_v54 = vsel %vm85_vm0, %v470_v5, 0.0 }
 0x317   :  { %v1045_v19 = vadd.f32 %v12184_v9, %v974_v23  ;;  %9870 = vrsqrt.f32 %v782_v50  ;;  %v720_v15 = vmul.f32 0.03125, %v644_v61 }
 0x318   :  { %8154 = vmatmul.mubr.msk.f32.gmra.mrb[4].mxu1 %vm85_vm0, %v11745_v6  ;;  %v1108_v30 = vpack.c.bf16 %v1044_v63, %v1043_v13  ;;  %v975_v28 = vmul.f32 %v12166_v31, %v904_v41  ;;  %9872 = vrsqrt.f32 %v781_v29 }
 0x319   :  { %v9863_v40 = vpop.eup %9862  ;;  %8155 = vmatprep.mubr.msk.f32.mxu1 %vm85_vm0, %v11747_v10  ;;  %8218 = vmatpush3.bf16.msra.mxu1 %v11765_v58  ;;  %v784_v0 = vadd.f32 1e-05, %v720_v15 }
 0x31a   :  { %v9529_v33 = vpop.permute.xlu1 %9528  ;;  %7756 = vmatmul.mubr.msk.bf16.gmra.mrb[92].mxu0 %vm85_vm0, %v1108_v30  ;;  %8219 = vmatprep.subr.bf16.mxu1 %v11886_v25  ;;  %v9865_v26 = vpop.eup %9864  ;;  %v1046_v47 = vadd.f32 %v12184_v9, %v975_v28  ;;  %v906_v20 = vmul.f32 %v9863_v40, %v11896_v56  ;;  %v10671_v56 = vld [vmem:[%s16916_s0 + $0x1f0] sm:$0xff]  ;;  %s10675_s0 = smov 96  }
 0x31b   :  { %v9531_v43 = vunpack.i.h.bf16 %v9529_v33  ;;  %v9530_v1 = vunpack.i.l.bf16 %v9529_v33  ;;  %1485 = vmatprep.mubr.bf16.mxu0 %v17551_v3  ;;  %v905_v39 = vmul.f32 %v9865_v26, %v11535_v18  ;;  %v12218_v16 = vsub.f32 %v10671_v56, %v341_v12  ;;  %v17647_v56 = vld [vmem:[#allocation30_spill] sm:$0xff] }
 0x31c   :  { %8156 = vmatmul.mubr.msk.f32.gmra.mrb[6].mxu1 %vm85_vm0, %v11747_v10  ;;  %v1109_v13 = vpack.c.bf16 %v1046_v47, %v1045_v19  ;;  %v977_v63 = vmul.f32 %v12166_v31, %v906_v20  ;;  %v719_v18 = vmul.f32 0.03125, %v12075_v42  ;;  %9874 = vrsqrt.f32 %v784_v0  ;;  %v17645_v47 = vld [vmem:[#allocation14_spill] sm:$0xff]  ;;  %v17646_v19 = vld [vmem:[#allocation4_spill] sm:$0xff]  ;;  %v17651_v0 = vld [vmem:[#allocation39_spill] sm:$0xff] }
 0x31d   :  { %v9216_v52 = vpack.c.bf16 %v9531_v43, %v9530_v1  ;;  %8157 = vmatprep.mubr.msk.f32.mxu1 %vm85_vm0, %v11757_v34  ;;  %8220 = vmatpush3.bf16.msra.mxu1 %v11777_v2  ;;  %v9867_v27 = vpop.eup %9866  ;;  %v976_v61 = vmul.f32 %v12166_v31, %v905_v39  ;;  %v469_v30 = vmul.f32 %v12218_v16, %v12218_v16 }
 0x31e   :  { %661 = vadd.xlane.f32.xlu0 %v660_v54  ;;  %8221 = vmatprep.subr.bf16.mxu1 %v11915_v35  ;;  %v9869_v41 = vpop.eup %9868  ;;  %v1048_v42 = vadd.f32 %v12184_v9, %v977_v63  ;;  %v908_v28 = vmul.f32 %v9867_v27, %v11908_v55  ;;  %v783_v40 = vadd.f32 1e-05, %v719_v18  ;;  %v17649_v27 = vld [vmem:[#allocation9_spill] sm:$0xff] }
 0x31f   :  { %9218 = vmatpush3.bf16.xpose.msk.msra.mxu0 %vm12087_vm1, %v9216_v52  ;;  %v1047_v49 = vadd.f32 %v12184_v9, %v976_v61  ;;  %v907_v5 = vmul.f32 %v9869_v41, %v11557_v59  ;;  %v657_v33 = vsel %vm85_vm0, %v469_v30, 0.0  ;;  %v17650_v61 = vld [vmem:[#allocation15_spill] sm:$0xff] }
 0x320   :  { %8158 = vmatmul.mubr.msk.f32.gmra.mrb[8].mxu1 %vm85_vm0, %v11757_v34  ;;  %v979_v23 = vmul.f32 %v12166_v31, %v908_v28  ;;  %9876 = vrsqrt.f32 %v783_v40  ;;  %v17652_v28 = vld [vmem:[#allocation2_spill] sm:$0xff]  ;;  %v17653_v40 = vld [vmem:[#allocation8_spill] sm:$0xff] }
 0x321   :  { %8159 = vmatprep.mubr.msk.f32.mxu1 %vm85_vm0, %v11759_v24  ;;  %8222 = vmatpush3.bf16.msra.mxu1 %v11789_v57  ;;  %v1110_v55 = vpack.c.bf16 %v1048_v42, %v1047_v49  ;;  %v9871_v26 = vpop.eup %9870  ;;  %v978_v59 = vmul.f32 %v12166_v31, %v907_v5  ;;  %v17654_v5 = vld [vmem:[#allocation43_spill] sm:$0xff] }
 0x322   :  { %7757 = vmatmul.mubr.msk.bf16.gmra.mrb[96].mxu0 %vm85_vm0, %v1109_v13  ;;  %8223 = vmatprep.subr.bf16.mxu1 %v11944_v4  ;;  %v9873_v12 = vpop.eup %9872  ;;  %v1050_v50 = vadd.f32 %v12184_v9, %v979_v23  ;;  %v910_v43 = vmul.f32 %v9871_v26, %v11926_v32  ;;  %v17648_v13 = vld [vmem:[#allocation37_spill] sm:$0xff] }
 0x323   :  { %1495 = vmatprep.mubr.bf16.mxu0 %v17551_v3  ;;  %v1049_v1 = vadd.f32 %v12184_v9, %v978_v59  ;;  %v909_v20 = vmul.f32 %v9873_v12, %v17645_v47  ;;  %v17656_v23 = vld [vmem:[#allocation13_spill] sm:$0xff]  ;;  %v17657_v59 = vld [vmem:[#allocation47_spill] sm:$0xff] }
 0x324   :  { %8160 = vmatmul.mubr.msk.f32.gmra.mrb[10].mxu1 %vm85_vm0, %v11759_v24  ;;  %v981_v52 = vmul.f32 %v12166_v31, %v910_v43 }
 0x325   :  { %8161 = vmatprep.mubr.msk.f32.mxu1 %vm85_vm0, %v11769_v53  ;;  %8224 = vmatpush3.bf16.msra.mxu1 %v11801_v45  ;;  %v1111_v29 = vpack.c.bf16 %v1050_v50, %v1049_v1  ;;  %v980_v32 = vmul.f32 %v12166_v31, %v909_v20  ;;  %v17658_v50 = vld [vmem:[#allocation7_spill] sm:$0xff]  ;;  %v17659_v1 = vld [vmem:[#allocation12_spill] sm:$0xff] }
 0x326   :  { %8225 = vmatprep.subr.bf16.mxu1 %v11963_v11  ;;  %v9875_v54 = vpop.eup %9874  ;;  %v1052_v15 = vadd.f32 %v12184_v9, %v981_v52  ;;  %v17660_v20 = vld [vmem:[#allocation11_spill] sm:$0xff]  ;;  %v17661_v52 = vld [vmem:[#allocation18_spill] sm:$0xff] }
 0x327   :  { %v912_v63 = vmul.f32 %v9875_v54, %v17648_v13  ;;  %v1051_v18 = vadd.f32 %v12184_v9, %v980_v32 }
 0x328   :  { %658 = vadd.xlane.f32.xlu1 %v657_v33  ;;  %8162 = vmatmul.mubr.msk.f32.gmra.mrb[12].mxu1 %vm85_vm0, %v11769_v53 }
 0x329   :  { %8163 = vmatprep.mubr.msk.f32.mxu1 %vm85_vm0, %v11771_v62  ;;  %8226 = vmatpush3.bf16.msra.mxu1 %v11813_v17  ;;  %v1112_v30 = vpack.c.bf16 %v1052_v15, %v1051_v18  ;;  %v983_v42 = vmul.f32 %v12166_v31, %v912_v63  ;;  %v17663_v15 = vld [vmem:[#allocation19_spill] sm:$0xff]  ;;  %v17665_v18 = vld [vmem:[#allocation22_spill] sm:$0xff] }
 0x32a   :  { %7758 = vmatmul.mubr.msk.bf16.gmra.mrb[100].mxu0 %vm85_vm0, %v1110_v55  ;;  %8227 = vmatprep.subr.bf16.mxu1 %v11975_v44  ;;  %v9877_v39 = vpop.eup %9876  ;;  %v17655_v55 = vld [vmem:[#allocation34_spill] sm:$0xff] }
 0x32b   :  { %1505 = vmatprep.mubr.bf16.mxu0 %v17551_v3  ;;  %v911_v41 = vmul.f32 %v9877_v39, %v17650_v61  ;;  %v1054_v33 = vadd.f32 %v12184_v9, %v983_v42 }
 0x32c   :  { %8164 = vmatmul.mubr.msk.f32.gmra.mrb[14].mxu1 %vm85_vm0, %v11771_v62 }
 0x32d   :  { %8165 = vmatprep.mubr.msk.f32.mxu1 %vm85_vm0, %v11781_v8  ;;  %8228 = vmatpush3.bf16.msra.mxu1 %v11825_v51  ;;  %v982_v49 = vmul.f32 %v12166_v31, %v911_v41 }
 0x32f   :  { %v1053_v26 = vadd.f32 %v12184_v9, %v982_v49 }
 0x330   :  { %8166 = vmatmul.mubr.msk.f32.gmra.mrb[16].mxu1 %vm85_vm0, %v11781_v8 }
 0x331   :  { %8167 = vmatprep.mubr.msk.f32.mxu1 %vm85_vm0, %v17646_v19  ;;  %v1113_v12 = vpack.c.bf16 %v1054_v33, %v1053_v26  ;;  %v17670_v33 = vld [vmem:[#allocation66_spill] sm:$0xff] }
 0x332   :  { %7759 = vmatmul.mubr.msk.bf16.gmra.mrb[104].mxu0 %vm85_vm0, %v1111_v29 }
 0x333   :  { %1515 = vmatprep.mubr.bf16.mxu0 %v17551_v3 }
 0x334   :  { %9553 = vrot.lane.b32.xlu0 %v17647_v56, %s10674_s26  ;;  %8168 = vmatmul.mubr.msk.f32.gmra.mrb[18].mxu1 %vm85_vm0, %v17646_v19 }
 0x335   :  { %8169 = vmatprep.mubr.msk.f32.mxu1 %vm85_vm0, %v17649_v27 }
 0x338   :  { %9573 = vrot.lane.b32.xlu0 %v17651_v0, %s10674_s26  ;;  %8170 = vmatmul.mubr.msk.f32.gmra.mrb[20].mxu1 %vm85_vm0, %v17649_v27 }
 0x339   :  { %9558 = vrot.lane.b32.xlu1 %v17652_v28, %s10674_s26  ;;  %8171 = vmatprep.mubr.msk.f32.mxu1 %vm85_vm0, %v17653_v40 }
 0x33a   :  { %7760 = vmatmul.mubr.msk.bf16.gmra.mrb[108].mxu0 %vm85_vm0, %v1112_v30 }
 0x33b   :  { %1525 = vmatprep.mubr.bf16.mxu0 %v17551_v3 }
 0x33c   :  { %9583 = vrot.lane.b32.xlu0 %v17654_v5, %s10674_s26  ;;  %8172 = vmatmul.mubr.msk.f32.gmra.mrb[22].mxu1 %vm85_vm0, %v17653_v40 }
 0x33d   :  { %9563 = vrot.lane.b32.xlu1 %v17655_v55, %s10674_s26  ;;  %8173 = vmatprep.mubr.msk.f32.mxu1 %vm85_vm0, %v17656_v23 }
 0x340   :  { %9593 = vrot.lane.b32.xlu0 %v17657_v59, %s10674_s26  ;;  %8174 = vmatmul.mubr.msk.f32.gmra.mrb[24].mxu1 %vm85_vm0, %v17656_v23 }
 0x341   :  { %9568 = vrot.lane.b32.xlu1 %v17658_v50, %s10674_s26  ;;  %v650_v43 = vpop.xlane.xlu0 %649  ;;  %8175 = vmatprep.mubr.msk.f32.mxu1 %vm85_vm0, %v17659_v1  ;;  %v17676_v50 = vld [vmem:[#allocation33_spill] sm:$0xff] }
 0x342   :  { %v722_v47 = vmul.f32 0.03125, %v650_v43  ;;  %7761 = vmatmul.mubr.msk.bf16.gmra.mrb[112].mxu0 %vm85_vm0, %v1113_v12  ;;  %v17673_v12 = vld [vmem:[#allocation28_spill] sm:$0xff] }
 0x343   :  { %1535 = vmatprep.mubr.bf16.mxu0 %v17551_v3  ;;  %v17677_v43 = vld [vmem:[#allocation36_spill] sm:$0xff] }
 0x344   :  { %3108 = vrot.lane.b32.xlu0 %v11731_v21, %s10675_s0  ;;  %8176 = vmatmul.mubr.msk.f32.gmra.mrb[26].mxu1 %vm85_vm0, %v17659_v1  ;;  %v786_v54 = vadd.f32 1e-05, %v722_v47  ;;  %v17662_v21 = vld [vmem:[#allocation16_spill] sm:$0xff] }
 0x345   :  { %9578 = vrot.lane.b32.xlu1 %v17660_v20, %s10674_s26  ;;  %v9534_v29 = vpop.permute.xlu0 %9533  ;;  %8177 = vmatprep.mubr.msk.f32.mxu1 %vm85_vm0, %v17661_v52  ;;  %v17678_v20 = vld [vmem:[#allocation38_spill] sm:$0xff] }
 0x346   :  { %v9536_v32 = vunpack.i.h.bf16 %v9534_v29  ;;  %v9535_v39 = vunpack.i.l.bf16 %v9534_v29  ;;  %9878 = vrsqrt.f32 %v786_v54 }
 0x348   :  { %v9219_v56 = vpack.c.bf16 %v9536_v32, %v9535_v39  ;;  %3112 = vrot.lane.b32.xlu0 %v11745_v6, %s10675_s0  ;;  %8178 = vmatmul.mubr.msk.f32.gmra.mrb[28].mxu1 %vm85_vm0, %v17661_v52  ;;  %v17664_v6 = vld [vmem:[#allocation20_spill] sm:$0xff]  ;;  %v17679_v39 = vld [vmem:[#allocation41_spill] sm:$0xff] }
 0x349   :  { %9588 = vrot.lane.b32.xlu1 %v17662_v21, %s10674_s26  ;;  %8179 = vmatprep.mubr.msk.f32.mxu1 %vm85_vm0, %v17663_v15  ;;  %v17680_v21 = vld [vmem:[#allocation45_spill] sm:$0xff] }
 0x34a   :  { %9221 = vmatprep.subr.msk.bf16.mxu0 %vm12087_vm1, %v9219_v56 }
 0x34b   :  { %v647_v13 = vpop.xlane.xlu1 %646 }
 0x34c   :  { %v721_v63 = vmul.f32 0.03125, %v647_v13  ;;  %3116 = vrot.lane.b32.xlu0 %v11757_v34, %s10675_s0  ;;  %8180 = vmatmul.mubr.msk.f32.gmra.mrb[30].mxu1 %vm85_vm0, %v17663_v15  ;;  %v17666_v34 = vld [vmem:[#allocation23_spill] sm:$0xff] }
 0x34d   :  { %9598 = vrot.lane.b32.xlu1 %v17664_v6, %s10674_s26  ;;  %8181 = vmatprep.mubr.msk.f32.mxu1 %vm85_vm0, %v17665_v18 }
 0x34e   :  { %v785_v61 = vadd.f32 1e-05, %v721_v63  ;;  %v17681_v63 = vld [vmem:[#allocation42_spill] sm:$0xff] }
 0x34f   :  { %v9539_v41 = vpop.permute.xlu1 %9538 }
 0x350   :  { %9880 = vrsqrt.f32 %v785_v61  ;;  %v9541_v0 = vunpack.i.h.bf16 %v9539_v41  ;;  %v9540_v30 = vunpack.i.l.bf16 %v9539_v41  ;;  %3120 = vrot.lane.b32.xlu0 %v11769_v53, %s10675_s0  ;;  %8182 = vmatmul.mubr.msk.f32.gmra.mrb[32].mxu1 %vm85_vm0, %v17665_v18  ;;  %v9879_v28 = vpop.eup %9878  ;;  %v17667_v53 = vld [vmem:[#allocation24_spill] sm:$0xff] }
 0x351   :  { %3110 = vrot.lane.b32.xlu1 %v11735_v36, %s10675_s0  ;;  %8183 = vmatprep.mubr.msk.f32.mxu1 %vm85_vm0, %v17666_v34  ;;  %v17668_v36 = vld [vmem:[#allocation61_spill] sm:$0xff] }
 0x352   :  { %v9222_v42 = vpack.c.bf16 %v9541_v0, %v9540_v30  ;;  %v914_v49 = vmul.f32 %v9879_v28, %v17668_v36  ;;  %v17682_v30 = vld [vmem:[#allocation46_spill] sm:$0xff] }
 0x354   :  { %3124 = vrot.lane.b32.xlu0 %v11781_v8, %s10675_s0  ;;  %8184 = vmatmul.mubr.msk.f32.gmra.mrb[34].mxu1 %vm85_vm0, %v17666_v34  ;;  %v17669_v8 = vld [vmem:[#allocation25_spill] sm:$0xff]  ;;  %v985_v55 = vmul.f32 %v12166_v31, %v914_v49 }
 0x355   :  { %9224 = vmatpush3.bf16.xpose.msk.msra.mxu0 %vm12087_vm1, %v9222_v42  ;;  %3114 = vrot.lane.b32.xlu1 %v11747_v10, %s10675_s0  ;;  %v17683_v42 = vld [vmem:[#allocation80_spill] sm:$0xff] }
 0x356   :  { %8185 = vmatprep.mubr.msk.f32.mxu1 %vm85_vm0, %v17667_v53  ;;  %v1056_v59 = vadd.f32 %v12184_v9, %v985_v55 }
 0x358   :  { %3128 = vrot.lane.b32.xlu0 %v17649_v27, %s10675_s0  ;;  %8186 = vmatmul.mubr.msk.f32.gmra.mrb[36].mxu1 %vm85_vm0, %v17667_v53  ;;  %v17671_v27 = vld [vmem:[#allocation26_spill] sm:$0xff] }
 0x359   :  { %3118 = vrot.lane.b32.xlu1 %v11759_v24, %s10675_s0  ;;  %8187 = vmatprep.mubr.msk.f32.mxu1 %vm85_vm0, %v17669_v8 }
 0x35a   :  { %v9881_v5 = vpop.eup %9880 }
 0x35b   :  { %v913_v10 = vmul.f32 %v9881_v5, %v17670_v33 }
 0x35c   :  { %3132 = vrot.lane.b32.xlu0 %v17656_v23, %s10675_s0  ;;  %8188 = vmatmul.mubr.msk.f32.gmra.mrb[38].mxu1 %vm85_vm0, %v17669_v8  ;;  %v17672_v23 = vld [vmem:[#allocation27_spill] sm:$0xff] }
 0x35d   :  { %3122 = vrot.lane.b32.xlu1 %v11771_v62, %s10675_s0  ;;  %8189 = vmatprep.mubr.msk.f32.mxu1 %vm85_vm0, %v17671_v27  ;;  %v984_v24 = vmul.f32 %v12166_v31, %v913_v10 }
 0x35f   :  { %v1055_v26 = vadd.f32 %v12184_v9, %v984_v24 }
 0x360   :  { %3136 = vrot.lane.b32.xlu0 %v17661_v52, %s10675_s0  ;;  %8190 = vmatmul.mubr.msk.f32.gmra.mrb[40].mxu1 %vm85_vm0, %v17671_v27 }
 0x361   :  { %3126 = vrot.lane.b32.xlu1 %v17646_v19, %s10675_s0  ;;  %8191 = vmatprep.mubr.msk.f32.mxu1 %vm85_vm0, %v17672_v23  ;;  %v1114_v62 = vpack.c.bf16 %v1056_v59, %v1055_v26  ;;  %v17674_v19 = vld [vmem:[#allocation29_spill] sm:$0xff] }
 0x363   :  { %7762 = vmatmul.mubr.msk.bf16.gmra.mrb[116].mxu0 %vm85_vm0, %v1114_v62 }
 0x364   :  { %3140 = vrot.lane.b32.xlu0 %v17665_v18, %s10675_s0  ;;  %8192 = vmatmul.mubr.msk.f32.gmra.mrb[42].mxu1 %vm85_vm0, %v17672_v23 }
 0x365   :  { %3130 = vrot.lane.b32.xlu1 %v17653_v40, %s10675_s0  ;;  %8193 = vmatprep.mubr.msk.f32.mxu1 %vm85_vm0, %v17673_v12  ;;  %v17675_v40 = vld [vmem:[#allocation32_spill] sm:$0xff] }
 0x366   :  { %1545 = vmatprep.mubr.bf16.mxu0 %v17551_v3 }
 0x368   :  { %3144 = vrot.lane.b32.xlu0 %v17667_v53, %s10675_s0  ;;  %8194 = vmatmul.mubr.msk.f32.gmra.mrb[44].mxu1 %vm85_vm0, %v17673_v12 }
 0x369   :  { %3134 = vrot.lane.b32.xlu1 %v17659_v1, %s10675_s0  ;;  %8195 = vmatprep.mubr.msk.f32.mxu1 %vm85_vm0, %v17674_v19 }
 0x36c   :  { %3148 = vrot.lane.b32.xlu0 %v17671_v27, %s10675_s0  ;;  %8196 = vmatmul.mubr.msk.f32.gmra.mrb[46].mxu1 %vm85_vm0, %v17674_v19 }
 0x36d   :  { %3138 = vrot.lane.b32.xlu1 %v17663_v15, %s10675_s0  ;;  %8197 = vmatprep.mubr.msk.f32.mxu1 %vm85_vm0, %v17675_v40 }
 0x370   :  { %3152 = vrot.lane.b32.xlu0 %v17673_v12, %s10675_s0  ;;  %8198 = vmatmul.mubr.msk.f32.gmra.mrb[48].mxu1 %vm85_vm0, %v17675_v40 }
 0x371   :  { %3142 = vrot.lane.b32.xlu1 %v17666_v34, %s10675_s0  ;;  %8199 = vmatprep.mubr.msk.f32.mxu1 %vm85_vm0, %v17676_v50 }
 0x374   :  { %3156 = vrot.lane.b32.xlu0 %v17675_v40, %s10675_s0  ;;  %8200 = vmatmul.mubr.msk.f32.gmra.mrb[50].mxu1 %vm85_vm0, %v17676_v50 }
 0x375   :  { %3146 = vrot.lane.b32.xlu1 %v17669_v8, %s10675_s0  ;;  %8201 = vmatprep.mubr.msk.f32.mxu1 %vm85_vm0, %v17677_v43 }
 0x376   :  { %v656_v1 = vpop.xlane.xlu0 %655 }
 0x377   :  { %v724_v47 = vmul.f32 0.03125, %v656_v1 }
 0x378   :  { %3160 = vrot.lane.b32.xlu0 %v17677_v43, %s10675_s0  ;;  %8202 = vmatmul.mubr.msk.f32.gmra.mrb[52].mxu1 %vm85_vm0, %v17677_v43 }
 0x379   :  { %3150 = vrot.lane.b32.xlu1 %v17672_v23, %s10675_s0  ;;  %8203 = vmatprep.mubr.msk.f32.mxu1 %vm85_vm0, %v17678_v20  ;;  %v788_v52 = vadd.f32 1e-05, %v724_v47 }
 0x37a   :  { %v9544_v29 = vpop.permute.xlu0 %9543 }
 0x37b   :  { %v9546_v54 = vunpack.i.h.bf16 %v9544_v29  ;;  %v9545_v32 = vunpack.i.l.bf16 %v9544_v29  ;;  %9882 = vrsqrt.f32 %v788_v52 }
 0x37c   :  { %3164 = vrot.lane.b32.xlu0 %v17679_v39, %s10675_s0  ;;  %8204 = vmatmul.mubr.msk.f32.gmra.mrb[54].mxu1 %vm85_vm0, %v17678_v20 }
 0x37d   :  { %v9225_v56 = vpack.c.bf16 %v9546_v54, %v9545_v32  ;;  %3154 = vrot.lane.b32.xlu1 %v17674_v19, %s10675_s0  ;;  %8205 = vmatprep.mubr.msk.f32.mxu1 %vm85_vm0, %v17679_v39 }
 0x37f   :  { %9227 = vmatprep.subr.msk.bf16.mxu0 %vm12087_vm1, %v9225_v56 }
 0x380   :  { %3168 = vrot.lane.b32.xlu0 %v17680_v21, %s10675_s0  ;;  %v653_v15 = vpop.xlane.xlu1 %652  ;;  %8206 = vmatmul.mubr.msk.f32.gmra.mrb[56].mxu1 %vm85_vm0, %v17679_v39 }
 0x381   :  { %v723_v13 = vmul.f32 0.03125, %v653_v15  ;;  %3158 = vrot.lane.b32.xlu1 %v17676_v50, %s10675_s0  ;;  %8207 = vmatprep.mubr.msk.f32.mxu1 %vm85_vm0, %v17681_v63 }
 0x383   :  { %v787_v6 = vadd.f32 1e-05, %v723_v13 }
 0x384   :  { %4165 = vrot.lane.b32.xlu0 %v11837_v48, %s10675_s0  ;;  %v9549_v18 = vpop.permute.xlu1 %9548  ;;  %8208 = vmatmul.mubr.msk.f32.gmra.mrb[58].mxu1 %vm85_vm0, %v17681_v63 }
 0x385   :  { %9884 = vrsqrt.f32 %v787_v6  ;;  %v9551_v61 = vunpack.i.h.bf16 %v9549_v18  ;;  %v9550_v41 = vunpack.i.l.bf16 %v9549_v18  ;;  %3162 = vrot.lane.b32.xlu1 %v17678_v20, %s10675_s0  ;;  %8209 = vmatprep.mubr.msk.f32.mxu1 %vm85_vm0, %v17680_v21  ;;  %v9883_v48 = vpop.eup %9882 }
 0x387   :  { %v9228_v0 = vpack.c.bf16 %v9551_v61, %v9550_v41 }
 0x388   :  { %4167 = vrot.lane.b32.xlu0 %v11849_v38, %s10675_s0  ;;  %8210 = vmatmul.mubr.msk.f32.gmra.mrb[60].mxu1 %vm85_vm0, %v17680_v21  ;;  %v916_v38 = vmul.f32 %v9883_v48, %v12105_v7 }
 0x389   :  { %3166 = vrot.lane.b32.xlu1 %v17681_v63, %s10675_s0  ;;  %8211 = vmatprep.mubr.msk.f32.mxu1 %vm85_vm0, %v17682_v30 }
 0x38a   :  { %9230 = vmatpush3.bf16.xpose.msk.msra.mxu0 %vm12087_vm1, %v9228_v0  ;;  %v987_v53 = vmul.f32 %v12166_v31, %v916_v38 }
 0x38c   :  { %4169 = vrot.lane.b32.xlu0 %v11862_v60, %s10675_s0  ;;  %8212 = vmatmul.mubr.msk.f32.gmra.mrb[62].mxu1 %vm85_vm0, %v17682_v30  ;;  %v1058_v49 = vadd.f32 %v12184_v9, %v987_v53 }
 0x38d   :  { %3170 = vrot.lane.b32.xlu1 %v17682_v30, %s10675_s0 }
 0x38f   :  { %v9885_v34 = vpop.eup %9884 }
 0x390   :  { %v915_v28 = vmul.f32 %v9885_v34, %v17683_v42 }
 0x391   :  { %4149 = vrot.lane.b32.xlu1 %v11741_v14, %s10675_s0 }
 0x392   :  { %v986_v36 = vmul.f32 %v12166_v31, %v915_v28 }
 0x394   :  { %v1057_v60 = vadd.f32 %v12184_v9, %v986_v36 }
 0x395   :  { %4151 = vrot.lane.b32.xlu1 %v11753_v46, %s10675_s0 }
 0x396   :  { %v1115_v7 = vpack.c.bf16 %v1058_v49, %v1057_v60 }
 0x398   :  { %7763 = vmatmul.mubr.msk.bf16.gmra.mrb[120].mxu0 %vm85_vm0, %v1115_v7 }
 0x399   :  { %1555 = vmatprep.mubr.bf16.mxu0 %v17551_v3 }
 0x3ab   :  { %v662_v8 = vpop.xlane.xlu0 %661 }
 0x3ac   :  { %v726_v5 = vmul.f32 0.03125, %v662_v8 }
 0x3ae   :  { %v790_v10 = vadd.f32 1e-05, %v726_v5 }
 0x3af   :  { %v9554_v33 = vpop.permute.xlu0 %9553 }
 0x3b0   :  { %v9556_v55 = vunpack.i.h.bf16 %v9554_v33  ;;  %v9555_v14 = vunpack.i.l.bf16 %v9554_v33  ;;  %9886 = vrsqrt.f32 %v790_v10 }
 0x3b2   :  { %v9231_v27 = vpack.c.bf16 %v9556_v55, %v9555_v14 }
 0x3b3   :  { %v9574_v24 = vpop.permute.xlu0 %9573 }
 0x3b4   :  { %9233 = vmatprep.subr.msk.bf16.mxu0 %vm12087_vm1, %v9231_v27  ;;  %v9576_v52 = vunpack.i.h.bf16 %v9574_v24  ;;  %v9575_v54 = vunpack.i.l.bf16 %v9574_v24 }
 0x3b5   :  { %v659_v26 = vpop.xlane.xlu1 %658 }
 0x3b6   :  { %v725_v59 = vmul.f32 0.03125, %v659_v26  ;;  %v9243_v6 = vpack.c.bf16 %v9576_v52, %v9575_v54 }
 0x3b7   :  { %v9584_v46 = vpop.permute.xlu0 %9583 }
 0x3b8   :  { %v789_v23 = vadd.f32 1e-05, %v725_v59  ;;  %v9586_v38 = vunpack.i.h.bf16 %v9584_v46  ;;  %v9585_v34 = vunpack.i.l.bf16 %v9584_v46 }
 0x3b9   :  { %v9559_v62 = vpop.permute.xlu1 %9558 }
 0x3ba   :  { %9888 = vrsqrt.f32 %v789_v23  ;;  %v9561_v12 = vunpack.i.h.bf16 %v9559_v62  ;;  %v9560_v3 = vunpack.i.l.bf16 %v9559_v62  ;;  %v9887_v43 = vpop.eup %9886  ;;  %v9249_v49 = vpack.c.bf16 %v9586_v38, %v9585_v34 }
 0x3bb   :  { %v9594_v19 = vpop.permute.xlu0 %9593  ;;  %v918_v39 = vmul.f32 %v9887_v43, %v12175_v37 }
 0x3bc   :  { %v9234_v40 = vpack.c.bf16 %v9561_v12, %v9560_v3  ;;  %v9596_v33 = vunpack.i.h.bf16 %v9594_v19  ;;  %v9595_v10 = vunpack.i.l.bf16 %v9594_v19 }
 0x3bd   :  { %v9564_v50 = vpop.permute.xlu1 %9563  ;;  %v989_v41 = vmul.f32 %v12166_v31, %v918_v39  ;;  %v17048_v39 = vmov -10000.0  }
 0x3be   :  { %v9566_v1 = vunpack.i.h.bf16 %v9564_v50  ;;  %v9565_v47 = vunpack.i.l.bf16 %v9564_v50  ;;  %9236 = vmatpush3.bf16.xpose.msk.msra.mxu0 %vm12087_vm1, %v9234_v40  ;;  %v9255_v26 = vpack.c.bf16 %v9596_v33, %v9595_v10 }
 0x3bf   :  { %v12497_v20 = vpop.permute.xlu0 %3108 }
 0x3c0   :  { %v9237_v29 = vpack.c.bf16 %v9566_v1, %v9565_v47 }
 0x3c1   :  { %v9569_v32 = vpop.permute.xlu1 %9568 }
 0x3c2   :  { %v9571_v56 = vunpack.i.h.bf16 %v9569_v32  ;;  %v9570_v21 = vunpack.i.l.bf16 %v9569_v32  ;;  %9239 = vmatprep.subr.msk.bf16.mxu0 %vm12087_vm1, %v9237_v29 }
 0x3c3   :  { %v12502_v15 = vpop.permute.xlu0 %3112 }
 0x3c4   :  { %v9889_v13 = vpop.eup %9888  ;;  %v9240_v63 = vpack.c.bf16 %v9571_v56, %v9570_v21 }
 0x3c5   :  { %v9579_v18 = vpop.permute.xlu1 %9578  ;;  %v917_v61 = vmul.f32 %v9889_v13, %v12218_v16  ;;  %v1060_v16 = vadd.f32 %v12184_v9, %v989_v41 }
 0x3c6   :  { %9242 = vmatpush3.bf16.xpose.msk.msra.mxu0 %vm12087_vm1, %v9240_v63  ;;  %v9581_v48 = vunpack.i.h.bf16 %v9579_v18  ;;  %v9580_v30 = vunpack.i.l.bf16 %v9579_v18 }
 0x3c7   :  { %v12508_v0 = vpop.permute.xlu0 %3116  ;;  %9245 = vmatprep.subr.msk.bf16.mxu0 %vm12087_vm1, %v9243_v6  ;;  %v988_v37 = vmul.f32 %v12166_v31, %v917_v61 }
 0x3c8   :  { %v9246_v60 = vpack.c.bf16 %v9581_v48, %v9580_v30 }
 0x3c9   :  { %v9589_v42 = vpop.permute.xlu1 %9588  ;;  %v1059_v28 = vadd.f32 %v12184_v9, %v988_v37  ;;  %v1566_v9 = vlaneseq }
 0x3ca   :  { %v9591_v8 = vunpack.i.h.bf16 %v9589_v42  ;;  %v9590_v5 = vunpack.i.l.bf16 %v9589_v42 }
 0x3cb   :  { %v12515_v53 = vpop.permute.xlu0 %3120  ;;  %v1116_v36 = vpack.c.bf16 %v1060_v16, %v1059_v28  ;;  %v12528_v27 = vand.u32 127, %v1566_v9  ;;  %v12538_v23 = vshrl.u32 %v1566_v9, 7 }
 0x3cc   :  { %v9252_v24 = vpack.c.bf16 %v9591_v8, %v9590_v5 }
 0x3cd   :  { %v9599_v7 = vpop.permute.xlu1 %9598  ;;  %7764 = vmatmul.mubr.msk.bf16.gmra.mrb[124].mxu0 %vm85_vm0, %v1116_v36  ;;  %v12541_v62 = vadd.s32 128, %v12528_v27  ;;  %v1568_v43 = vadd.s32 8, %v12538_v23  ;;  %v1569_v54 = vadd.s32 16, %v12538_v23  ;;  %v1570_v18 = vadd.s32 24, %v12538_v23 }
 0x3ce   :  { %9248 = vmatpush3.bf16.xpose.msk.msra.mxu0 %vm12087_vm1, %v9246_v60  ;;  %8357 = vmatprep.mubr.msk.f32.mxu0 %vm85_vm0, %v12497_v20  ;;  %v9601_v12 = vunpack.i.h.bf16 %v9599_v7  ;;  %v9600_v3 = vunpack.i.l.bf16 %v9599_v7  ;;  %v1571_v34 = vadd.s32 32, %v12538_v23  ;;  %v1572_v5 = vadd.s32 40, %v12538_v23 }
 0x3cf   :  { %v12522_v31 = vpop.permute.xlu0 %3124  ;;  %9251 = vmatprep.subr.msk.bf16.mxu0 %vm12087_vm1, %v9249_v49  ;;  %v1603_v50 = vsub.s32 %v12541_v62, %v12538_v23  ;;  %v1605_v52 = vsub.s32 %v12541_v62, %v1568_v43  ;;  %v1607_v63 = vsub.s32 %v12541_v62, %v1569_v54  ;;  %v1609_v28 = vsub.s32 %v12541_v62, %v1570_v18 }
 0x3d0   :  { %v9258_v1 = vpack.c.bf16 %v9601_v12, %v9600_v3  ;;  %v1611_v9 = vsub.s32 %v12541_v62, %v1571_v34  ;;  %v1573_v43 = vadd.s32 48, %v12538_v23 }
 0x3d1   :  { %v3111_v55 = vpop.permute.xlu1 %3110  ;;  %vm1731_vm2 = vcmp.lt.s32.totalorder %v1603_v50, 128  ;;  %vm1733_vm3 = vcmp.lt.s32.totalorder %v1605_v52, 128  ;;  %vm1735_vm4 = vcmp.lt.s32.totalorder %v1607_v63, 128  ;;  %vm1737_vm5 = vcmp.lt.s32.totalorder %v1609_v28, 128 }
 0x3d2   :  { %v12561_v56 = vsel %vm1731_vm2, 0.0, %v17048_v39  ;;  %v12578_v37 = vsel %vm1733_vm3, 0.0, %v17048_v39  ;;  %v12597_v36 = vsel %vm1735_vm4, 0.0, %v17048_v39  ;;  %v12623_v3 = vsel %vm1737_vm5, 0.0, %v17048_v39 }
 0x3d3   :  { %v12526_v14 = vpop.permute.xlu0 %3128  ;;  %17684 = vst [vmem:[#allocation14_spill] sm:$0xff] %v12561_v56  ;;  %17687 = vst [vmem:[#allocation37_spill] sm:$0xff] %v12578_v37  ;;  %vm1739_vm6 = vcmp.lt.s32.totalorder %v1611_v9, 128  ;;  %v1613_v52 = vsub.s32 %v12541_v62, %v1572_v5 }
 0x3d4   :  { %17690 = vst [vmem:[#allocation39_spill] sm:$0xff] %v12597_v36  ;;  %17695 = vst [vmem:[#allocation13_spill] sm:$0xff] %v12623_v3  ;;  %v12647_v34 = vsel %vm1739_vm6, 0.0, %v17048_v39 }
 0x3d5   :  { %v12530_v59 = vpop.permute.xlu1 %3114  ;;  %17700 = vst [vmem:[#allocation18_spill] sm:$0xff] %v12647_v34  ;;  %vm1741_vm7 = vcmp.lt.s32.totalorder %v1613_v52, 128 }
 0x3d6   :  { %9254 = vmatpush3.bf16.xpose.msk.msra.mxu0 %vm12087_vm1, %v9252_v24 }
 0x3d7   :  { %v12534_v46 = vpop.permute.xlu0 %3132  ;;  %9257 = vmatprep.subr.msk.bf16.mxu0 %vm12087_vm1, %v9255_v26 }
 0x3d9   :  { %v12543_v19 = vpop.permute.xlu1 %3118 }
 0x3db   :  { %v12545_v40 = vpop.permute.xlu0 %3136 }
 0x3dd   :  { %v12550_v47 = vpop.permute.xlu1 %3122 }
 0x3de   :  { %9260 = vmatpush3.bf16.xpose.msk.msra.mxu0 %vm12087_vm1, %v9258_v1 }
 0x3df   :  { %v12554_v29 = vpop.permute.xlu0 %3140 }
 0x3e1   :  { %v12558_v32 = vpop.permute.xlu1 %3126 }
 0x3e3   :  { %v12563_v21 = vpop.permute.xlu0 %3144  ;;  %v12565_v13 = vpop.f32.mrb[0].mxu1 }
 0x3e4   :  { %17685 = vst [vmem:[#allocation4_spill] sm:$0xff] %v12565_v13  ;;  %v2230_v6 = vpop.f32.mrb[1].mxu1 }
 0x3e5   :  { %v12570_v61 = vadd.f32 %v2230_v6, %v12561_v56  ;;  %v12572_v41 = vpop.permute.xlu1 %3130  ;;  %8358 = vmatmul.mubr.msk.f32.vlgmr.msra.gmra.mrb[128].mxu0 %vm85_vm0, %v12497_v20 }
 0x3e6   :  { %8359 = vmatprep.mubr.msk.f32.mxu0 %vm85_vm0, %v3111_v55 }
 0x3e7   :  { %17686 = vst [vmem:[#allocation30_spill] sm:$0xff] %v12570_v61  ;;  %v12580_v48 = vpop.permute.xlu0 %3148  ;;  %v12582_v30 = vpop.f32.mrb[2].mxu1  ;;  %v2419_v38 = vmax.f32 %v12565_v13, %v12570_v61 }
 0x3e8   :  { %17688 = vst [vmem:[#allocation9_spill] sm:$0xff] %v12582_v30  ;;  %v2236_v42 = vpop.f32.mrb[3].mxu1 }
 0x3e9   :  { %v12589_v20 = vadd.f32 %v2236_v42, %v12578_v37  ;;  %v12591_v16 = vpop.permute.xlu1 %3134  ;;  %8360 = vmatmul.mubr.msk.f32.gmra.mrb[130].mxu0 %vm85_vm0, %v3111_v55  ;;  %2420 = vmax.xlane.f32.xlu0 %v2419_v38 }
 0x3ea   :  { %8361 = vmatprep.mubr.msk.f32.mxu0 %vm85_vm0, %v12502_v15 }
 0x3eb   :  { %17689 = vst [vmem:[#allocation15_spill] sm:$0xff] %v12589_v20  ;;  %v12599_v60 = vpop.permute.xlu0 %3152  ;;  %v12601_v49 = vpop.f32.mrb[4].mxu1  ;;  %v2422_v7 = vmax.f32 %v12582_v30, %v12589_v20 }
 0x3ec   :  { %17691 = vst [vmem:[#allocation2_spill] sm:$0xff] %v12601_v49  ;;  %v2242_v8 = vpop.f32.mrb[5].mxu1 }
 0x3ed   :  { %v12608_v33 = vadd.f32 %v2242_v8, %v12597_v36  ;;  %v12610_v10 = vpop.permute.xlu1 %3138  ;;  %v12612_v55 = vpop.f32.mrb[92].mxu0  ;;  %8362 = vmatmul.mubr.msk.f32.gmra.mrb[132].mxu0 %vm85_vm0, %v12502_v15  ;;  %2423 = vmax.xlane.f32.xlu1 %v2422_v7  ;;  %v1615_v7 = vsub.s32 %v12541_v62, %v1573_v43  ;;  %v1574_v8 = vadd.s32 56, %v12538_v23 }
 0x3ee   :  { %17693 = vst [vmem:[#allocation43_spill] sm:$0xff] %v12612_v55  ;;  %v1479_v24 = vpop.f32.mrb[93].mxu0  ;;  %8363 = vmatprep.mubr.msk.f32.mxu0 %vm85_vm0, %v12530_v59 }
 0x3ef   :  { %17692 = vst [vmem:[#allocation8_spill] sm:$0xff] %v12608_v33  ;;  %v12618_v26 = vpop.f32.mrb[94].mxu0  ;;  %v12620_v12 = vpop.permute.xlu0 %3156  ;;  %v2425_v50 = vmax.f32 %v12601_v49, %v12608_v33  ;;  %vm1743_vm8 = vcmp.lt.s32.totalorder %v1615_v7, 128  ;;  %v17710_v7 = vmov -10000.0  }
 0x3f0   :  { %17694 = vst [vmem:[#allocation34_spill] sm:$0xff] %v12618_v26  ;;  %v12628_v1 = vpop.f32.mrb[6].mxu1  ;;  %v1483_v15 = vpop.f32.mrb[95].mxu0  ;;  %v12633_v54 = vpack.i.bf16 %v12618_v26, %v12612_v55 }
 0x3f1   :  { %17696 = vst [vmem:[#allocation47_spill] sm:$0xff] %v12628_v1  ;;  %v12635_v63 = vpack.c.bf16 %v1483_v15, %v1479_v24  ;;  %v2248_v6 = vpop.f32.mrb[7].mxu1  ;;  %v12637_v18 = vpop.permute.xlu1 %3142  ;;  %8364 = vmatmul.mubr.msk.f32.gmra.mrb[134].mxu0 %vm85_vm0, %v12530_v59  ;;  %2426 = vmax.xlane.f32.xlu0 %v2425_v50 }
 0x3f2   :  { %17697 = vst [vmem:[#allocation7_spill] sm:$0xff] %v12633_v54  ;;  %v12642_v38 = vadd.f32 %v2248_v6, %v12623_v3  ;;  %8365 = vmatprep.mubr.msk.f32.mxu0 %vm85_vm0, %v12508_v0  ;;  %v12673_v6 = vsel %vm1741_vm7, 0.0, %v17048_v39 }
 0x3f3   :  { %17698 = vst [vmem:[#allocation12_spill] sm:$0xff] %v12635_v63  ;;  %v12649_v42 = vpop.permute.xlu0 %3160  ;;  %v12651_v28 = vpop.f32.mrb[8].mxu1  ;;  %17705 = vst [vmem:[#allocation23_spill] sm:$0xff] %v12673_v6 }
 0x3f4   :  { %17699 = vst [vmem:[#allocation11_spill] sm:$0xff] %v12642_v38  ;;  %17701 = vst [vmem:[#allocation16_spill] sm:$0xff] %v12651_v28  ;;  %v2254_v9 = vpop.f32.mrb[9].mxu1  ;;  %v2428_v59 = vmax.f32 %v12628_v1, %v12642_v38 }
 0x3f5   :  { %v12658_v5 = vadd.f32 %v2254_v9, %v12647_v34  ;;  %v12660_v24 = vpop.permute.xlu1 %3146  ;;  %v12662_v50 = vpop.f32.mrb[96].mxu0  ;;  %8366 = vmatmul.mubr.msk.f32.gmra.mrb[136].mxu0 %vm85_vm0, %v12508_v0  ;;  %v1617_v0 = vsub.s32 %v12541_v62, %v1574_v8  ;;  %v12696_v8 = vsel %vm1743_vm8, 0.0, %v17710_v7 }
 0x3f6   :  { %17703 = vst [vmem:[#allocation20_spill] sm:$0xff] %v12662_v50  ;;  %2429 = vmax.xlane.f32.xlu0 %v2428_v59  ;;  %v1489_v15 = vpop.f32.mrb[97].mxu0  ;;  %8367 = vmatprep.mubr.msk.f32.mxu0 %vm85_vm0, %v12543_v19  ;;  %17711 = vst [vmem:[#allocation26_spill] sm:$0xff] %v12696_v8 }
 0x3f7   :  { %17702 = vst [vmem:[#allocation19_spill] sm:$0xff] %v12658_v5  ;;  %v12668_v43 = vpop.f32.mrb[98].mxu0  ;;  %v12670_v52 = vpop.permute.xlu0 %3164  ;;  %v2431_v9 = vmax.f32 %v12651_v28, %v12658_v5  ;;  %vm1745_vm9 = vcmp.lt.s32.totalorder %v1617_v0, 128 }
 0x3f8   :  { %17704 = vst [vmem:[#allocation22_spill] sm:$0xff] %v12668_v43  ;;  %v12677_v63 = vpop.f32.mrb[10].mxu1  ;;  %v1493_v55 = vpop.f32.mrb[99].mxu0  ;;  %v12682_v59 = vpack.i.bf16 %v12668_v43, %v12662_v50  ;;  %v12718_v0 = vsel %vm1745_vm9, 0.0, %v17710_v7 }
 0x3f9   :  { %17706 = vst [vmem:[#allocation24_spill] sm:$0xff] %v12677_v63  ;;  %v12684_v26 = vpack.c.bf16 %v1493_v55, %v1489_v15  ;;  %v2260_v54 = vpop.f32.mrb[11].mxu1  ;;  %v12686_v22 = vpop.permute.xlu1 %3150  ;;  %8368 = vmatmul.mubr.msk.f32.gmra.mrb[138].mxu0 %vm85_vm0, %v12543_v19  ;;  %17716 = vst [vmem:[#allocation33_spill] sm:$0xff] %v12718_v0 }
 0x3fa   :  { %17707 = vst [vmem:[#allocation61_spill] sm:$0xff] %v12682_v59  ;;  %v12691_v39 = vadd.f32 %v2260_v54, %v12673_v6  ;;  %2432 = vmax.xlane.f32.xlu0 %v2431_v9  ;;  %8369 = vmatprep.mubr.msk.f32.mxu0 %vm85_vm0, %v12515_v53 }
 0x3fb   :  { %17708 = vst [vmem:[#allocation25_spill] sm:$0xff] %v12684_v26  ;;  %v12698_v50 = vpop.permute.xlu0 %3168  ;;  %v12700_v55 = vpop.f32.mrb[12].mxu1 }
 0x3fc   :  { %17709 = vst [vmem:[#allocation66_spill] sm:$0xff] %v12691_v39  ;;  %17712 = vst [vmem:[#allocation27_spill] sm:$0xff] %v12700_v55  ;;  %v2266_v15 = vpop.f32.mrb[13].mxu1  ;;  %v2434_v26 = vmax.f32 %v12677_v63, %v12691_v39 }
 0x3fd   :  { %v12705_v19 = vadd.f32 %v2266_v15, %v12696_v8  ;;  %v12707_v54 = vpop.permute.xlu1 %3154  ;;  %v12709_v9 = vpop.f32.mrb[100].mxu0  ;;  %8370 = vmatmul.mubr.msk.f32.gmra.mrb[140].mxu0 %vm85_vm0, %v12515_v53 }
 0x3fe   :  { %17714 = vst [vmem:[#allocation29_spill] sm:$0xff] %v12709_v9  ;;  %2435 = vmax.xlane.f32.xlu1 %v2434_v26  ;;  %v1499_v43 = vpop.f32.mrb[101].mxu0  ;;  %8371 = vmatprep.mubr.msk.f32.mxu0 %vm85_vm0, %v12550_v47 }
 0x3ff   :  { %17713 = vst [vmem:[#allocation28_spill] sm:$0xff] %v12705_v19  ;;  %v12715_v34 = vpop.f32.mrb[102].mxu0  ;;  %v4166_v59 = vpop.permute.xlu0 %4165  ;;  %v2437_v15 = vmax.f32 %v12700_v55, %v12705_v19 }
 0x400   :  { %17715 = vst [vmem:[#allocation32_spill] sm:$0xff] %v12715_v34  ;;  %v12722_v6 = vpop.f32.mrb[14].mxu1  ;;  %v1503_v36 = vpop.f32.mrb[103].mxu0  ;;  %8421 = vmatprep.subr.bf16.mxu0 %v4166_v59  ;;  %9357 = vmatprep.subr.bf16.mxu1 %v4166_v59  ;;  %v12726_v53 = vpack.i.bf16 %v12715_v34, %v12709_v9 }
 0x401   :  { %17717 = vst [vmem:[#allocation36_spill] sm:$0xff] %v12722_v6  ;;  %v12728_v26 = vpack.c.bf16 %v1503_v36, %v1499_v43  ;;  %v2272_v56 = vpop.f32.mrb[15].mxu1  ;;  %v12730_v3 = vpop.permute.xlu1 %3158  ;;  %8372 = vmatmul.mubr.msk.f32.gmra.mrb[142].mxu0 %vm85_vm0, %v12550_v47  ;;  %2438 = vmax.xlane.f32.xlu0 %v2437_v15 }
 0x402   :  { %17718 = vst [vmem:[#allocation38_spill] sm:$0xff] %v12726_v53  ;;  %v12735_v37 = vadd.f32 %v2272_v56, %v12718_v0  ;;  %8373 = vmatprep.mubr.msk.f32.mxu0 %vm85_vm0, %v12522_v31 }
 0x403   :  { %17719 = vst [vmem:[#allocation41_spill] sm:$0xff] %v12728_v26  ;;  %v12739_v59 = vpop.f32.mrb[16].mxu1 }
 0x404   :  { %17720 = vst [vmem:[#allocation45_spill] sm:$0xff] %v12735_v37  ;;  %17721 = vst [vmem:[#allocation42_spill] sm:$0xff] %v12739_v59  ;;  %v12741_v44 = vpop.f32.mrb[17].mxu1  ;;  %v2440_v36 = vmax.f32 %v12722_v6, %v12735_v37 }
 0x405   :  { %v12745_v43 = vpop.permute.xlu1 %3162  ;;  %v12747_v26 = vpop.f32.mrb[104].mxu0  ;;  %8374 = vmatmul.mubr.msk.f32.gmra.mrb[144].mxu0 %vm85_vm0, %v12522_v31 }
 0x406   :  { %17722 = vst [vmem:[#allocation46_spill] sm:$0xff] %v12747_v26  ;;  %2441 = vmax.xlane.f32.xlu1 %v2440_v36  ;;  %v1509_v47 = vpop.f32.mrb[105].mxu0  ;;  %8375 = vmatprep.mubr.msk.f32.mxu0 %vm85_vm0, %v12558_v32 }
 0x407   :  { %v12753_v56 = vpop.f32.mrb[106].mxu0  ;;  %v12755_v15 = vpop.f32.mrb[18].mxu1 }
 0x408   :  { %17723 = vst [vmem:[#allocation80_spill] sm:$0xff] %v12753_v56  ;;  %17724 = vst [vmem:[#allocation81_spill] sm:$0xff] %v12755_v15  ;;  %v1513_v9 = vpop.f32.mrb[107].mxu0  ;;  %v12759_v34 = vpack.i.bf16 %v12753_v56, %v12747_v26  ;;  %v12763_v51 = vpop.f32.mrb[19].mxu1 }
 0x409   :  { %v12761_v53 = vpack.c.bf16 %v1513_v9, %v1509_v47  ;;  %v12765_v11 = vpop.permute.xlu1 %3166  ;;  %8376 = vmatmul.mubr.msk.f32.gmra.mrb[146].mxu0 %vm85_vm0, %v12558_v32  ;;  %v12781_v9 = vpop.permute.xlu0 %4167 }
 0x40a   :  { %17725 = vst [vmem:[#allocation82_spill] sm:$0xff] %v12759_v34  ;;  %8377 = vmatprep.mubr.msk.f32.mxu0 %vm85_vm0, %v12526_v14  ;;  %17729 = vst [vmem:[#allocation86_spill] sm:$0xff] %v12781_v9 }
 0x40b   :  { %17726 = vst [vmem:[#allocation83_spill] sm:$0xff] %v12761_v53  ;;  %v12771_v31 = vpop.f32.mrb[20].mxu1 }
 0x40c   :  { %17727 = vst [vmem:[#allocation84_spill] sm:$0xff] %v12771_v31  ;;  %v12773_v36 = vpop.f32.mrb[21].mxu1 }
 0x40d   :  { %v12775_v4 = vpop.permute.xlu1 %3170  ;;  %v12777_v26 = vpop.f32.mrb[108].mxu0  ;;  %8378 = vmatmul.mubr.msk.f32.gmra.mrb[148].mxu0 %vm85_vm0, %v12526_v14 }
 0x40e   :  { %17728 = vst [vmem:[#allocation85_spill] sm:$0xff] %v12777_v26  ;;  %v1519_v47 = vpop.f32.mrb[109].mxu0  ;;  %8379 = vmatprep.mubr.msk.f32.mxu0 %vm85_vm0, %v12572_v41 }
 0x40f   :  { %v12785_v32 = vpop.f32.mrb[110].mxu0  ;;  %v12787_v53 = vpop.f32.mrb[22].mxu1 }
 0x410   :  { %17730 = vst [vmem:[#allocation87_spill] sm:$0xff] %v12785_v32  ;;  %v1523_v56 = vpop.f32.mrb[111].mxu0  ;;  %v12789_v34 = vpop.f32.mrb[23].mxu1  ;;  %v12793_v17 = vpack.i.bf16 %v12785_v32, %v12777_v26 }
 0x411   :  { %v12795_v45 = vpack.c.bf16 %v1523_v56, %v1519_v47  ;;  %v12797_v14 = vpop.permute.xlu1 %4149  ;;  %8380 = vmatmul.mubr.msk.f32.gmra.mrb[150].mxu0 %vm85_vm0, %v12572_v41  ;;  %v12815_v47 = vpop.permute.xlu0 %4169 }
 0x412   :  { %17731 = vst [vmem:[#allocation88_spill] sm:$0xff] %v12793_v17  ;;  %17733 = vst [vmem:[#allocation90_spill] sm:$0xff] %v12797_v14  ;;  %8381 = vmatprep.mubr.msk.f32.mxu0 %vm85_vm0, %v12534_v46  ;;  %8422 = vmatpush3.bf16.msra.mxu0 %v12797_v14 }
 0x413   :  { %17732 = vst [vmem:[#allocation89_spill] sm:$0xff] %v12795_v45  ;;  %v12804_v35 = vpop.f32.mrb[24].mxu1  ;;  %8423 = vmatprep.subr.bf16.mxu0 %v12781_v9  ;;  %17736 = vst [vmem:[#allocation93_spill] sm:$0xff] %v12815_v47 }
 0x414   :  { %v12807_v57 = vpop.f32.mrb[25].mxu1 }
 0x415   :  { %v12809_v26 = vpop.permute.xlu1 %4151  ;;  %v12811_v56 = vpop.f32.mrb[112].mxu0  ;;  %8382 = vmatmul.mubr.msk.f32.gmra.mrb[152].mxu0 %vm85_vm0, %v12534_v46 }
 0x416   :  { %17734 = vst [vmem:[#allocation91_spill] sm:$0xff] %v12809_v26  ;;  %17735 = vst [vmem:[#allocation92_spill] sm:$0xff] %v12811_v56  ;;  %v1529_v41 = vpop.f32.mrb[113].mxu0  ;;  %8383 = vmatprep.mubr.msk.f32.mxu0 %vm85_vm0, %v12591_v16  ;;  %8424 = vmatpush3.bf16.msra.mxu0 %v12809_v26 }
 0x417   :  { %v12820_v45 = vpop.f32.mrb[114].mxu0  ;;  %v12822_v32 = vpop.f32.mrb[26].mxu1  ;;  %8425 = vmatprep.subr.bf16.mxu0 %v12815_v47 }
 0x418   :  { %17737 = vst [vmem:[#allocation94_spill] sm:$0xff] %v12820_v45  ;;  %v1533_v17 = vpop.f32.mrb[115].mxu0  ;;  %v12825_v9 = vpop.f32.mrb[27].mxu1  ;;  %v12829_v46 = vpack.i.bf16 %v12820_v45, %v12811_v56 }
 0x419   :  { %v12831_v14 = vpack.c.bf16 %v1533_v17, %v1529_v41  ;;  %8384 = vmatmul.mubr.msk.f32.gmra.mrb[154].mxu0 %vm85_vm0, %v12591_v16 }
 0x41a   :  { %17738 = vst [vmem:[#allocation95_spill] sm:$0xff] %v12829_v46  ;;  %8385 = vmatprep.mubr.msk.f32.mxu0 %vm85_vm0, %v12545_v40 }
 0x41b   :  { %17739 = vst [vmem:[#allocation96_spill] sm:$0xff] %v12831_v14  ;;  %v12837_v26 = vpop.f32.mrb[28].mxu1 }
 0x41c   :  { %v12839_v2 = vpop.f32.mrb[29].mxu1 }
 0x41d   :  { %8386 = vmatmul.mubr.msk.f32.gmra.mrb[156].mxu0 %vm85_vm0, %v12545_v40 }
 0x41e   :  { %8387 = vmatprep.mubr.msk.f32.mxu0 %vm85_vm0, %v12610_v10 }
 0x41f   :  { %v12845_v56 = vpop.f32.mrb[30].mxu1 }
 0x420   :  { %v12847_v17 = vpop.f32.mrb[31].mxu1 }
 0x421   :  { %8388 = vmatmul.mubr.msk.f32.gmra.mrb[158].mxu0 %vm85_vm0, %v12610_v10 }
 0x422   :  { %8389 = vmatprep.mubr.msk.f32.mxu0 %vm85_vm0, %v12554_v29 }
 0x423   :  { %v12853_v16 = vpop.f32.mrb[32].mxu1 }
 0x424   :  { %v12855_v41 = vpop.f32.mrb[33].mxu1 }
 0x425   :  { %8390 = vmatmul.mubr.msk.f32.gmra.mrb[160].mxu0 %vm85_vm0, %v12554_v29 }
 0x426   :  { %8391 = vmatprep.mubr.msk.f32.mxu0 %vm85_vm0, %v12637_v18 }
 0x427   :  { %v12861_v40 = vpop.f32.mrb[34].mxu1 }
 0x428   :  { %v12863_v14 = vpop.f32.mrb[35].mxu1 }
 0x429   :  { %8392 = vmatmul.mubr.msk.f32.gmra.mrb[162].mxu0 %vm85_vm0, %v12637_v18 }
 0x42a   :  { %8393 = vmatprep.mubr.msk.f32.mxu0 %vm85_vm0, %v12563_v21 }
 0x42b   :  { %v12869_v10 = vpop.f32.mrb[36].mxu1 }
 0x42c   :  { %v12871_v45 = vpop.f32.mrb[37].mxu1 }
 0x42d   :  { %8394 = vmatmul.mubr.msk.f32.gmra.mrb[164].mxu0 %vm85_vm0, %v12563_v21 }
 0x42e   :  { %8395 = vmatprep.mubr.msk.f32.mxu0 %vm85_vm0, %v12660_v24 }
 0x42f   :  { %v12877_v29 = vpop.f32.mrb[38].mxu1 }
 0x430   :  { %v12879_v46 = vpop.f32.mrb[39].mxu1 }
 0x431   :  { %8396 = vmatmul.mubr.msk.f32.gmra.mrb[166].mxu0 %vm85_vm0, %v12660_v24 }
 0x432   :  { %8397 = vmatprep.mubr.msk.f32.mxu0 %vm85_vm0, %v12580_v48 }
 0x433   :  { %v12885_v18 = vpop.f32.mrb[40].mxu1 }
 0x434   :  { %v12887_v47 = vpop.f32.mrb[41].mxu1 }
 0x435   :  { %17740 = vst [vmem:[#allocation97_spill] sm:$0xff] %v12887_v47  ;;  %8398 = vmatmul.mubr.msk.f32.gmra.mrb[168].mxu0 %vm85_vm0, %v12580_v48 }
 0x436   :  { %v12891_v21 = vpop.f32.mrb[116].mxu0  ;;  %8399 = vmatprep.mubr.msk.f32.mxu0 %vm85_vm0, %v12686_v22 }
 0x437   :  { %17741 = vst [vmem:[#allocation98_spill] sm:$0xff] %v12891_v21  ;;  %v1539_v37 = vpop.f32.mrb[117].mxu0  ;;  %v12895_v6 = vpop.f32.mrb[42].mxu1 }
 0x438   :  { %v12897_v39 = vpop.f32.mrb[118].mxu0  ;;  %v12899_v24 = vpop.f32.mrb[43].mxu1 }
 0x439   :  { %17742 = vst [vmem:[#allocation99_spill] sm:$0xff] %v12897_v39  ;;  %v1543_v19 = vpop.f32.mrb[119].mxu0  ;;  %8400 = vmatmul.mubr.msk.f32.gmra.mrb[170].mxu0 %vm85_vm0, %v12686_v22  ;;  %v12905_v55 = vpack.i.bf16 %v12897_v39, %v12891_v21 }
 0x43a   :  { %v12907_v48 = vpack.c.bf16 %v1543_v19, %v1539_v37  ;;  %8401 = vmatprep.mubr.msk.f32.mxu0 %vm85_vm0, %v12599_v60 }
 0x43b   :  { %17743 = vst [vmem:[#allocation100_spill] sm:$0xff] %v12905_v55  ;;  %v12911_v63 = vpop.f32.mrb[44].mxu1 }
 0x43c   :  { %17744 = vst [vmem:[#allocation101_spill] sm:$0xff] %v12907_v48  ;;  %v12913_v38 = vpop.f32.mrb[45].mxu1 }
 0x43d   :  { %17745 = vst [vmem:[#allocation102_spill] sm:$0xff] %v12913_v38  ;;  %8402 = vmatmul.mubr.msk.f32.gmra.mrb[172].mxu0 %vm85_vm0, %v12599_v60 }
 0x43e   :  { %8403 = vmatprep.mubr.msk.f32.mxu0 %vm85_vm0, %v12707_v54 }
 0x43f   :  { %v12919_v22 = vpop.f32.mrb[46].mxu1 }
 0x440   :  { %v12921_v5 = vpop.f32.mrb[47].mxu1 }
 0x441   :  { %8404 = vmatmul.mubr.msk.f32.gmra.mrb[174].mxu0 %vm85_vm0, %v12707_v54 }
 0x442   :  { %8405 = vmatprep.mubr.msk.f32.mxu0 %vm85_vm0, %v12620_v12 }
 0x443   :  { %v12927_v37 = vpop.f32.mrb[48].mxu1 }
 0x444   :  { %v12929_v19 = vpop.f32.mrb[49].mxu1 }
 0x445   :  { %17746 = vst [vmem:[#allocation103_spill] sm:$0xff] %v12929_v19  ;;  %8406 = vmatmul.mubr.msk.f32.gmra.mrb[176].mxu0 %vm85_vm0, %v12620_v12 }
 0x446   :  { %8407 = vmatprep.mubr.msk.f32.mxu0 %vm85_vm0, %v12730_v3 }
 0x447   :  { %v12935_v60 = vpop.f32.mrb[50].mxu1 }
 0x448   :  { %v12937_v48 = vpop.f32.mrb[51].mxu1 }
 0x449   :  { %8408 = vmatmul.mubr.msk.f32.gmra.mrb[178].mxu0 %vm85_vm0, %v12730_v3 }
 0x44a   :  { %8409 = vmatprep.mubr.msk.f32.mxu0 %vm85_vm0, %v12649_v42 }
 0x44b   :  { %v12943_v54 = vpop.f32.mrb[52].mxu1 }
 0x44c   :  { %v12945_v21 = vpop.f32.mrb[53].mxu1 }
 0x44d   :  { %17747 = vst [vmem:[#allocation104_spill] sm:$0xff] %v12945_v21  ;;  %8410 = vmatmul.mubr.msk.f32.gmra.mrb[180].mxu0 %vm85_vm0, %v12649_v42 }
 0x44e   :  { %8411 = vmatprep.mubr.msk.f32.mxu0 %vm85_vm0, %v12745_v43 }
 0x44f   :  { %v12951_v12 = vpop.f32.mrb[54].mxu1 }
 0x450   :  { %v12953_v39 = vpop.f32.mrb[55].mxu1 }
 0x451   :  { %8412 = vmatmul.mubr.msk.f32.gmra.mrb[182].mxu0 %vm85_vm0, %v12745_v43 }
 0x452   :  { %8413 = vmatprep.mubr.msk.f32.mxu0 %vm85_vm0, %v12670_v52 }
 0x453   :  { %v12959_v3 = vpop.f32.mrb[56].mxu1 }
 0x454   :  { %v12961_v55 = vpop.f32.mrb[57].mxu1 }
 0x455   :  { %17748 = vst [vmem:[#allocation105_spill] sm:$0xff] %v12961_v55  ;;  %8414 = vmatmul.mubr.msk.f32.gmra.mrb[184].mxu0 %vm85_vm0, %v12670_v52 }
 0x456   :  { %8415 = vmatprep.mubr.msk.f32.mxu0 %vm85_vm0, %v12765_v11 }
 0x457   :  { %v12967_v42 = vpop.f32.mrb[58].mxu1 }
 0x458   :  { %17749 = vst [vmem:[#allocation106_spill] sm:$0xff] %v12967_v42  ;;  %v12969_v28 = vpop.f32.mrb[59].mxu1 }
 0x459   :  { %17750 = vst [vmem:[#allocation107_spill] sm:$0xff] %v12969_v28  ;;  %8416 = vmatmul.mubr.msk.f32.gmra.mrb[186].mxu0 %vm85_vm0, %v12765_v11 }
 0x45a   :  { %8417 = vmatprep.mubr.msk.f32.mxu0 %vm85_vm0, %v12698_v50 }
 0x45b   :  { %v12975_v43 = vpop.f32.mrb[60].mxu1 }
 0x45c   :  { %v12977_v1 = vpop.f32.mrb[61].mxu1 }
 0x45d   :  { %17751 = vst [vmem:[#allocation108_spill] sm:$0xff] %v12977_v1  ;;  %8418 = vmatmul.mubr.msk.f32.gmra.mrb[188].mxu0 %vm85_vm0, %v12698_v50 }
 0x45e   :  { %8419 = vmatprep.mubr.msk.f32.mxu0 %vm85_vm0, %v12775_v4 }
 0x45f   :  { %v12983_v52 = vpop.f32.mrb[62].mxu1 }
 0x460   :  { %17752 = vst [vmem:[#allocation109_spill] sm:$0xff] %v12983_v52  ;;  %v12985_v20 = vpop.f32.mrb[63].mxu1 }
 0x461   :  { %17753 = vst [vmem:[#allocation110_spill] sm:$0xff] %v12985_v20  ;;  %8420 = vmatmul.mubr.msk.f32.gmra.mrb[190].mxu0 %vm85_vm0, %v12775_v4 }
 0x46b   :  { %v12989_v11 = vpop.f32.mrb[120].mxu0 }
 0x46c   :  { %17754 = vst [vmem:[#allocation111_spill] sm:$0xff] %v12989_v11  ;;  %v1549_v33 = vpop.f32.mrb[121].mxu0 }
 0x46d   :  { %v12991_v49 = vpop.f32.mrb[122].mxu0 }
 0x46e   :  { %17755 = vst [vmem:[#allocation112_spill] sm:$0xff] %v12991_v49  ;;  %v1553_v30 = vpop.f32.mrb[123].mxu0  ;;  %v12995_v61 = vpack.i.bf16 %v12991_v49, %v12989_v11 }
 0x46f   :  { %v12997_v50 = vpack.c.bf16 %v1553_v30, %v1549_v33 }
 0x470   :  { %17756 = vst [vmem:[#allocation113_spill] sm:$0xff] %v12995_v61 }
 0x471   :  { %17757 = vst [vmem:[#allocation114_spill] sm:$0xff] %v12997_v50 }
 0x4a0   :  { %v12999_v13 = vpop.f32.mrb[124].mxu0 }
 0x4a1   :  { %17758 = vst [vmem:[#allocation115_spill] sm:$0xff] %v12999_v13  ;;  %v1559_v58 = vpop.f32.mrb[125].mxu0 }
 0x4a2   :  { %v13001_v25 = vpop.f32.mrb[126].mxu0 }
 0x4a3   :  { %17759 = vst [vmem:[#allocation116_spill] sm:$0xff] %v13001_v25  ;;  %v1563_v20 = vpop.f32.mrb[127].mxu0  ;;  %v13005_v4 = vpack.i.bf16 %v13001_v25, %v12999_v13  ;;  %v1575_v13 = vadd.s32 64, %v12538_v23  ;;  %v1576_v25 = vadd.s32 72, %v12538_v23 }
 0x4a4   :  { %v13007_v52 = vpack.c.bf16 %v1563_v20, %v1559_v58 }
 0x4a5   :  { %17760 = vst [vmem:[#allocation117_spill] sm:$0xff] %v13005_v4 }
 0x4a6   :  { %17761 = vst [vmem:[#allocation118_spill] sm:$0xff] %v13007_v52  ;;  %v1619_v52 = vsub.s32 %v12541_v62, %v1575_v13 }
 0x4a8   :  { %vm1747_vm10 = vcmp.lt.s32.totalorder %v1619_v52, 128 }
 0x4b8   :  { %v13009_v28 = vpop.f32.mrb[128].mxu0 }
 0x4b9   :  { %17762 = vst [vmem:[#allocation119_spill] sm:$0xff] %v13009_v28  ;;  %v13011_v42 = vpop.f32.mrb[129].mxu0 }
 0x4ba   :  { %17763 = vst [vmem:[#allocation120_spill] sm:$0xff] %v13011_v42 }
 0x4bc   :  { %v13013_v11 = vpop.f32.mrb[130].mxu0 }
 0x4bd   :  { %17764 = vst [vmem:[#allocation121_spill] sm:$0xff] %v13013_v11  ;;  %v13015_v30 = vpop.f32.mrb[131].mxu0  ;;  %v1579_v11 = vadd.s32 96, %v12538_v23 }
 0x4be   :  { %17765 = vst [vmem:[#allocation122_spill] sm:$0xff] %v13015_v30 }
 0x4c0   :  { %v13017_v33 = vpop.f32.mrb[132].mxu0 }
 0x4c1   :  { %17766 = vst [vmem:[#allocation123_spill] sm:$0xff] %v13017_v33  ;;  %v13019_v50 = vpop.f32.mrb[133].mxu0  ;;  %v1621_v33 = vsub.s32 %v12541_v62, %v1576_v25 }
 0x4c2   :  { %17767 = vst [vmem:[#allocation124_spill] sm:$0xff] %v13019_v50  ;;  %v1577_v50 = vadd.s32 80, %v12538_v23 }
 0x4c3   :  { %vm1749_vm11 = vcmp.lt.s32.totalorder %v1621_v33, 128 }
 0x4c4   :  { %v13021_v49 = vpop.f32.mrb[134].mxu0  ;;  %v1623_v13 = vsub.s32 %v12541_v62, %v1577_v50 }
 0x4c5   :  { %17768 = vst [vmem:[#allocation125_spill] sm:$0xff] %v13021_v49  ;;  %v13023_v61 = vpop.f32.mrb[135].mxu0  ;;  %v13041_v49 = vsel %vm1747_vm10, 0.0, %v17710_v7 }
 0x4c6   :  { %17769 = vst [vmem:[#allocation126_spill] sm:$0xff] %v13023_v61  ;;  %17774 = vst [vmem:[#allocation131_spill] sm:$0xff] %v13041_v49  ;;  %v13050_v52 = vadd.f32 %v12741_v44, %v13041_v49  ;;  %v13057_v61 = vsel %vm1749_vm11, 0.0, %v17710_v7  ;;  %vm1751_vm12 = vcmp.lt.s32.totalorder %v1623_v13, 128 }
 0x4c7   :  { %17777 = vst [vmem:[#allocation134_spill] sm:$0xff] %v13057_v61  ;;  %v13066_v44 = vadd.f32 %v12763_v51, %v13057_v61 }
 0x4c8   :  { %v13026_v58 = vpop.f32.mrb[136].mxu0  ;;  %17776 = vst [vmem:[#allocation133_spill] sm:$0xff] %v13050_v52  ;;  %v2443_v13 = vmax.f32 %v12739_v59, %v13050_v52 }
 0x4c9   :  { %17770 = vst [vmem:[#allocation127_spill] sm:$0xff] %v13026_v58  ;;  %v13028_v20 = vpop.f32.mrb[137].mxu0  ;;  %17779 = vst [vmem:[#allocation136_spill] sm:$0xff] %v13066_v44 }
 0x4ca   :  { %17771 = vst [vmem:[#allocation128_spill] sm:$0xff] %v13028_v20  ;;  %v1578_v20 = vadd.s32 88, %v12538_v23 }
 0x4cc   :  { %v13032_v4 = vpop.f32.mrb[138].mxu0  ;;  %v1625_v50 = vsub.s32 %v12541_v62, %v1578_v20  ;;  %v13075_v20 = vsel %vm1751_vm12, 0.0, %v17710_v7 }
 0x4cd   :  { %17772 = vst [vmem:[#allocation129_spill] sm:$0xff] %v13032_v4  ;;  %v13034_v28 = vpop.f32.mrb[139].mxu0  ;;  %17780 = vst [vmem:[#allocation137_spill] sm:$0xff] %v13075_v20 }
 0x4ce   :  { %17773 = vst [vmem:[#allocation130_spill] sm:$0xff] %v13034_v28  ;;  %vm1753_vm13 = vcmp.lt.s32.totalorder %v1625_v50, 128  ;;  %v2446_v50 = vmax.f32 %v12755_v15, %v13066_v44 }
 0x4d0   :  { %v13038_v42 = vpop.f32.mrb[140].mxu0 }
 0x4d1   :  { %v3468_v58 = vpop.f32.mrb[141].mxu0 }
 0x4d2   :  { %v13046_v4 = vadd.f32 %v3468_v58, %v12696_v8 }
 0x4d4   :  { %17775 = vst [vmem:[#allocation132_spill] sm:$0xff] %v13046_v4  ;;  %v3639_v25 = vmax.f32 %v13038_v42, %v13046_v4  ;;  %v13054_v28 = vpop.f32.mrb[142].mxu0 }
 0x4d5   :  { %v3474_v33 = vpop.f32.mrb[143].mxu0 }
 0x4d6   :  { %v13062_v58 = vadd.f32 %v3474_v33, %v12718_v0  ;;  %3640 = vmax.xlane.f32.xlu0 %v3639_v25  ;;  %v1627_v33 = vsub.s32 %v12541_v62, %v1579_v11  ;;  %v1580_v25 = vadd.s32 104, %v12538_v23  ;;  %v13084_v0 = vadd.f32 %v12773_v36, %v13075_v20 }
 0x4d7   :  { %v13093_v11 = vsel %vm1753_vm13, 0.0, %v17710_v7 }
 0x4d8   :  { %17778 = vst [vmem:[#allocation135_spill] sm:$0xff] %v13062_v58  ;;  %v3642_v8 = vmax.f32 %v13054_v28, %v13062_v58  ;;  %v13070_v30 = vpop.f32.mrb[144].mxu0  ;;  %17781 = vst [vmem:[#allocation138_spill] sm:$0xff] %v13084_v0  ;;  %vm1755_vm14 = vcmp.lt.s32.totalorder %v1627_v33, 128  ;;  %v2449_v33 = vmax.f32 %v12771_v31, %v13084_v0 }
 0x4d9   :  { %v3480_v4 = vpop.f32.mrb[145].mxu0  ;;  %17782 = vst [vmem:[#allocation139_spill] sm:$0xff] %v13093_v11 }
 0x4da   :  { %v13080_v51 = vadd.f32 %v3480_v4, %v13041_v49  ;;  %3643 = vmax.xlane.f32.xlu1 %v3642_v8  ;;  %2444 = vmax.xlane.f32.xlu0 %v2443_v13  ;;  %v1629_v8 = vsub.s32 %v12541_v62, %v1580_v25  ;;  %v1581_v4 = vadd.s32 112, %v12538_v23  ;;  %v13102_v13 = vadd.f32 %v12789_v34, %v13093_v11 }
 0x4db   :  { %v13111_v25 = vsel %vm1755_vm14, 0.0, %v17710_v7 }
 0x4dc   :  { %v3645_v52 = vmax.f32 %v13070_v30, %v13080_v51  ;;  %v13088_v59 = vpop.f32.mrb[146].mxu0  ;;  %17784 = vst [vmem:[#allocation141_spill] sm:$0xff] %v13111_v25  ;;  %vm1757_vm15 = vcmp.lt.s32.totalorder %v1629_v8, 128  ;;  %v2452_v8 = vmax.f32 %v12787_v53, %v13102_v13 }
 0x4dd   :  { %v3486_v58 = vpop.f32.mrb[147].mxu0 }
 0x4de   :  { %v13098_v36 = vadd.f32 %v3486_v58, %v13057_v61  ;;  %2447 = vmax.xlane.f32.xlu1 %v2446_v50  ;;  %3646 = vmax.xlane.f32.xlu0 %v3645_v52  ;;  %v1631_v58 = vsub.s32 %v12541_v62, %v1581_v4  ;;  %v1582_v52 = vadd.s32 120, %v12538_v23  ;;  %v13120_v50 = vadd.f32 %v12807_v57, %v13111_v25 }
 0x4df   :  { %v13129_v4 = vsel %vm1757_vm15, 0.0, %v17710_v7 }
 0x4e0   :  { %v3648_v49 = vmax.f32 %v13088_v59, %v13098_v36  ;;  %v13106_v44 = vpop.f32.mrb[148].mxu0  ;;  %17786 = vst [vmem:[#allocation143_spill] sm:$0xff] %v13120_v50  ;;  %17787 = vst [vmem:[#allocation144_spill] sm:$0xff] %v13129_v4  ;;  %vm1759_vm2 = vcmp.lt.s32.totalorder %v1631_v58, 128  ;;  %v2455_v58 = vmax.f32 %v12804_v35, %v13120_v50 }
 0x4e1   :  { %17783 = vst [vmem:[#allocation140_spill] sm:$0xff] %v13106_v44  ;;  %v3492_v15 = vpop.f32.mrb[149].mxu0 }
 0x4e2   :  { %v13116_v34 = vadd.f32 %v3492_v15, %v13075_v20  ;;  %3649 = vmax.xlane.f32.xlu1 %v3648_v49  ;;  %2450 = vmax.xlane.f32.xlu0 %v2449_v33  ;;  %v1633_v49 = vsub.s32 %v12541_v62, %v1582_v52  ;;  %v1583_v15 = vadd.s32 128, %v12538_v23  ;;  %v13138_v33 = vadd.f32 %v12825_v9, %v13129_v4 }
 0x4e3   :  { %v13147_v62 = vsel %vm1759_vm2, 0.0, %v17710_v7 }
 0x4e4   :  { %17785 = vst [vmem:[#allocation142_spill] sm:$0xff] %v13116_v34  ;;  %v3651_v61 = vmax.f32 %v13106_v44, %v13116_v34  ;;  %v13124_v0 = vpop.f32.mrb[150].mxu0  ;;  %17789 = vst [vmem:[#allocation146_spill] sm:$0xff] %v13147_v62  ;;  %vm1761_vm3 = vcmp.lt.s32.totalorder %v1633_v49, 128  ;;  %v2458_v49 = vmax.f32 %v12822_v32, %v13138_v33 }
 0x4e5   :  { %v3498_v31 = vpop.f32.mrb[151].mxu0 }
 0x4e6   :  { %v13134_v57 = vadd.f32 %v3498_v31, %v13093_v11  ;;  %2453 = vmax.xlane.f32.xlu1 %v2452_v8  ;;  %3652 = vmax.xlane.f32.xlu0 %v3651_v61  ;;  %v1634_v31 = vsub.s32 %v12528_v27, %v1583_v15  ;;  %v1584_v61 = vadd.s32 136, %v12538_v23  ;;  %v13156_v8 = vadd.f32 %v12839_v2, %v13147_v62 }
 0x4e7   :  { %v13165_v15 = vsel %vm1761_vm3, 0.0, %v17710_v7 }
 0x4e8   :  { %v3654_v20 = vmax.f32 %v13124_v0, %v13134_v57  ;;  %v13142_v34 = vpop.f32.mrb[152].mxu0  ;;  %17792 = vst [vmem:[#allocation149_spill] sm:$0xff] %v13165_v15  ;;  %vm1698_vm4 = vcmp.ge.s32.totalorder %v1634_v31, 4294967168  ;;  %v2461_v31 = vmax.f32 %v12837_v26, %v13156_v8 }
 0x4e9   :  { %17788 = vst [vmem:[#allocation145_spill] sm:$0xff] %v13142_v34  ;;  %v3504_v52 = vpop.f32.mrb[153].mxu0 }
 0x4ea   :  { %v13152_v9 = vadd.f32 %v3504_v52, %v13111_v25  ;;  %3655 = vmax.xlane.f32.xlu1 %v3654_v20  ;;  %2456 = vmax.xlane.f32.xlu0 %v2455_v58  ;;  %v1636_v20 = vsub.s32 %v12528_v27, %v1584_v61  ;;  %v1585_v58 = vadd.s32 144, %v12538_v23  ;;  %v13174_v52 = vadd.f32 %v12847_v17, %v13165_v15 }
 0x4eb   :  { %v13183_v61 = vsel %vm1698_vm4, 0.0, %v17710_v7 }
 0x4ec   :  { %17790 = vst [vmem:[#allocation147_spill] sm:$0xff] %v13152_v9  ;;  %v3657_v11 = vmax.f32 %v13142_v34, %v13152_v9  ;;  %v13160_v44 = vpop.f32.mrb[154].mxu0  ;;  %17795 = vst [vmem:[#allocation152_spill] sm:$0xff] %v13183_v61  ;;  %vm1700_vm5 = vcmp.ge.s32.totalorder %v1636_v20, 4294967168  ;;  %v2464_v20 = vmax.f32 %v12845_v56, %v13174_v52 }
 0x4ed   :  { %17791 = vst [vmem:[#allocation148_spill] sm:$0xff] %v13160_v44  ;;  %v3510_v50 = vpop.f32.mrb[155].mxu0 }
 0x4ee   :  { %v13170_v2 = vadd.f32 %v3510_v50, %v13129_v4  ;;  %2459 = vmax.xlane.f32.xlu1 %v2458_v49  ;;  %3658 = vmax.xlane.f32.xlu0 %v3657_v11  ;;  %v1638_v50 = vsub.s32 %v12528_v27, %v1585_v58  ;;  %v1586_v11 = vadd.s32 152, %v12538_v23  ;;  %v13192_v49 = vadd.f32 %v12853_v16, %v13183_v61 }
 0x4ef   :  { %v13201_v58 = vsel %vm1700_vm5, 0.0, %v17710_v7 }
 0x4f0   :  { %17793 = vst [vmem:[#allocation150_spill] sm:$0xff] %v13170_v2  ;;  %v3660_v25 = vmax.f32 %v13160_v44, %v13170_v2  ;;  %v13178_v9 = vpop.f32.mrb[156].mxu0  ;;  %17798 = vst [vmem:[#allocation155_spill] sm:$0xff] %v13201_v58  ;;  %vm1702_vm6 = vcmp.ge.s32.totalorder %v1638_v50, 4294967168  ;;  %v2467_v50 = vmax.f32 %v13192_v49, %v12855_v41 }
 0x4f1   :  { %17794 = vst [vmem:[#allocation151_spill] sm:$0xff] %v13178_v9  ;;  %v3516_v34 = vpop.f32.mrb[157].mxu0 }
 0x4f2   :  { %v13188_v17 = vadd.f32 %v3516_v34, %v13147_v62  ;;  %3661 = vmax.xlane.f32.xlu1 %v3660_v25  ;;  %2462 = vmax.xlane.f32.xlu0 %v2461_v31  ;;  %v1640_v25 = vsub.s32 %v12528_v27, %v1586_v11  ;;  %v1587_v34 = vadd.s32 160, %v12538_v23  ;;  %v13210_v31 = vadd.f32 %v12861_v40, %v13201_v58 }
 0x4f3   :  { %v13217_v11 = vsel %vm1702_vm6, 0.0, %v17710_v7  ;;  %v1588_v40 = vadd.s32 168, %v12538_v23 }
 0x4f4   :  { %17796 = vst [vmem:[#allocation153_spill] sm:$0xff] %v13188_v17  ;;  %v3663_v4 = vmax.f32 %v13178_v9, %v13188_v17  ;;  %v13196_v2 = vpop.f32.mrb[158].mxu0  ;;  %17800 = vst [vmem:[#allocation157_spill] sm:$0xff] %v13217_v11  ;;  %vm1704_vm7 = vcmp.ge.s32.totalorder %v1640_v25, 4294967168 }
 0x4f5   :  { %17797 = vst [vmem:[#allocation154_spill] sm:$0xff] %v13196_v2  ;;  %v3522_v44 = vpop.f32.mrb[159].mxu0 }
 0x4f6   :  { %v13206_v16 = vadd.f32 %v3522_v44, %v13165_v15  ;;  %2465 = vmax.xlane.f32.xlu1 %v2464_v20  ;;  %3664 = vmax.xlane.f32.xlu0 %v3663_v4  ;;  %v1642_v4 = vsub.s32 %v12528_v27, %v1587_v34  ;;  %v13230_v15 = vadd.f32 %v12869_v10, %v13217_v11 }
 0x4f8   :  { %17799 = vst [vmem:[#allocation156_spill] sm:$0xff] %v13206_v16  ;;  %v3666_v62 = vmax.f32 %v13196_v2, %v13206_v16  ;;  %v3526_v17 = vpop.f32.mrb[160].mxu0  ;;  %vm1706_vm8 = vcmp.ge.s32.totalorder %v1642_v4, 4294967168 }
 0x4f9   :  { %v13220_v9 = vadd.f32 %v3526_v17, %v13183_v61  ;;  %v13222_v44 = vpop.f32.mrb[161].mxu0  ;;  %v2470_v17 = vmax.f32 %v13210_v31, %v12863_v14  ;;  %v13235_v61 = vsel %vm1704_vm7, 0.0, %v17710_v7 }
 0x4fa   :  { %17802 = vst [vmem:[#allocation159_spill] sm:$0xff] %v13222_v44  ;;  %3667 = vmax.xlane.f32.xlu1 %v3666_v62  ;;  %2468 = vmax.xlane.f32.xlu0 %v2467_v50  ;;  %17803 = vst [vmem:[#allocation160_spill] sm:$0xff] %v13235_v61  ;;  %v1644_v62 = vsub.s32 %v12528_v27, %v1588_v40  ;;  %v1589_v50 = vadd.s32 176, %v12538_v23 }
 0x4fb   :  { %17801 = vst [vmem:[#allocation158_spill] sm:$0xff] %v13220_v9  ;;  %v3669_v20 = vmax.f32 %v13220_v9, %v13222_v44  ;;  %v13248_v44 = vadd.f32 %v12877_v29, %v13235_v61 }
 0x4fc   :  { %v3532_v16 = vpop.f32.mrb[162].mxu0  ;;  %vm1708_vm9 = vcmp.ge.s32.totalorder %v1644_v62, 4294967168 }
 0x4fd   :  { %v13238_v25 = vadd.f32 %v3532_v16, %v13201_v58  ;;  %v13240_v34 = vpop.f32.mrb[163].mxu0  ;;  %v2473_v16 = vmax.f32 %v13230_v15, %v12871_v45  ;;  %v13253_v58 = vsel %vm1706_vm8, 0.0, %v17710_v7 }
 0x4fe   :  { %17805 = vst [vmem:[#allocation162_spill] sm:$0xff] %v13240_v34  ;;  %2471 = vmax.xlane.f32.xlu1 %v2470_v17  ;;  %3670 = vmax.xlane.f32.xlu0 %v3669_v20  ;;  %17806 = vst [vmem:[#allocation163_spill] sm:$0xff] %v13253_v58  ;;  %v1646_v20 = vsub.s32 %v12528_v27, %v1589_v50  ;;  %v1590_v17 = vadd.s32 184, %v12538_v23 }
 0x4ff   :  { %17804 = vst [vmem:[#allocation161_spill] sm:$0xff] %v13238_v25  ;;  %v3672_v10 = vmax.f32 %v13238_v25, %v13240_v34  ;;  %v13266_v34 = vadd.f32 %v12885_v18, %v13253_v58 }
 0x500   :  { %v3538_v9 = vpop.f32.mrb[164].mxu0  ;;  %vm1710_vm10 = vcmp.ge.s32.totalorder %v1646_v20, 4294967168 }
 0x501   :  { %v13256_v4 = vadd.f32 %v3538_v9, %v13217_v11  ;;  %v13258_v40 = vpop.f32.mrb[165].mxu0  ;;  %v2476_v9 = vmax.f32 %v13248_v44, %v12879_v46  ;;  %v13271_v11 = vsel %vm1708_vm9, 0.0, %v17710_v7 }
 0x502   :  { %17808 = vst [vmem:[#allocation165_spill] sm:$0xff] %v13258_v40  ;;  %3673 = vmax.xlane.f32.xlu1 %v3672_v10  ;;  %2474 = vmax.xlane.f32.xlu0 %v2473_v16  ;;  %17809 = vst [vmem:[#allocation166_spill] sm:$0xff] %v13271_v11  ;;  %v1648_v10 = vsub.s32 %v12528_v27, %v1590_v17  ;;  %v1591_v16 = vadd.s32 192, %v12538_v23 }
 0x503   :  { %17807 = vst [vmem:[#allocation164_spill] sm:$0xff] %v13256_v4  ;;  %v3675_v29 = vmax.f32 %v13256_v4, %v13258_v40  ;;  %v13284_v40 = vadd.f32 %v12895_v6, %v13271_v11 }
 0x504   :  { %v3544_v25 = vpop.f32.mrb[166].mxu0  ;;  %vm1712_vm11 = vcmp.ge.s32.totalorder %v1648_v10, 4294967168 }
 0x505   :  { %v13274_v62 = vadd.f32 %v3544_v25, %v13235_v61  ;;  %v13276_v50 = vpop.f32.mrb[167].mxu0  ;;  %v2479_v25 = vmax.f32 %v13266_v34, %v12887_v47  ;;  %v13289_v61 = vsel %vm1710_vm10, 0.0, %v17710_v7 }
 0x506   :  { %17811 = vst [vmem:[#allocation168_spill] sm:$0xff] %v13276_v50  ;;  %2477 = vmax.xlane.f32.xlu1 %v2476_v9  ;;  %3676 = vmax.xlane.f32.xlu0 %v3675_v29  ;;  %17812 = vst [vmem:[#allocation169_spill] sm:$0xff] %v13289_v61  ;;  %v1650_v29 = vsub.s32 %v12528_v27, %v1591_v16  ;;  %v1592_v9 = vadd.s32 200, %v12538_v23 }
 0x507   :  { %17810 = vst [vmem:[#allocation167_spill] sm:$0xff] %v13274_v62  ;;  %v3678_v18 = vmax.f32 %v13274_v62, %v13276_v50  ;;  %v13302_v50 = vadd.f32 %v12911_v63, %v13289_v61  ;;  %v1593_v63 = vadd.s32 208, %v12538_v23 }
 0x508   :  { %v3550_v4 = vpop.f32.mrb[168].mxu0  ;;  %vm1714_vm12 = vcmp.ge.s32.totalorder %v1650_v29, 4294967168 }
 0x509   :  { %v13292_v20 = vadd.f32 %v3550_v4, %v13253_v58  ;;  %v13294_v17 = vpop.f32.mrb[169].mxu0  ;;  %17815 = vst [vmem:[#allocation172_spill] sm:$0xff] %v13302_v50  ;;  %v2482_v4 = vmax.f32 %v13284_v40, %v12899_v24  ;;  %v13307_v58 = vsel %vm1712_vm11, 0.0, %v17710_v7 }
 0x50a   :  { %17814 = vst [vmem:[#allocation171_spill] sm:$0xff] %v13294_v17  ;;  %3679 = vmax.xlane.f32.xlu1 %v3678_v18  ;;  %2480 = vmax.xlane.f32.xlu0 %v2479_v25  ;;  %17816 = vst [vmem:[#allocation173_spill] sm:$0xff] %v13307_v58  ;;  %v1652_v18 = vsub.s32 %v12528_v27, %v1592_v9 }
 0x50b   :  { %17813 = vst [vmem:[#allocation170_spill] sm:$0xff] %v13292_v20  ;;  %v3681_v6 = vmax.f32 %v13292_v20, %v13294_v17  ;;  %v13320_v17 = vadd.f32 %v12919_v22, %v13307_v58  ;;  %v1594_v22 = vadd.s32 216, %v12538_v23 }
 0x50c   :  { %v3556_v62 = vpop.f32.mrb[170].mxu0  ;;  %vm1716_vm13 = vcmp.ge.s32.totalorder %v1652_v18, 4294967168 }
 0x50d   :  { %v13310_v10 = vadd.f32 %v3556_v62, %v13271_v11  ;;  %v13312_v16 = vpop.f32.mrb[171].mxu0  ;;  %v2485_v62 = vmax.f32 %v13302_v50, %v12913_v38  ;;  %v13325_v11 = vsel %vm1714_vm12, 0.0, %v17710_v7 }
 0x50e   :  { %17818 = vst [vmem:[#allocation175_spill] sm:$0xff] %v13312_v16  ;;  %2483 = vmax.xlane.f32.xlu1 %v2482_v4  ;;  %3682 = vmax.xlane.f32.xlu0 %v3681_v6  ;;  %17819 = vst [vmem:[#allocation176_spill] sm:$0xff] %v13325_v11  ;;  %v1654_v6 = vsub.s32 %v12528_v27, %v1593_v63 }
 0x50f   :  { %17817 = vst [vmem:[#allocation174_spill] sm:$0xff] %v13310_v10  ;;  %v3684_v25 = vmax.f32 %v13310_v10, %v13312_v16  ;;  %v13338_v16 = vadd.f32 %v12927_v37, %v13325_v11  ;;  %v1595_v37 = vadd.s32 224, %v12538_v23 }
 0x510   :  { %v3562_v20 = vpop.f32.mrb[172].mxu0  ;;  %vm1718_vm14 = vcmp.ge.s32.totalorder %v1654_v6, 4294967168 }
 0x511   :  { %v13328_v29 = vadd.f32 %v3562_v20, %v13289_v61  ;;  %v13330_v9 = vpop.f32.mrb[173].mxu0  ;;  %17822 = vst [vmem:[#allocation179_spill] sm:$0xff] %v13338_v16  ;;  %v2488_v20 = vmax.f32 %v13320_v17, %v12921_v5  ;;  %v13343_v61 = vsel %vm1716_vm13, 0.0, %v17710_v7  ;;  %v13366_v6 = vsel %vm1718_vm14, 0.0, %v17710_v7 }
 0x512   :  { %17821 = vst [vmem:[#allocation178_spill] sm:$0xff] %v13330_v9  ;;  %3685 = vmax.xlane.f32.xlu1 %v3684_v25  ;;  %2486 = vmax.xlane.f32.xlu0 %v2485_v62  ;;  %17823 = vst [vmem:[#allocation180_spill] sm:$0xff] %v13343_v61  ;;  %v1656_v25 = vsub.s32 %v12528_v27, %v1594_v22  ;;  %v1597_v22 = vadd.s32 240, %v12538_v23 }
 0x513   :  { %17820 = vst [vmem:[#allocation177_spill] sm:$0xff] %v13328_v29  ;;  %v3687_v4 = vmax.f32 %v13328_v29, %v13330_v9  ;;  %v13356_v9 = vadd.f32 %v12935_v60, %v13343_v61  ;;  %17828 = vst [vmem:[#allocation185_spill] sm:$0xff] %v13366_v6  ;;  %v1658_v60 = vsub.s32 %v12528_v27, %v1595_v37 }
 0x514   :  { %v3568_v10 = vpop.f32.mrb[174].mxu0  ;;  %vm1720_vm15 = vcmp.ge.s32.totalorder %v1656_v25, 4294967168  ;;  %v1662_v37 = vsub.s32 %v12528_v27, %v1597_v22 }
 0x515   :  { %v13346_v18 = vadd.f32 %v3568_v10, %v13307_v58  ;;  %v13348_v63 = vpop.f32.mrb[175].mxu0  ;;  %v2491_v10 = vmax.f32 %v13338_v16, %v12929_v19  ;;  %v13384_v25 = vsel %vm1720_vm15, 0.0, %v17710_v7  ;;  %vm1722_vm2 = vcmp.ge.s32.totalorder %v1658_v60, 4294967168  ;;  %v17863_v19 = vld [vmem:[#allocation47_spill] sm:$0xff] }
 0x516   :  { %17825 = vst [vmem:[#allocation182_spill] sm:$0xff] %v13348_v63  ;;  %2489 = vmax.xlane.f32.xlu1 %v2488_v20  ;;  %3688 = vmax.xlane.f32.xlu0 %v3687_v4  ;;  %17832 = vst [vmem:[#allocation189_spill] sm:$0xff] %v13384_v25  ;;  %v13402_v60 = vsel %vm1722_vm2, 0.0, %v17710_v7  ;;  %vm1726_vm3 = vcmp.ge.s32.totalorder %v1662_v37, 4294967168 }
 0x517   :  { %17824 = vst [vmem:[#allocation181_spill] sm:$0xff] %v13346_v18  ;;  %v3690_v62 = vmax.f32 %v13346_v18, %v13348_v63  ;;  %17835 = vst [vmem:[#allocation192_spill] sm:$0xff] %v13402_v60 }
 0x518   :  { %v3574_v29 = vpop.f32.mrb[176].mxu0 }
 0x519   :  { %v13361_v58 = vadd.f32 %v3574_v29, %v13325_v11  ;;  %v13363_v4 = vpop.f32.mrb[177].mxu0  ;;  %v2494_v29 = vmax.f32 %v13356_v9, %v12937_v48  ;;  %v13376_v11 = vadd.f32 %v12943_v54, %v13366_v6 }
 0x51a   :  { %17827 = vst [vmem:[#allocation184_spill] sm:$0xff] %v13363_v4  ;;  %3691 = vmax.xlane.f32.xlu1 %v3690_v62  ;;  %2492 = vmax.xlane.f32.xlu0 %v2491_v10  ;;  %v1596_v62 = vadd.s32 232, %v12538_v23 }
 0x51b   :  { %17826 = vst [vmem:[#allocation183_spill] sm:$0xff] %v13361_v58  ;;  %v3693_v20 = vmax.f32 %v13361_v58, %v13363_v4  ;;  %17829 = vst [vmem:[#allocation186_spill] sm:$0xff] %v13376_v11  ;;  %v17860_v58 = vld [vmem:[#allocation2_spill] sm:$0xff] }
 0x51c   :  { %v3580_v63 = vpop.f32.mrb[178].mxu0 }
 0x51d   :  { %v13379_v18 = vadd.f32 %v3580_v63, %v13343_v61  ;;  %v13381_v2 = vpop.f32.mrb[179].mxu0  ;;  %v2497_v63 = vmax.f32 %v13376_v11, %v12945_v21  ;;  %v13394_v61 = vadd.f32 %v12951_v12, %v13384_v25  ;;  %v17862_v21 = vld [vmem:[#allocation15_spill] sm:$0xff] }
 0x51e   :  { %17831 = vst [vmem:[#allocation188_spill] sm:$0xff] %v13381_v2  ;;  %2495 = vmax.xlane.f32.xlu1 %v2494_v29  ;;  %3694 = vmax.xlane.f32.xlu0 %v3693_v20  ;;  %v1660_v20 = vsub.s32 %v12528_v27, %v1596_v62 }
 0x51f   :  { %17830 = vst [vmem:[#allocation187_spill] sm:$0xff] %v13379_v18  ;;  %v3696_v10 = vmax.f32 %v13379_v18, %v13381_v2  ;;  %v2500_v12 = vmax.f32 %v13394_v61, %v12953_v39 }
 0x520   :  { %v3586_v54 = vpop.f32.mrb[180].mxu0  ;;  %vm1724_vm4 = vcmp.ge.s32.totalorder %v1660_v20, 4294967168  ;;  %v1598_v20 = vadd.s32 248, %v12538_v23 }
 0x521   :  { %v13397_v4 = vadd.f32 %v3586_v54, %v13366_v6  ;;  %v13399_v22 = vpop.f32.mrb[181].mxu0  ;;  %v13411_v54 = vadd.f32 %v12959_v3, %v13402_v60  ;;  %v13414_v6 = vsel %vm1726_vm3, 0.0, %v17710_v7 }
 0x522   :  { %17834 = vst [vmem:[#allocation191_spill] sm:$0xff] %v13399_v22  ;;  %3697 = vmax.xlane.f32.xlu1 %v3696_v10  ;;  %2498 = vmax.xlane.f32.xlu0 %v2497_v63  ;;  %17837 = vst [vmem:[#allocation194_spill] sm:$0xff] %v13414_v6  ;;  %v13425_v63 = vadd.f32 %v12975_v43, %v13414_v6 }
 0x523   :  { %17833 = vst [vmem:[#allocation190_spill] sm:$0xff] %v13397_v4  ;;  %v3699_v29 = vmax.f32 %v13397_v4, %v13399_v22  ;;  %17836 = vst [vmem:[#allocation193_spill] sm:$0xff] %v13411_v54  ;;  %v2503_v22 = vmax.f32 %v13411_v54, %v12961_v55 }
 0x524   :  { %v3592_v2 = vpop.f32.mrb[182].mxu0  ;;  %17840 = vst [vmem:[#allocation197_spill] sm:$0xff] %v13425_v63 }
 0x525   :  { %v13417_v37 = vadd.f32 %v3592_v2, %v13384_v25  ;;  %v13419_v10 = vpop.f32.mrb[183].mxu0  ;;  %v2509_v25 = vmax.f32 %v13425_v63, %v12977_v1  ;;  %v17861_v63 = vld [vmem:[#allocation8_spill] sm:$0xff] }
 0x526   :  { %17839 = vst [vmem:[#allocation196_spill] sm:$0xff] %v13419_v10  ;;  %2501 = vmax.xlane.f32.xlu1 %v2500_v12  ;;  %3700 = vmax.xlane.f32.xlu0 %v3699_v29  ;;  %v13435_v12 = vsel %vm1724_vm4, 0.0, %v17710_v7 }
 0x527   :  { %17838 = vst [vmem:[#allocation195_spill] sm:$0xff] %v13417_v37  ;;  %v3702_v62 = vmax.f32 %v13417_v37, %v13419_v10  ;;  %17843 = vst [vmem:[#allocation200_spill] sm:$0xff] %v13435_v12  ;;  %v17844_v10 = vld [vmem:[#allocation106_spill] sm:$0xff]  ;;  %v1664_v37 = vsub.s32 %v12528_v27, %v1598_v20 }
 0x528   :  { %v3598_v3 = vpop.f32.mrb[184].mxu0 }
 0x529   :  { %v13430_v4 = vadd.f32 %v3598_v3, %v13402_v60  ;;  %v13432_v2 = vpop.f32.mrb[185].mxu0  ;;  %v13444_v3 = vadd.f32 %v17844_v10, %v13435_v12  ;;  %vm1728_vm5 = vcmp.ge.s32.totalorder %v1664_v37, 4294967168 }
 0x52a   :  { %17842 = vst [vmem:[#allocation199_spill] sm:$0xff] %v13432_v2  ;;  %3703 = vmax.xlane.f32.xlu1 %v3702_v62  ;;  %2504 = vmax.xlane.f32.xlu0 %v2503_v22  ;;  %v17847_v62 = vld [vmem:[#allocation107_spill] sm:$0xff]  ;;  %v13462_v27 = vsel %vm1728_vm5, 0.0, %v17710_v7  ;;  %v17854_v7 = vld [vmem:[#allocation110_spill] sm:$0xff] }
 0x52b   :  { %17841 = vst [vmem:[#allocation198_spill] sm:$0xff] %v13430_v4  ;;  %v3705_v43 = vmax.f32 %v13430_v4, %v13432_v2  ;;  %v2506_v2 = vmax.f32 %v13444_v3, %v17847_v62  ;;  %17850 = vst [vmem:[#allocation203_spill] sm:$0xff] %v13462_v27 }
 0x52c   :  { %v3604_v29 = vpop.f32.mrb[186].mxu0 }
 0x52d   :  { %v13446_v60 = vpop.f32.mrb[187].mxu0  ;;  %v13450_v23 = vadd.f32 %v3604_v29, %v13435_v12  ;;  %v17853_v29 = vld [vmem:[#allocation109_spill] sm:$0xff] }
 0x52e   :  { %17845 = vst [vmem:[#allocation106_spill] sm:$0xff] %v13446_v60  ;;  %3706 = vmax.xlane.f32.xlu1 %v3705_v43  ;;  %2510 = vmax.xlane.f32.xlu0 %v2509_v25 }
 0x52f   :  { %17846 = vst [vmem:[#allocation201_spill] sm:$0xff] %v13450_v23  ;;  %v3708_v10 = vmax.f32 %v13450_v23, %v13446_v60  ;;  %v2424_v60 = vpop.xlane.xlu1 %2423 }
 0x530   :  { %v3610_v22 = vpop.f32.mrb[188].mxu0 }
 0x531   :  { %v13454_v4 = vpop.f32.mrb[189].mxu0  ;;  %v13459_v18 = vadd.f32 %v3610_v22, %v13414_v6  ;;  %v13475_v22 = vadd.f32 %v17853_v29, %v13462_v27  ;;  %v17858_v29 = vld [vmem:[#allocation30_spill] sm:$0xff] }
 0x532   :  { %17848 = vst [vmem:[#allocation107_spill] sm:$0xff] %v13454_v4  ;;  %2507 = vmax.xlane.f32.xlu1 %v2506_v2 }
 0x533   :  { %17849 = vst [vmem:[#allocation202_spill] sm:$0xff] %v13459_v18  ;;  %v3711_v2 = vmax.f32 %v13459_v18, %v13454_v4  ;;  %v2512_v6 = vmax.f32 %v13475_v22, %v17854_v7  ;;  %v17857_v4 = vld [vmem:[#allocation4_spill] sm:$0xff]  ;;  %v2436_v50 = vpop.xlane.xlu1 %2435 }
 0x534   :  { %v3616_v25 = vpop.f32.mrb[190].mxu0 }
 0x535   :  { %v13465_v20 = vadd.f32 %v3616_v25, %v13462_v27  ;;  %v13467_v43 = vpop.f32.mrb[191].mxu0  ;;  %v2421_v25 = vpop.xlane.xlu0 %2420 }
 0x536   :  { %17852 = vst [vmem:[#allocation205_spill] sm:$0xff] %v13467_v43  ;;  %3709 = vmax.xlane.f32.xlu1 %v3708_v10  ;;  %v17855_v10 = vld [vmem:[#allocation31_spill] sm:$0xff]  ;;  %v2515_v18 = vsub.f32 %v17857_v4, %v2421_v25  ;;  %v2516_v27 = vsub.f32 %v17858_v29, %v2421_v25  ;;  %v17864_v4 = vld [vmem:[#allocation16_spill] sm:$0xff] }
 0x537   :  { %17851 = vst [vmem:[#allocation204_spill] sm:$0xff] %v13465_v20  ;;  %v3714_v37 = vmax.f32 %v13465_v20, %v13467_v43  ;;  %v17856_v43 = vld [vmem:[#allocation3_spill] sm:$0xff] }
 0x538   :  { %v2579_v23 = vmul.f32 1.442695, %v2515_v18  ;;  %v17865_v29 = vld [vmem:[#allocation19_spill] sm:$0xff] }
 0x539   :  { %3715 = vmax.xlane.f32.xlu0 %v3714_v37  ;;  %v2427_v12 = vpop.xlane.xlu0 %2426  ;;  %v17859_v37 = vld [vmem:[#allocation9_spill] sm:$0xff] }
 0x53a   :  { %3712 = vmax.xlane.f32.xlu1 %v3711_v2  ;;  %v2517_v2 = vsub.f32 %v17859_v37, %v2424_v60  ;;  %v2519_v1 = vsub.f32 %v17860_v58, %v2427_v12  ;;  %v2520_v55 = vsub.f32 %v17861_v63, %v2427_v12  ;;  %9890 = vpow2.f32 %v2579_v23  ;;  %v17867_v12 = vld [vmem:[#allocation24_spill] sm:$0xff] }
 0x53c   :  { %v2583_v11 = vmul.f32 1.442695, %v2517_v2  ;;  %v2587_v16 = vmul.f32 1.442695, %v2519_v1  ;;  %v2589_v25 = vmul.f32 1.442695, %v2520_v55  ;;  %v2442_v1 = vpop.xlane.xlu1 %2441 }
 0x53d   :  { %v2430_v20 = vpop.xlane.xlu0 %2429 }
 0x53e   :  { %2513 = vmax.xlane.f32.xlu1 %v2512_v6  ;;  %v2581_v6 = vmul.f32 1.442695, %v2516_v27  ;;  %v17866_v27 = vld [vmem:[#allocation11_spill] sm:$0xff] }
 0x53f   :  { %v2522_v47 = vsub.f32 %v17866_v27, %v2430_v20 }
 0x540   :  { %9892 = vpow2.f32 %v2581_v6 }
 0x541   :  { %v2433_v54 = vpop.xlane.xlu0 %2432  ;;  %9894 = vpow2.f32 %v2583_v11  ;;  %v17871_v11 = vld [vmem:[#allocation36_spill] sm:$0xff] }
 0x542   :  { %v2523_v38 = vsub.f32 %v17864_v4, %v2433_v54  ;;  %v2524_v18 = vsub.f32 %v17865_v29, %v2433_v54  ;;  %9896 = vpow2.f32 %v2587_v16  ;;  %v17869_v4 = vld [vmem:[#allocation28_spill] sm:$0xff]  ;;  %v2593_v54 = vmul.f32 1.442695, %v2522_v47  ;;  %v17870_v29 = vld [vmem:[#allocation66_spill] sm:$0xff] }
 0x543   :  { %9898 = vpow2.f32 %v2589_v25 }
 0x544   :  { %v2597_v2 = vmul.f32 1.442695, %v2524_v18 }
 0x545   :  { %v2439_v37 = vpop.xlane.xlu0 %2438 }
 0x546   :  { %v2528_v6 = vsub.f32 %v17869_v4, %v2439_v37 }
 0x548   :  { %v2605_v16 = vmul.f32 1.442695, %v2528_v6 }
 0x54f   :  { %4171 = vrot.lane.b32.xlu1 %v17855_v10, %s10675_s0  ;;  %4153 = vrot.lane.b32.xlu0 %v17856_v43, %s10675_s0  ;;  %v2518_v10 = vsub.f32 %v17862_v21, %v2424_v60  ;;  %v2521_v43 = vsub.f32 %v17863_v19, %v2430_v20  ;;  %v2525_v21 = vsub.f32 %v17867_v12, %v2436_v50  ;;  %v2595_v60 = vmul.f32 1.442695, %v2523_v38  ;;  %v17868_v19 = vld [vmem:[#allocation27_spill] sm:$0xff]  ;;  %v17872_v12 = vld [vmem:[#allocation132_spill] sm:$0xff] }
 0x550   :  { %v2527_v23 = vsub.f32 %v17868_v19, %v2439_v37  ;;  %v13502_v37 = vpop.eup %9890 }
 0x551   :  { %v2585_v58 = vmul.f32 1.442695, %v2518_v10  ;;  %v2591_v63 = vmul.f32 1.442695, %v2521_v43  ;;  %v2526_v10 = vsub.f32 %v17870_v29, %v2436_v50  ;;  %v2599_v20 = vmul.f32 1.442695, %v2525_v21 }
 0x552   :  { %v2529_v43 = vsub.f32 %v17871_v11, %v2442_v1  ;;  %v2603_v27 = vmul.f32 1.442695, %v2527_v23  ;;  %v17873_v50 = vld [vmem:[#allocation45_spill] sm:$0xff]  ;;  %v17875_v29 = vld [vmem:[#allocation135_spill] sm:$0xff] }
 0x553   :  { %9900 = vpow2.f32 %v2585_v58  ;;  %v2601_v47 = vmul.f32 1.442695, %v2526_v10  ;;  %v2530_v58 = vsub.f32 %v17873_v50, %v2442_v1 }
 0x554   :  { %9902 = vpow2.f32 %v2591_v63  ;;  %v13505_v63 = vpop.eup %9892  ;;  %v2607_v21 = vmul.f32 1.442695, %v2529_v43 }
 0x555   :  { %9904 = vpow2.f32 %v2595_v60  ;;  %v2707_v10 = vadd.f32 %v13505_v63, %v13502_v37 }
 0x556   :  { %9906 = vpow2.f32 %v2597_v2 }
 0x557   :  { %9908 = vpow2.f32 %v2593_v54  ;;  %v2609_v54 = vmul.f32 1.442695, %v2530_v58 }
 0x558   :  { %9910 = vpow2.f32 %v2599_v20 }
 0x559   :  { %9912 = vpow2.f32 %v2603_v27 }
 0x55a   :  { %9914 = vpow2.f32 %v2605_v16 }
 0x55b   :  { %9916 = vpow2.f32 %v2601_v47 }
 0x55c   :  { %9918 = vpow2.f32 %v2607_v21 }
 0x563   :  { %v3641_v55 = vpop.xlane.xlu0 %3640 }
 0x564   :  { %v3729_v38 = vsub.f32 %v13038_v42, %v3641_v55  ;;  %v3730_v25 = vsub.f32 %v17872_v12, %v3641_v55  ;;  %v13507_v42 = vpop.eup %9894 }
 0x565   :  { %v13510_v55 = vpop.eup %9896 }
 0x566   :  { %v3805_v60 = vmul.f32 1.442695, %v3729_v38  ;;  %v3807_v23 = vmul.f32 1.442695, %v3730_v25  ;;  %17874 = vst [vmem:[#allocation109_spill] sm:$0xff] %v13510_v55  ;;  %v13515_v20 = vpop.eup %9898 }
 0x567   :  { %v3644_v18 = vpop.xlane.xlu1 %3643  ;;  %v13500_v19 = vpop.xlane.xlu0 %2444  ;;  %17876 = vst [vmem:[#allocation110_spill] sm:$0xff] %v13515_v20  ;;  %v2713_v47 = vadd.f32 %v13515_v20, %v13510_v55 }
 0x568   :  { %v3731_v2 = vsub.f32 %v13054_v28, %v3644_v18  ;;  %v3732_v1 = vsub.f32 %v17875_v29, %v3644_v18  ;;  %v13517_v11 = vpop.eup %9900  ;;  %9920 = vpow2.f32 %v3805_v60  ;;  %v17883_v60 = vld [vmem:[#allocation81_spill] sm:$0xff]  ;;  %v17885_v29 = vld [vmem:[#allocation136_spill] sm:$0xff] }
 0x569   :  { %17877 = vst [vmem:[#allocation31_spill] sm:$0xff] %v13517_v11  ;;  %v13519_v43 = vpop.eup %9902  ;;  %9922 = vpow2.f32 %v3807_v23  ;;  %v2710_v58 = vadd.f32 %v13517_v11, %v13507_v42 }
 0x56a   :  { %17878 = vst [vmem:[#allocation3_spill] sm:$0xff] %v13519_v43  ;;  %v3809_v28 = vmul.f32 1.442695, %v3731_v2  ;;  %v13524_v12 = vpop.eup %9904  ;;  %9924 = vpow2.f32 %v2609_v54  ;;  %v3811_v25 = vmul.f32 1.442695, %v3732_v1 }
 0x56b   :  { %v2448_v4 = vpop.xlane.xlu1 %2447  ;;  %v3647_v6 = vpop.xlane.xlu0 %3646  ;;  %17879 = vst [vmem:[#allocation4_spill] sm:$0xff] %v13524_v12 }
 0x56c   :  { %v3733_v27 = vsub.f32 %v13070_v30, %v3647_v6  ;;  %v3734_v18 = vsub.f32 %v13080_v51, %v3647_v6  ;;  %v13529_v50 = vpop.eup %9906  ;;  %9926 = vpow2.f32 %v3809_v28  ;;  %v2533_v23 = vsub.f32 %v17883_v60, %v2448_v4 }
 0x56d   :  { %17880 = vst [vmem:[#allocation30_spill] sm:$0xff] %v13529_v50  ;;  %v13533_v21 = vpop.eup %9908  ;;  %9928 = vpow2.f32 %v3811_v25  ;;  %v2534_v1 = vsub.f32 %v17885_v29, %v2448_v4 }
 0x56e   :  { %2708 = vadd.xlane.f32.xlu0 %v2707_v10  ;;  %17881 = vst [vmem:[#allocation9_spill] sm:$0xff] %v13533_v21  ;;  %v13535_v30 = vpop.eup %9910  ;;  %v3813_v2 = vmul.f32 1.442695, %v3733_v27  ;;  %v3815_v10 = vmul.f32 1.442695, %v3734_v18  ;;  %v2716_v28 = vadd.f32 %v13533_v21, %v13519_v43 }
 0x56f   :  { %v3650_v38 = vpop.xlane.xlu1 %3649  ;;  %v13522_v16 = vpop.xlane.xlu0 %2450  ;;  %17882 = vst [vmem:[#allocation2_spill] sm:$0xff] %v13535_v30  ;;  %v2615_v60 = vmul.f32 1.442695, %v2533_v23  ;;  %v2617_v29 = vmul.f32 1.442695, %v2534_v1 }
 0x570   :  { %v13542_v6 = vpop.eup %9912  ;;  %9930 = vpow2.f32 %v3813_v2  ;;  %v3735_v25 = vsub.f32 %v13088_v59, %v3650_v38 }
 0x571   :  { %17884 = vst [vmem:[#allocation8_spill] sm:$0xff] %v13542_v6  ;;  %v13547_v55 = vpop.eup %9914  ;;  %9932 = vpow2.f32 %v3815_v10 }
 0x572   :  { %2714 = vadd.xlane.f32.xlu0 %v2713_v47  ;;  %v2719_v47 = vadd.f32 %v13529_v50, %v13524_v12  ;;  %17886 = vst [vmem:[#allocation15_spill] sm:$0xff] %v13547_v55  ;;  %v13551_v27 = vpop.eup %9916  ;;  %v3736_v12 = vsub.f32 %v13098_v36, %v3650_v38  ;;  %9934 = vpow2.f32 %v2615_v60  ;;  %v3817_v2 = vmul.f32 1.442695, %v3735_v25 }
 0x573   :  { %2711 = vadd.xlane.f32.xlu1 %v2710_v58  ;;  %v13538_v54 = vpop.xlane.xlu1 %2453  ;;  %v13540_v51 = vpop.xlane.xlu0 %3652  ;;  %17887 = vst [vmem:[#allocation47_spill] sm:$0xff] %v13551_v27  ;;  %v2722_v23 = vadd.f32 %v13551_v27, %v13535_v30  ;;  %9936 = vpow2.f32 %v2617_v29 }
 0x574   :  { %v13553_v58 = vpop.eup %9918  ;;  %v3819_v36 = vmul.f32 1.442695, %v3736_v12  ;;  %9938 = vpow2.f32 %v3817_v2 }
 0x575   :  { %17888 = vst [vmem:[#allocation16_spill] sm:$0xff] %v13553_v58  ;;  %v13560_v18 = vpop.eup %9920 }
 0x576   :  { %2720 = vadd.xlane.f32.xlu0 %v2719_v47  ;;  %17889 = vst [vmem:[#allocation19_spill] sm:$0xff] %v13560_v18  ;;  %v2725_v47 = vadd.f32 %v13547_v55, %v13542_v6  ;;  %v13565_v50 = vpop.eup %9922  ;;  %9940 = vpow2.f32 %v3819_v36 }
 0x577   :  { %v13556_v20 = vpop.xlane.xlu1 %3655  ;;  %2717 = vadd.xlane.f32.xlu1 %v2716_v28  ;;  %v13558_v4 = vpop.xlane.xlu0 %2456  ;;  %17890 = vst [vmem:[#allocation11_spill] sm:$0xff] %v13565_v50  ;;  %v3927_v38 = vadd.f32 %v13565_v50, %v13560_v18 }
 0x578   :  { %v13569_v59 = vpop.eup %9924 }
 0x579   :  { %17891 = vst [vmem:[#allocation24_spill] sm:$0xff] %v13569_v59  ;;  %v13577_v10 = vpop.eup %9926  ;;  %v2728_v6 = vadd.f32 %v13569_v59, %v13553_v58 }
 0x57a   :  { %2726 = vadd.xlane.f32.xlu0 %v2725_v47  ;;  %17893 = vst [vmem:[#allocation28_spill] sm:$0xff] %v13577_v10  ;;  %v13581_v55 = vpop.eup %9928 }
 0x57b   :  { %v13571_v28 = vpop.xlane.xlu1 %2459  ;;  %2723 = vadd.xlane.f32.xlu1 %v2722_v23  ;;  %v13573_v1 = vpop.xlane.xlu0 %3658  ;;  %17894 = vst [vmem:[#allocation66_spill] sm:$0xff] %v13581_v55  ;;  %v3930_v12 = vadd.f32 %v13581_v55, %v13577_v10 }
 0x57c   :  { %17892 = vst [vmem:[#allocation27_spill] sm:$0xff] %v13573_v1  ;;  %v13587_v29 = vpop.eup %9930 }
 0x57d   :  { %17896 = vst [vmem:[#allocation132_spill] sm:$0xff] %v13587_v29  ;;  %v13591_v47 = vpop.eup %9932 }
 0x57e   :  { %3928 = vadd.xlane.f32.xlu0 %v3927_v38  ;;  %17897 = vst [vmem:[#allocation45_spill] sm:$0xff] %v13591_v47  ;;  %v13597_v38 = vpop.eup %9934 }
 0x57f   :  { %v13583_v60 = vpop.xlane.xlu1 %3661  ;;  %2729 = vadd.xlane.f32.xlu1 %v2728_v6  ;;  %v13585_v25 = vpop.xlane.xlu0 %2462  ;;  %17899 = vst [vmem:[#allocation81_spill] sm:$0xff] %v13597_v38  ;;  %v3933_v6 = vadd.f32 %v13591_v47, %v13587_v29 }
 0x580   :  { %17895 = vst [vmem:[#allocation36_spill] sm:$0xff] %v13583_v60  ;;  %v13601_v2 = vpop.eup %9936 }
 0x581   :  { %17900 = vst [vmem:[#allocation136_spill] sm:$0xff] %v13601_v2  ;;  %v13607_v10 = vpop.eup %9938  ;;  %v2734_v55 = vadd.f32 %v13601_v2, %v13597_v38  ;;  %v17907_v38 = vld [vmem:[#allocation5_spill] sm:$0xff] }
 0x582   :  { %17902 = vst [vmem:[#allocation207_spill] sm:$0xff] %v13607_v10 }
 0x583   :  { %v13593_v23 = vpop.xlane.xlu1 %2465  ;;  %3931 = vadd.xlane.f32.xlu1 %v3930_v12  ;;  %v13595_v18 = vpop.xlane.xlu0 %3664 }
 0x584   :  { %17898 = vst [vmem:[#allocation135_spill] sm:$0xff] %v13595_v18  ;;  %v13611_v12 = vpop.eup %9940 }
 0x585   :  { %17903 = vst [vmem:[#allocation208_spill] sm:$0xff] %v13611_v12  ;;  %v3936_v29 = vadd.f32 %v13611_v12, %v13607_v10 }
 0x587   :  { %v13603_v36 = vpop.xlane.xlu1 %3667  ;;  %3934 = vadd.xlane.f32.xlu1 %v3933_v6  ;;  %v13605_v50 = vpop.xlane.xlu0 %2468 }
 0x588   :  { %17901 = vst [vmem:[#allocation206_spill] sm:$0xff] %v13603_v36 }
 0x58b   :  { %v2472_v18 = vpop.xlane.xlu1 %2471  ;;  %2735 = vadd.xlane.f32.xlu1 %v2734_v55  ;;  %v13613_v1 = vpop.xlane.xlu0 %3670 }
 0x58c   :  { %17904 = vst [vmem:[#allocation209_spill] sm:$0xff] %v13613_v1  ;;  %v17909_v1 = vld [vmem:[#allocation42_spill] sm:$0xff] }
 0x58d   :  { %v2531_v59 = vsub.f32 %v17909_v1, %v13500_v19 }
 0x58f   :  { %v13617_v47 = vpop.xlane.xlu1 %3673  ;;  %3937 = vadd.xlane.f32.xlu1 %v3936_v29  ;;  %v13619_v6 = vpop.xlane.xlu0 %2474  ;;  %v17911_v29 = vld [vmem:[#allocation133_spill] sm:$0xff]  ;;  %v2611_v30 = vmul.f32 1.442695, %v2531_v59 }
 0x590   :  { %17905 = vst [vmem:[#allocation210_spill] sm:$0xff] %v13617_v47  ;;  %v2532_v47 = vsub.f32 %v17911_v29, %v13500_v19 }
 0x591   :  { %9942 = vpow2.f32 %v2611_v30  ;;  %v2538_v30 = vsub.f32 %v13102_v13, %v13538_v54 }
 0x593   :  { %v13621_v36 = vpop.xlane.xlu1 %2477  ;;  %v13623_v58 = vpop.xlane.xlu0 %3676  ;;  %v2625_v21 = vmul.f32 1.442695, %v2538_v30 }
 0x594   :  { %17906 = vst [vmem:[#allocation211_spill] sm:$0xff] %v13623_v58  ;;  %4155 = vrot.lane.b32.xlu0 %v17907_v38, %s10675_s0  ;;  %v2613_v38 = vmul.f32 1.442695, %v2532_v47  ;;  %v2537_v47 = vsub.f32 %v12787_v53, %v13538_v54  ;;  %v2545_v54 = vsub.f32 %v12845_v56, %v13593_v23 }
 0x596   :  { %9944 = vpow2.f32 %v2613_v38  ;;  %v2623_v38 = vmul.f32 1.442695, %v2537_v47 }
 0x597   :  { %v13627_v2 = vpop.xlane.xlu1 %3679  ;;  %v13629_v55 = vpop.xlane.xlu0 %2480 }
 0x598   :  { %17908 = vst [vmem:[#allocation5_spill] sm:$0xff] %v13627_v2  ;;  %v17913_v2 = vld [vmem:[#allocation6_spill] sm:$0xff]  ;;  %9946 = vpow2.f32 %v2623_v38 }
 0x599   :  { %9948 = vpow2.f32 %v2625_v21  ;;  %v2553_v21 = vsub.f32 %v13248_v44, %v13621_v36 }
 0x59b   :  { %v13633_v10 = vpop.xlane.xlu1 %2483  ;;  %v13635_v12 = vpop.xlane.xlu0 %3682 }
 0x59c   :  { %17910 = vst [vmem:[#allocation42_spill] sm:$0xff] %v13635_v12  ;;  %v13659_v29 = vpop.eup %9942 }
 0x59f   :  { %v13639_v27 = vpop.xlane.xlu1 %3685  ;;  %v13641_v58 = vpop.xlane.xlu0 %2486 }
 0x5a0   :  { %17912 = vst [vmem:[#allocation133_spill] sm:$0xff] %v13639_v27  ;;  %4157 = vrot.lane.b32.xlu1 %v17913_v2, %s10675_s0  ;;  %v13663_v2 = vpop.eup %9944 }
 0x5a1   :  { %v2731_v53 = vadd.f32 %v13663_v2, %v13659_v29 }
 0x5a3   :  { %v13645_v43 = vpop.xlane.xlu1 %2489  ;;  %v13647_v1 = vpop.xlane.xlu0 %3688 }
 0x5a4   :  { %17914 = vst [vmem:[#allocation6_spill] sm:$0xff] %v13647_v1 }
 0x5a7   :  { %v13649_v60 = vpop.xlane.xlu1 %3691  ;;  %v13651_v12 = vpop.xlane.xlu0 %2492 }
 0x5a8   :  { %17915 = vst [vmem:[#allocation212_spill] sm:$0xff] %v13649_v60  ;;  %v2541_v60 = vsub.f32 %v12822_v32, %v13571_v28  ;;  %v2546_v32 = vsub.f32 %v13174_v52, %v13593_v23 }
 0x5aa   :  { %v2631_v13 = vmul.f32 1.442695, %v2541_v60  ;;  %v2550_v60 = vsub.f32 %v12863_v14, %v2472_v18  ;;  %v2655_v14 = vmul.f32 1.442695, %v2553_v21 }
 0x5ab   :  { %v13653_v19 = vpop.xlane.xlu1 %2495  ;;  %v13655_v59 = vpop.xlane.xlu0 %3694 }
 0x5ac   :  { %17916 = vst [vmem:[#allocation213_spill] sm:$0xff] %v13655_v59  ;;  %v2542_v59 = vsub.f32 %v13138_v33, %v13571_v28  ;;  %9950 = vpow2.f32 %v2631_v13  ;;  %v2639_v33 = vmul.f32 1.442695, %v2545_v54  ;;  %v2549_v28 = vsub.f32 %v13210_v31, %v2472_v18  ;;  %v13695_v13 = vpop.eup %9946 }
 0x5ad   :  { %v2649_v23 = vmul.f32 1.442695, %v2550_v60  ;;  %v13697_v31 = vpop.eup %9948  ;;  %v2557_v18 = vsub.f32 %v13284_v40, %v13633_v10  ;;  %v2561_v40 = vsub.f32 %v13320_v17, %v13645_v43  ;;  %v2565_v17 = vsub.f32 %v13356_v9, %v13653_v19 }
 0x5ae   :  { %v2633_v47 = vmul.f32 1.442695, %v2542_v59  ;;  %v2647_v56 = vmul.f32 1.442695, %v2549_v28  ;;  %v2554_v59 = vsub.f32 %v12879_v46, %v13621_v36  ;;  %v2740_v46 = vadd.f32 %v13697_v31, %v13695_v13 }
 0x5af   :  { %v13665_v1 = vpop.xlane.xlu1 %3697  ;;  %v13669_v27 = vpop.xlane.xlu0 %2498  ;;  %v2679_v9 = vmul.f32 1.442695, %v2565_v17 }
 0x5b0   :  { %17917 = vst [vmem:[#allocation214_spill] sm:$0xff] %v13665_v1  ;;  %9952 = vpow2.f32 %v2633_v47  ;;  %v2657_v44 = vmul.f32 1.442695, %v2554_v59  ;;  %v2558_v47 = vsub.f32 %v12899_v24, %v13633_v10  ;;  %v2562_v24 = vsub.f32 %v12921_v5, %v13645_v43  ;;  %v17924_v43 = vld [vmem:[#allocation35_spill] sm:$0xff] }
 0x5b1   :  { %9954 = vpow2.f32 %v2639_v33  ;;  %v2566_v5 = vsub.f32 %v12937_v48, %v13653_v19 }
 0x5b2   :  { %v2665_v60 = vmul.f32 1.442695, %v2558_v47 }
 0x5b3   :  { %v13675_v11 = vpop.xlane.xlu1 %2501  ;;  %2732 = vadd.xlane.f32.xlu0 %v2731_v53  ;;  %v13681_v30 = vpop.xlane.xlu0 %3700  ;;  %v2641_v53 = vmul.f32 1.442695, %v2546_v32  ;;  %v2681_v19 = vmul.f32 1.442695, %v2566_v5 }
 0x5b4   :  { %17918 = vst [vmem:[#allocation215_spill] sm:$0xff] %v13681_v30  ;;  %v2569_v48 = vsub.f32 %v13394_v61, %v13675_v11 }
 0x5b5   :  { %9956 = vpow2.f32 %v2641_v53  ;;  %v2663_v53 = vmul.f32 1.442695, %v2557_v18  ;;  %v2673_v18 = vmul.f32 1.442695, %v2562_v24 }
 0x5b6   :  { %9958 = vpow2.f32 %v2647_v56  ;;  %v13705_v32 = vpop.eup %9950 }
 0x5b7   :  { %v13683_v1 = vpop.xlane.xlu1 %3703  ;;  %v13691_v52 = vpop.xlane.xlu0 %2504  ;;  %9960 = vpow2.f32 %v2649_v23 }
 0x5b8   :  { %17919 = vst [vmem:[#allocation216_spill] sm:$0xff] %v13683_v1  ;;  %9962 = vpow2.f32 %v2655_v14  ;;  %v2671_v14 = vmul.f32 1.442695, %v2561_v40 }
 0x5b9   :  { %9964 = vpow2.f32 %v2657_v44 }
 0x5ba   :  { %v13711_v36 = vpop.eup %9952  ;;  %9966 = vpow2.f32 %v2663_v53 }
 0x5bb   :  { %v13687_v38 = vpop.xlane.xlu1 %3706  ;;  %v13707_v33 = vpop.xlane.xlu0 %2510  ;;  %v2746_v21 = vadd.f32 %v13711_v36, %v13705_v32  ;;  %9968 = vpow2.f32 %v2665_v60  ;;  %v2570_v60 = vsub.f32 %v12953_v39, %v13675_v11  ;;  %v2687_v39 = vmul.f32 1.442695, %v2569_v48 }
 0x5bc   :  { %17920 = vst [vmem:[#allocation217_spill] sm:$0xff] %v13687_v38  ;;  %v13719_v10 = vpop.eup %9954  ;;  %9970 = vpow2.f32 %v2671_v14  ;;  %v17926_v14 = vld [vmem:[#allocation138_spill] sm:$0xff]  ;;  %v3740_v11 = vsub.f32 %v13134_v57, %v13556_v20 }
 0x5bd   :  { %9972 = vpow2.f32 %v2673_v18  ;;  %v2536_v17 = vsub.f32 %v17926_v14, %v13522_v16  ;;  %v3739_v18 = vsub.f32 %v13124_v0, %v13556_v20  ;;  %v2689_v5 = vmul.f32 1.442695, %v2570_v60 }
 0x5be   :  { %9974 = vpow2.f32 %v2679_v9  ;;  %v3827_v20 = vmul.f32 1.442695, %v3740_v11 }
 0x5bf   :  { %v13699_v54 = vpop.xlane.xlu1 %2507  ;;  %v13725_v23 = vpop.eup %9956  ;;  %9976 = vpow2.f32 %v2681_v19  ;;  %v2621_v9 = vmul.f32 1.442695, %v2536_v17 }
 0x5c0   :  { %v13735_v44 = vpop.eup %9958  ;;  %9978 = vpow2.f32 %v2687_v39  ;;  %v2573_v57 = vsub.f32 %v13444_v3, %v13699_v54 }
 0x5c1   :  { %v13741_v53 = vpop.eup %9960  ;;  %9980 = vpow2.f32 %v2689_v5 }
 0x5c2   :  { %v13750_v24 = vpop.eup %9962  ;;  %v2695_v39 = vmul.f32 1.442695, %v2573_v57  ;;  %v2552_v57 = vsub.f32 %v12871_v45, %v13619_v6 }
 0x5c3   :  { %v13713_v28 = vpop.xlane.xlu1 %3709 }
 0x5c4   :  { %17921 = vst [vmem:[#allocation218_spill] sm:$0xff] %v13713_v28  ;;  %2741 = vadd.xlane.f32.xlu1 %v2740_v46  ;;  %v2752_v46 = vadd.f32 %v13725_v23, %v13719_v10  ;;  %v3825_v28 = vmul.f32 1.442695, %v3739_v18  ;;  %v2544_v18 = vsub.f32 %v13156_v8, %v13585_v25  ;;  %v2653_v45 = vmul.f32 1.442695, %v2552_v57  ;;  %v17938_v57 = vld [vmem:[#allocation179_spill] sm:$0xff] }
 0x5c6   :  { %v13721_v56 = vpop.xlane.xlu0 %3715  ;;  %v2637_v8 = vmul.f32 1.442695, %v2544_v18 }
 0x5c7   :  { %17922 = vst [vmem:[#allocation219_spill] sm:$0xff] %v13721_v56  ;;  %v13727_v59 = vpop.xlane.xlu1 %3712  ;;  %v2758_v56 = vadd.f32 %v13741_v53, %v13735_v44 }
 0x5c8   :  { %17923 = vst [vmem:[#allocation220_spill] sm:$0xff] %v13727_v59  ;;  %2747 = vadd.xlane.f32.xlu1 %v2746_v21  ;;  %v17925_v21 = vld [vmem:[#allocation84_spill] sm:$0xff]  ;;  %v13756_v59 = vpop.eup %9964 }
 0x5c9   :  { %4173 = vrot.lane.b32.xlu0 %v17924_v43, %s10675_s0  ;;  %v2535_v43 = vsub.f32 %v17925_v21, %v13522_v16  ;;  %v2539_v16 = vsub.f32 %v12804_v35, %v13558_v4  ;;  %v2764_v14 = vadd.f32 %v13756_v59, %v13750_v24  ;;  %v2574_v35 = vsub.f32 %v17847_v62, %v13699_v54 }
 0x5ca   :  { %v13737_v47 = vpop.permute.xlu0 %4153 }
 0x5cb   :  { %v13743_v40 = vpop.xlane.xlu1 %2513  ;;  %8426 = vmatpush3.bf16.msra.mxu0 %v13737_v47  ;;  %v2619_v21 = vmul.f32 1.442695, %v2535_v43  ;;  %v2627_v60 = vmul.f32 1.442695, %v2539_v16  ;;  %v2543_v43 = vsub.f32 %v12837_v26, %v13585_v25  ;;  %v2697_v54 = vmul.f32 1.442695, %v2574_v35 }
 0x5cc   :  { %2753 = vadd.xlane.f32.xlu1 %v2752_v46  ;;  %v13767_v46 = vpop.eup %9966  ;;  %v2577_v62 = vsub.f32 %v13475_v22, %v13743_v40  ;;  %v2578_v26 = vsub.f32 %v17854_v7, %v13743_v40  ;;  %v2547_v22 = vsub.f32 %v13192_v49, %v13605_v50  ;;  %v2548_v7 = vsub.f32 %v12855_v41, %v13605_v50 }
 0x5cd   :  { %v13773_v0 = vpop.eup %9968  ;;  %9982 = vpow2.f32 %v2619_v21  ;;  %v2635_v5 = vmul.f32 1.442695, %v2543_v43 }
 0x5ce   :  { %v13781_v19 = vpop.eup %9970  ;;  %9984 = vpow2.f32 %v2621_v9  ;;  %v2703_v25 = vmul.f32 1.442695, %v2577_v62  ;;  %v2643_v49 = vmul.f32 1.442695, %v2547_v22  ;;  %v2645_v50 = vmul.f32 1.442695, %v2548_v7 }
 0x5cf   :  { %v13760_v61 = vpop.permute.xlu1 %4171  ;;  %v13787_v17 = vpop.eup %9972  ;;  %9986 = vpow2.f32 %v3825_v28  ;;  %v2705_v28 = vmul.f32 1.442695, %v2578_v26 }
 0x5d0   :  { %2759 = vadd.xlane.f32.xlu1 %v2758_v56  ;;  %8427 = vmatprep.subr.bf16.mxu0 %v13760_v61  ;;  %v17927_v56 = vld [vmem:[#allocation143_spill] sm:$0xff]  ;;  %9988 = vpow2.f32 %v3827_v20  ;;  %v13795_v11 = vpop.eup %9974  ;;  %v2776_v21 = vadd.f32 %v13787_v17, %v13781_v19 }
 0x5d1   :  { %v2540_v48 = vsub.f32 %v17927_v56, %v13558_v4  ;;  %v2770_v4 = vadd.f32 %v13773_v0, %v13767_v46  ;;  %9990 = vpow2.f32 %v2627_v60  ;;  %v13799_v16 = vpop.eup %9976 }
 0x5d2   :  { %v13805_v40 = vpop.eup %9978 }
 0x5d3   :  { %v2629_v3 = vmul.f32 1.442695, %v2540_v48  ;;  %17928 = vst [vmem:[#allocation35_spill] sm:$0xff] %v13805_v40  ;;  %v13809_v9 = vpop.eup %9980  ;;  %v2551_v48 = vsub.f32 %v13230_v15, %v13619_v6  ;;  %v17931_v6 = vld [vmem:[#allocation97_spill] sm:$0xff] }
 0x5d4   :  { %2765 = vadd.xlane.f32.xlu1 %v2764_v14  ;;  %v2782_v14 = vadd.f32 %v13799_v16, %v13795_v11  ;;  %v2788_v35 = vadd.f32 %v13809_v9, %v13805_v40  ;;  %v2556_v18 = vsub.f32 %v17931_v6, %v13629_v55 }
 0x5d5   :  { %9992 = vpow2.f32 %v2629_v3  ;;  %v2651_v15 = vmul.f32 1.442695, %v2551_v48 }
 0x5d6   :  { %9994 = vpow2.f32 %v2695_v39  ;;  %v2661_v22 = vmul.f32 1.442695, %v2556_v18 }
 0x5d7   :  { %9996 = vpow2.f32 %v2697_v54  ;;  %v13811_v56 = vpop.eup %9982 }
 0x5d8   :  { %2771 = vadd.xlane.f32.xlu1 %v2770_v4  ;;  %9998 = vpow2.f32 %v2635_v5  ;;  %v13815_v41 = vpop.eup %9984  ;;  %v2555_v4 = vsub.f32 %v13266_v34, %v13629_v55 }
 0x5d9   :  { %10000 = vpow2.f32 %v2637_v8  ;;  %v13819_v20 = vpop.eup %9986  ;;  %v2737_v54 = vadd.f32 %v13815_v41, %v13811_v56 }
 0x5da   :  { %10002 = vpow2.f32 %v2703_v25  ;;  %17929 = vst [vmem:[#allocation84_spill] sm:$0xff] %v13819_v20  ;;  %v13823_v60 = vpop.eup %9988  ;;  %v2659_v34 = vmul.f32 1.442695, %v2555_v4  ;;  %v17935_v25 = vld [vmem:[#allocation102_spill] sm:$0xff] }
 0x5db   :  { %10004 = vpow2.f32 %v2705_v28  ;;  %17930 = vst [vmem:[#allocation138_spill] sm:$0xff] %v13823_v60  ;;  %v13825_v43 = vpop.eup %9990  ;;  %v3942_v62 = vadd.f32 %v13823_v60, %v13819_v20  ;;  %v2560_v7 = vsub.f32 %v17935_v25, %v13641_v58 }
 0x5dc   :  { %2777 = vadd.xlane.f32.xlu1 %v2776_v21  ;;  %10006 = vpow2.f32 %v2643_v49  ;;  %v17934_v21 = vld [vmem:[#allocation172_spill] sm:$0xff] }
 0x5dd   :  { %10008 = vpow2.f32 %v2645_v50  ;;  %v2559_v8 = vsub.f32 %v17934_v21, %v13641_v58  ;;  %v17939_v58 = vld [vmem:[#allocation103_spill] sm:$0xff] }
 0x5de   :  { %10010 = vpow2.f32 %v2651_v15  ;;  %v2669_v15 = vmul.f32 1.442695, %v2560_v7  ;;  %v2564_v4 = vsub.f32 %v17939_v58, %v13651_v12  ;;  %v17943_v58 = vld [vmem:[#allocation104_spill] sm:$0xff] }
 0x5df   :  { %v13829_v3 = vpop.eup %9992  ;;  %10012 = vpow2.f32 %v2653_v45  ;;  %v2667_v50 = vmul.f32 1.442695, %v2559_v8  ;;  %v17941_v8 = vld [vmem:[#allocation142_spill] sm:$0xff] }
 0x5e0   :  { %2783 = vadd.xlane.f32.xlu1 %v2782_v14  ;;  %v13833_v39 = vpop.eup %9994  ;;  %v2743_v49 = vadd.f32 %v13829_v3, %v13825_v43  ;;  %10014 = vpow2.f32 %v2659_v34 }
 0x5e1   :  { %17932 = vst [vmem:[#allocation143_spill] sm:$0xff] %v13833_v39  ;;  %v13839_v26 = vpop.eup %9996  ;;  %10016 = vpow2.f32 %v2661_v22  ;;  %v2677_v22 = vmul.f32 1.442695, %v2564_v4  ;;  %v17944_v4 = vld [vmem:[#allocation193_spill] sm:$0xff] }
 0x5e2   :  { %17933 = vst [vmem:[#allocation97_spill] sm:$0xff] %v13839_v26  ;;  %v13841_v5 = vpop.eup %9998  ;;  %v2794_v14 = vadd.f32 %v13839_v26, %v13833_v39  ;;  %10018 = vpow2.f32 %v2667_v50 }
 0x5e3   :  { %v13845_v55 = vpop.eup %10000  ;;  %10020 = vpow2.f32 %v2669_v15 }
 0x5e4   :  { %2789 = vadd.xlane.f32.xlu1 %v2788_v35  ;;  %v13849_v28 = vpop.eup %10002  ;;  %v2563_v35 = vsub.f32 %v17938_v57, %v13651_v12  ;;  %v2749_v18 = vadd.f32 %v13845_v55, %v13841_v5  ;;  %v3738_v12 = vsub.f32 %v17941_v8, %v13540_v51  ;;  %v17942_v57 = vld [vmem:[#allocation186_spill] sm:$0xff] }
 0x5e5   :  { %17936 = vst [vmem:[#allocation172_spill] sm:$0xff] %v13849_v28  ;;  %v13855_v48 = vpop.eup %10004  ;;  %v2567_v50 = vsub.f32 %v17942_v57, %v13669_v27 }
 0x5e6   :  { %17937 = vst [vmem:[#allocation102_spill] sm:$0xff] %v13855_v48  ;;  %v13861_v45 = vpop.eup %10006  ;;  %v2800_v6 = vadd.f32 %v13855_v48, %v13849_v28  ;;  %v2675_v21 = vmul.f32 1.442695, %v2563_v35  ;;  %v3823_v35 = vmul.f32 1.442695, %v3738_v12 }
 0x5e8   :  { %3943 = vadd.xlane.f32.xlu1 %v3942_v62  ;;  %2738 = vadd.xlane.f32.xlu0 %v2737_v54  ;;  %v13867_v62 = vpop.eup %10008  ;;  %v17940_v54 = vld [vmem:[#allocation140_spill] sm:$0xff]  ;;  %10022 = vpow2.f32 %v2675_v21  ;;  %v17945_v21 = vld [vmem:[#allocation105_spill] sm:$0xff] }
 0x5e9   :  { %v3737_v34 = vsub.f32 %v17940_v54, %v13540_v51  ;;  %v13873_v25 = vpop.eup %10010  ;;  %v2755_v7 = vadd.f32 %v13867_v62, %v13861_v45  ;;  %10024 = vpow2.f32 %v2677_v22  ;;  %v2568_v51 = vsub.f32 %v17943_v58, %v13669_v27 }
 0x5ea   :  { %v2572_v8 = vsub.f32 %v17945_v21, %v13691_v52 }
 0x5eb   :  { %v2685_v12 = vmul.f32 1.442695, %v2568_v51 }
 0x5ec   :  { %2795 = vadd.xlane.f32.xlu1 %v2794_v14  ;;  %2744 = vadd.xlane.f32.xlu0 %v2743_v49  ;;  %v13877_v14 = vpop.eup %10012  ;;  %v3821_v49 = vmul.f32 1.442695, %v3737_v34  ;;  %v2683_v34 = vmul.f32 1.442695, %v2567_v50  ;;  %v17947_v50 = vld [vmem:[#allocation108_spill] sm:$0xff] }
 0x5ed   :  { %v13883_v15 = vpop.eup %10014 }
 0x5ee   :  { %v13889_v54 = vpop.eup %10016  ;;  %10026 = vpow2.f32 %v3821_v49  ;;  %v2693_v49 = vmul.f32 1.442695, %v2572_v8 }
 0x5ef   :  { %10028 = vpow2.f32 %v3823_v35  ;;  %v13893_v22 = vpop.eup %10018  ;;  %v2767_v58 = vadd.f32 %v13889_v54, %v13883_v15 }
 0x5f0   :  { %2801 = vadd.xlane.f32.xlu1 %v2800_v6  ;;  %2750 = vadd.xlane.f32.xlu0 %v2749_v18  ;;  %v2571_v6 = vsub.f32 %v17944_v4, %v13691_v52  ;;  %v2761_v18 = vadd.f32 %v13877_v14, %v13873_v25  ;;  %v13899_v4 = vpop.eup %10020  ;;  %10030 = vpow2.f32 %v2683_v34  ;;  %v2576_v52 = vsub.f32 %v17947_v50, %v13707_v33 }
 0x5f1   :  { %10032 = vpow2.f32 %v2685_v12 }
 0x5f2   :  { %v2691_v27 = vmul.f32 1.442695, %v2571_v6  ;;  %v13903_v35 = vpop.eup %10022  ;;  %v2773_v6 = vadd.f32 %v13899_v4, %v13893_v22 }
 0x5f4   :  { %2756 = vadd.xlane.f32.xlu0 %v2755_v7  ;;  %v17946_v7 = vld [vmem:[#allocation197_spill] sm:$0xff]  ;;  %10034 = vpow2.f32 %v2691_v27 }
 0x5f5   :  { %v2575_v57 = vsub.f32 %v17946_v7, %v13707_v33  ;;  %v2701_v7 = vmul.f32 1.442695, %v2576_v52  ;;  %v17948_v33 = vld [vmem:[#allocation10_spill] sm:$0xff] }
 0x5f7   :  { %v2699_v51 = vmul.f32 1.442695, %v2575_v57 }
 0x5f8   :  { %2762 = vadd.xlane.f32.xlu0 %v2761_v18  ;;  %v13907_v18 = vpop.eup %10024 }
 0x5f9   :  { %v13911_v8 = vpop.eup %10026  ;;  %v2779_v12 = vadd.f32 %v13907_v18, %v13903_v35 }
 0x5fa   :  { %17949 = vst [vmem:[#allocation179_spill] sm:$0xff] %v13911_v8  ;;  %v13915_v27 = vpop.eup %10028 }
 0x5fb   :  { %v2709_v38 = vpop.xlane.xlu0 %2708  ;;  %17950 = vst [vmem:[#allocation103_spill] sm:$0xff] %v13915_v27  ;;  %v3939_v50 = vadd.f32 %v13915_v27, %v13911_v8 }
 0x5fc   :  { %2768 = vadd.xlane.f32.xlu0 %v2767_v58  ;;  %10036 = vrcp.f32 %v2709_v38  ;;  %v17951_v58 = vld [vmem:[#allocation17_spill] sm:$0xff] }
 0x5fd   :  { %10038 = vpow2.f32 %v2693_v49  ;;  %v13919_v49 = vpop.eup %10030 }
 0x5fe   :  { %17952 = vst [vmem:[#allocation140_spill] sm:$0xff] %v13919_v49  ;;  %v13923_v52 = vpop.eup %10032 }
 0x5ff   :  { %v2715_v21 = vpop.xlane.xlu0 %2714 }
 0x600   :  { %v2712_v34 = vpop.xlane.xlu1 %2711  ;;  %2774 = vadd.xlane.f32.xlu0 %v2773_v6  ;;  %v13925_v6 = vpop.eup %10034 }
 0x601   :  { %10040 = vrcp.f32 %v2712_v34  ;;  %4159 = vrot.lane.b32.xlu1 %v17948_v33, %s10675_s0  ;;  %17953 = vst [vmem:[#allocation142_spill] sm:$0xff] %v13925_v6  ;;  %v2785_v33 = vadd.f32 %v13923_v52, %v13919_v49  ;;  %v17970_v49 = vld [vmem:[#allocation93_spill] sm:$0xff] }
 0x602   :  { %10042 = vpow2.f32 %v2699_v51 }
 0x603   :  { %10044 = vrcp.f32 %v2715_v21  ;;  %v2721_v57 = vpop.xlane.xlu0 %2720 }
 0x604   :  { %10046 = vpow2.f32 %v2701_v7  ;;  %v2718_v38 = vpop.xlane.xlu1 %2717  ;;  %2780 = vadd.xlane.f32.xlu0 %v2779_v12 }
 0x605   :  { %10048 = vrcp.f32 %v2718_v38  ;;  %4161 = vrot.lane.b32.xlu1 %v17951_v58, %s10675_s0 }
 0x606   :  { %10050 = vrcp.f32 %v2721_v57  ;;  %v10037_v7 = vpop.eup %10036 }
 0x607   :  { %v2727_v51 = vpop.xlane.xlu0 %2726  ;;  %v13927_v34 = vpop.eup %10038  ;;  %v2835_v1 = vmul.f32 %v10037_v7, %v13502_v37  ;;  %v2836_v57 = vmul.f32 %v10037_v7, %v13505_v63  ;;  %v17958_v37 = vld [vmem:[#allocation110_spill] sm:$0xff]  ;;  %v17960_v63 = vld [vmem:[#allocation36_spill] sm:$0xff] }
 0x608   :  { %v2724_v21 = vpop.xlane.xlu1 %2723  ;;  %3940 = vadd.xlane.f32.xlu0 %v3939_v50  ;;  %17954 = vst [vmem:[#allocation186_spill] sm:$0xff] %v13927_v34  ;;  %v17957_v50 = vld [vmem:[#allocation31_spill] sm:$0xff]  ;;  %v2791_v28 = vadd.f32 %v13927_v34, %v13925_v6  ;;  %v17961_v7 = vld [vmem:[#allocation148_spill] sm:$0xff]  ;;  %v17962_v6 = vld [vmem:[#allocation150_spill] sm:$0xff] }
 0x609   :  { %10052 = vrcp.f32 %v2724_v21 }
 0x60b   :  { %v10041_v12 = vpop.eup %10040  ;;  %v13931_v38 = vpop.xlane.xlu0 %3928 }
 0x60c   :  { %17955 = vst [vmem:[#allocation104_spill] sm:$0xff] %v13931_v38  ;;  %v13933_v58 = vpop.eup %10042  ;;  %v2837_v20 = vmul.f32 %v10041_v12, %v13507_v42  ;;  %v2730_v8 = vpop.xlane.xlu1 %2729  ;;  %2786 = vadd.xlane.f32.xlu0 %v2785_v33  ;;  %v2838_v21 = vmul.f32 %v10041_v12, %v17957_v50  ;;  %v17959_v33 = vld [vmem:[#allocation9_spill] sm:$0xff]  ;;  %v3743_v12 = vsub.f32 %v17961_v7, %v17960_v63 }
 0x60d   :  { %17956 = vst [vmem:[#allocation193_spill] sm:$0xff] %v13933_v58  ;;  %v10045_v60 = vpop.eup %10044  ;;  %10054 = vrcp.f32 %v2730_v8  ;;  %v17964_v8 = vld [vmem:[#allocation86_spill] sm:$0xff]  ;;  %v17967_v7 = vld [vmem:[#allocation109_spill] sm:$0xff] }
 0x60e   :  { %v13939_v27 = vpop.eup %10046  ;;  %v2900_v48 = vpack.c.bf16 %v2838_v21, %v2836_v57  ;;  %v2899_v39 = vpack.c.bf16 %v2837_v20, %v2835_v1  ;;  %v2840_v42 = vmul.f32 %v10045_v60, %v17958_v37  ;;  %10056 = vrcp.f32 %v2727_v51  ;;  %v17963_v1 = vld [vmem:[#allocation90_spill] sm:$0xff]  ;;  %v17965_v21 = vld [vmem:[#allocation3_spill] sm:$0xff] }
 0x60f   :  { %v10049_v30 = vpop.eup %10048  ;;  %v4156_v38 = vpop.permute.xlu0 %4155  ;;  %v3744_v57 = vsub.f32 %v17962_v6, %v17960_v63  ;;  %v2797_v20 = vadd.f32 %v13939_v27, %v13933_v58  ;;  %v17966_v51 = vld [vmem:[#allocation47_spill] sm:$0xff]  ;;  %v2839_v40 = vmul.f32 %v10045_v60, %v17967_v7  ;;  %v17969_v63 = vld [vmem:[#allocation30_spill] sm:$0xff] }
 0x610   :  { %2792 = vadd.xlane.f32.xlu0 %v2791_v28  ;;  %2963 = vmatprep.mubr.bf16.mxu1 %v2900_v48  ;;  %v2842_v26 = vmul.f32 %v10049_v30, %v17959_v33  ;;  %v10051_v50 = vpop.eup %10050  ;;  %v2841_v37 = vmul.f32 %v10049_v30, %v17965_v21  ;;  %v17968_v6 = vld [vmem:[#allocation91_spill] sm:$0xff]  ;;  %v17971_v60 = vld [vmem:[#allocation2_spill] sm:$0xff] }
 0x611   :  { %8428 = vmatpush3.bf16.msra.mxu0 %v4156_v38  ;;  %2964 = vmatmul.mubr.bf16.vlgmr.msra.gmra.mrb[64].mxu1 %v2899_v39  ;;  %v3833_v39 = vmul.f32 1.442695, %v3743_v12  ;;  %v3835_v34 = vmul.f32 1.442695, %v3744_v57  ;;  %v17972_v57 = vld [vmem:[#allocation24_spill] sm:$0xff] }
 0x612   :  { %9365 = vmatpush3.bf16.msra.mxu1 %v17963_v1  ;;  %v2902_v28 = vpack.c.bf16 %v2842_v26, %v2840_v42  ;;  %v2844_v1 = vmul.f32 %v10051_v50, %v17969_v63  ;;  %v2901_v26 = vpack.c.bf16 %v2841_v37, %v2839_v40 }
 0x613   :  { %v10053_v48 = vpop.eup %10052  ;;  %9358 = vmatprep.subr.bf16.mxu1 %v17964_v8  ;;  %10058 = vpow2.f32 %v3833_v39 }
 0x614   :  { %2798 = vadd.xlane.f32.xlu0 %v2797_v20  ;;  %2971 = vmatprep.mubr.bf16.mxu1 %v2902_v28  ;;  %v2846_v33 = vmul.f32 %v10053_v48, %v17966_v51  ;;  %10060 = vpow2.f32 %v3835_v34  ;;  %v2845_v12 = vmul.f32 %v10053_v48, %v17971_v60  ;;  %v17973_v28 = vld [vmem:[#allocation4_spill] sm:$0xff] }
 0x615   :  { %v2843_v8 = vmul.f32 %v10051_v50, %v17973_v28  ;;  %v13975_v50 = vpop.xlane.xlu1 %3931 }
 0x616   :  { %9366 = vmatpush3.bf16.msra.mxu1 %v17968_v6  ;;  %v2904_v42 = vpack.c.bf16 %v2846_v33, %v2844_v1  ;;  %v17979_v6 = vld [vmem:[#allocation44_spill] sm:$0xff]  ;;  %v17981_v1 = vld [vmem:[#allocation145_spill] sm:$0xff] }
 0x617   :  { %9359 = vmatprep.subr.bf16.mxu1 %v17970_v49  ;;  %v10055_v58 = vpop.eup %10054  ;;  %v17974_v49 = vld [vmem:[#allocation15_spill] sm:$0xff]  ;;  %v2903_v21 = vpack.c.bf16 %v2845_v12, %v2843_v8 }
 0x618   :  { %v10057_v30 = vpop.eup %10056  ;;  %v2850_v20 = vmul.f32 %v10055_v58, %v17972_v57 }
 0x619   :  { %2972 = vmatmul.mubr.bf16.gmra.mrb[68].mxu1 %v2901_v26  ;;  %v2848_v40 = vmul.f32 %v10057_v30, %v17974_v49  ;;  %v13979_v63 = vpop.xlane.xlu1 %3934 }
 0x61a   :  { %9367 = vmatpush3.bf16.msra.mxu1 %v13737_v47  ;;  %2979 = vmatprep.mubr.bf16.mxu1 %v2904_v42  ;;  %v17976_v47 = vld [vmem:[#allocation16_spill] sm:$0xff]  ;;  %v17982_v42 = vld [vmem:[#allocation147_spill] sm:$0xff] }
 0x61b   :  { %9360 = vmatprep.subr.bf16.mxu1 %v13760_v61  ;;  %v2906_v37 = vpack.c.bf16 %v2850_v20, %v2848_v40  ;;  %v2849_v51 = vmul.f32 %v10055_v58, %v17976_v47  ;;  %v17977_v61 = vld [vmem:[#allocation8_spill] sm:$0xff]  ;;  %v17980_v58 = vld [vmem:[#allocation27_spill] sm:$0xff]  ;;  %v17983_v20 = vld [vmem:[#allocation21_spill] sm:$0xff] }
 0x61c   :  { %v2847_v39 = vmul.f32 %v10057_v30, %v17977_v61  ;;  %v3741_v26 = vsub.f32 %v17981_v1, %v17980_v58  ;;  %v3742_v30 = vsub.f32 %v17982_v42, %v17980_v58  ;;  %v17984_v40 = vld [vmem:[#allocation206_spill] sm:$0xff]  ;;  %v17987_v61 = vld [vmem:[#allocation156_spill] sm:$0xff]  ;;  %v17989_v58 = vld [vmem:[#allocation167_spill] sm:$0xff] }
 0x61d   :  { %v13965_v34 = vpop.eup %10058  ;;  %v2736_v12 = vpop.xlane.xlu1 %2735 }
 0x61e   :  { %9368 = vmatpush3.bf16.msra.mxu1 %v4156_v38  ;;  %17975 = vst [vmem:[#allocation105_spill] sm:$0xff] %v13965_v34  ;;  %v13968_v33 = vpop.eup %10060  ;;  %v2905_v7 = vpack.c.bf16 %v2849_v51, %v2847_v39  ;;  %v17978_v38 = vld [vmem:[#allocation40_spill] sm:$0xff]  ;;  %v3829_v60 = vmul.f32 1.442695, %v3741_v26  ;;  %v3831_v57 = vmul.f32 1.442695, %v3742_v30  ;;  %v3748_v39 = vsub.f32 %v17987_v61, %v17984_v40 }
 0x61f   :  { %v3948_v48 = vadd.f32 %v13968_v33, %v13965_v34  ;;  %v17990_v30 = vld [vmem:[#allocation168_spill] sm:$0xff]  ;;  %v17994_v61 = vld [vmem:[#allocation174_spill] sm:$0xff] }
 0x620   :  { %10062 = vpow2.f32 %v3829_v60  ;;  %v3843_v42 = vmul.f32 1.442695, %v3748_v39 }
 0x621   :  { %2980 = vmatmul.mubr.bf16.gmra.mrb[72].mxu1 %v2903_v21  ;;  %10064 = vpow2.f32 %v3831_v57  ;;  %v13987_v28 = vpop.xlane.xlu1 %3937  ;;  %v17985_v21 = vld [vmem:[#allocation154_spill] sm:$0xff] }
 0x622   :  { %2987 = vmatprep.mubr.bf16.mxu1 %v2906_v37  ;;  %10066 = vrcp.f32 %v2736_v12  ;;  %v3747_v37 = vsub.f32 %v17985_v21, %v17984_v40  ;;  %v17992_v40 = vld [vmem:[#allocation81_spill] sm:$0xff] }
 0x625   :  { %v4158_v47 = vpop.permute.xlu1 %4157 }
 0x629   :  { %3949 = vadd.xlane.f32.xlu1 %v3948_v48  ;;  %2988 = vmatmul.mubr.bf16.gmra.mrb[76].mxu1 %v2905_v7 }
 0x62a   :  { %4175 = vrot.lane.b32.xlu0 %v17978_v38, %s10675_s0  ;;  %v13991_v51 = vpop.eup %10062  ;;  %v3841_v38 = vmul.f32 1.442695, %v3747_v37 }
 0x62b   :  { %17986 = vst [vmem:[#allocation197_spill] sm:$0xff] %v13991_v51  ;;  %v13995_v48 = vpop.eup %10064 }
 0x62c   :  { %v10067_v7 = vpop.eup %10066  ;;  %v3945_v12 = vadd.f32 %v13995_v48, %v13991_v51 }
 0x62d   :  { %v2853_v21 = vmul.f32 %v10067_v7, %v17992_v40 }
 0x62e   :  { %4177 = vrot.lane.b32.xlu0 %v17979_v6, %s10675_s0  ;;  %v17988_v6 = vld [vmem:[#allocation5_spill] sm:$0xff] }
 0x62f   :  { %v3755_v1 = vsub.f32 %v17989_v58, %v17988_v6  ;;  %v3756_v60 = vsub.f32 %v17990_v30, %v17988_v6  ;;  %v17995_v30 = vld [vmem:[#allocation175_spill] sm:$0xff] }
 0x631   :  { %v3857_v37 = vmul.f32 1.442695, %v3755_v1  ;;  %v3859_v6 = vmul.f32 1.442695, %v3756_v60 }
 0x63a   :  { %4163 = vrot.lane.b32.xlu1 %v17983_v20, %s10675_s0  ;;  %v17991_v20 = vld [vmem:[#allocation136_spill] sm:$0xff] }
 0x640   :  { %v2733_v8 = vpop.xlane.xlu0 %2732 }
 0x641   :  { %10068 = vrcp.f32 %v2733_v8  ;;  %v2854_v8 = vmul.f32 %v10067_v7, %v17991_v20  ;;  %v17996_v7 = vld [vmem:[#allocation212_spill] sm:$0xff] }
 0x642   :  { %10070 = vpow2.f32 %v3841_v38  ;;  %v17997_v38 = vld [vmem:[#allocation181_spill] sm:$0xff] }
 0x643   :  { %10072 = vpow2.f32 %v3843_v42  ;;  %v3763_v1 = vsub.f32 %v17997_v38, %v17996_v7 }
 0x644   :  { %v4174_v49 = vpop.permute.xlu0 %4173  ;;  %10074 = vpow2.f32 %v3857_v37 }
 0x645   :  { %8429 = vmatprep.subr.bf16.mxu0 %v4174_v49  ;;  %9361 = vmatprep.subr.bf16.mxu1 %v4174_v49  ;;  %10076 = vpow2.f32 %v3859_v6 }
 0x646   :  { %8430 = vmatpush3.bf16.msra.mxu0 %v4158_v47  ;;  %9369 = vmatpush3.bf16.msra.mxu1 %v4158_v47  ;;  %v17993_v47 = vld [vmem:[#allocation133_spill] sm:$0xff] }
 0x647   :  { %v3759_v39 = vsub.f32 %v17994_v61, %v17993_v47  ;;  %v3760_v51 = vsub.f32 %v17995_v30, %v17993_v47  ;;  %v18005_v61 = vld [vmem:[#allocation48_spill] sm:$0xff] }
 0x64b   :  { %v10069_v26 = vpop.eup %10068 }
 0x64c   :  { %v2852_v57 = vmul.f32 %v10069_v26, %v13663_v2  ;;  %v2851_v49 = vmul.f32 %v10069_v26, %v13659_v29  ;;  %v3865_v2 = vmul.f32 1.442695, %v3759_v39  ;;  %v3867_v29 = vmul.f32 1.442695, %v3760_v51  ;;  %v14013_v26 = vpop.eup %10070  ;;  %v18006_v39 = vld [vmem:[#allocation37_spill] sm:$0xff] }
 0x64d   :  { %3946 = vadd.xlane.f32.xlu0 %v3945_v12  ;;  %17998 = vst [vmem:[#allocation108_spill] sm:$0xff] %v14013_v26  ;;  %v17999_v12 = vld [vmem:[#allocation182_spill] sm:$0xff]  ;;  %v14017_v60 = vpop.eup %10072 }
 0x64e   :  { %v2908_v58 = vpack.c.bf16 %v2854_v8, %v2852_v57  ;;  %v2907_v34 = vpack.c.bf16 %v2853_v21, %v2851_v49  ;;  %10078 = vpow2.f32 %v3865_v2  ;;  %v3764_v42 = vsub.f32 %v17999_v12, %v17996_v7  ;;  %18000 = vst [vmem:[#allocation10_spill] sm:$0xff] %v14017_v60  ;;  %v14019_v8 = vpop.eup %10074  ;;  %v18012_v12 = vld [vmem:[#allocation135_spill] sm:$0xff] }
 0x64f   :  { %10080 = vpow2.f32 %v3867_v29  ;;  %v3873_v57 = vmul.f32 1.442695, %v3763_v1  ;;  %18001 = vst [vmem:[#allocation17_spill] sm:$0xff] %v14019_v8  ;;  %v14023_v51 = vpop.eup %10076  ;;  %v18010_v29 = vld [vmem:[#allocation121_spill] sm:$0xff] }
 0x650   :  { %2995 = vmatprep.mubr.bf16.mxu1 %v2908_v58  ;;  %v3875_v20 = vmul.f32 1.442695, %v3764_v42  ;;  %18002 = vst [vmem:[#allocation31_spill] sm:$0xff] %v14023_v51  ;;  %v3966_v21 = vadd.f32 %v14023_v51, %v14019_v8  ;;  %v18007_v58 = vld [vmem:[#allocation122_spill] sm:$0xff]  ;;  %v18013_v42 = vld [vmem:[#allocation151_spill] sm:$0xff] }
 0x651   :  { %2996 = vmatmul.mubr.bf16.gmra.mrb[80].mxu1 %v2907_v34  ;;  %v3954_v34 = vadd.f32 %v14017_v60, %v14013_v26  ;;  %v2742_v49 = vpop.xlane.xlu1 %2741  ;;  %10082 = vpow2.f32 %v3873_v57  ;;  %v14035_v6 = vadd.f32 %v18007_v58, %v18006_v39  ;;  %v3745_v57 = vsub.f32 %v18013_v42, %v18012_v12  ;;  %v18019_v39 = vld [vmem:[#allocation158_spill] sm:$0xff] }
 0x652   :  { %10084 = vpow2.f32 %v3875_v20  ;;  %v18014_v20 = vld [vmem:[#allocation153_spill] sm:$0xff]  ;;  %v18024_v60 = vld [vmem:[#allocation162_spill] sm:$0xff] }
 0x653   :  { %18008 = vst [vmem:[#allocation36_spill] sm:$0xff] %v14035_v6  ;;  %v3624_v7 = vmax.f32 %v18010_v29, %v14035_v6  ;;  %v3837_v29 = vmul.f32 1.442695, %v3745_v57  ;;  %v18026_v57 = vld [vmem:[#allocation164_spill] sm:$0xff] }
 0x655   :  { %v2748_v47 = vpop.xlane.xlu1 %2747  ;;  %10086 = vpow2.f32 %v3837_v29 }
 0x658   :  { %v14025_v40 = vpop.eup %10078 }
 0x659   :  { %18003 = vst [vmem:[#allocation110_spill] sm:$0xff] %v14025_v40  ;;  %v14029_v37 = vpop.eup %10080  ;;  %v2754_v1 = vpop.xlane.xlu1 %2753 }
 0x65a   :  { %18004 = vst [vmem:[#allocation9_spill] sm:$0xff] %v14029_v37  ;;  %v3972_v30 = vadd.f32 %v14029_v37, %v14025_v40  ;;  %v18020_v37 = vld [vmem:[#allocation159_spill] sm:$0xff] }
 0x65b   :  { %v14039_v2 = vpop.eup %10082 }
 0x65c   :  { %18009 = vst [vmem:[#allocation148_spill] sm:$0xff] %v14039_v2  ;;  %v14043_v38 = vpop.eup %10084 }
 0x65d   :  { %18011 = vst [vmem:[#allocation150_spill] sm:$0xff] %v14043_v38  ;;  %v3978_v6 = vadd.f32 %v14043_v38, %v14039_v2 }
 0x65e   :  { %3955 = vadd.xlane.f32.xlu1 %v3954_v34  ;;  %v3746_v34 = vsub.f32 %v18014_v20, %v18012_v12  ;;  %v18021_v12 = vld [vmem:[#allocation125_spill] sm:$0xff] }
 0x660   :  { %v3839_v42 = vmul.f32 1.442695, %v3746_v34 }
 0x662   :  { %3967 = vadd.xlane.f32.xlu1 %v3966_v21  ;;  %v18015_v21 = vld [vmem:[#allocation13_spill] sm:$0xff]  ;;  %10088 = vpow2.f32 %v3839_v42  ;;  %v18029_v42 = vld [vmem:[#allocation170_spill] sm:$0xff] }
 0x663   :  { %4179 = vrot.lane.b32.xlu0 %v18005_v61, %s10675_s0  ;;  %v18016_v61 = vld [vmem:[#allocation126_spill] sm:$0xff] }
 0x664   :  { %v14051_v58 = vadd.f32 %v18016_v61, %v18015_v21  ;;  %v18022_v61 = vld [vmem:[#allocation210_spill] sm:$0xff]  ;;  %v18023_v21 = vld [vmem:[#allocation161_spill] sm:$0xff] }
 0x665   :  { %v3751_v26 = vsub.f32 %v18023_v21, %v18022_v61  ;;  %v3752_v2 = vsub.f32 %v18024_v60, %v18022_v61  ;;  %v18028_v21 = vld [vmem:[#allocation42_spill] sm:$0xff] }
 0x666   :  { %3973 = vadd.xlane.f32.xlu1 %v3972_v30  ;;  %18017 = vst [vmem:[#allocation90_spill] sm:$0xff] %v14051_v58  ;;  %v18018_v30 = vld [vmem:[#allocation209_spill] sm:$0xff]  ;;  %v3630_v20 = vmax.f32 %v18021_v12, %v14051_v58 }
 0x667   :  { %v3749_v40 = vsub.f32 %v18019_v39, %v18018_v30  ;;  %v3750_v8 = vsub.f32 %v18020_v37, %v18018_v30  ;;  %v3849_v37 = vmul.f32 1.442695, %v3751_v26  ;;  %v18027_v30 = vld [vmem:[#allocation165_spill] sm:$0xff]  ;;  %v3851_v29 = vmul.f32 1.442695, %v3752_v2 }
 0x669   :  { %v3845_v51 = vmul.f32 1.442695, %v3749_v40  ;;  %v3847_v39 = vmul.f32 1.442695, %v3750_v8 }
 0x66a   :  { %3625 = vmax.xlane.f32.xlu1 %v3624_v7  ;;  %v14059_v7 = vpop.xlane.xlu1 %2759 }
 0x66b   :  { %10090 = vpow2.f32 %v3845_v51  ;;  %v3757_v51 = vsub.f32 %v18029_v42, %v18028_v21 }
 0x66c   :  { %10092 = vrcp.f32 %v2742_v49  ;;  %v14079_v49 = vpop.eup %10086 }
 0x66d   :  { %10094 = vpow2.f32 %v3847_v39  ;;  %18031 = vst [vmem:[#allocation86_spill] sm:$0xff] %v14079_v49  ;;  %v14081_v2 = vpop.eup %10088 }
 0x66e   :  { %3979 = vadd.xlane.f32.xlu1 %v3978_v6  ;;  %v18025_v6 = vld [vmem:[#allocation211_spill] sm:$0xff]  ;;  %v14071_v40 = vpop.xlane.xlu1 %2765  ;;  %18032 = vst [vmem:[#allocation3_spill] sm:$0xff] %v14081_v2 }
 0x66f   :  { %v3753_v34 = vsub.f32 %v18026_v57, %v18025_v6  ;;  %v3754_v38 = vsub.f32 %v18027_v30, %v18025_v6 }
 0x671   :  { %v3853_v8 = vmul.f32 1.442695, %v3753_v34  ;;  %v3855_v60 = vmul.f32 1.442695, %v3754_v38  ;;  %v3951_v34 = vadd.f32 %v14081_v2, %v14079_v49 }
 0x672   :  { %3631 = vmax.xlane.f32.xlu1 %v3630_v20  ;;  %v18030_v20 = vld [vmem:[#allocation171_spill] sm:$0xff]  ;;  %v14077_v6 = vpop.xlane.xlu1 %2771 }
 0x673   :  { %v3758_v61 = vsub.f32 %v18030_v20, %v18028_v21 }
 0x675   :  { %v2739_v58 = vpop.xlane.xlu0 %2738  ;;  %v14083_v39 = vpop.eup %10090 }
 0x676   :  { %10096 = vrcp.f32 %v2739_v58  ;;  %v3861_v58 = vmul.f32 1.442695, %v3757_v51  ;;  %v14091_v42 = vpop.xlane.xlu1 %2777 }
 0x677   :  { %10098 = vpow2.f32 %v3849_v37  ;;  %v3863_v37 = vmul.f32 1.442695, %v3758_v61 }
 0x678   :  { %10100 = vrcp.f32 %v2748_v47  ;;  %v10093_v47 = vpop.eup %10092 }
 0x679   :  { %v2745_v26 = vpop.xlane.xlu0 %2744  ;;  %10102 = vpow2.f32 %v3851_v29  ;;  %v14085_v57 = vpop.eup %10094  ;;  %v18033_v29 = vld [vmem:[#allocation6_spill] sm:$0xff]  ;;  %v2857_v61 = vmul.f32 %v10093_v47, %v13695_v13 }
 0x67a   :  { %10104 = vrcp.f32 %v2745_v26  ;;  %v2858_v26 = vmul.f32 %v10093_v47, %v13697_v31 }
 0x67b   :  { %10106 = vpow2.f32 %v3853_v8  ;;  %v18034_v8 = vld [vmem:[#allocation177_spill] sm:$0xff] }
 0x67c   :  { %10108 = vpow2.f32 %v3855_v60  ;;  %v3761_v21 = vsub.f32 %v18034_v8, %v18033_v29  ;;  %v18036_v8 = vld [vmem:[#allocation51_spill] sm:$0xff] }
 0x67d   :  { %v2751_v38 = vpop.xlane.xlu0 %2750  ;;  %10110 = vrcp.f32 %v2754_v1 }
 0x67e   :  { %10112 = vrcp.f32 %v2751_v38  ;;  %v3869_v13 = vmul.f32 1.442695, %v3761_v21 }
 0x67f   :  { %10114 = vpow2.f32 %v3861_v58  ;;  %v18035_v58 = vld [vmem:[#allocation178_spill] sm:$0xff] }
 0x680   :  { %v10097_v30 = vpop.eup %10096  ;;  %10116 = vpow2.f32 %v3863_v37  ;;  %v3762_v12 = vsub.f32 %v18035_v58, %v18033_v29 }
 0x681   :  { %v2757_v60 = vpop.xlane.xlu0 %2756  ;;  %v14093_v51 = vpop.eup %10098  ;;  %v2856_v1 = vmul.f32 %v10097_v30, %v13815_v41  ;;  %v2855_v20 = vmul.f32 %v10097_v30, %v13811_v56  ;;  %v3957_v41 = vadd.f32 %v14085_v57, %v14083_v39 }
 0x682   :  { %3952 = vadd.xlane.f32.xlu0 %v3951_v34  ;;  %v10101_v38 = vpop.eup %10100  ;;  %10118 = vrcp.f32 %v2757_v60  ;;  %v3871_v58 = vmul.f32 1.442695, %v3762_v12 }
 0x683   :  { %9608 = vrot.lane.b32.xlu1 %v18036_v8, %s10673_s14  ;;  %v14103_v49 = vpop.eup %10102  ;;  %v2910_v2 = vpack.c.bf16 %v2858_v26, %v2856_v1  ;;  %v2909_v34 = vpack.c.bf16 %v2857_v61, %v2855_v20  ;;  %v2862_v37 = vmul.f32 %v10101_v38, %v13711_v36  ;;  %10120 = vrcp.f32 %v14059_v7  ;;  %v14114_v1 = vpop.xlane.xlu1 %2783 }
 0x684   :  { %v10105_v31 = vpop.eup %10104  ;;  %v3960_v20 = vadd.f32 %v14103_v49, %v14093_v51  ;;  %10122 = vpow2.f32 %v3869_v13  ;;  %v2861_v7 = vmul.f32 %v10101_v38, %v13705_v32  ;;  %v18037_v13 = vld [vmem:[#allocation213_spill] sm:$0xff]  ;;  %v18039_v32 = vld [vmem:[#allocation14_spill] sm:$0xff]  ;;  %v18040_v38 = vld [vmem:[#allocation120_spill] sm:$0xff] }
 0x685   :  { %v2763_v56 = vpop.xlane.xlu0 %2762  ;;  %v14107_v30 = vpop.eup %10106  ;;  %3003 = vmatprep.mubr.bf16.mxu1 %v2910_v2  ;;  %v2860_v47 = vmul.f32 %v10105_v31, %v13829_v3  ;;  %v2859_v61 = vmul.f32 %v10105_v31, %v13825_v43  ;;  %10124 = vpow2.f32 %v3871_v58 }
 0x686   :  { %3958 = vadd.xlane.f32.xlu0 %v3957_v41  ;;  %v14111_v29 = vpop.eup %10108  ;;  %3004 = vmatmul.mubr.bf16.gmra.mrb[84].mxu1 %v2909_v34  ;;  %10126 = vrcp.f32 %v2763_v56 }
 0x687   :  { %v10111_v26 = vpop.eup %10110  ;;  %v2912_v60 = vpack.c.bf16 %v2862_v37, %v2860_v47  ;;  %v3963_v12 = vadd.f32 %v14111_v29, %v14107_v30  ;;  %v14128_v47 = vpop.xlane.xlu1 %2789  ;;  %v2911_v31 = vpack.c.bf16 %v2861_v7, %v2859_v61  ;;  %v18038_v37 = vld [vmem:[#allocation183_spill] sm:$0xff]  ;;  %10128 = vrcp.f32 %v14071_v40 }
 0x688   :  { %v10113_v21 = vpop.eup %10112  ;;  %v2866_v41 = vmul.f32 %v10111_v26, %v13725_v23  ;;  %v18041_v23 = vld [vmem:[#allocation184_spill] sm:$0xff] }
 0x689   :  { %v2769_v2 = vpop.xlane.xlu0 %2768  ;;  %3011 = vmatprep.mubr.bf16.mxu1 %v2912_v60  ;;  %v2864_v36 = vmul.f32 %v10113_v21, %v13845_v55  ;;  %v14120_v3 = vpop.eup %10114  ;;  %v3765_v55 = vsub.f32 %v18038_v37, %v18037_v13  ;;  %v3766_v8 = vsub.f32 %v18041_v23, %v18037_v13  ;;  %v18042_v13 = vld [vmem:[#allocation119_spill] sm:$0xff] }
 0x68a   :  { %3961 = vadd.xlane.f32.xlu0 %v3960_v20  ;;  %v14126_v34 = vpop.eup %10116  ;;  %v14135_v20 = vadd.f32 %v18040_v38, %v18039_v32  ;;  %10130 = vrcp.f32 %v2769_v2 }
 0x68b   :  { %v2914_v60 = vpack.c.bf16 %v2866_v41, %v2864_v36  ;;  %v3969_v56 = vadd.f32 %v14126_v34, %v14120_v3  ;;  %v3877_v36 = vmul.f32 1.442695, %v3765_v55  ;;  %v14143_v41 = vpop.xlane.xlu1 %3943  ;;  %v3879_v38 = vmul.f32 1.442695, %v3766_v8 }
 0x68c   :  { %v10119_v58 = vpop.eup %10118 }
 0x68d   :  { %v2775_v43 = vpop.xlane.xlu0 %2774  ;;  %v10121_v61 = vpop.eup %10120  ;;  %v2868_v40 = vmul.f32 %v10119_v58, %v13867_v62  ;;  %10132 = vpow2.f32 %v3877_v36  ;;  %v2867_v36 = vmul.f32 %v10119_v58, %v13861_v45 }
 0x68e   :  { %3964 = vadd.xlane.f32.xlu0 %v3963_v12  ;;  %3012 = vmatmul.mubr.bf16.gmra.mrb[88].mxu1 %v2911_v31  ;;  %v2863_v12 = vmul.f32 %v10113_v21, %v13841_v5  ;;  %v2865_v31 = vmul.f32 %v10111_v26, %v13719_v10  ;;  %v14146_v37 = vpop.eup %10122  ;;  %v2870_v23 = vmul.f32 %v10121_v61, %v13741_v53  ;;  %10134 = vrcp.f32 %v14077_v6  ;;  %v18043_v10 = vld [vmem:[#allocation39_spill] sm:$0xff]  ;;  %v18044_v26 = vld [vmem:[#allocation124_spill] sm:$0xff] }
 0x68f   :  { %3019 = vmatprep.mubr.bf16.mxu1 %v2914_v60  ;;  %v3621_v60 = vmax.f32 %v18042_v13, %v14135_v20  ;;  %v14151_v32 = vpop.eup %10124  ;;  %10136 = vpow2.f32 %v3879_v38  ;;  %v14162_v2 = vpop.xlane.xlu1 %2795  ;;  %v2869_v6 = vmul.f32 %v10121_v61, %v13735_v44 }
 0x690   :  { %v2913_v21 = vpack.c.bf16 %v2865_v31, %v2863_v12  ;;  %v2916_v62 = vpack.c.bf16 %v2870_v23, %v2868_v40  ;;  %v10127_v55 = vpop.eup %10126  ;;  %v3975_v53 = vadd.f32 %v14151_v32, %v14146_v37  ;;  %v18045_v31 = vld [vmem:[#allocation123_spill] sm:$0xff]  ;;  %10138 = vrcp.f32 %v2775_v43 }
 0x691   :  { %v2781_v7 = vpop.xlane.xlu0 %2780  ;;  %v10129_v8 = vpop.eup %10128  ;;  %v2872_v40 = vmul.f32 %v10127_v55, %v13877_v14  ;;  %10140 = vrcp.f32 %v14091_v42  ;;  %v2871_v58 = vmul.f32 %v10127_v55, %v13873_v25  ;;  %v18046_v42 = vld [vmem:[#allocation23_spill] sm:$0xff] }
 0x692   :  { %3970 = vadd.xlane.f32.xlu0 %v3969_v56  ;;  %v14158_v56 = vadd.f32 %v18044_v26, %v18043_v10  ;;  %v2874_v38 = vmul.f32 %v10129_v8, %v13756_v59  ;;  %v2873_v61 = vmul.f32 %v10129_v8, %v13750_v24  ;;  %10142 = vrcp.f32 %v2781_v7 }
 0x693   :  { %v14171_v10 = vpop.xlane.xlu1 %2801  ;;  %10144 = vrcp.f32 %v14114_v1 }
 0x694   :  { %v10131_v26 = vpop.eup %10130 }
 0x695   :  { %v14153_v5 = vpop.xlane.xlu0 %3940  ;;  %v2876_v43 = vmul.f32 %v10131_v26, %v13889_v54  ;;  %v2875_v8 = vmul.f32 %v10131_v26, %v13883_v15 }
 0x696   :  { %3622 = vmax.xlane.f32.xlu0 %v3621_v60  ;;  %3020 = vmatmul.mubr.bf16.gmra.mrb[92].mxu1 %v2913_v21  ;;  %v3627_v60 = vmax.f32 %v18045_v31, %v14158_v56  ;;  %v2915_v21 = vpack.c.bf16 %v2869_v6, %v2867_v36  ;;  %v18047_v36 = vld [vmem:[#allocation130_spill] sm:$0xff] }
 0x697   :  { %3027 = vmatprep.mubr.bf16.mxu1 %v2916_v62  ;;  %v2918_v62 = vpack.c.bf16 %v2874_v38, %v2872_v40  ;;  %v14173_v45 = vpop.eup %10132  ;;  %v14185_v40 = vadd.f32 %v18047_v36, %v18046_v42  ;;  %v4160_v6 = vpop.permute.xlu1 %4159  ;;  %v2917_v38 = vpack.c.bf16 %v2873_v61, %v2871_v58 }
 0x698   :  { %v10135_v44 = vpop.eup %10134 }
 0x699   :  { %v2787_v12 = vpop.xlane.xlu0 %2786  ;;  %v14178_v59 = vpop.eup %10136  ;;  %v2877_v1 = vmul.f32 %v10135_v44, %v13767_v46  ;;  %v18049_v46 = vld [vmem:[#allocation61_spill] sm:$0xff] }
 0x69a   :  { %3976 = vadd.xlane.f32.xlu0 %v3975_v53  ;;  %v2878_v53 = vmul.f32 %v10135_v44, %v13773_v0  ;;  %v10139_v55 = vpop.eup %10138  ;;  %v18048_v0 = vld [vmem:[#allocation129_spill] sm:$0xff]  ;;  %10146 = vrcp.f32 %v2787_v12 }
 0x69b   :  { %v10141_v24 = vpop.eup %10140  ;;  %v3636_v54 = vmax.f32 %v18048_v0, %v14185_v40  ;;  %v4162_v58 = vpop.permute.xlu1 %4161  ;;  %v2919_v61 = vpack.c.bf16 %v2877_v1, %v2875_v8  ;;  %10148 = vrcp.f32 %v14128_v47  ;;  %v2879_v26 = vmul.f32 %v10139_v55, %v13893_v22  ;;  %v18054_v8 = vld [vmem:[#allocation140_spill] sm:$0xff] }
 0x69c   :  { %v2920_v25 = vpack.c.bf16 %v2878_v53, %v2876_v43  ;;  %v2882_v43 = vmul.f32 %v10141_v24, %v13787_v17  ;;  %v10143_v36 = vpop.eup %10142 }
 0x69d   :  { %v2793_v23 = vpop.xlane.xlu0 %2792  ;;  %v10145_v15 = vpop.eup %10144  ;;  %v2883_v22 = vmul.f32 %v10143_v36, %v13903_v35 }
 0x69e   :  { %3628 = vmax.xlane.f32.xlu0 %v3627_v60  ;;  %3028 = vmatmul.mubr.bf16.gmra.mrb[96].mxu1 %v2915_v21  ;;  %v3981_v21 = vadd.f32 %v14178_v59, %v14173_v45  ;;  %v2886_v17 = vmul.f32 %v10145_v15, %v13799_v16  ;;  %10150 = vrcp.f32 %v2793_v23  ;;  %v18052_v16 = vld [vmem:[#allocation188_spill] sm:$0xff] }
 0x69f   :  { %3035 = vmatprep.mubr.bf16.mxu1 %v2918_v62  ;;  %v2880_v62 = vmul.f32 %v10139_v55, %v13899_v4  ;;  %v2884_v4 = vmul.f32 %v10143_v36, %v13907_v18  ;;  %10152 = vrcp.f32 %v14162_v2  ;;  %v18053_v55 = vld [vmem:[#allocation55_spill] sm:$0xff] }
 0x6a1   :  { %v14175_v14 = vpop.xlane.xlu0 %2798  ;;  %v2922_v53 = vpack.c.bf16 %v2882_v43, %v2880_v62  ;;  %v2924_v44 = vpack.c.bf16 %v2886_v17, %v2884_v4  ;;  %v18056_v43 = vld [vmem:[#allocation35_spill] sm:$0xff]  ;;  %v18060_v4 = vld [vmem:[#allocation190_spill] sm:$0xff] }
 0x6a2   :  { %10154 = vrcp.f32 %v14175_v14 }
 0x6a3   :  { %10156 = vrcp.f32 %v14171_v10  ;;  %v18058_v10 = vld [vmem:[#allocation104_spill] sm:$0xff] }
 0x6a5   :  { %v4176_v60 = vpop.permute.xlu0 %4175 }
 0x6a6   :  { %8431 = vmatprep.subr.bf16.mxu0 %v4176_v60  ;;  %9362 = vmatprep.subr.bf16.mxu1 %v4176_v60  ;;  %v10147_v60 = vpop.eup %10146 }
 0x6a7   :  { %3036 = vmatmul.mubr.bf16.gmra.mrb[100].mxu1 %v2917_v38  ;;  %3982 = vadd.xlane.f32.xlu1 %v3981_v21  ;;  %v10149_v47 = vpop.eup %10148  ;;  %v2888_v18 = vmul.f32 %v10147_v60, %v13923_v52  ;;  %v18050_v38 = vld [vmem:[#allocation214_spill] sm:$0xff]  ;;  %v2887_v62 = vmul.f32 %v10147_v60, %v18054_v8  ;;  %v18067_v8 = vld [vmem:[#allocation193_spill] sm:$0xff] }
 0x6a8   :  { %3043 = vmatprep.mubr.bf16.mxu1 %v2920_v25  ;;  %8432 = vmatpush3.bf16.msra.mxu0 %v4160_v6  ;;  %v2885_v25 = vmul.f32 %v10145_v15, %v13795_v11  ;;  %v3768_v23 = vsub.f32 %v18052_v16, %v18050_v38  ;;  %v2890_v2 = vmul.f32 %v10149_v47, %v13809_v9  ;;  %v10151_v35 = vpop.eup %10150  ;;  %v18057_v9 = vld [vmem:[#allocation97_spill] sm:$0xff]  ;;  %v18062_v60 = vld [vmem:[#allocation142_spill] sm:$0xff] }
 0x6a9   :  { %9370 = vmatpush3.bf16.msra.mxu1 %v4160_v6  ;;  %v4178_v7 = vpop.permute.xlu0 %4177  ;;  %v2881_v6 = vmul.f32 %v10141_v24, %v13781_v19  ;;  %v18051_v19 = vld [vmem:[#allocation187_spill] sm:$0xff]  ;;  %v10153_v11 = vpop.eup %10152 }
 0x6aa   :  { %8433 = vmatprep.subr.bf16.mxu0 %v4178_v7  ;;  %9363 = vmatprep.subr.bf16.mxu1 %v4178_v7  ;;  %v3767_v21 = vsub.f32 %v18051_v19, %v18050_v38  ;;  %v2923_v24 = vpack.c.bf16 %v2885_v25, %v2883_v22  ;;  %v3883_v52 = vmul.f32 1.442695, %v3768_v23  ;;  %v2894_v14 = vmul.f32 %v10153_v11, %v18057_v9  ;;  %v18064_v19 = vld [vmem:[#allocation102_spill] sm:$0xff]  ;;  %v18070_v9 = vld [vmem:[#allocation11_spill] sm:$0xff] }
 0x6ab   :  { %3637 = vmax.xlane.f32.xlu1 %v3636_v54  ;;  %v2921_v12 = vpack.c.bf16 %v2881_v6, %v2879_v26  ;;  %v2926_v54 = vpack.c.bf16 %v2890_v2, %v2888_v18  ;;  %v18059_v26 = vld [vmem:[#allocation215_spill] sm:$0xff] }
 0x6ac   :  { %8434 = vmatpush3.bf16.msra.mxu0 %v4162_v58  ;;  %v3881_v7 = vmul.f32 1.442695, %v3767_v21  ;;  %v10155_v15 = vpop.eup %10154  ;;  %v3769_v6 = vsub.f32 %v18060_v4, %v18059_v26  ;;  %v18063_v18 = vld [vmem:[#allocation143_spill] sm:$0xff] }
 0x6ad   :  { %9371 = vmatpush3.bf16.msra.mxu1 %v4162_v58  ;;  %v18055_v58 = vld [vmem:[#allocation186_spill] sm:$0xff]  ;;  %v10157_v17 = vpop.eup %10156  ;;  %v2896_v22 = vmul.f32 %v10155_v15, %v13939_v27 }
 0x6ae   :  { %v2892_v1 = vmul.f32 %v10151_v35, %v18055_v58  ;;  %10158 = vpow2.f32 %v3881_v7  ;;  %v3885_v38 = vmul.f32 1.442695, %v3769_v6  ;;  %v2898_v21 = vmul.f32 %v10157_v17, %v18064_v19  ;;  %v18068_v58 = vld [vmem:[#allocation66_spill] sm:$0xff]  ;;  %v18075_v19 = vld [vmem:[#allocation45_spill] sm:$0xff] }
 0x6af   :  { %3044 = vmatmul.mubr.bf16.gmra.mrb[104].mxu1 %v2919_v61  ;;  %v2889_v61 = vmul.f32 %v10149_v47, %v18056_v43  ;;  %10160 = vpow2.f32 %v3883_v52  ;;  %v2891_v47 = vmul.f32 %v10151_v35, %v18062_v60  ;;  %v18065_v35 = vld [vmem:[#allocation18_spill] sm:$0xff]  ;;  %v18066_v52 = vld [vmem:[#allocation128_spill] sm:$0xff] }
 0x6b0   :  { %3051 = vmatprep.mubr.bf16.mxu1 %v2922_v53  ;;  %10162 = vrcp.f32 %v13975_v50  ;;  %v2928_v36 = vpack.c.bf16 %v2894_v14, %v2892_v1  ;;  %v2893_v50 = vmul.f32 %v10153_v11, %v18063_v18  ;;  %v14236_v27 = vadd.f32 %v18066_v52, %v18065_v35  ;;  %v18069_v43 = vld [vmem:[#allocation172_spill] sm:$0xff] }
 0x6b1   :  { %v2925_v53 = vpack.c.bf16 %v2889_v61, %v2887_v62  ;;  %10164 = vrcp.f32 %v18058_v10  ;;  %v2895_v62 = vmul.f32 %v10155_v15, %v18067_v8  ;;  %v2897_v61 = vmul.f32 %v10157_v17, %v18069_v43  ;;  %v18073_v18 = vld [vmem:[#allocation208_spill] sm:$0xff] }
 0x6b2   :  { %v2927_v23 = vpack.c.bf16 %v2893_v50, %v2891_v47  ;;  %10166 = vpow2.f32 %v3885_v38  ;;  %v18074_v38 = vld [vmem:[#allocation19_spill] sm:$0xff] }
 0x6b3   :  { %v2929_v10 = vpack.c.bf16 %v2897_v61, %v2895_v62  ;;  %v18077_v62 = vld [vmem:[#allocation207_spill] sm:$0xff] }
 0x6b4   :  { %9603 = vrot.lane.b32.xlu0 %v18049_v46, %s10673_s14 }
 0x6b6   :  { %v3950_v15 = vpop.xlane.xlu1 %3949 }
 0x6b7   :  { %3052 = vmatmul.mubr.bf16.gmra.mrb[108].mxu1 %v2921_v12  ;;  %v18061_v12 = vld [vmem:[#allocation191_spill] sm:$0xff] }
 0x6b8   :  { %3059 = vmatprep.mubr.bf16.mxu1 %v2924_v44  ;;  %v3770_v44 = vsub.f32 %v18061_v12, %v18059_v26  ;;  %v14230_v25 = vpop.eup %10158  ;;  %v18072_v12 = vld [vmem:[#allocation28_spill] sm:$0xff] }
 0x6b9   :  { %v14232_v2 = vpop.eup %10160 }
 0x6ba   :  { %v3887_v16 = vmul.f32 1.442695, %v3770_v44  ;;  %v3984_v11 = vadd.f32 %v14232_v2, %v14230_v25 }
 0x6bc   :  { %9618 = vrot.lane.b32.xlu1 %v18053_v55, %s10673_s14  ;;  %10168 = vpow2.f32 %v3887_v16 }
 0x6bd   :  { %10170 = vrcp.f32 %v13987_v28 }
 0x6be   :  { %10172 = vrcp.f32 %v13979_v63 }
 0x6bf   :  { %3060 = vmatmul.mubr.bf16.gmra.mrb[112].mxu1 %v2923_v24  ;;  %v2930_v24 = vpack.c.bf16 %v2898_v21, %v2896_v22  ;;  %10174 = vrcp.f32 %v14153_v5  ;;  %v4164_v22 = vpop.permute.xlu1 %4163 }
 0x6c0   :  { %3067 = vmatprep.mubr.bf16.mxu1 %v2926_v54  ;;  %v10163_v54 = vpop.eup %10162  ;;  %10176 = vrcp.f32 %v14143_v41 }
 0x6c1   :  { %v10165_v7 = vpop.eup %10164  ;;  %v4052_v1 = vmul.f32 %v10163_v54, %v18068_v58  ;;  %v4051_v44 = vmul.f32 %v10163_v54, %v18072_v12 }
 0x6c2   :  { %v4050_v14 = vmul.f32 %v10165_v7, %v18070_v9  ;;  %v14248_v4 = vpop.eup %10166  ;;  %v4049_v5 = vmul.f32 %v10165_v7, %v18074_v38  ;;  %v18080_v9 = vld [vmem:[#allocation132_spill] sm:$0xff] }
 0x6c4   :  { %v4108_v26 = vpack.c.bf16 %v4052_v1, %v4050_v14  ;;  %v4107_v41 = vpack.c.bf16 %v4051_v44, %v4049_v5  ;;  %v18078_v1 = vld [vmem:[#allocation103_spill] sm:$0xff] }
 0x6c6   :  { %v14251_v6 = vpop.eup %10168 }
 0x6c7   :  { %3068 = vmatmul.mubr.bf16.gmra.mrb[116].mxu1 %v2925_v53  ;;  %v18071_v53 = vld [vmem:[#allocation127_spill] sm:$0xff]  ;;  %v10171_v17 = vpop.eup %10170  ;;  %v3987_v47 = vadd.f32 %v14251_v6, %v14248_v4 }
 0x6c8   :  { %3075 = vmatprep.mubr.bf16.mxu1 %v2928_v36  ;;  %v3633_v36 = vmax.f32 %v18071_v53, %v14236_v27  ;;  %v10173_v63 = vpop.eup %10172  ;;  %v4056_v50 = vmul.f32 %v10171_v17, %v18073_v18  ;;  %v4055_v7 = vmul.f32 %v10171_v17, %v18077_v62  ;;  %v18082_v17 = vld [vmem:[#allocation38_spill] sm:$0xff] }
 0x6c9   :  { %v4054_v21 = vmul.f32 %v10173_v63, %v18075_v19  ;;  %v4053_v14 = vmul.f32 %v10173_v63, %v18080_v9  ;;  %v18084_v63 = vld [vmem:[#allocation179_spill] sm:$0xff] }
 0x6cb   :  { %v4110_v16 = vpack.c.bf16 %v4056_v50, %v4054_v21  ;;  %v18086_v21 = vld [vmem:[#allocation84_spill] sm:$0xff] }
 0x6cf   :  { %3076 = vmatmul.mubr.bf16.gmra.mrb[120].mxu1 %v2927_v23  ;;  %v10175_v23 = vpop.eup %10174 }
 0x6d0   :  { %3083 = vmatprep.mubr.bf16.mxu1 %v2930_v24  ;;  %v10177_v52 = vpop.eup %10176  ;;  %v4058_v43 = vmul.f32 %v10175_v23, %v18078_v1  ;;  %v4057_v50 = vmul.f32 %v10175_v23, %v18084_v63 }
 0x6d3   :  { %3985 = vadd.xlane.f32.xlu0 %v3984_v11 }
 0x6d7   :  { %3084 = vmatmul.mubr.bf16.gmra.mrb[124].mxu1 %v2929_v10  ;;  %3634 = vmax.xlane.f32.xlu0 %v3633_v36  ;;  %v18081_v36 = vld [vmem:[#allocation138_spill] sm:$0xff] }
 0x6d8   :  { %4253 = vmatprep.mubr.bf16.mxu1 %v4108_v26  ;;  %v4060_v10 = vmul.f32 %v10177_v52, %v18081_v36  ;;  %v4109_v26 = vpack.c.bf16 %v4055_v7, %v4053_v14  ;;  %v18088_v7 = vld [vmem:[#allocation216_spill] sm:$0xff]  ;;  %v18092_v36 = vld [vmem:[#allocation197_spill] sm:$0xff] }
 0x6da   :  { %v3947_v28 = vpop.xlane.xlu0 %3946 }
 0x6db   :  { %10178 = vrcp.f32 %v3947_v28  ;;  %v4112_v28 = vpack.c.bf16 %v4060_v10, %v4058_v43 }
 0x6dc   :  { %10180 = vrcp.f32 %v3950_v15 }
 0x6de   :  { %v4180_v60 = vpop.permute.xlu0 %4179 }
 0x6df   :  { %8435 = vmatprep.subr.bf16.mxu0 %v4180_v60  ;;  %9364 = vmatprep.subr.bf16.mxu1 %v4180_v60 }
 0x6e0   :  { %3988 = vadd.xlane.f32.xlu1 %v3987_v47  ;;  %8436 = vmatpush3.bf16.msra.mxu0 %v4164_v22 }
 0x6e1   :  { %9372 = vmatpush3.bf16.msra.mxu1 %v4164_v22 }
 0x6e4   :  { %4254 = vmatmul.mubr.bf16.vlgmr.msra.gmra.mrb[128].mxu1 %v4107_v41  ;;  %v8229_v24 = vpop.f32.mrb[64].mxu1  ;;  %v4059_v41 = vmul.f32 %v10177_v52, %v18086_v21  ;;  %v18096_v21 = vld [vmem:[#allocation198_spill] sm:$0xff] }
 0x6e5   :  { %4261 = vmatprep.mubr.bf16.mxu1 %v4110_v16  ;;  %v8230_v54 = vpop.f32.mrb[65].mxu1  ;;  %v10179_v12 = vpop.eup %10178  ;;  %v18087_v16 = vld [vmem:[#allocation59_spill] sm:$0xff] }
 0x6e6   :  { %v14260_v11 = vadd.f32 %v8230_v54, %v8229_v24  ;;  %v8232_v8 = vpop.f32.mrb[66].mxu1  ;;  %v10181_v47 = vpop.eup %10180  ;;  %v4062_v5 = vmul.f32 %v10179_v12, %v13995_v48  ;;  %v18090_v48 = vld [vmem:[#allocation196_spill] sm:$0xff]  ;;  %v18111_v54 = vld [vmem:[#allocation106_spill] sm:$0xff] }
 0x6e7   :  { %v8233_v58 = vpop.f32.mrb[67].mxu1  ;;  %v4064_v24 = vmul.f32 %v10181_v47, %v13968_v33  ;;  %v3772_v43 = vsub.f32 %v18090_v48, %v18088_v7  ;;  %v4061_v33 = vmul.f32 %v10179_v12, %v18092_v36  ;;  %v18097_v12 = vld [vmem:[#allocation199_spill] sm:$0xff] }
 0x6e8   :  { %18076 = vst [vmem:[#allocation47_spill] sm:$0xff] %v14260_v11  ;;  %v14264_v61 = vadd.f32 %v8233_v58, %v8232_v8  ;;  %v4111_v8 = vpack.c.bf16 %v4059_v41, %v4057_v50  ;;  %v18089_v58 = vld [vmem:[#allocation195_spill] sm:$0xff]  ;;  %v18104_v50 = vld [vmem:[#allocation82_spill] sm:$0xff] }
 0x6e9   :  { %v4114_v62 = vpack.c.bf16 %v4064_v24, %v4062_v5  ;;  %v3771_v23 = vsub.f32 %v18089_v58, %v18088_v7  ;;  %v18095_v5 = vld [vmem:[#allocation217_spill] sm:$0xff] }
 0x6ea   :  { %18079 = vst [vmem:[#allocation109_spill] sm:$0xff] %v14264_v61  ;;  %v3773_v41 = vsub.f32 %v18096_v21, %v18095_v5 }
 0x6ec   :  { %4262 = vmatmul.mubr.bf16.gmra.mrb[132].mxu1 %v4109_v26  ;;  %v8235_v44 = vpop.f32.mrb[68].mxu1  ;;  %v3889_v26 = vmul.f32 1.442695, %v3771_v23  ;;  %v3893_v23 = vmul.f32 1.442695, %v3773_v41 }
 0x6ed   :  { %4269 = vmatprep.mubr.bf16.mxu1 %v4112_v28  ;;  %9613 = vrot.lane.b32.xlu0 %v18082_v17, %s10673_s14  ;;  %v8236_v60 = vpop.f32.mrb[69].mxu1 }
 0x6ee   :  { %v14272_v22 = vadd.f32 %v8236_v60, %v8235_v44  ;;  %v8238_v18 = vpop.f32.mrb[70].mxu1  ;;  %v18094_v44 = vld [vmem:[#allocation105_spill] sm:$0xff]  ;;  %10182 = vpow2.f32 %v3889_v26 }
 0x6ef   :  { %v8239_v38 = vpop.f32.mrb[71].mxu1  ;;  %v4063_v60 = vmul.f32 %v10181_v47, %v18094_v44 }
 0x6f0   :  { %18083 = vst [vmem:[#allocation91_spill] sm:$0xff] %v14272_v22  ;;  %v14276_v19 = vadd.f32 %v8239_v38, %v8238_v18  ;;  %v3891_v18 = vmul.f32 1.442695, %v3772_v43 }
 0x6f1   :  { %9628 = vrot.lane.b32.xlu1 %v18087_v16, %s10673_s14  ;;  %v4113_v63 = vpack.c.bf16 %v4063_v60, %v4061_v33 }
 0x6f2   :  { %18085 = vst [vmem:[#allocation30_spill] sm:$0xff] %v14276_v19  ;;  %10184 = vpow2.f32 %v3891_v18  ;;  %v18194_v19 = vld [vmem:[#allocation71_spill] sm:$0xff] }
 0x6f3   :  { %10186 = vpow2.f32 %v3893_v23  ;;  %v18102_v23 = vld [vmem:[#allocation86_spill] sm:$0xff] }
 0x6f4   :  { %4270 = vmatmul.mubr.bf16.gmra.mrb[136].mxu1 %v4111_v8  ;;  %v8241_v1 = vpop.f32.mrb[72].mxu1  ;;  %v3774_v8 = vsub.f32 %v18097_v12, %v18095_v5  ;;  %v18100_v12 = vld [vmem:[#allocation3_spill] sm:$0xff] }
 0x6f5   :  { %4277 = vmatprep.mubr.bf16.mxu1 %v4114_v62  ;;  %v8242_v52 = vpop.f32.mrb[73].mxu1 }
 0x6f6   :  { %v14288_v9 = vadd.f32 %v8242_v52, %v8241_v1  ;;  %v8244_v14 = vpop.f32.mrb[74].mxu1  ;;  %v3895_v1 = vmul.f32 1.442695, %v3774_v8 }
 0x6f7   :  { %v8245_v10 = vpop.f32.mrb[75].mxu1 }
 0x6f8   :  { %18091 = vst [vmem:[#allocation93_spill] sm:$0xff] %v14288_v9  ;;  %v14291_v28 = vadd.f32 %v8245_v10, %v8244_v14  ;;  %v14306_v43 = vpop.eup %10182  ;;  %10188 = vpow2.f32 %v3895_v1  ;;  %v3956_v14 = vpop.xlane.xlu1 %3955 }
 0x6f9   :  { %10190 = vrcp.f32 %v3956_v14  ;;  %v18103_v14 = vld [vmem:[#allocation108_spill] sm:$0xff] }
 0x6fa   :  { %18093 = vst [vmem:[#allocation2_spill] sm:$0xff] %v14291_v28 }
 0x6fc   :  { %4278 = vmatmul.mubr.bf16.gmra.mrb[140].mxu1 %v4113_v63  ;;  %v8247_v38 = vpop.f32.mrb[76].mxu1  ;;  %v14308_v52 = vpop.eup %10184 }
 0x6fd   :  { %v8248_v24 = vpop.f32.mrb[77].mxu1  ;;  %v3990_v36 = vadd.f32 %v14308_v52, %v14306_v43  ;;  %v3968_v33 = vpop.xlane.xlu1 %3967 }
 0x6fe   :  { %v14300_v62 = vadd.f32 %v8248_v24, %v8247_v38  ;;  %v8250_v7 = vpop.f32.mrb[78].mxu1  ;;  %v14312_v10 = vpop.eup %10186 }
 0x6ff   :  { %v8251_v47 = vpop.f32.mrb[79].mxu1 }
 0x700   :  { %18098 = vst [vmem:[#allocation24_spill] sm:$0xff] %v14300_v62  ;;  %v14302_v58 = vadd.f32 %v8251_v47, %v8250_v7  ;;  %v18101_v7 = vld [vmem:[#allocation10_spill] sm:$0xff] }
 0x701   :  { %v3974_v63 = vpop.xlane.xlu1 %3973 }
 0x702   :  { %18099 = vst [vmem:[#allocation4_spill] sm:$0xff] %v14302_v58  ;;  %v14314_v44 = vpop.eup %10188 }
 0x703   :  { %v3993_v18 = vadd.f32 %v14314_v44, %v14312_v10  ;;  %v10191_v5 = vpop.eup %10190 }
 0x704   :  { %v4068_v47 = vmul.f32 %v10191_v5, %v18101_v7 }
 0x705   :  { %v14318_v41 = vpop.xlane.xlu1 %3625 }
 0x709   :  { %v3980_v48 = vpop.xlane.xlu1 %3979 }
 0x70c   :  { %3991 = vadd.xlane.f32.xlu0 %v3990_v36  ;;  %v4067_v36 = vmul.f32 %v10191_v5, %v18103_v14 }
 0x70f   :  { %v3953_v26 = vpop.xlane.xlu0 %3952 }
 0x710   :  { %10192 = vrcp.f32 %v3953_v26 }
 0x713   :  { %v3959_v60 = vpop.xlane.xlu0 %3958 }
 0x714   :  { %10194 = vrcp.f32 %v3959_v60 }
 0x715   :  { %3994 = vadd.xlane.f32.xlu1 %v3993_v18 }
 0x717   :  { %v3962_v38 = vpop.xlane.xlu0 %3961 }
 0x718   :  { %10196 = vrcp.f32 %v3962_v38 }
 0x719   :  { %10198 = vrcp.f32 %v3968_v33 }
 0x71a   :  { %v10193_v21 = vpop.eup %10192 }
 0x71b   :  { %v3965_v24 = vpop.xlane.xlu0 %3964  ;;  %v4066_v8 = vmul.f32 %v10193_v21, %v18100_v12  ;;  %v4065_v1 = vmul.f32 %v10193_v21, %v18102_v23 }
 0x71c   :  { %10200 = vrcp.f32 %v3965_v24 }
 0x71d   :  { %v4116_v26 = vpack.c.bf16 %v4068_v47, %v4066_v8  ;;  %v4115_v18 = vpack.c.bf16 %v4067_v36, %v4065_v1  ;;  %10202 = vrcp.f32 %v3974_v63  ;;  %v14332_v36 = vpop.xlane.xlu1 %3631 }
 0x71e   :  { %v10195_v38 = vpop.eup %10194 }
 0x71f   :  { %4285 = vmatprep.mubr.bf16.mxu1 %v4116_v26  ;;  %v3971_v60 = vpop.xlane.xlu0 %3970  ;;  %v4070_v21 = vmul.f32 %v10195_v38, %v14085_v57  ;;  %v4069_v24 = vmul.f32 %v10195_v38, %v14083_v39 }
 0x720   :  { %10204 = vrcp.f32 %v3971_v60  ;;  %4286 = vmatmul.mubr.bf16.gmra.mrb[144].mxu1 %v4115_v18  ;;  %v18106_v18 = vld [vmem:[#allocation64_spill] sm:$0xff] }
 0x721   :  { %10206 = vrcp.f32 %v3980_v48 }
 0x722   :  { %v10197_v33 = vpop.eup %10196  ;;  %9623 = vrot.lane.b32.xlu0 %v18104_v50, %s10673_s14 }
 0x723   :  { %v14326_v12 = vpop.xlane.xlu0 %3622  ;;  %v4072_v5 = vmul.f32 %v10197_v33, %v14103_v49  ;;  %v4071_v63 = vmul.f32 %v10197_v33, %v14093_v51  ;;  %v10199_v8 = vpop.eup %10198  ;;  %v18107_v51 = vld [vmem:[#allocation31_spill] sm:$0xff] }
 0x724   :  { %v8253_v7 = vpop.f32.mrb[80].mxu1  ;;  %v4076_v38 = vmul.f32 %v10199_v8, %v18107_v51 }
 0x725   :  { %v8254_v47 = vpop.f32.mrb[81].mxu1  ;;  %v4118_v23 = vpack.c.bf16 %v4072_v5, %v4070_v21  ;;  %v4117_v1 = vpack.c.bf16 %v4071_v63, %v4069_v24  ;;  %v18109_v5 = vld [vmem:[#allocation218_spill] sm:$0xff]  ;;  %v18110_v24 = vld [vmem:[#allocation201_spill] sm:$0xff] }
 0x726   :  { %v10201_v14 = vpop.eup %10200  ;;  %v14334_v26 = vadd.f32 %v8254_v47, %v8253_v7  ;;  %9638 = vrot.lane.b32.xlu1 %v18106_v18, %s10673_s14  ;;  %v8256_v57 = vpop.f32.mrb[82].mxu1  ;;  %v3775_v63 = vsub.f32 %v18110_v24, %v18109_v5  ;;  %v3776_v15 = vsub.f32 %v18111_v54, %v18109_v5 }
 0x727   :  { %v8257_v60 = vpop.f32.mrb[83].mxu1  ;;  %4293 = vmatprep.mubr.bf16.mxu1 %v4118_v23  ;;  %v3977_v49 = vpop.xlane.xlu0 %3976  ;;  %v4074_v39 = vmul.f32 %v10201_v14, %v14111_v29  ;;  %v4073_v23 = vmul.f32 %v10201_v14, %v14107_v30  ;;  %v18115_v29 = vld [vmem:[#allocation202_spill] sm:$0xff] }
 0x728   :  { %18105 = vst [vmem:[#allocation15_spill] sm:$0xff] %v14334_v26  ;;  %v14340_v33 = vadd.f32 %v8257_v60, %v8256_v57  ;;  %4294 = vmatmul.mubr.bf16.gmra.mrb[148].mxu1 %v4117_v1  ;;  %v10203_v21 = vpop.eup %10202  ;;  %10208 = vrcp.f32 %v3977_v49  ;;  %v9609_v57 = vpop.permute.xlu1 %9608  ;;  %v18112_v60 = vld [vmem:[#allocation17_spill] sm:$0xff]  ;;  %v3897_v24 = vmul.f32 1.442695, %v3775_v63  ;;  %v3899_v62 = vmul.f32 1.442695, %v3776_v15 }
 0x729   :  { %v4120_v7 = vpack.c.bf16 %v4076_v38, %v4074_v39  ;;  %v4075_v51 = vmul.f32 %v10199_v8, %v18112_v60  ;;  %v18113_v39 = vld [vmem:[#allocation9_spill] sm:$0xff]  ;;  %v9611_v54 = vunpack.i.h.bf16 %v9609_v57  ;;  %v9610_v49 = vunpack.i.l.bf16 %v9609_v57  ;;  %v18116_v15 = vld [vmem:[#allocation107_spill] sm:$0xff] }
 0x72a   :  { %18108 = vst [vmem:[#allocation16_spill] sm:$0xff] %v14340_v33  ;;  %v10205_v47 = vpop.eup %10204  ;;  %v4080_v38 = vmul.f32 %v10203_v21, %v18113_v39  ;;  %10210 = vpow2.f32 %v3897_v24  ;;  %v18119_v24 = vld [vmem:[#allocation150_spill] sm:$0xff] }
 0x72b   :  { %4301 = vmatprep.mubr.bf16.mxu1 %v4120_v7  ;;  %v14349_v48 = vpop.xlane.xlu0 %3628  ;;  %v4078_v1 = vmul.f32 %v10205_v47, %v14126_v34  ;;  %v4119_v58 = vpack.c.bf16 %v4075_v51, %v4073_v23  ;;  %v10207_v7 = vpop.eup %10206  ;;  %10212 = vpow2.f32 %v3899_v62  ;;  %v18114_v34 = vld [vmem:[#allocation220_spill] sm:$0xff]  ;;  %v4077_v63 = vmul.f32 %v10205_v47, %v14120_v3 }
 0x72c   :  { %v3777_v26 = vsub.f32 %v18115_v29, %v18114_v34  ;;  %v3778_v23 = vsub.f32 %v18116_v15, %v18114_v34  ;;  %v9264_v60 = vpack.c.bf16 %v9611_v54, %v9610_v49  ;;  %v4084_v29 = vmul.f32 %v10207_v7, %v18119_v24  ;;  %v18120_v49 = vld [vmem:[#allocation148_spill] sm:$0xff]  ;;  %v18122_v15 = vld [vmem:[#allocation69_spill] sm:$0xff] }
 0x72d   :  { %v4122_v30 = vpack.c.bf16 %v4080_v38, %v4078_v1  ;;  %v18118_v1 = vld [vmem:[#allocation110_spill] sm:$0xff] }
 0x72e   :  { %v3903_v3 = vmul.f32 1.442695, %v3778_v23 }
 0x72f   :  { %v9604_v5 = vpop.permute.xlu0 %9603 }
 0x730   :  { %v9606_v14 = vunpack.i.h.bf16 %v9604_v5  ;;  %v9605_v9 = vunpack.i.l.bf16 %v9604_v5  ;;  %4302 = vmatmul.mubr.bf16.gmra.mrb[152].mxu1 %v4119_v58  ;;  %v4079_v58 = vmul.f32 %v10203_v21, %v18118_v1  ;;  %v4083_v5 = vmul.f32 %v10207_v7, %v18120_v49 }
 0x731   :  { %4309 = vmatprep.mubr.bf16.mxu1 %v4122_v30 }
 0x732   :  { %v9261_v8 = vpack.c.bf16 %v9606_v14, %v9605_v9  ;;  %v10209_v57 = vpop.eup %10208  ;;  %v3901_v9 = vmul.f32 1.442695, %v3777_v26  ;;  %v4121_v39 = vpack.c.bf16 %v4079_v58, %v4077_v63  ;;  %v18124_v58 = vld [vmem:[#allocation219_spill] sm:$0xff] }
 0x733   :  { %v4082_v62 = vmul.f32 %v10209_v57, %v14151_v32  ;;  %v4081_v38 = vmul.f32 %v10209_v57, %v14146_v37 }
 0x734   :  { %9263 = vmatprep.subr.msk.bf16.mxu1 %vm12087_vm1, %v9261_v8  ;;  %10214 = vpow2.f32 %v3901_v9  ;;  %v14367_v54 = vpop.eup %10210  ;;  %v3983_v34 = vpop.xlane.xlu1 %3982  ;;  %v18121_v8 = vld [vmem:[#allocation88_spill] sm:$0xff]  ;;  %v18127_v9 = vld [vmem:[#allocation205_spill] sm:$0xff] }
 0x735   :  { %9266 = vmatpush3.bf16.xpose.msk.msra.mxu1 %vm12087_vm1, %v9264_v60  ;;  %v4124_v47 = vpack.c.bf16 %v4084_v29, %v4082_v62  ;;  %10216 = vpow2.f32 %v3903_v3  ;;  %v14369_v21 = vpop.eup %10212  ;;  %v4123_v30 = vpack.c.bf16 %v4083_v5, %v4081_v38  ;;  %v18125_v62 = vld [vmem:[#allocation204_spill] sm:$0xff] }
 0x736   :  { %v3996_v32 = vadd.f32 %v14369_v21, %v14367_v54  ;;  %v3779_v24 = vsub.f32 %v18125_v62, %v18124_v58  ;;  %10218 = vrcp.f32 %v3983_v34  ;;  %v18128_v3 = vld [vmem:[#allocation100_spill] sm:$0xff]  ;;  %v18129_v34 = vld [vmem:[#allocation73_spill] sm:$0xff] }
 0x738   :  { %4310 = vmatmul.mubr.bf16.gmra.mrb[156].mxu1 %v4121_v39  ;;  %v14386_v57 = vpop.xlane.xlu1 %3637  ;;  %v3780_v39 = vsub.f32 %v18127_v9, %v18124_v58  ;;  %v3905_v49 = vmul.f32 1.442695, %v3779_v24  ;;  %v18132_v24 = vld [vmem:[#allocation77_spill] sm:$0xff] }
 0x739   :  { %4317 = vmatprep.mubr.bf16.mxu1 %v4124_v47 }
 0x73e   :  { %v14374_v26 = vpop.eup %10214 }
 0x73f   :  { %v14376_v14 = vpop.eup %10216 }
 0x740   :  { %4318 = vmatmul.mubr.bf16.gmra.mrb[160].mxu1 %v4123_v30  ;;  %v3999_v37 = vadd.f32 %v14376_v14, %v14374_v26  ;;  %v3907_v30 = vmul.f32 1.442695, %v3780_v39  ;;  %v10219_v39 = vpop.eup %10218 }
 0x741   :  { %3997 = vadd.xlane.f32.xlu0 %v3996_v32  ;;  %v9619_v32 = vpop.permute.xlu1 %9618 }
 0x742   :  { %v9621_v62 = vunpack.i.h.bf16 %v9619_v32  ;;  %v9620_v9 = vunpack.i.l.bf16 %v9619_v32 }
 0x744   :  { %v9270_v33 = vpack.c.bf16 %v9621_v62, %v9620_v9 }
 0x74a   :  { %4000 = vadd.xlane.f32.xlu1 %v3999_v37 }
 0x757   :  { %9633 = vrot.lane.b32.xlu0 %v18121_v8, %s10673_s14 }
 0x759   :  { %v8259_v63 = vpop.f32.mrb[84].mxu1 }
 0x75a   :  { %v8260_v7 = vpop.f32.mrb[85].mxu1 }
 0x75b   :  { %9648 = vrot.lane.b32.xlu1 %v18122_v15, %s10673_s14  ;;  %v14384_v23 = vadd.f32 %v8260_v7, %v8259_v63  ;;  %v8262_v60 = vpop.f32.mrb[86].mxu1 }
 0x75c   :  { %v8263_v1 = vpop.f32.mrb[87].mxu1 }
 0x75d   :  { %18123 = vst [vmem:[#allocation8_spill] sm:$0xff] %v14384_v23  ;;  %v14390_v29 = vadd.f32 %v8263_v1, %v8262_v60 }
 0x75f   :  { %18126 = vst [vmem:[#allocation40_spill] sm:$0xff] %v14390_v29  ;;  %9653 = vrot.lane.b32.xlu1 %v18128_v3, %s10673_s14 }
 0x760   :  { %v3986_v38 = vpop.xlane.xlu0 %3985 }
 0x761   :  { %10220 = vrcp.f32 %v3986_v38  ;;  %v8265_v5 = vpop.f32.mrb[88].mxu1  ;;  %v4085_v38 = vmul.f32 %v10219_v39, %v14173_v45 }
 0x762   :  { %v8266_v37 = vpop.f32.mrb[89].mxu1  ;;  %10222 = vpow2.f32 %v3905_v49 }
 0x763   :  { %9658 = vrot.lane.b32.xlu1 %v18129_v34, %s10673_s14  ;;  %v14400_v63 = vadd.f32 %v8266_v37, %v8265_v5  ;;  %v8268_v7 = vpop.f32.mrb[90].mxu1  ;;  %10224 = vpow2.f32 %v3907_v30  ;;  %v4086_v30 = vmul.f32 %v10219_v39, %v14178_v59 }
 0x764   :  { %v14402_v60 = vpop.xlane.xlu0 %3634  ;;  %v8269_v1 = vpop.f32.mrb[91].mxu1 }
 0x765   :  { %18130 = vst [vmem:[#allocation44_spill] sm:$0xff] %v14400_v63  ;;  %v14404_v58 = vadd.f32 %v8269_v1, %v8268_v7  ;;  %v18133_v7 = vld [vmem:[#allocation7_spill] sm:$0xff] }
 0x767   :  { %18131 = vst [vmem:[#allocation27_spill] sm:$0xff] %v14404_v58  ;;  %9668 = vrot.lane.b32.xlu1 %v18132_v24, %s10673_s14  ;;  %v3722_v58 = vsub.f32 %v14158_v56, %v14349_v48 }
 0x768   :  { %v9614_v47 = vpop.permute.xlu0 %9613 }
 0x769   :  { %v9616_v5 = vunpack.i.h.bf16 %v9614_v47  ;;  %v9615_v37 = vunpack.i.l.bf16 %v9614_v47  ;;  %v8271_v23 = vpop.f32.mrb[92].mxu1 }
 0x76a   :  { %v8272_v49 = vpop.f32.mrb[93].mxu1 }
 0x76b   :  { %v10221_v29 = vpop.eup %10220  ;;  %v9267_v28 = vpack.c.bf16 %v9616_v5, %v9615_v37  ;;  %9678 = vrot.lane.b32.xlu1 %v18133_v7, %s10673_s14  ;;  %v14413_v32 = vadd.f32 %v8272_v49, %v8271_v23  ;;  %v8274_v1 = vpop.f32.mrb[94].mxu1  ;;  %v18139_v37 = vld [vmem:[#allocation36_spill] sm:$0xff] }
 0x76c   :  { %v4088_v22 = vmul.f32 %v10221_v29, %v14232_v2  ;;  %v4087_v63 = vmul.f32 %v10221_v29, %v14230_v25  ;;  %v8275_v47 = vpop.f32.mrb[95].mxu1  ;;  %v14424_v23 = vpop.eup %10222  ;;  %v3720_v49 = vsub.f32 %v18139_v37, %v14318_v41 }
 0x76d   :  { %18134 = vst [vmem:[#allocation145_spill] sm:$0xff] %v14413_v32  ;;  %9269 = vmatprep.subr.msk.bf16.mxu1 %vm12087_vm1, %v9267_v28  ;;  %v14420_v62 = vadd.f32 %v8275_v47, %v8274_v1  ;;  %v14428_v45 = vpop.eup %10224 }
 0x76e   :  { %9272 = vmatpush3.bf16.xpose.msk.msra.mxu1 %vm12087_vm1, %v9270_v33  ;;  %v4126_v9 = vpack.c.bf16 %v4088_v22, %v4086_v30  ;;  %v4125_v59 = vpack.c.bf16 %v4087_v63, %v4085_v38  ;;  %v4002_v5 = vadd.f32 %v14428_v45, %v14424_v23  ;;  %v18138_v63 = vld [vmem:[#allocation121_spill] sm:$0xff] }
 0x76f   :  { %18135 = vst [vmem:[#allocation147_spill] sm:$0xff] %v14420_v62  ;;  %v3719_v38 = vsub.f32 %v18138_v63, %v14318_v41 }
 0x770   :  { %4325 = vmatprep.mubr.bf16.mxu1 %v4126_v9  ;;  %v3727_v9 = vsub.f32 %v18048_v0, %v14386_v57 }
 0x771   :  { %4326 = vmatmul.mubr.bf16.gmra.mrb[164].mxu1 %v4125_v59  ;;  %v8277_v25 = vpop.f32.mrb[96].mxu1  ;;  %v3785_v47 = vmul.f32 1.442695, %v3719_v38 }
 0x772   :  { %v8278_v29 = vpop.f32.mrb[97].mxu1  ;;  %v3801_v41 = vmul.f32 1.442695, %v3727_v9 }
 0x773   :  { %v14430_v39 = vadd.f32 %v8278_v29, %v8277_v25  ;;  %v8280_v28 = vpop.f32.mrb[98].mxu1  ;;  %v3787_v25 = vmul.f32 1.442695, %v3720_v49  ;;  %v3728_v29 = vsub.f32 %v14185_v40, %v14386_v57  ;;  %10226 = vpow2.f32 %v3785_v47 }
 0x774   :  { %v8281_v33 = vpop.f32.mrb[99].mxu1 }
 0x775   :  { %18136 = vst [vmem:[#allocation21_spill] sm:$0xff] %v14430_v39  ;;  %v14434_v22 = vadd.f32 %v8281_v33, %v8280_v28  ;;  %10228 = vpow2.f32 %v3787_v25  ;;  %v3803_v37 = vmul.f32 1.442695, %v3728_v29 }
 0x776   :  { %4003 = vadd.xlane.f32.xlu0 %v4002_v5  ;;  %10230 = vpow2.f32 %v3801_v41  ;;  %v18145_v41 = vld [vmem:[#allocation95_spill] sm:$0xff] }
 0x777   :  { %18137 = vst [vmem:[#allocation206_spill] sm:$0xff] %v14434_v22  ;;  %10232 = vpow2.f32 %v3803_v37 }
 0x77a   :  { %v8283_v1 = vpop.f32.mrb[100].mxu1 }
 0x77b   :  { %v8284_v59 = vpop.f32.mrb[101].mxu1 }
 0x77c   :  { %v14446_v28 = vadd.f32 %v8284_v59, %v8283_v1  ;;  %v8286_v5 = vpop.f32.mrb[102].mxu1 }
 0x77d   :  { %v8287_v33 = vpop.f32.mrb[103].mxu1  ;;  %v14458_v47 = vpop.eup %10226 }
 0x77e   :  { %18140 = vst [vmem:[#allocation154_spill] sm:$0xff] %v14446_v28  ;;  %v14448_v63 = vadd.f32 %v8287_v33, %v8286_v5 }
 0x77f   :  { %v14460_v9 = vpop.eup %10228 }
 0x780   :  { %18141 = vst [vmem:[#allocation156_spill] sm:$0xff] %v14448_v63 }
 0x782   :  { %v8289_v30 = vpop.f32.mrb[104].mxu1 }
 0x783   :  { %v8290_v0 = vpop.f32.mrb[105].mxu1 }
 0x784   :  { %v14452_v49 = vadd.f32 %v8290_v0, %v8289_v30  ;;  %v8292_v40 = vpop.f32.mrb[106].mxu1  ;;  %v14466_v30 = vpop.eup %10230  ;;  %v3912_v0 = vadd.f32 %v14460_v9, %v14458_v47 }
 0x785   :  { %v8293_v57 = vpop.f32.mrb[107].mxu1 }
 0x786   :  { %18142 = vst [vmem:[#allocation5_spill] sm:$0xff] %v14452_v49  ;;  %v14454_v1 = vadd.f32 %v8293_v57, %v8292_v40  ;;  %v14470_v40 = vpop.eup %10232  ;;  %v3989_v49 = vpop.xlane.xlu1 %3988 }
 0x787   :  { %10234 = vrcp.f32 %v3989_v49 }
 0x788   :  { %18143 = vst [vmem:[#allocation167_spill] sm:$0xff] %v14454_v1 }
 0x78a   :  { %v8295_v25 = vpop.f32.mrb[108].mxu1 }
 0x78b   :  { %v8296_v29 = vpop.f32.mrb[109].mxu1 }
 0x78c   :  { %v14462_v5 = vadd.f32 %v8296_v29, %v8295_v25  ;;  %v8298_v33 = vpop.f32.mrb[110].mxu1  ;;  %9643 = vrot.lane.b32.xlu0 %v18145_v41, %s10673_s14  ;;  %v18147_v25 = vld [vmem:[#allocation113_spill] sm:$0xff]  ;;  %v3924_v29 = vadd.f32 %v14470_v40, %v14466_v30 }
 0x78d   :  { %v8299_v37 = vpop.f32.mrb[111].mxu1 }
 0x78e   :  { %18144 = vst [vmem:[#allocation168_spill] sm:$0xff] %v14462_v5  ;;  %v14472_v57 = vadd.f32 %v8299_v37, %v8298_v33  ;;  %v18149_v33 = vld [vmem:[#allocation117_spill] sm:$0xff] }
 0x78f   :  { %3913 = vadd.xlane.f32.xlu1 %v3912_v0 }
 0x790   :  { %18146 = vst [vmem:[#allocation136_spill] sm:$0xff] %v14472_v57  ;;  %9663 = vrot.lane.b32.xlu0 %v18147_v25, %s10673_s14  ;;  %v9629_v57 = vpop.permute.xlu1 %9628 }
 0x792   :  { %v8301_v38 = vpop.f32.mrb[112].mxu1 }
 0x793   :  { %v8302_v2 = vpop.f32.mrb[113].mxu1  ;;  %3925 = vadd.xlane.f32.xlu1 %v3924_v29  ;;  %v3717_v29 = vsub.f32 %v18042_v13, %v14326_v12 }
 0x794   :  { %v14480_v1 = vadd.f32 %v8302_v2, %v8301_v38  ;;  %v8304_v28 = vpop.f32.mrb[114].mxu1  ;;  %9673 = vrot.lane.b32.xlu0 %v18149_v33, %s10673_s14  ;;  %v3718_v38 = vsub.f32 %v14135_v20, %v14326_v12 }
 0x795   :  { %v8305_v37 = vpop.f32.mrb[115].mxu1 }
 0x796   :  { %18148 = vst [vmem:[#allocation81_spill] sm:$0xff] %v14480_v1  ;;  %v14484_v0 = vadd.f32 %v8305_v37, %v8304_v28  ;;  %v9631_v28 = vunpack.i.h.bf16 %v9629_v57  ;;  %v9630_v37 = vunpack.i.l.bf16 %v9629_v57  ;;  %v3783_v13 = vmul.f32 1.442695, %v3718_v38  ;;  %v10235_v57 = vpop.eup %10234 }
 0x798   :  { %18150 = vst [vmem:[#allocation133_spill] sm:$0xff] %v14484_v0  ;;  %v3781_v0 = vmul.f32 1.442695, %v3717_v29 }
 0x799   :  { %v3992_v5 = vpop.xlane.xlu0 %3991 }
 0x79a   :  { %v8307_v63 = vpop.f32.mrb[116].mxu1  ;;  %10236 = vrcp.f32 %v3992_v5  ;;  %v3721_v5 = vsub.f32 %v18045_v31, %v14349_v48  ;;  %v18154_v48 = vld [vmem:[#allocation90_spill] sm:$0xff] }
 0x79b   :  { %v8308_v2 = vpop.f32.mrb[117].mxu1  ;;  %10238 = vpow2.f32 %v3781_v0  ;;  %v3724_v29 = vsub.f32 %v18154_v48, %v14332_v36  ;;  %v4090_v0 = vmul.f32 %v10235_v57, %v14251_v6  ;;  %v3726_v6 = vsub.f32 %v14236_v27, %v14402_v60 }
 0x79c   :  { %v14492_v39 = vadd.f32 %v8308_v2, %v8307_v63  ;;  %v8310_v22 = vpop.f32.mrb[118].mxu1  ;;  %v9276_v63 = vpack.c.bf16 %v9631_v28, %v9630_v37  ;;  %v18153_v2 = vld [vmem:[#allocation125_spill] sm:$0xff]  ;;  %10240 = vpow2.f32 %v3783_v13  ;;  %v18156_v28 = vld [vmem:[#allocation51_spill] sm:$0xff] }
 0x79d   :  { %v8311_v49 = vpop.f32.mrb[119].mxu1  ;;  %v9624_v32 = vpop.permute.xlu0 %9623 }
 0x79e   :  { %18151 = vst [vmem:[#allocation174_spill] sm:$0xff] %v14492_v39  ;;  %v14494_v62 = vadd.f32 %v8311_v49, %v8310_v22  ;;  %v9626_v59 = vunpack.i.h.bf16 %v9624_v32  ;;  %v9625_v1 = vunpack.i.l.bf16 %v9624_v32  ;;  %v3723_v22 = vsub.f32 %v18153_v2, %v14332_v36 }
 0x79f   :  { %v3789_v32 = vmul.f32 1.442695, %v3721_v5  ;;  %v3725_v36 = vsub.f32 %v18071_v53, %v14402_v60  ;;  %v3799_v53 = vmul.f32 1.442695, %v3726_v6 }
 0x7a0   :  { %18152 = vst [vmem:[#allocation175_spill] sm:$0xff] %v14494_v62  ;;  %v9273_v12 = vpack.c.bf16 %v9626_v59, %v9625_v1  ;;  %v3791_v1 = vmul.f32 1.442695, %v3722_v58  ;;  %v3793_v2 = vmul.f32 1.442695, %v3723_v22 }
 0x7a1   :  { %10242 = vpow2.f32 %v3789_v32 }
 0x7a2   :  { %v8313_v49 = vpop.f32.mrb[120].mxu1  ;;  %9275 = vmatprep.subr.msk.bf16.mxu1 %vm12087_vm1, %v9273_v12  ;;  %v4089_v12 = vmul.f32 %v10235_v57, %v14248_v4  ;;  %10244 = vpow2.f32 %v3791_v1 }
 0x7a3   :  { %v8314_v31 = vpop.f32.mrb[121].mxu1  ;;  %9278 = vmatpush3.bf16.xpose.msk.msra.mxu1 %vm12087_vm1, %v9276_v63  ;;  %10246 = vpow2.f32 %v3793_v2 }
 0x7a4   :  { %v10237_v56 = vpop.eup %10236  ;;  %v14510_v59 = vadd.f32 %v8314_v31, %v8313_v49  ;;  %v8316_v38 = vpop.f32.mrb[122].mxu1  ;;  %9688 = vrot.lane.b32.xlu1 %v18156_v28, %s10674_s26  ;;  %v3795_v49 = vmul.f32 1.442695, %v3724_v29 }
 0x7a5   :  { %v8317_v37 = vpop.f32.mrb[123].mxu1  ;;  %v4092_v5 = vmul.f32 %v10237_v56, %v14308_v52  ;;  %v4091_v63 = vmul.f32 %v10237_v56, %v14306_v43  ;;  %v3797_v43 = vmul.f32 1.442695, %v3725_v36  ;;  %v14532_v27 = vpop.eup %10238 }
 0x7a6   :  { %18155 = vst [vmem:[#allocation212_spill] sm:$0xff] %v14510_v59  ;;  %v14518_v20 = vadd.f32 %v8317_v37, %v8316_v38  ;;  %10248 = vpow2.f32 %v3795_v49  ;;  %v14534_v31 = vpop.eup %10240  ;;  %v18191_v59 = vld [vmem:[#allocation67_spill] sm:$0xff] }
 0x7a7   :  { %v4128_v58 = vpack.c.bf16 %v4092_v5, %v4090_v0  ;;  %v4127_v13 = vpack.c.bf16 %v4091_v63, %v4089_v12  ;;  %10250 = vpow2.f32 %v3797_v43 }
 0x7a8   :  { %18157 = vst [vmem:[#allocation181_spill] sm:$0xff] %v14518_v20  ;;  %9693 = vrot.lane.b32.xlu1 %v18082_v17, %s10674_s26  ;;  %10252 = vpow2.f32 %v3799_v53  ;;  %v18192_v20 = vld [vmem:[#allocation116_spill] sm:$0xff] }
 0x7a9   :  { %4333 = vmatprep.mubr.bf16.mxu1 %v4128_v58 }
 0x7aa   :  { %v8319_v4 = vpop.f32.mrb[124].mxu1  ;;  %4334 = vmatmul.mubr.bf16.gmra.mrb[168].mxu1 %v4127_v13 }
 0x7ab   :  { %v8320_v57 = vpop.f32.mrb[125].mxu1  ;;  %v14542_v48 = vpop.eup %10242 }
 0x7ac   :  { %v14528_v22 = vadd.f32 %v8320_v57, %v8319_v4  ;;  %v8322_v32 = vpop.f32.mrb[126].mxu1  ;;  %9698 = vrot.lane.b32.xlu1 %v18053_v55, %s10674_s26  ;;  %v3909_v55 = vadd.f32 %v14534_v31, %v14532_v27  ;;  %v14546_v29 = vpop.eup %10244 }
 0x7ad   :  { %v8323_v60 = vpop.f32.mrb[127].mxu1  ;;  %v14550_v1 = vpop.eup %10246  ;;  %v3915_v38 = vadd.f32 %v14546_v29, %v14542_v48 }
 0x7ae   :  { %18158 = vst [vmem:[#allocation182_spill] sm:$0xff] %v14528_v22  ;;  %v14536_v17 = vadd.f32 %v8323_v60, %v8322_v32  ;;  %v18164_v60 = vld [vmem:[#allocation50_spill] sm:$0xff] }
 0x7b0   :  { %18159 = vst [vmem:[#allocation48_spill] sm:$0xff] %v14536_v17  ;;  %9708 = vrot.lane.b32.xlu1 %v18087_v16, %s10674_s26  ;;  %v14554_v28 = vpop.eup %10248 }
 0x7b1   :  { %v14558_v0 = vpop.eup %10250 }
 0x7b2   :  { %v14564_v63 = vpop.eup %10252 }
 0x7b3   :  { %3910 = vadd.xlane.f32.xlu0 %v3909_v55  ;;  %v3921_v58 = vadd.f32 %v14564_v63, %v14558_v0  ;;  %v3995_v55 = vpop.xlane.xlu1 %3994 }
 0x7b4   :  { %9718 = vrot.lane.b32.xlu1 %v18106_v18, %s10674_s26  ;;  %v3918_v18 = vadd.f32 %v14554_v28, %v14550_v1  ;;  %10254 = vrcp.f32 %v3995_v55 }
 0x7b7   :  { %v8455_v37 = vpop.f32.mrb[128].mxu1  ;;  %3916 = vadd.xlane.f32.xlu0 %v3915_v38 }
 0x7b8   :  { %v8456_v16 = vpop.f32.mrb[129].mxu1  ;;  %9728 = vrot.lane.b32.xlu1 %v18122_v15, %s10674_s26 }
 0x7b9   :  { %v14560_v5 = vadd.f32 %v8456_v16, %v8455_v37  ;;  %v8458_v12 = vpop.f32.mrb[130].mxu1 }
 0x7ba   :  { %v8459_v2 = vpop.f32.mrb[131].mxu1 }
 0x7bb   :  { %18160 = vst [vmem:[#allocation122_spill] sm:$0xff] %v14560_v5  ;;  %v14566_v36 = vadd.f32 %v8459_v2, %v8458_v12  ;;  %3919 = vadd.xlane.f32.xlu0 %v3918_v18  ;;  %v18167_v12 = vld [vmem:[#allocation54_spill] sm:$0xff]  ;;  %v9639_v2 = vpop.permute.xlu1 %9638 }
 0x7bc   :  { %9738 = vrot.lane.b32.xlu1 %v18129_v34, %s10674_s26 }
 0x7bd   :  { %18161 = vst [vmem:[#allocation135_spill] sm:$0xff] %v14566_v36 }
 0x7bf   :  { %v8461_v13 = vpop.f32.mrb[132].mxu1  ;;  %3922 = vadd.xlane.f32.xlu0 %v3921_v58 }
 0x7c0   :  { %v8462_v49 = vpop.f32.mrb[133].mxu1  ;;  %9748 = vrot.lane.b32.xlu1 %v18132_v24, %s10674_s26 }
 0x7c1   :  { %v14576_v6 = vadd.f32 %v8462_v49, %v8461_v13  ;;  %v8464_v4 = vpop.f32.mrb[134].mxu1  ;;  %v18168_v49 = vld [vmem:[#allocation58_spill] sm:$0xff] }
 0x7c2   :  { %v8465_v43 = vpop.f32.mrb[135].mxu1 }
 0x7c3   :  { %18162 = vst [vmem:[#allocation151_spill] sm:$0xff] %v14576_v6  ;;  %v14578_v57 = vadd.f32 %v8465_v43, %v8464_v4 }
 0x7c4   :  { %9758 = vrot.lane.b32.xlu1 %v18133_v7, %s10674_s26  ;;  %v18171_v7 = vld [vmem:[#allocation63_spill] sm:$0xff] }
 0x7c5   :  { %18163 = vst [vmem:[#allocation153_spill] sm:$0xff] %v14578_v57 }
 0x7c7   :  { %v8467_v53 = vpop.f32.mrb[136].mxu1 }
 0x7c8   :  { %v8468_v32 = vpop.f32.mrb[137].mxu1  ;;  %6012 = vrot.lane.b32.xlu1 %v18164_v60, %s10675_s0 }
 0x7c9   :  { %v14586_v38 = vadd.f32 %v8468_v32, %v8467_v53  ;;  %v8470_v24 = vpop.f32.mrb[138].mxu1  ;;  %v9641_v53 = vunpack.i.h.bf16 %v9639_v2  ;;  %v9640_v32 = vunpack.i.l.bf16 %v9639_v2  ;;  %v18172_v2 = vld [vmem:[#allocation68_spill] sm:$0xff] }
 0x7ca   :  { %v8471_v37 = vpop.f32.mrb[139].mxu1 }
 0x7cb   :  { %18165 = vst [vmem:[#allocation126_spill] sm:$0xff] %v14586_v38  ;;  %v14588_v16 = vadd.f32 %v8471_v37, %v8470_v24 }
 0x7cc   :  { %6016 = vrot.lane.b32.xlu1 %v18167_v12, %s10675_s0 }
 0x7cd   :  { %18166 = vst [vmem:[#allocation209_spill] sm:$0xff] %v14588_v16 }
 0x7ce   :  { %v3998_v18 = vpop.xlane.xlu0 %3997 }
 0x7cf   :  { %v8473_v58 = vpop.f32.mrb[140].mxu1  ;;  %10256 = vrcp.f32 %v3998_v18 }
 0x7d0   :  { %v8474_v13 = vpop.f32.mrb[141].mxu1  ;;  %6020 = vrot.lane.b32.xlu1 %v18168_v49, %s10675_s0 }
 0x7d1   :  { %v14596_v4 = vadd.f32 %v8474_v13, %v8473_v58  ;;  %v8476_v43 = vpop.f32.mrb[142].mxu1  ;;  %v9282_v58 = vpack.c.bf16 %v9641_v53, %v9640_v32  ;;  %v10255_v13 = vpop.eup %10254 }
 0x7d2   :  { %v8477_v24 = vpop.f32.mrb[143].mxu1  ;;  %v9634_v37 = vpop.permute.xlu0 %9633 }
 0x7d3   :  { %18169 = vst [vmem:[#allocation158_spill] sm:$0xff] %v14596_v4  ;;  %v14598_v56 = vadd.f32 %v8477_v24, %v8476_v43  ;;  %v9636_v55 = vunpack.i.h.bf16 %v9634_v37  ;;  %v9635_v52 = vunpack.i.l.bf16 %v9634_v37 }
 0x7d4   :  { %6024 = vrot.lane.b32.xlu1 %v18171_v7, %s10675_s0 }
 0x7d5   :  { %18170 = vst [vmem:[#allocation159_spill] sm:$0xff] %v14598_v56  ;;  %v9279_v34 = vpack.c.bf16 %v9636_v55, %v9635_v52  ;;  %9683 = vrot.lane.b32.xlu0 %v18049_v46, %s10674_s26  ;;  %v4094_v52 = vmul.f32 %v10255_v13, %v14314_v44  ;;  %v4093_v46 = vmul.f32 %v10255_v13, %v14312_v10  ;;  %v18175_v10 = vld [vmem:[#allocation34_spill] sm:$0xff]  ;;  %v18182_v13 = vld [vmem:[#allocation53_spill] sm:$0xff] }
 0x7d6   :  { %v18176_v44 = vld [vmem:[#allocation22_spill] sm:$0xff] }
 0x7d7   :  { %9281 = vmatprep.subr.msk.bf16.mxu1 %vm12087_vm1, %v9279_v34  ;;  %v18173_v34 = vld [vmem:[#allocation72_spill] sm:$0xff] }
 0x7d8   :  { %6028 = vrot.lane.b32.xlu1 %v18172_v2, %s10675_s0  ;;  %9284 = vmatpush3.bf16.xpose.msk.msra.mxu1 %vm12087_vm1, %v9282_v58 }
 0x7d9   :  { %v10257_v43 = vpop.eup %10256  ;;  %9703 = vrot.lane.b32.xlu0 %v18104_v50, %s10674_s26  ;;  %v18174_v50 = vld [vmem:[#allocation76_spill] sm:$0xff] }
 0x7da   :  { %v4096_v24 = vmul.f32 %v10257_v43, %v14369_v21  ;;  %v4095_v53 = vmul.f32 %v10257_v43, %v14367_v54  ;;  %v18177_v54 = vld [vmem:[#allocation32_spill] sm:$0xff] }
 0x7db   :  { %v18178_v21 = vld [vmem:[#allocation80_spill] sm:$0xff] }
 0x7dc   :  { %6032 = vrot.lane.b32.xlu1 %v18173_v34, %s10675_s0  ;;  %v4130_v32 = vpack.c.bf16 %v4096_v24, %v4094_v52  ;;  %v4129_v37 = vpack.c.bf16 %v4095_v53, %v4093_v46  ;;  %v4001_v24 = vpop.xlane.xlu1 %4000  ;;  %v18185_v53 = vld [vmem:[#allocation57_spill] sm:$0xff]  ;;  %v18190_v46 = vld [vmem:[#allocation112_spill] sm:$0xff] }
 0x7dd   :  { %9713 = vrot.lane.b32.xlu0 %v18121_v8, %s10674_s26  ;;  %v18179_v8 = vld [vmem:[#allocation49_spill] sm:$0xff]  ;;  %10258 = vrcp.f32 %v4001_v24 }
 0x7de   :  { %4341 = vmatprep.mubr.bf16.mxu1 %v4130_v32 }
 0x7df   :  { %4342 = vmatmul.mubr.bf16.gmra.mrb[172].mxu1 %v4129_v37  ;;  %v18186_v37 = vld [vmem:[#allocation99_spill] sm:$0xff] }
 0x7e0   :  { %6036 = vrot.lane.b32.xlu1 %v18174_v50, %s10675_s0  ;;  %v9649_v15 = vpop.permute.xlu1 %9648 }
 0x7e1   :  { %9723 = vrot.lane.b32.xlu0 %v18145_v41, %s10674_s26  ;;  %v9651_v11 = vunpack.i.h.bf16 %v9649_v15  ;;  %v9650_v17 = vunpack.i.l.bf16 %v9649_v15 }
 0x7e3   :  { %v9288_v38 = vpack.c.bf16 %v9651_v11, %v9650_v17 }
 0x7e4   :  { %6040 = vrot.lane.b32.xlu1 %v18175_v10, %s10675_s0  ;;  %v9654_v62 = vpop.permute.xlu1 %9653 }
 0x7e5   :  { %9733 = vrot.lane.b32.xlu0 %v18128_v3, %s10674_s26  ;;  %v18180_v3 = vld [vmem:[#allocation87_spill] sm:$0xff] }
 0x7e7   :  { %v10259_v56 = vpop.eup %10258 }
 0x7e8   :  { %6044 = vrot.lane.b32.xlu1 %v18176_v44, %s10675_s0  ;;  %v9659_v16 = vpop.permute.xlu1 %9658  ;;  %v4097_v17 = vmul.f32 %v10259_v56, %v14374_v26 }
 0x7e9   :  { %9743 = vrot.lane.b32.xlu0 %v18147_v25, %s10674_s26 }
 0x7ec   :  { %6048 = vrot.lane.b32.xlu1 %v18177_v54, %s10675_s0  ;;  %v9669_v26 = vpop.permute.xlu1 %9668 }
 0x7ed   :  { %9753 = vrot.lane.b32.xlu0 %v18149_v33, %s10674_s26  ;;  %v18184_v33 = vld [vmem:[#allocation94_spill] sm:$0xff] }
 0x7f0   :  { %6052 = vrot.lane.b32.xlu1 %v18178_v21, %s10675_s0 }
 0x7f1   :  { %6010 = vrot.lane.b32.xlu0 %v18179_v8, %s10675_s0 }
 0x7f3   :  { %v8479_v41 = vpop.f32.mrb[144].mxu1 }
 0x7f4   :  { %6056 = vrot.lane.b32.xlu1 %v18180_v3, %s10675_s0  ;;  %v8480_v55 = vpop.f32.mrb[145].mxu1 }
 0x7f5   :  { %v14644_v58 = vadd.f32 %v8480_v55, %v8479_v41  ;;  %v8482_v25 = vpop.f32.mrb[146].mxu1  ;;  %6014 = vrot.lane.b32.xlu0 %v18182_v13, %s10675_s0 }
 0x7f6   :  { %v8483_v43 = vpop.f32.mrb[147].mxu1 }
 0x7f7   :  { %18181 = vst [vmem:[#allocation210_spill] sm:$0xff] %v14644_v58  ;;  %v14648_v52 = vadd.f32 %v8483_v43, %v8482_v25  ;;  %v18188_v25 = vld [vmem:[#allocation62_spill] sm:$0xff]  ;;  %v9655_v58 = vunpack.i.l.bf16 %v9654_v62 }
 0x7f8   :  { %6060 = vrot.lane.b32.xlu1 %v18184_v33, %s10675_s0 }
 0x7f9   :  { %18183 = vst [vmem:[#allocation161_spill] sm:$0xff] %v14648_v52  ;;  %6018 = vrot.lane.b32.xlu0 %v18185_v53, %s10675_s0 }
 0x7fb   :  { %v8485_v32 = vpop.f32.mrb[148].mxu1 }
 0x7fc   :  { %6064 = vrot.lane.b32.xlu1 %v18186_v37, %s10675_s0  ;;  %v8486_v41 = vpop.f32.mrb[149].mxu1 }
 0x7fd   :  { %v14658_v55 = vadd.f32 %v8486_v41, %v8485_v32  ;;  %v8488_v18 = vpop.f32.mrb[150].mxu1  ;;  %6022 = vrot.lane.b32.xlu0 %v18188_v25, %s10675_s0 }
 0x7fe   :  { %v8489_v43 = vpop.f32.mrb[151].mxu1 }
 0x7ff   :  { %18187 = vst [vmem:[#allocation162_spill] sm:$0xff] %v14658_v55  ;;  %v14662_v22 = vadd.f32 %v8489_v43, %v8488_v18 }
 0x800   :  { %6068 = vrot.lane.b32.xlu1 %v18190_v46, %s10675_s0 }
 0x801   :  { %18189 = vst [vmem:[#allocation211_spill] sm:$0xff] %v14662_v22  ;;  %6026 = vrot.lane.b32.xlu0 %v18191_v59, %s10675_s0  ;;  %v9656_v22 = vunpack.i.h.bf16 %v9654_v62 }
 0x803   :  { %v8491_v32 = vpop.f32.mrb[152].mxu1  ;;  %v4004_v41 = vpop.xlane.xlu0 %4003  ;;  %v9291_v57 = vpack.c.bf16 %v9656_v22, %v9655_v58  ;;  %v4098_v22 = vmul.f32 %v10259_v56, %v14376_v14  ;;  %v9660_v58 = vunpack.i.l.bf16 %v9659_v16 }
 0x804   :  { %10260 = vrcp.f32 %v4004_v41  ;;  %6072 = vrot.lane.b32.xlu1 %v18192_v20, %s10675_s0  ;;  %v8492_v39 = vpop.f32.mrb[153].mxu1 }
 0x805   :  { %v14672_v18 = vadd.f32 %v8492_v39, %v8491_v32  ;;  %v8494_v43 = vpop.f32.mrb[154].mxu1  ;;  %6030 = vrot.lane.b32.xlu0 %v18194_v19, %s10675_s0  ;;  %v18196_v39 = vld [vmem:[#allocation75_spill] sm:$0xff] }
 0x806   :  { %v8495_v24 = vpop.f32.mrb[155].mxu1 }
 0x807   :  { %18193 = vst [vmem:[#allocation164_spill] sm:$0xff] %v14672_v18  ;;  %v14676_v61 = vadd.f32 %v8495_v24, %v8494_v43  ;;  %v9644_v55 = vpop.permute.xlu0 %9643  ;;  %v18197_v24 = vld [vmem:[#allocation43_spill] sm:$0xff] }
 0x808   :  { %v9646_v41 = vunpack.i.h.bf16 %v9644_v55  ;;  %v9645_v52 = vunpack.i.l.bf16 %v9644_v55 }
 0x809   :  { %18195 = vst [vmem:[#allocation165_spill] sm:$0xff] %v14676_v61  ;;  %6034 = vrot.lane.b32.xlu0 %v18196_v39, %s10675_s0  ;;  %v18198_v61 = vld [vmem:[#allocation20_spill] sm:$0xff] }
 0x80a   :  { %v9285_v32 = vpack.c.bf16 %v9646_v41, %v9645_v52  ;;  %v9661_v41 = vunpack.i.h.bf16 %v9659_v16 }
 0x80b   :  { %v8497_v6 = vpop.f32.mrb[156].mxu1  ;;  %v9664_v43 = vpop.permute.xlu0 %9663 }
 0x80c   :  { %v8498_v15 = vpop.f32.mrb[157].mxu1  ;;  %9287 = vmatprep.subr.msk.bf16.mxu1 %vm12087_vm1, %v9285_v32  ;;  %v9666_v4 = vunpack.i.h.bf16 %v9664_v43  ;;  %v9665_v18 = vunpack.i.l.bf16 %v9664_v43  ;;  %v9294_v14 = vpack.c.bf16 %v9661_v41, %v9660_v58  ;;  %v18199_v43 = vld [vmem:[#allocation29_spill] sm:$0xff]  ;;  %v9679_v58 = vpop.permute.xlu1 %9678 }
 0x80d   :  { %v14684_v62 = vadd.f32 %v8498_v15, %v8497_v6  ;;  %v8500_v55 = vpop.f32.mrb[158].mxu1  ;;  %6038 = vrot.lane.b32.xlu0 %v18197_v24, %s10675_s0  ;;  %9290 = vmatpush3.bf16.xpose.msk.msra.mxu1 %vm12087_vm1, %v9288_v38 }
 0x80e   :  { %v10261_v52 = vpop.eup %10260  ;;  %v8501_v11 = vpop.f32.mrb[159].mxu1  ;;  %9293 = vmatprep.subr.msk.bf16.mxu1 %vm12087_vm1, %v9291_v57  ;;  %v9297_v56 = vpack.c.bf16 %v9666_v4, %v9665_v18  ;;  %v9671_v4 = vunpack.i.h.bf16 %v9669_v26  ;;  %v9670_v18 = vunpack.i.l.bf16 %v9669_v26  ;;  %v18202_v26 = vld [vmem:[#allocation92_spill] sm:$0xff] }
 0x80f   :  { %v14694_v6 = vadd.f32 %v8501_v11, %v8500_v55  ;;  %v4100_v32 = vmul.f32 %v10261_v52, %v14428_v45  ;;  %v4099_v15 = vmul.f32 %v10261_v52, %v14424_v23  ;;  %v9674_v45 = vpop.permute.xlu0 %9673 }
 0x810   :  { %v9675_v41 = vunpack.i.l.bf16 %v9674_v45 }
 0x811   :  { %6042 = vrot.lane.b32.xlu0 %v18198_v61, %s10675_s0  ;;  %v4132_v57 = vpack.c.bf16 %v4100_v32, %v4098_v22  ;;  %v4131_v5 = vpack.c.bf16 %v4099_v15, %v4097_v17  ;;  %v18200_v22 = vld [vmem:[#allocation46_spill] sm:$0xff]  ;;  %v9300_v17 = vpack.c.bf16 %v9671_v4, %v9670_v18  ;;  %v18201_v15 = vld [vmem:[#allocation85_spill] sm:$0xff] }
 0x813   :  { %v8503_v36 = vpop.f32.mrb[160].mxu1  ;;  %4349 = vmatprep.mubr.bf16.mxu1 %v4132_v57  ;;  %v9681_v57 = vunpack.i.h.bf16 %v9679_v58 }
 0x814   :  { %v8504_v16 = vpop.f32.mrb[161].mxu1  ;;  %4350 = vmatmul.mubr.bf16.gmra.mrb[176].mxu1 %v4131_v5 }
 0x815   :  { %v14702_v55 = vadd.f32 %v8504_v16, %v8503_v36  ;;  %v8506_v23 = vpop.f32.mrb[162].mxu1  ;;  %6046 = vrot.lane.b32.xlu0 %v18199_v43, %s10675_s0  ;;  %9296 = vmatpush3.bf16.xpose.msk.msra.mxu1 %vm12087_vm1, %v9294_v14  ;;  %v9676_v36 = vunpack.i.h.bf16 %v9674_v45  ;;  %v9680_v14 = vunpack.i.l.bf16 %v9679_v58  ;;  %v18203_v16 = vld [vmem:[#allocation98_spill] sm:$0xff]  ;;  %v18204_v45 = vld [vmem:[#allocation111_spill] sm:$0xff] }
 0x816   :  { %8601 = vmatprep.mubr.msk.f32.mxu1 %vm85_vm0, %v18179_v8  ;;  %v8507_v52 = vpop.f32.mrb[163].mxu1  ;;  %9299 = vmatprep.subr.msk.bf16.mxu1 %vm12087_vm1, %v9297_v56 }
 0x817   :  { %v14712_v5 = vadd.f32 %v8507_v52, %v8506_v23  ;;  %v9303_v32 = vpack.c.bf16 %v9676_v36, %v9675_v41  ;;  %v9306_v56 = vpack.c.bf16 %v9681_v57, %v9680_v14  ;;  %v18205_v23 = vld [vmem:[#allocation115_spill] sm:$0xff] }
 0x819   :  { %6050 = vrot.lane.b32.xlu0 %v18200_v22, %s10675_s0 }
 0x81d   :  { %6054 = vrot.lane.b32.xlu0 %v18201_v15, %s10675_s0  ;;  %9302 = vmatpush3.bf16.xpose.msk.msra.mxu1 %vm12087_vm1, %v9300_v17 }
 0x81e   :  { %9305 = vmatprep.subr.msk.bf16.mxu1 %vm12087_vm1, %v9303_v32 }
 0x821   :  { %6058 = vrot.lane.b32.xlu0 %v18202_v26, %s10675_s0 }
 0x825   :  { %6062 = vrot.lane.b32.xlu0 %v18203_v16, %s10675_s0  ;;  %9308 = vmatpush3.bf16.xpose.msk.msra.mxu1 %vm12087_vm1, %v9306_v56 }
 0x829   :  { %6066 = vrot.lane.b32.xlu0 %v18204_v45, %s10675_s0 }
 0x82c   :  { %8602 = vmatmul.mubr.msk.f32.vlgmr.msra.gmra.mrb[180].mxu1 %vm85_vm0, %v18179_v8  ;;  %v3914_v8 = vpop.xlane.xlu1 %3913 }
 0x82d   :  { %6070 = vrot.lane.b32.xlu0 %v18205_v23, %s10675_s0  ;;  %8603 = vmatprep.mubr.msk.f32.mxu1 %vm85_vm0, %v18164_v60  ;;  %10262 = vrcp.f32 %v3914_v8 }
 0x830   :  { %8604 = vmatmul.mubr.msk.f32.gmra.mrb[182].mxu1 %vm85_vm0, %v18164_v60 }
 0x831   :  { %8605 = vmatprep.mubr.msk.f32.mxu1 %vm85_vm0, %v18182_v13 }
 0x834   :  { %8606 = vmatmul.mubr.msk.f32.gmra.mrb[184].mxu1 %vm85_vm0, %v18182_v13 }
 0x835   :  { %8607 = vmatprep.mubr.msk.f32.mxu1 %vm85_vm0, %v18167_v12 }
 0x837   :  { %v10263_v41 = vpop.eup %10262 }
 0x838   :  { %8608 = vmatmul.mubr.msk.f32.gmra.mrb[186].mxu1 %vm85_vm0, %v18167_v12  ;;  %v3926_v12 = vpop.xlane.xlu1 %3925  ;;  %v4039_v57 = vmul.f32 %v10263_v41, %v14458_v47  ;;  %v4040_v56 = vmul.f32 %v10263_v41, %v14460_v9 }
 0x839   :  { %8609 = vmatprep.mubr.msk.f32.mxu1 %vm85_vm0, %v18185_v53 }
 0x83c   :  { %8610 = vmatmul.mubr.msk.f32.gmra.mrb[188].mxu1 %vm85_vm0, %v18185_v53  ;;  %v9689_v17 = vpop.permute.xlu1 %9688 }
 0x83d   :  { %8611 = vmatprep.mubr.msk.f32.mxu1 %vm85_vm0, %v18168_v49 }
 0x840   :  { %v3911_v60 = vpop.xlane.xlu0 %3910  ;;  %8612 = vmatmul.mubr.msk.f32.gmra.mrb[190].mxu1 %vm85_vm0, %v18168_v49 }
 0x841   :  { %10264 = vrcp.f32 %v3911_v60  ;;  %8613 = vmatprep.mubr.msk.f32.mxu1 %vm85_vm0, %v18188_v25 }
 0x844   :  { %v8509_v13 = vpop.f32.mrb[164].mxu1  ;;  %8614 = vmatmul.mubr.msk.f32.gmra.mrb[192].mxu1 %vm85_vm0, %v18188_v25  ;;  %v3917_v52 = vpop.xlane.xlu0 %3916 }
 0x845   :  { %v8510_v4 = vpop.f32.mrb[165].mxu1  ;;  %8615 = vmatprep.mubr.msk.f32.mxu1 %vm85_vm0, %v18171_v7  ;;  %10266 = vrcp.f32 %v3917_v52  ;;  %v9694_v52 = vpop.permute.xlu1 %9693 }
 0x846   :  { %v14762_v53 = vadd.f32 %v8510_v4, %v8509_v13  ;;  %v8512_v18 = vpop.f32.mrb[166].mxu1  ;;  %v9690_v4 = vunpack.i.l.bf16 %v9689_v17 }
 0x847   :  { %v8513_v36 = vpop.f32.mrb[167].mxu1 }
 0x848   :  { %v14764_v49 = vadd.f32 %v8513_v36, %v8512_v18  ;;  %8616 = vmatmul.mubr.msk.f32.gmra.mrb[194].mxu1 %vm85_vm0, %v18171_v7  ;;  %v3920_v58 = vpop.xlane.xlu0 %3919 }
 0x849   :  { %8617 = vmatprep.mubr.msk.f32.mxu1 %vm85_vm0, %v18191_v59  ;;  %10268 = vrcp.f32 %v3920_v58 }
 0x84a   :  { %10270 = vrcp.f32 %v3926_v12  ;;  %v9691_v12 = vunpack.i.h.bf16 %v9689_v17 }
 0x84b   :  { %v10265_v32 = vpop.eup %10264 }
 0x84c   :  { %v4037_v14 = vmul.f32 %v10265_v32, %v14532_v27  ;;  %8618 = vmatmul.mubr.msk.f32.gmra.mrb[196].mxu1 %vm85_vm0, %v18191_v59  ;;  %v4038_v7 = vmul.f32 %v10265_v32, %v14534_v31  ;;  %v3923_v8 = vpop.xlane.xlu0 %3922  ;;  %v9696_v59 = vunpack.i.h.bf16 %v9694_v52  ;;  %v9695_v27 = vunpack.i.l.bf16 %v9694_v52 }
 0x84d   :  { %8619 = vmatprep.mubr.msk.f32.mxu1 %vm85_vm0, %v18172_v2  ;;  %10272 = vrcp.f32 %v3923_v8  ;;  %v9312_v41 = vpack.c.bf16 %v9691_v12, %v9690_v4 }
 0x84e   :  { %v4102_v60 = vpack.c.bf16 %v4040_v56, %v4038_v7  ;;  %v4101_v13 = vpack.c.bf16 %v4039_v57, %v4037_v14  ;;  %v9315_v7 = vpack.c.bf16 %v9696_v59, %v9695_v27  ;;  %v9699_v56 = vpop.permute.xlu1 %9698 }
 0x84f   :  { %v10267_v9 = vpop.eup %10266 }
 0x850   :  { %4229 = vmatprep.mubr.bf16.mxu0 %v4102_v60  ;;  %8620 = vmatmul.mubr.msk.f32.gmra.mrb[198].mxu1 %vm85_vm0, %v18172_v2  ;;  %v9684_v47 = vpop.permute.xlu0 %9683  ;;  %v4042_v2 = vmul.f32 %v10267_v9, %v14546_v29  ;;  %v4041_v57 = vmul.f32 %v10267_v9, %v14542_v48  ;;  %v9701_v48 = vunpack.i.h.bf16 %v9699_v56  ;;  %v9700_v29 = vunpack.i.l.bf16 %v9699_v56 }
 0x851   :  { %4230 = vmatmul.mubr.bf16.vlgmr.msra.gmra.mrb[192].mxu0 %v4101_v13  ;;  %8621 = vmatprep.mubr.msk.f32.mxu1 %vm85_vm0, %v18194_v19  ;;  %v9686_v31 = vunpack.i.h.bf16 %v9684_v47  ;;  %v9685_v18 = vunpack.i.l.bf16 %v9684_v47 }
 0x852   :  { %v9709_v9 = vpop.permute.xlu1 %9708 }
 0x853   :  { %v10269_v36 = vpop.eup %10268  ;;  %v9309_v58 = vpack.c.bf16 %v9686_v31, %v9685_v18 }
 0x854   :  { %8622 = vmatmul.mubr.msk.f32.gmra.mrb[200].mxu1 %vm85_vm0, %v18194_v19  ;;  %v10271_v17 = vpop.eup %10270  ;;  %v4044_v32 = vmul.f32 %v10269_v36, %v14554_v28  ;;  %v4043_v14 = vmul.f32 %v10269_v36, %v14550_v1  ;;  %v9704_v8 = vpop.permute.xlu0 %9703 }
 0x855   :  { %8623 = vmatprep.mubr.msk.f32.mxu1 %vm85_vm0, %v18173_v34  ;;  %9311 = vmatprep.subr.msk.bf16.mxu1 %vm12087_vm1, %v9309_v58  ;;  %v4048_v28 = vmul.f32 %v10271_v17, %v14470_v40  ;;  %v9706_v52 = vunpack.i.h.bf16 %v9704_v8  ;;  %v9705_v12 = vunpack.i.l.bf16 %v9704_v8 }
 0x856   :  { %9314 = vmatpush3.bf16.xpose.msk.msra.mxu1 %vm12087_vm1, %v9312_v41  ;;  %v4104_v19 = vpack.c.bf16 %v4044_v32, %v4042_v2  ;;  %v4103_v60 = vpack.c.bf16 %v4043_v14, %v4041_v57  ;;  %v9719_v36 = vpop.permute.xlu1 %9718 }
 0x857   :  { %v10273_v13 = vpop.eup %10272  ;;  %9317 = vmatprep.subr.msk.bf16.mxu1 %vm12087_vm1, %v9315_v7  ;;  %v9321_v59 = vpack.c.bf16 %v9706_v52, %v9705_v12 }
 0x858   :  { %8624 = vmatmul.mubr.msk.f32.gmra.mrb[202].mxu1 %vm85_vm0, %v18173_v34  ;;  %4237 = vmatprep.mubr.bf16.mxu0 %v4104_v19  ;;  %v4046_v1 = vmul.f32 %v10273_v13, %v14564_v63  ;;  %v4045_v47 = vmul.f32 %v10273_v13, %v14558_v0  ;;  %v9318_v34 = vpack.c.bf16 %v9701_v48, %v9700_v29  ;;  %v9714_v27 = vpop.permute.xlu0 %9713  ;;  %v9711_v0 = vunpack.i.h.bf16 %v9709_v9 }
 0x859   :  { %8625 = vmatprep.mubr.msk.f32.mxu1 %vm85_vm0, %v18196_v39  ;;  %4238 = vmatmul.mubr.bf16.gmra.mrb[196].mxu0 %v4103_v60  ;;  %v4047_v63 = vmul.f32 %v10271_v17, %v14466_v30  ;;  %v9716_v31 = vunpack.i.h.bf16 %v9714_v27  ;;  %v9715_v18 = vunpack.i.l.bf16 %v9714_v27  ;;  %v9720_v17 = vunpack.i.l.bf16 %v9719_v36 }
 0x85a   :  { %v4106_v4 = vpack.c.bf16 %v4048_v28, %v4046_v1  ;;  %v9729_v57 = vpop.permute.xlu1 %9728 }
 0x85b   :  { %v4105_v40 = vpack.c.bf16 %v4047_v63, %v4045_v47  ;;  %v9327_v41 = vpack.c.bf16 %v9716_v31, %v9715_v18  ;;  %v9730_v56 = vunpack.i.l.bf16 %v9729_v57 }
 0x85c   :  { %8626 = vmatmul.mubr.msk.f32.gmra.mrb[204].mxu1 %vm85_vm0, %v18196_v39  ;;  %4245 = vmatprep.mubr.bf16.mxu0 %v4106_v4  ;;  %v9710_v39 = vunpack.i.l.bf16 %v9709_v9  ;;  %v9724_v58 = vpop.permute.xlu0 %9723 }
 0x85d   :  { %8627 = vmatprep.mubr.msk.f32.mxu1 %vm85_vm0, %v18174_v50  ;;  %v9725_v2 = vunpack.i.l.bf16 %v9724_v58 }
 0x85e   :  { %9320 = vmatpush3.bf16.xpose.msk.msra.mxu1 %vm12087_vm1, %v9318_v34  ;;  %v9324_v30 = vpack.c.bf16 %v9711_v0, %v9710_v39  ;;  %v9739_v60 = vpop.permute.xlu1 %9738 }
 0x85f   :  { %9323 = vmatprep.subr.msk.bf16.mxu1 %vm12087_vm1, %v9321_v59  ;;  %v9740_v29 = vunpack.i.l.bf16 %v9739_v60 }
 0x860   :  { %8628 = vmatmul.mubr.msk.f32.gmra.mrb[206].mxu1 %vm85_vm0, %v18174_v50  ;;  %v9721_v50 = vunpack.i.h.bf16 %v9719_v36  ;;  %v9734_v7 = vpop.permute.xlu0 %9733 }
 0x861   :  { %8629 = vmatprep.mubr.msk.f32.mxu1 %vm85_vm0, %v18197_v24  ;;  %4246 = vmatmul.mubr.bf16.gmra.mrb[200].mxu0 %v4105_v40  ;;  %v9735_v8 = vunpack.i.l.bf16 %v9734_v7 }
 0x862   :  { %v9330_v32 = vpack.c.bf16 %v9721_v50, %v9720_v17  ;;  %v9749_v12 = vpop.permute.xlu1 %9748  ;;  %v1074_v50 = vld [vmem:[%s16920_s4 + $0x8] sm:$0xff] }
 0x863   :  { %v9750_v63 = vunpack.i.l.bf16 %v9749_v12 }
 0x864   :  { %8630 = vmatmul.mubr.msk.f32.gmra.mrb[208].mxu1 %vm85_vm0, %v18197_v24  ;;  %v9726_v24 = vunpack.i.h.bf16 %v9724_v58  ;;  %v9744_v48 = vpop.permute.xlu0 %9743  ;;  %v1073_v58 = vld [vmem:[%s16920_s4] sm:$0xff] }
 0x865   :  { %8631 = vmatprep.mubr.msk.f32.mxu1 %vm85_vm0, %v18175_v10  ;;  %v9745_v1 = vunpack.i.l.bf16 %v9744_v48 }
 0x866   :  { %9326 = vmatpush3.bf16.xpose.msk.msra.mxu1 %vm12087_vm1, %v9324_v30  ;;  %v9333_v14 = vpack.c.bf16 %v9726_v24, %v9725_v2 }
 0x867   :  { %9329 = vmatprep.subr.msk.bf16.mxu1 %vm12087_vm1, %v9327_v41 }
 0x868   :  { %8632 = vmatmul.mubr.msk.f32.gmra.mrb[210].mxu1 %vm85_vm0, %v18175_v10  ;;  %v9731_v10 = vunpack.i.h.bf16 %v9729_v57  ;;  %v9754_v34 = vpop.permute.xlu0 %9753 }
 0x869   :  { %8633 = vmatprep.mubr.msk.f32.mxu1 %vm85_vm0, %v18198_v61  ;;  %v9756_v40 = vunpack.i.h.bf16 %v9754_v34  ;;  %v9755_v0 = vunpack.i.l.bf16 %v9754_v34 }
 0x86a   :  { %v9336_v19 = vpack.c.bf16 %v9731_v10, %v9730_v56 }
 0x86b   :  { %v9351_v18 = vpack.c.bf16 %v9756_v40, %v9755_v0 }
 0x86c   :  { %8634 = vmatmul.mubr.msk.f32.gmra.mrb[212].mxu1 %vm85_vm0, %v18198_v61  ;;  %v9736_v61 = vunpack.i.h.bf16 %v9734_v7  ;;  %v6011_v51 = vpop.permute.xlu0 %6010 }
 0x86d   :  { %8635 = vmatprep.mubr.msk.f32.mxu1 %vm85_vm0, %v18176_v44 }
 0x86e   :  { %9332 = vmatpush3.bf16.xpose.msk.msra.mxu1 %vm12087_vm1, %v9330_v32  ;;  %v9339_v13 = vpack.c.bf16 %v9736_v61, %v9735_v8  ;;  %v14942_v32 = vpack.c.bf16 %v1074_v50, %v1073_v58 }
 0x86f   :  { %9335 = vmatprep.subr.msk.bf16.mxu1 %vm12087_vm1, %v9333_v14 }
 0x870   :  { %8636 = vmatmul.mubr.msk.f32.gmra.mrb[214].mxu1 %vm85_vm0, %v18176_v44  ;;  %v9741_v44 = vunpack.i.h.bf16 %v9739_v60  ;;  %18206 = vst [vmem:[#allocation42_spill] sm:$0xff] %v14942_v32 }
 0x871   :  { %8637 = vmatprep.mubr.msk.f32.mxu1 %vm85_vm0, %v18199_v43 }
 0x872   :  { %v9342_v28 = vpack.c.bf16 %v9741_v44, %v9740_v29 }
 0x874   :  { %8638 = vmatmul.mubr.msk.f32.gmra.mrb[216].mxu1 %vm85_vm0, %v18199_v43  ;;  %v9746_v43 = vunpack.i.h.bf16 %v9744_v48 }
 0x875   :  { %8639 = vmatprep.mubr.msk.f32.mxu1 %vm85_vm0, %v18177_v54 }
 0x876   :  { %9338 = vmatpush3.bf16.xpose.msk.msra.mxu1 %vm12087_vm1, %v9336_v19  ;;  %v9345_v4 = vpack.c.bf16 %v9746_v43, %v9745_v1 }
 0x877   :  { %9341 = vmatprep.subr.msk.bf16.mxu1 %vm12087_vm1, %v9339_v13 }
 0x878   :  { %8640 = vmatmul.mubr.msk.f32.gmra.mrb[218].mxu1 %vm85_vm0, %v18177_v54 }
 0x879   :  { %8641 = vmatprep.mubr.msk.f32.mxu1 %vm85_vm0, %v18200_v22 }
 0x87c   :  { %8642 = vmatmul.mubr.msk.f32.gmra.mrb[220].mxu1 %vm85_vm0, %v18200_v22  ;;  %v9751_v22 = vunpack.i.h.bf16 %v9749_v12 }
 0x87d   :  { %v8515_v52 = vpop.f32.mrb[168].mxu1  ;;  %8643 = vmatprep.mubr.msk.f32.mxu1 %vm85_vm0, %v18178_v21 }
 0x87e   :  { %v8516_v47 = vpop.f32.mrb[169].mxu1  ;;  %9344 = vmatpush3.bf16.xpose.msk.msra.mxu1 %vm12087_vm1, %v9342_v28  ;;  %v9348_v31 = vpack.c.bf16 %v9751_v22, %v9750_v63  ;;  %v18219_v22 = vld [vmem:[#allocation139_spill] sm:$0xff] }
 0x87f   :  { %v14858_v54 = vadd.f32 %v8516_v47, %v8515_v52  ;;  %v8518_v9 = vpop.f32.mrb[170].mxu1  ;;  %9347 = vmatprep.subr.msk.bf16.mxu1 %vm12087_vm1, %v9345_v4 }
 0x880   :  { %v8519_v59 = vpop.f32.mrb[171].mxu1  ;;  %8644 = vmatmul.mubr.msk.f32.gmra.mrb[222].mxu1 %vm85_vm0, %v18178_v21  ;;  %v9759_v21 = vpop.permute.xlu1 %9758 }
 0x881   :  { %v14866_v27 = vadd.f32 %v8519_v59, %v8518_v9  ;;  %8645 = vmatprep.mubr.msk.f32.mxu1 %vm85_vm0, %v18201_v15  ;;  %v9761_v30 = vunpack.i.h.bf16 %v9759_v21  ;;  %v9760_v36 = vunpack.i.l.bf16 %v9759_v21 }
 0x884   :  { %8646 = vmatmul.mubr.msk.f32.gmra.mrb[224].mxu1 %vm85_vm0, %v18201_v15  ;;  %v9354_v15 = vpack.c.bf16 %v9761_v30, %v9760_v36  ;;  %v18207_v36 = vld [vmem:[#allocation14_spill] sm:$0xff] }
 0x885   :  { %8647 = vmatprep.mubr.msk.f32.mxu1 %vm85_vm0, %v18180_v3 }
 0x886   :  { %9350 = vmatpush3.bf16.xpose.msk.msra.mxu1 %vm12087_vm1, %v9348_v31 }
 0x887   :  { %9353 = vmatprep.subr.msk.bf16.mxu1 %vm12087_vm1, %v9351_v18 }
 0x888   :  { %8648 = vmatmul.mubr.msk.f32.gmra.mrb[226].mxu1 %vm85_vm0, %v18180_v3  ;;  %v6013_v3 = vpop.permute.xlu1 %6012 }
 0x889   :  { %8649 = vmatprep.mubr.msk.f32.mxu1 %vm85_vm0, %v18202_v26 }
 0x88c   :  { %8650 = vmatmul.mubr.msk.f32.gmra.mrb[228].mxu1 %vm85_vm0, %v18202_v26  ;;  %v6015_v26 = vpop.permute.xlu0 %6014  ;;  %v6017_v17 = vpop.permute.xlu1 %6016 }
 0x88d   :  { %8651 = vmatprep.mubr.msk.f32.mxu1 %vm85_vm0, %v18184_v33 }
 0x88e   :  { %9356 = vmatpush3.bf16.xpose.msk.msra.mxu1 %vm12087_vm1, %v9354_v15 }
 0x890   :  { %8652 = vmatmul.mubr.msk.f32.gmra.mrb[230].mxu1 %vm85_vm0, %v18184_v33  ;;  %v1077_v33 = vld [vmem:[%s16920_s4 + $0x20] sm:$0xff]  ;;  %v6019_v7 = vpop.permute.xlu0 %6018  ;;  %v6021_v56 = vpop.permute.xlu1 %6020 }
 0x891   :  { %8653 = vmatprep.mubr.msk.f32.mxu1 %vm85_vm0, %v18203_v16 }
 0x894   :  { %8654 = vmatmul.mubr.msk.f32.gmra.mrb[232].mxu1 %vm85_vm0, %v18203_v16  ;;  %v1080_v16 = vld [vmem:[%s16920_s4 + $0x38] sm:$0xff]  ;;  %v6023_v61 = vpop.permute.xlu0 %6022  ;;  %v6025_v8 = vpop.permute.xlu1 %6024 }
 0x895   :  { %8655 = vmatprep.mubr.msk.f32.mxu1 %vm85_vm0, %v18186_v37 }
 0x898   :  { %8656 = vmatmul.mubr.msk.f32.gmra.mrb[234].mxu1 %vm85_vm0, %v18186_v37  ;;  %v6027_v19 = vpop.permute.xlu0 %6026  ;;  %v6029_v60 = vpop.permute.xlu1 %6028 }
 0x899   :  { %8657 = vmatprep.mubr.msk.f32.mxu1 %vm85_vm0, %v18204_v45 }
 0x89c   :  { %8658 = vmatmul.mubr.msk.f32.gmra.mrb[236].mxu1 %vm85_vm0, %v18204_v45  ;;  %v6031_v13 = vpop.permute.xlu0 %6030  ;;  %v6033_v48 = vpop.permute.xlu1 %6032 }
 0x89d   :  { %8659 = vmatprep.mubr.msk.f32.mxu1 %vm85_vm0, %v18190_v46 }
 0x8a0   :  { %8660 = vmatmul.mubr.msk.f32.gmra.mrb[238].mxu1 %vm85_vm0, %v18190_v46  ;;  %v1078_v46 = vld [vmem:[%s16920_s4 + $0x28] sm:$0xff]  ;;  %v6035_v44 = vpop.permute.xlu0 %6034  ;;  %v6037_v29 = vpop.permute.xlu1 %6036 }
 0x8a1   :  { %8661 = vmatprep.mubr.msk.f32.mxu1 %vm85_vm0, %v18205_v23  ;;  %v1083_v37 = vpack.c.bf16 %v1078_v46, %v1077_v33 }
 0x8a3   :  { %9021 = vmatprep.subr.bf16.mxu0 %v1083_v37  ;;  %9093 = vmatprep.subr.bf16.mxu1 %v1083_v37 }
 0x8a4   :  { %8662 = vmatmul.mubr.msk.f32.gmra.mrb[240].mxu1 %vm85_vm0, %v18205_v23  ;;  %9022 = vmatpush3.bf16.msra.mxu0 %v1083_v37  ;;  %v6039_v43 = vpop.permute.xlu0 %6038  ;;  %v6041_v1 = vpop.permute.xlu1 %6040 }
 0x8a5   :  { %8663 = vmatprep.mubr.msk.f32.mxu1 %vm85_vm0, %v18192_v20 }
 0x8a8   :  { %8664 = vmatmul.mubr.msk.f32.gmra.mrb[242].mxu1 %vm85_vm0, %v18192_v20  ;;  %v1079_v20 = vld [vmem:[%s16920_s4 + $0x30] sm:$0xff]  ;;  %v6043_v52 = vpop.permute.xlu0 %6042  ;;  %v6045_v59 = vpop.permute.xlu1 %6044 }
 0x8a9   :  { %8809 = vmatprep.mubr.msk.f32.mxu1 %vm85_vm0, %v6011_v51  ;;  %v1084_v45 = vpack.c.bf16 %v1080_v16, %v1079_v20 }
 0x8ab   :  { %9023 = vmatprep.subr.bf16.mxu0 %v1084_v45 }
 0x8ac   :  { %8810 = vmatmul.mubr.msk.f32.vlgmr.msra.gmra.mrb[244].mxu1 %vm85_vm0, %v6011_v51  ;;  %9024 = vmatpush3.bf16.msra.mxu0 %v1084_v45  ;;  %v6047_v63 = vpop.permute.xlu0 %6046  ;;  %v6049_v40 = vpop.permute.xlu1 %6048 }
 0x8ad   :  { %8811 = vmatprep.mubr.msk.f32.mxu1 %vm85_vm0, %v6013_v3  ;;  %9094 = vmatpush3.bf16.msra.mxu1 %v1083_v37  ;;  %v18208_v37 = vld [vmem:[#allocation37_spill] sm:$0xff] }
 0x8ae   :  { %9095 = vmatprep.subr.bf16.mxu1 %v1084_v45  ;;  %9057 = vmatprep.subr.bf16.mxu0 %v14942_v32 }
 0x8b0   :  { %8812 = vmatmul.mubr.msk.f32.gmra.mrb[246].mxu1 %vm85_vm0, %v6013_v3  ;;  %v6051_v0 = vpop.permute.xlu0 %6050  ;;  %v6053_v31 = vpop.permute.xlu1 %6052 }
 0x8b1   :  { %8813 = vmatprep.mubr.msk.f32.mxu1 %vm85_vm0, %v6015_v26  ;;  %9096 = vmatpush3.bf16.msra.mxu1 %v1084_v45 }
 0x8b2   :  { %v8521_v23 = vpop.f32.mrb[172].mxu1  ;;  %9129 = vmatprep.subr.bf16.mxu1 %v14942_v32 }
 0x8b3   :  { %v8522_v41 = vpop.f32.mrb[173].mxu1 }
 0x8b4   :  { %v14939_v24 = vadd.f32 %v8522_v41, %v8521_v23  ;;  %v8524_v2 = vpop.f32.mrb[174].mxu1  ;;  %8814 = vmatmul.mubr.msk.f32.gmra.mrb[248].mxu1 %vm85_vm0, %v6015_v26  ;;  %v6055_v18 = vpop.permute.xlu0 %6054  ;;  %v18209_v41 = vld [vmem:[#allocation39_spill] sm:$0xff] }
 0x8b5   :  { %v8525_v57 = vpop.f32.mrb[175].mxu1  ;;  %8815 = vmatprep.mubr.msk.f32.mxu1 %vm85_vm0, %v6017_v17  ;;  %v6057_v33 = vpop.permute.xlu1 %6056 }
 0x8b6   :  { %v14945_v14 = vadd.f32 %v8525_v57, %v8524_v2 }
 0x8b8   :  { %8816 = vmatmul.mubr.msk.f32.gmra.mrb[250].mxu1 %vm85_vm0, %v6017_v17  ;;  %v6059_v45 = vpop.permute.xlu0 %6058 }
 0x8b9   :  { %8817 = vmatprep.mubr.msk.f32.mxu1 %vm85_vm0, %v6019_v7  ;;  %v6061_v2 = vpop.permute.xlu1 %6060 }
 0x8bc   :  { %8818 = vmatmul.mubr.msk.f32.gmra.mrb[252].mxu1 %vm85_vm0, %v6019_v7  ;;  %v18210_v7 = vld [vmem:[#allocation13_spill] sm:$0xff] }
 0x8bd   :  { %8819 = vmatprep.mubr.msk.f32.mxu1 %vm85_vm0, %v6021_v56 }
 0x8c0   :  { %8820 = vmatmul.mubr.msk.f32.gmra.mrb[254].mxu1 %vm85_vm0, %v6021_v56 }
 0x8c1   :  { %8821 = vmatprep.mubr.msk.f32.mxu1 %vm85_vm0, %v6023_v61 }
 0x8c4   :  { %8822 = vmatmul.mubr.msk.f32.gmra.mrb[0].mxu1 %vm85_vm0, %v6023_v61 }
 0x8c5   :  { %8823 = vmatprep.mubr.msk.f32.mxu1 %vm85_vm0, %v6025_v8 }
 0x8c8   :  { %8824 = vmatmul.mubr.msk.f32.gmra.mrb[2].mxu1 %vm85_vm0, %v6025_v8 }
 0x8c9   :  { %8825 = vmatprep.mubr.msk.f32.mxu1 %vm85_vm0, %v6027_v19 }
 0x8cc   :  { %8826 = vmatmul.mubr.msk.f32.gmra.mrb[4].mxu1 %vm85_vm0, %v6027_v19  ;;  %v6063_v19 = vpop.permute.xlu0 %6062 }
 0x8cd   :  { %8827 = vmatprep.mubr.msk.f32.mxu1 %vm85_vm0, %v6029_v60 }
 0x8d0   :  { %8828 = vmatmul.mubr.msk.f32.gmra.mrb[6].mxu1 %vm85_vm0, %v6029_v60 }
 0x8d1   :  { %8829 = vmatprep.mubr.msk.f32.mxu1 %vm85_vm0, %v6031_v13 }
 0x8d4   :  { %8830 = vmatmul.mubr.msk.f32.gmra.mrb[8].mxu1 %vm85_vm0, %v6031_v13 }
 0x8d5   :  { %8831 = vmatprep.mubr.msk.f32.mxu1 %vm85_vm0, %v6033_v48 }
 0x8d8   :  { %8832 = vmatmul.mubr.msk.f32.gmra.mrb[10].mxu1 %vm85_vm0, %v6033_v48 }
 0x8d9   :  { %8833 = vmatprep.mubr.msk.f32.mxu1 %vm85_vm0, %v6035_v44 }
 0x8dc   :  { %8834 = vmatmul.mubr.msk.f32.gmra.mrb[12].mxu1 %vm85_vm0, %v6035_v44 }
 0x8dd   :  { %8835 = vmatprep.mubr.msk.f32.mxu1 %vm85_vm0, %v6037_v29 }
 0x8e0   :  { %8836 = vmatmul.mubr.msk.f32.gmra.mrb[14].mxu1 %vm85_vm0, %v6037_v29  ;;  %v6065_v29 = vpop.permute.xlu1 %6064 }
 0x8e1   :  { %8837 = vmatprep.mubr.msk.f32.mxu1 %vm85_vm0, %v6039_v43 }
 0x8e4   :  { %8838 = vmatmul.mubr.msk.f32.gmra.mrb[16].mxu1 %vm85_vm0, %v6039_v43 }
 0x8e5   :  { %8839 = vmatprep.mubr.msk.f32.mxu1 %vm85_vm0, %v6041_v1 }
 0x8e7   :  { %v8527_v28 = vpop.f32.mrb[176].mxu1 }
 0x8e8   :  { %v8528_v12 = vpop.f32.mrb[177].mxu1  ;;  %8840 = vmatmul.mubr.msk.f32.gmra.mrb[18].mxu1 %vm85_vm0, %v6041_v1 }
 0x8e9   :  { %v14976_v4 = vadd.f32 %v8528_v12, %v8527_v28  ;;  %v8530_v47 = vpop.f32.mrb[178].mxu1  ;;  %8841 = vmatprep.mubr.msk.f32.mxu1 %vm85_vm0, %v6043_v52  ;;  %v6067_v12 = vpop.permute.xlu0 %6066 }
 0x8ea   :  { %v8531_v34 = vpop.f32.mrb[179].mxu1 }
 0x8eb   :  { %v14979_v9 = vadd.f32 %v8531_v34, %v8530_v47  ;;  %v18211_v34 = vld [vmem:[#allocation26_spill] sm:$0xff] }
 0x8ec   :  { %8842 = vmatmul.mubr.msk.f32.gmra.mrb[20].mxu1 %vm85_vm0, %v6043_v52 }
 0x8ed   :  { %8843 = vmatprep.mubr.msk.f32.mxu1 %vm85_vm0, %v6045_v59 }
 0x8f0   :  { %8844 = vmatmul.mubr.msk.f32.gmra.mrb[22].mxu1 %vm85_vm0, %v6045_v59 }
 0x8f1   :  { %8845 = vmatprep.mubr.msk.f32.mxu1 %vm85_vm0, %v6047_v63 }
 0x8f4   :  { %8846 = vmatmul.mubr.msk.f32.gmra.mrb[24].mxu1 %vm85_vm0, %v6047_v63 }
 0x8f5   :  { %8847 = vmatprep.mubr.msk.f32.mxu1 %vm85_vm0, %v6049_v40 }
 0x8f8   :  { %8848 = vmatmul.mubr.msk.f32.gmra.mrb[26].mxu1 %vm85_vm0, %v6049_v40 }
 0x8f9   :  { %8849 = vmatprep.mubr.msk.f32.mxu1 %vm85_vm0, %v6051_v0 }
 0x8fc   :  { %8850 = vmatmul.mubr.msk.f32.gmra.mrb[28].mxu1 %vm85_vm0, %v6051_v0  ;;  %v6069_v0 = vpop.permute.xlu1 %6068 }
 0x8fd   :  { %8851 = vmatprep.mubr.msk.f32.mxu1 %vm85_vm0, %v6053_v31 }
 0x8ff   :  { %v14993_v21 = vpop.f32.mrb[180].mxu1 }
 0x900   :  { %v5132_v30 = vpop.f32.mrb[181].mxu1  ;;  %8852 = vmatmul.mubr.msk.f32.gmra.mrb[30].mxu1 %vm85_vm0, %v6053_v31 }
 0x901   :  { %v14997_v15 = vadd.f32 %v5132_v30, %v18207_v36  ;;  %8853 = vmatprep.mubr.msk.f32.mxu1 %vm85_vm0, %v6055_v18 }
 0x903   :  { %v5321_v51 = vmax.f32 %v14993_v21, %v14997_v15  ;;  %v15002_v3 = vpop.f32.mrb[182].mxu1 }
 0x904   :  { %v5138_v46 = vpop.f32.mrb[183].mxu1  ;;  %8854 = vmatmul.mubr.msk.f32.gmra.mrb[32].mxu1 %vm85_vm0, %v6055_v18  ;;  %v18212_v18 = vld [vmem:[#allocation33_spill] sm:$0xff] }
 0x905   :  { %v15006_v26 = vadd.f32 %v5138_v46, %v18208_v37  ;;  %8855 = vmatprep.mubr.msk.f32.mxu1 %vm85_vm0, %v6057_v33  ;;  %5322 = vmax.xlane.f32.xlu0 %v5321_v51  ;;  %v6071_v46 = vpop.permute.xlu0 %6070 }
 0x907   :  { %v5324_v20 = vmax.f32 %v15002_v3, %v15006_v26  ;;  %v15011_v16 = vpop.f32.mrb[184].mxu1 }
 0x908   :  { %v5144_v23 = vpop.f32.mrb[185].mxu1  ;;  %8856 = vmatmul.mubr.msk.f32.gmra.mrb[34].mxu1 %vm85_vm0, %v6057_v33 }
 0x909   :  { %v15015_v58 = vadd.f32 %v5144_v23, %v18209_v41  ;;  %8857 = vmatprep.mubr.msk.f32.mxu1 %vm85_vm0, %v6059_v45  ;;  %5325 = vmax.xlane.f32.xlu1 %v5324_v20 }
 0x90b   :  { %v5327_v50 = vmax.f32 %v15011_v16, %v15015_v58  ;;  %v15020_v17 = vpop.f32.mrb[186].mxu1 }
 0x90c   :  { %v5150_v57 = vpop.f32.mrb[187].mxu1  ;;  %8858 = vmatmul.mubr.msk.f32.gmra.mrb[36].mxu1 %vm85_vm0, %v6059_v45  ;;  %v18213_v45 = vld [vmem:[#allocation131_spill] sm:$0xff] }
 0x90d   :  { %v15024_v56 = vadd.f32 %v5150_v57, %v18210_v7  ;;  %8859 = vmatprep.mubr.msk.f32.mxu1 %vm85_vm0, %v6061_v2  ;;  %5328 = vmax.xlane.f32.xlu0 %v5327_v50  ;;  %v6073_v50 = vpop.permute.xlu1 %6072 }
 0x90f   :  { %v5330_v61 = vmax.f32 %v15020_v17, %v15024_v56  ;;  %v15029_v8 = vpop.f32.mrb[188].mxu1 }
 0x910   :  { %v5156_v60 = vpop.f32.mrb[189].mxu1  ;;  %8860 = vmatmul.mubr.msk.f32.gmra.mrb[38].mxu1 %vm85_vm0, %v6061_v2 }
 0x911   :  { %v15033_v13 = vadd.f32 %v5156_v60, %v18065_v35  ;;  %8861 = vmatprep.mubr.msk.f32.mxu1 %vm85_vm0, %v6063_v19  ;;  %5331 = vmax.xlane.f32.xlu0 %v5330_v61  ;;  %v18214_v60 = vld [vmem:[#allocation134_spill] sm:$0xff] }
 0x913   :  { %v5333_v48 = vmax.f32 %v15029_v8, %v15033_v13  ;;  %v15038_v44 = vpop.f32.mrb[190].mxu1 }
 0x914   :  { %v5162_v43 = vpop.f32.mrb[191].mxu1  ;;  %8862 = vmatmul.mubr.msk.f32.gmra.mrb[40].mxu1 %vm85_vm0, %v6063_v19 }
 0x915   :  { %v15042_v1 = vadd.f32 %v5162_v43, %v18046_v42  ;;  %8863 = vmatprep.mubr.msk.f32.mxu1 %vm85_vm0, %v6065_v29  ;;  %5334 = vmax.xlane.f32.xlu0 %v5333_v48 }
 0x917   :  { %v5336_v28 = vmax.f32 %v15038_v44, %v15042_v1  ;;  %v15047_v52 = vpop.f32.mrb[192].mxu1 }
 0x918   :  { %v5168_v47 = vpop.f32.mrb[193].mxu1  ;;  %8864 = vmatmul.mubr.msk.f32.gmra.mrb[42].mxu1 %vm85_vm0, %v6065_v29 }
 0x919   :  { %v15051_v59 = vadd.f32 %v5168_v47, %v18211_v34  ;;  %8865 = vmatprep.mubr.msk.f32.mxu1 %vm85_vm0, %v6067_v12  ;;  %5337 = vmax.xlane.f32.xlu1 %v5336_v28 }
 0x91b   :  { %v5339_v63 = vmax.f32 %v15047_v52, %v15051_v59  ;;  %v15056_v40 = vpop.f32.mrb[194].mxu1 }
 0x91c   :  { %v5174_v31 = vpop.f32.mrb[195].mxu1  ;;  %8866 = vmatmul.mubr.msk.f32.gmra.mrb[44].mxu1 %vm85_vm0, %v6067_v12 }
 0x91d   :  { %v15060_v30 = vadd.f32 %v5174_v31, %v18212_v18  ;;  %8867 = vmatprep.mubr.msk.f32.mxu1 %vm85_vm0, %v6069_v0  ;;  %5340 = vmax.xlane.f32.xlu0 %v5339_v63 }
 0x91f   :  { %v5342_v51 = vmax.f32 %v15056_v40, %v15060_v30  ;;  %v15065_v33 = vpop.f32.mrb[196].mxu1 }
 0x920   :  { %v5180_v20 = vpop.f32.mrb[197].mxu1  ;;  %8868 = vmatmul.mubr.msk.f32.gmra.mrb[46].mxu1 %vm85_vm0, %v6069_v0 }
 0x921   :  { %v15069_v23 = vadd.f32 %v5180_v20, %v18213_v45  ;;  %8869 = vmatprep.mubr.msk.f32.mxu1 %vm85_vm0, %v6071_v46  ;;  %5343 = vmax.xlane.f32.xlu1 %v5342_v51  ;;  %v18216_v51 = vld [vmem:[#allocation137_spill] sm:$0xff] }
 0x923   :  { %v5345_v2 = vmax.f32 %v15065_v33, %v15069_v23  ;;  %v15074_v57 = vpop.f32.mrb[198].mxu1 }
 0x924   :  { %v8437_v61 = vpop.f32.mrb[192].mxu0  ;;  %v5186_v19 = vpop.f32.mrb[199].mxu1  ;;  %8870 = vmatmul.mubr.msk.f32.gmra.mrb[48].mxu1 %vm85_vm0, %v6071_v46 }
 0x925   :  { %v15078_v48 = vadd.f32 %v5186_v19, %v18214_v60  ;;  %v8438_v29 = vpop.f32.mrb[193].mxu0  ;;  %8871 = vmatprep.mubr.msk.f32.mxu1 %vm85_vm0, %v6073_v50  ;;  %5346 = vmax.xlane.f32.xlu0 %v5345_v2 }
 0x926   :  { %v8439_v43 = vadd.f32 %v8438_v29, %v8437_v61  ;;  %v8440_v28 = vpop.f32.mrb[194].mxu0 }
 0x927   :  { %v5348_v12 = vmax.f32 %v15074_v57, %v15078_v48  ;;  %v8441_v47 = vpop.f32.mrb[195].mxu0  ;;  %v15083_v63 = vpop.f32.mrb[200].mxu1 }
 0x928   :  { %18215 = vst [vmem:[#allocation170_spill] sm:$0xff] %v15083_v63  ;;  %v8442_v0 = vadd.f32 %v8441_v47, %v8440_v28  ;;  %v5192_v31 = vpop.f32.mrb[201].mxu1  ;;  %8872 = vmatmul.mubr.msk.f32.gmra.mrb[50].mxu1 %vm85_vm0, %v6073_v50 }
 0x929   :  { %v15087_v46 = vadd.f32 %v5192_v31, %v18216_v51  ;;  %5349 = vmax.xlane.f32.xlu1 %v5348_v12 }
 0x92a   :  { %v4358_v20 = vpack.c.bf16 %v8442_v0, %v8439_v43 }
 0x92b   :  { %18217 = vst [vmem:[#allocation171_spill] sm:$0xff] %v15087_v46  ;;  %v5351_v2 = vmax.f32 %v15083_v63, %v15087_v46  ;;  %v15091_v61 = vpop.f32.mrb[202].mxu1  ;;  %v18225_v46 = vld [vmem:[#allocation144_spill] sm:$0xff] }
 0x92c   :  { %18218 = vst [vmem:[#allocation6_spill] sm:$0xff] %v15091_v61  ;;  %9025 = vmatprep.mubr.msk.bf16.mxu0 %vm85_vm0, %v4358_v20  ;;  %v5198_v19 = vpop.f32.mrb[203].mxu1  ;;  %v8443_v29 = vpop.f32.mrb[196].mxu0  ;;  %v1075_v20 = vld [vmem:[%s16920_s4 + $0x10] sm:$0xff] }
 0x92d   :  { %v15095_v10 = vadd.f32 %v5198_v19, %v18219_v22  ;;  %5352 = vmax.xlane.f32.xlu0 %v5351_v2  ;;  %v8444_v28 = vpop.f32.mrb[197].mxu0  ;;  %v1076_v19 = vld [vmem:[%s16920_s4 + $0x18] sm:$0xff] }
 0x92e   :  { %v8445_v47 = vadd.f32 %v8444_v28, %v8443_v29  ;;  %v8446_v12 = vpop.f32.mrb[198].mxu0  ;;  %v18221_v2 = vld [vmem:[#allocation141_spill] sm:$0xff]  ;;  %v15114_v38 = vpack.c.bf16 %v1076_v19, %v1075_v20 }
 0x92f   :  { %18220 = vst [vmem:[#allocation177_spill] sm:$0xff] %v15095_v10  ;;  %v5354_v50 = vmax.f32 %v15091_v61, %v15095_v10  ;;  %v15099_v43 = vpop.f32.mrb[204].mxu1  ;;  %v8447_v0 = vpop.f32.mrb[199].mxu0 }
 0x930   :  { %v5204_v31 = vpop.f32.mrb[205].mxu1  ;;  %v8448_v39 = vadd.f32 %v8447_v0, %v8446_v12  ;;  %18224 = vst [vmem:[#allocation183_spill] sm:$0xff] %v15114_v38 }
 0x931   :  { %v15108_v25 = vadd.f32 %v5204_v31, %v18221_v2  ;;  %5355 = vmax.xlane.f32.xlu1 %v5354_v50 }
 0x932   :  { %v4359_v11 = vpack.c.bf16 %v8448_v39, %v8445_v47 }
 0x933   :  { %18222 = vst [vmem:[#allocation178_spill] sm:$0xff] %v15108_v25  ;;  %v5357_v29 = vmax.f32 %v15099_v43, %v15108_v25  ;;  %v15112_v28 = vpop.f32.mrb[206].mxu1 }
 0x934   :  { %18223 = vst [vmem:[#allocation213_spill] sm:$0xff] %v15112_v28  ;;  %v5210_v10 = vpop.f32.mrb[207].mxu1  ;;  %v8449_v61 = vpop.f32.mrb[200].mxu0  ;;  %9026 = vmatmul.mubr.msk.bf16.vlgmr.msra.gmra.mrb[204].mxu0 %vm85_vm0, %v4359_v11  ;;  %v18228_v11 = vld [vmem:[#allocation146_spill] sm:$0xff] }
 0x935   :  { %v15118_v63 = vadd.f32 %v5210_v10, %v18225_v46  ;;  %5358 = vmax.xlane.f32.xlu0 %v5357_v29  ;;  %9058 = vmatpush3.bf16.msra.mxu0 %v14942_v32  ;;  %v8450_v12 = vpop.f32.mrb[201].mxu0  ;;  %v18230_v32 = vld [vmem:[#allocation25_spill] sm:$0xff] }
 0x936   :  { %v8451_v50 = vadd.f32 %v8450_v12, %v8449_v61  ;;  %v8452_v47 = vpop.f32.mrb[202].mxu0  ;;  %9059 = vmatprep.subr.bf16.mxu0 %v15114_v38 }
 0x937   :  { %18226 = vst [vmem:[#allocation120_spill] sm:$0xff] %v15118_v63  ;;  %v5360_v39 = vmax.f32 %v15112_v28, %v15118_v63  ;;  %v15124_v0 = vpop.f32.mrb[208].mxu1  ;;  %v8453_v31 = vpop.f32.mrb[203].mxu0  ;;  %v18232_v63 = vld [vmem:[#allocation149_spill] sm:$0xff] }
 0x938   :  { %18227 = vst [vmem:[#allocation184_spill] sm:$0xff] %v15124_v0  ;;  %v5216_v20 = vpop.f32.mrb[209].mxu1  ;;  %v8454_v19 = vadd.f32 %v8453_v31, %v8452_v47  ;;  %v18234_v47 = vld [vmem:[#allocation135_spill] sm:$0xff]  ;;  %v18235_v31 = vld [vmem:[#allocation122_spill] sm:$0xff] }
 0x939   :  { %v15127_v25 = vadd.f32 %v5216_v20, %v18228_v11  ;;  %5361 = vmax.xlane.f32.xlu1 %v5360_v39  ;;  %9060 = vmatpush3.bf16.msra.mxu0 %v15114_v38  ;;  %v18236_v39 = vpack.c.bf16 %v18234_v47, %v18235_v31  ;;  %v18237_v20 = vld [vmem:[#allocation153_spill] sm:$0xff]  ;;  %v18243_v31 = vld [vmem:[#allocation155_spill] sm:$0xff] }
 0x93a   :  { %v4360_v10 = vpack.c.bf16 %v8454_v19, %v8451_v50  ;;  %8665 = vmatprep.subr.bf16.mxu0 %v18230_v32  ;;  %v18238_v19 = vld [vmem:[#allocation151_spill] sm:$0xff] }
 0x93b   :  { %18229 = vst [vmem:[#allocation119_spill] sm:$0xff] %v15127_v25  ;;  %v5363_v29 = vmax.f32 %v15124_v0, %v15127_v25  ;;  %v15133_v61 = vpop.f32.mrb[210].mxu1  ;;  %v18239_v38 = vpack.c.bf16 %v18237_v20, %v18238_v19  ;;  %v18240_v25 = vld [vmem:[#allocation152_spill] sm:$0xff]  ;;  %v18246_v20 = vld [vmem:[#allocation209_spill] sm:$0xff]  ;;  %v18247_v19 = vld [vmem:[#allocation126_spill] sm:$0xff] }
 0x93c   :  { %18231 = vst [vmem:[#allocation124_spill] sm:$0xff] %v15133_v61  ;;  %v5222_v12 = vpop.f32.mrb[211].mxu1  ;;  %9029 = vmatprep.mubr.msk.bf16.mxu0 %vm85_vm0, %v4360_v10 }
 0x93d   :  { %v15137_v28 = vadd.f32 %v5222_v12, %v18232_v63  ;;  %5364 = vmax.xlane.f32.xlu0 %v5363_v29  ;;  %9030 = vmatmul.mubr.msk.bf16.gmra.mrb[208].mxu0 %vm85_vm0, %v18236_v39 }
 0x93e   :  { %9033 = vmatprep.mubr.msk.bf16.mxu0 %vm85_vm0, %v18239_v38 }
 0x93f   :  { %18233 = vst [vmem:[#allocation123_spill] sm:$0xff] %v15137_v28  ;;  %v5366_v50 = vmax.f32 %v15133_v61, %v15137_v28  ;;  %v5226_v32 = vpop.f32.mrb[212].mxu1  ;;  %v18249_v61 = vld [vmem:[#allocation159_spill] sm:$0xff] }
 0x940   :  { %v15150_v10 = vadd.f32 %v5226_v32, %v18240_v25  ;;  %v15152_v12 = vpop.f32.mrb[213].mxu1  ;;  %v18248_v32 = vpack.c.bf16 %v18246_v20, %v18247_v19 }
 0x941   :  { %18242 = vst [vmem:[#allocation130_spill] sm:$0xff] %v15152_v12  ;;  %5367 = vmax.xlane.f32.xlu1 %v5366_v50  ;;  %v18250_v50 = vld [vmem:[#allocation158_spill] sm:$0xff] }
 0x942   :  { %18241 = vst [vmem:[#allocation23_spill] sm:$0xff] %v15150_v10  ;;  %v5369_v29 = vmax.f32 %v15150_v10, %v15152_v12  ;;  %v18251_v0 = vpack.c.bf16 %v18249_v61, %v18250_v50  ;;  %v18252_v10 = vld [vmem:[#allocation157_spill] sm:$0xff]  ;;  %v18261_v50 = vld [vmem:[#allocation211_spill] sm:$0xff] }
 0x943   :  { %v5232_v47 = vpop.f32.mrb[214].mxu1  ;;  %v18258_v61 = vld [vmem:[#allocation161_spill] sm:$0xff] }
 0x944   :  { %v15157_v39 = vadd.f32 %v5232_v47, %v18243_v31  ;;  %v15159_v28 = vpop.f32.mrb[215].mxu1  ;;  %5370 = vmax.xlane.f32.xlu0 %v5369_v29 }
 0x945   :  { %18245 = vst [vmem:[#allocation61_spill] sm:$0xff] %v15159_v28  ;;  %9034 = vmatmul.mubr.msk.bf16.gmra.mrb[212].mxu0 %vm85_vm0, %v18248_v32  ;;  %v18259_v32 = vld [vmem:[#allocation210_spill] sm:$0xff] }
 0x946   :  { %18244 = vst [vmem:[#allocation129_spill] sm:$0xff] %v15157_v39  ;;  %v5372_v38 = vmax.f32 %v15157_v39, %v15159_v28  ;;  %9037 = vmatprep.mubr.msk.bf16.mxu0 %vm85_vm0, %v18251_v0  ;;  %v18255_v39 = vld [vmem:[#allocation160_spill] sm:$0xff] }
 0x947   :  { %v5238_v12 = vpop.f32.mrb[216].mxu1 }
 0x948   :  { %v15172_v47 = vadd.f32 %v5238_v12, %v18252_v10  ;;  %v15174_v31 = vpop.f32.mrb[217].mxu1  ;;  %5373 = vmax.xlane.f32.xlu1 %v5372_v38  ;;  %v18260_v12 = vpack.c.bf16 %v18258_v61, %v18259_v32  ;;  %v18262_v38 = vld [vmem:[#allocation162_spill] sm:$0xff] }
 0x949   :  { %18254 = vst [vmem:[#allocation187_spill] sm:$0xff] %v15174_v31  ;;  %v18263_v10 = vpack.c.bf16 %v18261_v50, %v18262_v38  ;;  %v18271_v50 = vld [vmem:[#allocation164_spill] sm:$0xff] }
 0x94a   :  { %18253 = vst [vmem:[#allocation214_spill] sm:$0xff] %v15172_v47  ;;  %v5375_v29 = vmax.f32 %v15172_v47, %v15174_v31  ;;  %v18264_v47 = vld [vmem:[#allocation163_spill] sm:$0xff] }
 0x94b   :  { %v5244_v28 = vpop.f32.mrb[218].mxu1 }
 0x94c   :  { %v15179_v20 = vadd.f32 %v5244_v28, %v18255_v39  ;;  %v15181_v19 = vpop.f32.mrb[219].mxu1  ;;  %5376 = vmax.xlane.f32.xlu0 %v5375_v29 }
 0x94d   :  { %18257 = vst [vmem:[#allocation55_spill] sm:$0xff] %v15181_v19  ;;  %9038 = vmatmul.mubr.msk.bf16.gmra.mrb[216].mxu0 %vm85_vm0, %v18260_v12  ;;  %v18270_v12 = vld [vmem:[#allocation165_spill] sm:$0xff] }
 0x94e   :  { %18256 = vst [vmem:[#allocation188_spill] sm:$0xff] %v15179_v20  ;;  %v5378_v0 = vmax.f32 %v15179_v20, %v15181_v19  ;;  %9041 = vmatprep.mubr.msk.bf16.mxu0 %vm85_vm0, %v18263_v10  ;;  %v18267_v20 = vld [vmem:[#allocation166_spill] sm:$0xff] }
 0x94f   :  { %v5250_v31 = vpop.f32.mrb[220].mxu1 }
 0x950   :  { %v15194_v28 = vadd.f32 %v5250_v31, %v18264_v47  ;;  %v15196_v39 = vpop.f32.mrb[221].mxu1  ;;  %5379 = vmax.xlane.f32.xlu1 %v5378_v0  ;;  %v18272_v31 = vpack.c.bf16 %v18270_v12, %v18271_v50  ;;  %v18273_v0 = vpack.c.bf16 %v14694_v6, %v14684_v62  ;;  %v18278_v6 = vpack.c.bf16 %v14712_v5, %v14702_v55 }
 0x951   :  { %18266 = vst [vmem:[#allocation186_spill] sm:$0xff] %v15196_v39 }
 0x952   :  { %18265 = vst [vmem:[#allocation140_spill] sm:$0xff] %v15194_v28  ;;  %v5381_v29 = vmax.f32 %v15194_v28, %v15196_v39  ;;  %v18274_v39 = vld [vmem:[#allocation169_spill] sm:$0xff] }
 0x953   :  { %v5256_v19 = vpop.f32.mrb[222].mxu1 }
 0x954   :  { %v15201_v61 = vadd.f32 %v5256_v19, %v18267_v20  ;;  %v15203_v32 = vpop.f32.mrb[223].mxu1  ;;  %5382 = vmax.xlane.f32.xlu0 %v5381_v29 }
 0x955   :  { %18269 = vst [vmem:[#allocation97_spill] sm:$0xff] %v15203_v32  ;;  %9042 = vmatmul.mubr.msk.bf16.gmra.mrb[220].mxu0 %vm85_vm0, %v18272_v31 }
 0x956   :  { %18268 = vst [vmem:[#allocation35_spill] sm:$0xff] %v15201_v61  ;;  %v5384_v10 = vmax.f32 %v15201_v61, %v15203_v32  ;;  %9045 = vmatprep.mubr.msk.bf16.mxu0 %vm85_vm0, %v18273_v0  ;;  %v18275_v61 = vld [vmem:[#allocation173_spill] sm:$0xff]  ;;  %v18280_v0 = vld [vmem:[#allocation176_spill] sm:$0xff] }
 0x957   :  { %v5262_v38 = vpop.f32.mrb[224].mxu1 }
 0x958   :  { %v15216_v19 = vadd.f32 %v5262_v38, %v18274_v39  ;;  %v15218_v28 = vpop.f32.mrb[225].mxu1  ;;  %5385 = vmax.xlane.f32.xlu1 %v5384_v10  ;;  %v18279_v10 = vpack.c.bf16 %v14764_v49, %v14762_v53  ;;  %v18283_v49 = vpack.c.bf16 %v14866_v27, %v14858_v54 }
 0x95a   :  { %v5387_v29 = vmax.f32 %v15216_v19, %v15218_v28 }
 0x95b   :  { %v5268_v32 = vpop.f32.mrb[226].mxu1 }
 0x95c   :  { %v15223_v12 = vadd.f32 %v5268_v32, %v18275_v61  ;;  %v15225_v50 = vpop.f32.mrb[227].mxu1  ;;  %5388 = vmax.xlane.f32.xlu0 %v5387_v29 }
 0x95d   :  { %18277 = vst [vmem:[#allocation215_spill] sm:$0xff] %v15225_v50  ;;  %9046 = vmatmul.mubr.msk.bf16.gmra.mrb[224].mxu0 %vm85_vm0, %v18278_v6 }
 0x95e   :  { %18276 = vst [vmem:[#allocation104_spill] sm:$0xff] %v15223_v12  ;;  %v5390_v62 = vmax.f32 %v15223_v12, %v15225_v50  ;;  %9049 = vmatprep.mubr.msk.bf16.mxu0 %vm85_vm0, %v18279_v10  ;;  %v18281_v12 = vld [vmem:[#allocation180_spill] sm:$0xff]  ;;  %v18285_v10 = vld [vmem:[#allocation185_spill] sm:$0xff] }
 0x95f   :  { %v5274_v31 = vpop.f32.mrb[228].mxu1 }
 0x960   :  { %v15238_v32 = vadd.f32 %v5274_v31, %v18280_v0  ;;  %v15240_v38 = vpop.f32.mrb[229].mxu1  ;;  %5391 = vmax.xlane.f32.xlu1 %v5390_v62  ;;  %v18284_v62 = vpack.c.bf16 %v14945_v14, %v14939_v24  ;;  %v18289_v14 = vpack.c.bf16 %v14979_v9, %v14976_v4 }
 0x962   :  { %v5393_v29 = vmax.f32 %v15238_v32, %v15240_v38 }
 0x963   :  { %v5280_v50 = vpop.f32.mrb[230].mxu1 }
 0x964   :  { %v15245_v55 = vadd.f32 %v5280_v50, %v18281_v12  ;;  %v15247_v5 = vpop.f32.mrb[231].mxu1  ;;  %5394 = vmax.xlane.f32.xlu0 %v5393_v29  ;;  %v18286_v12 = vld [vmem:[#allocation189_spill] sm:$0xff] }
 0x965   :  { %18282 = vst [vmem:[#allocation190_spill] sm:$0xff] %v15247_v5  ;;  %9050 = vmatmul.mubr.msk.bf16.gmra.mrb[228].mxu0 %vm85_vm0, %v18283_v49  ;;  %v18290_v49 = vld [vmem:[#allocation109_spill] sm:$0xff] }
 0x966   :  { %v5396_v53 = vmax.f32 %v15245_v55, %v15247_v5  ;;  %9053 = vmatprep.mubr.msk.bf16.mxu0 %vm85_vm0, %v18284_v62 }
 0x967   :  { %v5286_v6 = vpop.f32.mrb[232].mxu1 }
 0x968   :  { %v15260_v50 = vadd.f32 %v5286_v6, %v18285_v10  ;;  %v15262_v31 = vpop.f32.mrb[233].mxu1  ;;  %5397 = vmax.xlane.f32.xlu1 %v5396_v53  ;;  %v18291_v53 = vld [vmem:[#allocation47_spill] sm:$0xff]  ;;  %v18293_v10 = vld [vmem:[#allocation192_spill] sm:$0xff] }
 0x969   :  { %v18292_v62 = vpack.c.bf16 %v18290_v49, %v18291_v53  ;;  %v18299_v49 = vld [vmem:[#allocation30_spill] sm:$0xff]  ;;  %v18300_v53 = vld [vmem:[#allocation91_spill] sm:$0xff] }
 0x96a   :  { %v5399_v29 = vmax.f32 %v15260_v50, %v15262_v31 }
 0x96b   :  { %v5292_v0 = vpop.f32.mrb[234].mxu1 }
 0x96c   :  { %v15267_v54 = vadd.f32 %v5292_v0, %v18286_v12  ;;  %v15269_v27 = vpop.f32.mrb[235].mxu1  ;;  %5400 = vmax.xlane.f32.xlu0 %v5399_v29 }
 0x96d   :  { %18288 = vst [vmem:[#allocation142_spill] sm:$0xff] %v15269_v27  ;;  %9054 = vmatmul.mubr.msk.bf16.gmra.mrb[232].mxu0 %vm85_vm0, %v18289_v14 }
 0x96e   :  { %18287 = vst [vmem:[#allocation191_spill] sm:$0xff] %v15267_v54  ;;  %v5402_v24 = vmax.f32 %v15267_v54, %v15269_v27  ;;  %9061 = vmatprep.mubr.msk.bf16.mxu0 %vm85_vm0, %v18292_v62  ;;  %v18296_v54 = vld [vmem:[#allocation200_spill] sm:$0xff]  ;;  %v18301_v62 = vpack.c.bf16 %v18299_v49, %v18300_v53 }
 0x96f   :  { %v5298_v6 = vpop.f32.mrb[236].mxu1  ;;  %v18310_v53 = vld [vmem:[#allocation56_spill] sm:$0xff] }
 0x970   :  { %v15282_v0 = vadd.f32 %v5298_v6, %v18293_v10  ;;  %v15284_v12 = vpop.f32.mrb[237].mxu1  ;;  %5403 = vmax.xlane.f32.xlu1 %v5402_v24  ;;  %v18302_v6 = vld [vmem:[#allocation52_spill] sm:$0xff]  ;;  %v18303_v24 = vld [vmem:[#allocation2_spill] sm:$0xff]  ;;  %v18304_v10 = vld [vmem:[#allocation93_spill] sm:$0xff] }
 0x971   :  { %18295 = vst [vmem:[#allocation102_spill] sm:$0xff] %v15284_v12 }
 0x972   :  { %18294 = vst [vmem:[#allocation143_spill] sm:$0xff] %v15282_v0  ;;  %v5405_v29 = vmax.f32 %v15282_v0, %v15284_v12  ;;  %v18305_v12 = vpack.c.bf16 %v18303_v24, %v18304_v10  ;;  %v18307_v0 = vld [vmem:[#allocation194_spill] sm:$0xff]  ;;  %v18312_v10 = vld [vmem:[#allocation203_spill] sm:$0xff] }
 0x973   :  { %v5304_v27 = vpop.f32.mrb[238].mxu1 }
 0x974   :  { %v15289_v4 = vadd.f32 %v5304_v27, %v18296_v54  ;;  %v15291_v9 = vpop.f32.mrb[239].mxu1  ;;  %5406 = vmax.xlane.f32.xlu0 %v5405_v29  ;;  %v18306_v54 = vld [vmem:[#allocation41_spill] sm:$0xff] }
 0x975   :  { %18298 = vst [vmem:[#allocation128_spill] sm:$0xff] %v15291_v9  ;;  %9062 = vmatmul.mubr.msk.bf16.vlgmr.msra.gmra.mrb[204].mxu0 %vm85_vm0, %v18301_v62 }
 0x976   :  { %18297 = vst [vmem:[#allocation18_spill] sm:$0xff] %v15289_v4  ;;  %v5408_v14 = vmax.f32 %v15289_v4, %v15291_v9  ;;  %8666 = vmatpush3.bf16.msra.mxu0 %v18302_v6  ;;  %9065 = vmatprep.mubr.msk.bf16.mxu0 %vm85_vm0, %v18305_v12  ;;  %v18311_v9 = vld [vmem:[#allocation83_spill] sm:$0xff]  ;;  %v18318_v4 = vld [vmem:[#allocation60_spill] sm:$0xff] }
 0x977   :  { %v5310_v27 = vpop.f32.mrb[240].mxu1  ;;  %8667 = vmatprep.subr.bf16.mxu0 %v18306_v54  ;;  %v18316_v54 = vld [vmem:[#allocation24_spill] sm:$0xff] }
 0x978   :  { %v15306_v29 = vadd.f32 %v5310_v27, %v18307_v0  ;;  %v15308_v5 = vpop.f32.mrb[241].mxu1  ;;  %5409 = vmax.xlane.f32.xlu1 %v5408_v14  ;;  %v18315_v0 = vld [vmem:[#allocation4_spill] sm:$0xff] }
 0x979   :  { %18309 = vst [vmem:[#allocation66_spill] sm:$0xff] %v15308_v5  ;;  %v18317_v14 = vpack.c.bf16 %v18315_v0, %v18316_v54  ;;  %v18323_v0 = vld [vmem:[#allocation65_spill] sm:$0xff] }
 0x97a   :  { %18308 = vst [vmem:[#allocation193_spill] sm:$0xff] %v15306_v29  ;;  %v5411_v49 = vmax.f32 %v15306_v29, %v15308_v5  ;;  %8668 = vmatpush3.bf16.msra.mxu0 %v18310_v53  ;;  %v18319_v53 = vld [vmem:[#allocation16_spill] sm:$0xff]  ;;  %v18320_v5 = vld [vmem:[#allocation15_spill] sm:$0xff] }
 0x97b   :  { %v5316_v62 = vpop.f32.mrb[242].mxu1  ;;  %8669 = vmatprep.subr.bf16.mxu0 %v18311_v9  ;;  %v18321_v29 = vpack.c.bf16 %v18319_v53, %v18320_v5  ;;  %v18326_v53 = vld [vmem:[#allocation40_spill] sm:$0xff] }
 0x97c   :  { %v15315_v24 = vadd.f32 %v5316_v62, %v18312_v10  ;;  %v15317_v12 = vpop.f32.mrb[243].mxu1  ;;  %5412 = vmax.xlane.f32.xlu0 %v5411_v49  ;;  %v18322_v10 = vld [vmem:[#allocation89_spill] sm:$0xff] }
 0x97d   :  { %18314 = vst [vmem:[#allocation11_spill] sm:$0xff] %v15317_v12  ;;  %9066 = vmatmul.mubr.msk.bf16.gmra.mrb[208].mxu0 %vm85_vm0, %v18317_v14 }
 0x97e   :  { %18313 = vst [vmem:[#allocation172_spill] sm:$0xff] %v15315_v24  ;;  %v5414_v27 = vmax.f32 %v15315_v24, %v15317_v12  ;;  %8670 = vmatpush3.bf16.msra.mxu0 %v18318_v4  ;;  %9069 = vmatprep.mubr.msk.bf16.mxu0 %vm85_vm0, %v18321_v29  ;;  %v18324_v4 = vld [vmem:[#allocation96_spill] sm:$0xff] }
 0x97f   :  { %v15330_v62 = vpop.f32.mrb[244].mxu1  ;;  %8671 = vmatprep.subr.bf16.mxu0 %v18322_v10  ;;  %v18327_v10 = vld [vmem:[#allocation8_spill] sm:$0xff] }
 0x980   :  { %v6334_v49 = vpop.f32.mrb[245].mxu1  ;;  %5415 = vmax.xlane.f32.xlu1 %v5414_v27  ;;  %v18328_v27 = vpack.c.bf16 %v18326_v53, %v18327_v10  ;;  %v18331_v12 = vld [vmem:[#allocation44_spill] sm:$0xff]  ;;  %v18335_v53 = vld [vmem:[#allocation74_spill] sm:$0xff] }
 0x981   :  { %v15334_v9 = vadd.f32 %v6334_v49, %v18207_v36  ;;  %v18329_v49 = vld [vmem:[#allocation70_spill] sm:$0xff] }
 0x982   :  { %8672 = vmatpush3.bf16.msra.mxu0 %v18323_v0  ;;  %v18330_v0 = vld [vmem:[#allocation27_spill] sm:$0xff] }
 0x983   :  { %v6523_v54 = vmax.f32 %v15330_v62, %v15334_v9  ;;  %v15339_v14 = vpop.f32.mrb[246].mxu1  ;;  %8673 = vmatprep.subr.bf16.mxu0 %v18324_v4  ;;  %v18332_v24 = vpack.c.bf16 %v18330_v0, %v18331_v12  ;;  %v18339_v0 = vld [vmem:[#allocation147_spill] sm:$0xff] }
 0x984   :  { %v6340_v5 = vpop.f32.mrb[247].mxu1 }
 0x985   :  { %v15343_v29 = vadd.f32 %v6340_v5, %v18208_v37  ;;  %6524 = vmax.xlane.f32.xlu0 %v6523_v54  ;;  %9070 = vmatmul.mubr.msk.bf16.gmra.mrb[212].mxu0 %vm85_vm0, %v18328_v27  ;;  %v18333_v37 = vld [vmem:[#allocation101_spill] sm:$0xff] }
 0x986   :  { %8674 = vmatpush3.bf16.msra.mxu0 %v18329_v49  ;;  %9073 = vmatprep.mubr.msk.bf16.mxu0 %vm85_vm0, %v18332_v24  ;;  %v18337_v49 = vld [vmem:[#allocation114_spill] sm:$0xff] }
 0x987   :  { %18325 = vst [vmem:[#allocation127_spill] sm:$0xff] %v15343_v29  ;;  %v6526_v36 = vmax.f32 %v15339_v14, %v15343_v29  ;;  %v15356_v4 = vpop.f32.mrb[248].mxu1  ;;  %8675 = vmatprep.subr.bf16.mxu0 %v18333_v37  ;;  %v18340_v37 = vld [vmem:[#allocation145_spill] sm:$0xff] }
 0x988   :  { %v6346_v54 = vpop.f32.mrb[249].mxu1  ;;  %v18341_v29 = vpack.c.bf16 %v18339_v0, %v18340_v37  ;;  %v18349_v0 = vld [vmem:[#allocation12_spill] sm:$0xff] }
 0x989   :  { %v15360_v5 = vadd.f32 %v6346_v54, %v18209_v41  ;;  %6527 = vmax.xlane.f32.xlu1 %v6526_v36  ;;  %v18342_v36 = vld [vmem:[#allocation78_spill] sm:$0xff] }
 0x98a   :  { %8676 = vmatpush3.bf16.msra.mxu0 %v18335_v53  ;;  %v18343_v54 = vld [vmem:[#allocation206_spill] sm:$0xff]  ;;  %v18344_v53 = vld [vmem:[#allocation21_spill] sm:$0xff] }
 0x98b   :  { %18334 = vst [vmem:[#allocation28_spill] sm:$0xff] %v15360_v5  ;;  %v6529_v10 = vmax.f32 %v15356_v4, %v15360_v5  ;;  %v15365_v27 = vpop.f32.mrb[250].mxu1  ;;  %8677 = vmatprep.subr.bf16.mxu0 %v18337_v49  ;;  %v18345_v5 = vpack.c.bf16 %v18343_v54, %v18344_v53 }
 0x98c   :  { %18336 = vst [vmem:[#allocation208_spill] sm:$0xff] %v15365_v27  ;;  %v6352_v12 = vpop.f32.mrb[251].mxu1 }
 0x98d   :  { %v15369_v24 = vadd.f32 %v6352_v12, %v18210_v7  ;;  %6530 = vmax.xlane.f32.xlu0 %v6529_v10  ;;  %9074 = vmatmul.mubr.msk.bf16.gmra.mrb[216].mxu0 %vm85_vm0, %v18341_v29  ;;  %v18347_v7 = vld [vmem:[#allocation118_spill] sm:$0xff] }
 0x98e   :  { %8678 = vmatpush3.bf16.msra.mxu0 %v18342_v36  ;;  %9077 = vmatprep.mubr.msk.bf16.mxu0 %vm85_vm0, %v18345_v5 }
 0x98f   :  { %18338 = vst [vmem:[#allocation19_spill] sm:$0xff] %v15369_v24  ;;  %v6532_v41 = vmax.f32 %v15365_v27, %v15369_v24  ;;  %v15382_v49 = vpop.f32.mrb[252].mxu1  ;;  %8679 = vmatprep.subr.bf16.mxu0 %v18347_v7 }
 0x990   :  { %18346 = vst [vmem:[#allocation45_spill] sm:$0xff] %v15382_v49  ;;  %v6358_v10 = vpop.f32.mrb[253].mxu1 }
 0x991   :  { %v15386_v12 = vadd.f32 %v6358_v10, %v18065_v35  ;;  %6533 = vmax.xlane.f32.xlu1 %v6532_v41  ;;  %v18352_v35 = vld [vmem:[#allocation156_spill] sm:$0xff]  ;;  %v18353_v41 = vld [vmem:[#allocation154_spill] sm:$0xff] }
 0x992   :  { %v5323_v29 = vpop.xlane.xlu0 %5322  ;;  %8680 = vmatpush3.bf16.msra.mxu0 %v18349_v0  ;;  %v18354_v10 = vpack.c.bf16 %v18352_v35, %v18353_v41 }
 0x993   :  { %18348 = vst [vmem:[#allocation207_spill] sm:$0xff] %v15386_v12  ;;  %v6535_v37 = vmax.f32 %v15382_v49, %v15386_v12  ;;  %v5417_v36 = vsub.f32 %v14993_v21, %v5323_v29  ;;  %v5418_v53 = vsub.f32 %v14997_v15, %v5323_v29  ;;  %v15393_v5 = vpop.f32.mrb[254].mxu1  ;;  %v18355_v15 = vld [vmem:[#allocation167_spill] sm:$0xff]  ;;  %v18356_v29 = vld [vmem:[#allocation5_spill] sm:$0xff] }
 0x994   :  { %18350 = vst [vmem:[#allocation103_spill] sm:$0xff] %v15393_v5  ;;  %v6364_v54 = vpop.f32.mrb[255].mxu1  ;;  %v18357_v0 = vpack.c.bf16 %v18355_v15, %v18356_v29 }
 0x995   :  { %v5481_v24 = vmul.f32 1.442695, %v5417_v36  ;;  %v5483_v7 = vmul.f32 1.442695, %v5418_v53  ;;  %v15396_v27 = vadd.f32 %v6364_v54, %v18046_v42  ;;  %6536 = vmax.xlane.f32.xlu0 %v6535_v37  ;;  %9078 = vmatmul.mubr.msk.bf16.gmra.mrb[220].mxu0 %vm85_vm0, %v18354_v10 }
 0x996   :  { %v5326_v12 = vpop.xlane.xlu1 %5325  ;;  %9081 = vmatprep.mubr.msk.bf16.mxu0 %vm85_vm0, %v18357_v0 }
 0x997   :  { %18351 = vst [vmem:[#allocation132_spill] sm:$0xff] %v15396_v27  ;;  %10274 = vpow2.f32 %v5481_v24  ;;  %v6538_v21 = vmax.f32 %v15393_v5, %v15396_v27  ;;  %v5419_v36 = vsub.f32 %v15002_v3, %v5326_v12  ;;  %v5420_v42 = vsub.f32 %v15006_v26, %v5326_v12  ;;  %v15410_v37 = vpop.f32.mrb[0].mxu1  ;;  %v18403_v5 = vld [vmem:[#allocation119_spill] sm:$0xff] }
 0x998   :  { %18358 = vst [vmem:[#allocation138_spill] sm:$0xff] %v15410_v37  ;;  %10276 = vpow2.f32 %v5483_v7  ;;  %v6370_v53 = vpop.f32.mrb[1].mxu1 }
 0x999   :  { %v5485_v54 = vmul.f32 1.442695, %v5419_v36  ;;  %v5487_v35 = vmul.f32 1.442695, %v5420_v42  ;;  %v15413_v24 = vadd.f32 %v6370_v53, %v18211_v34  ;;  %6539 = vmax.xlane.f32.xlu1 %v6538_v21  ;;  %v18362_v34 = vld [vmem:[#allocation136_spill] sm:$0xff]  ;;  %v18366_v53 = vld [vmem:[#allocation81_spill] sm:$0xff] }
 0x99a   :  { %v5329_v41 = vpop.xlane.xlu0 %5328  ;;  %v18363_v21 = vld [vmem:[#allocation168_spill] sm:$0xff] }
 0x99b   :  { %18359 = vst [vmem:[#allocation38_spill] sm:$0xff] %v15413_v24  ;;  %10278 = vpow2.f32 %v5485_v54  ;;  %v6541_v10 = vmax.f32 %v15410_v37, %v15413_v24  ;;  %v5421_v0 = vsub.f32 %v15011_v16, %v5329_v41  ;;  %v5422_v3 = vsub.f32 %v15015_v58, %v5329_v41  ;;  %v15419_v26 = vpop.f32.mrb[2].mxu1  ;;  %v18365_v58 = vld [vmem:[#allocation133_spill] sm:$0xff]  ;;  %v18397_v24 = vld [vmem:[#allocation120_spill] sm:$0xff] }
 0x99c   :  { %18360 = vst [vmem:[#allocation179_spill] sm:$0xff] %v15419_v26  ;;  %10280 = vpow2.f32 %v5487_v35  ;;  %v6376_v7 = vpop.f32.mrb[3].mxu1  ;;  %v18364_v36 = vpack.c.bf16 %v18362_v34, %v18363_v21  ;;  %v18367_v54 = vpack.c.bf16 %v18365_v58, %v18366_v53 }
 0x99d   :  { %v5489_v12 = vmul.f32 1.442695, %v5421_v0  ;;  %v5491_v15 = vmul.f32 1.442695, %v5422_v3  ;;  %v15422_v29 = vadd.f32 %v6376_v7, %v18212_v18  ;;  %6542 = vmax.xlane.f32.xlu0 %v6541_v10 }
 0x99e   :  { %9082 = vmatmul.mubr.msk.bf16.gmra.mrb[224].mxu0 %vm85_vm0, %v18364_v36  ;;  %v5332_v42 = vpop.xlane.xlu0 %5331 }
 0x99f   :  { %18361 = vst [vmem:[#allocation84_spill] sm:$0xff] %v15422_v29  ;;  %10282 = vpow2.f32 %v5489_v12  ;;  %v6544_v16 = vmax.f32 %v15419_v26, %v15422_v29  ;;  %9085 = vmatprep.mubr.msk.bf16.mxu0 %vm85_vm0, %v18367_v54  ;;  %v5423_v35 = vsub.f32 %v15020_v17, %v5332_v42  ;;  %v5424_v18 = vsub.f32 %v15024_v56, %v5332_v42  ;;  %v15436_v41 = vpop.f32.mrb[4].mxu1 }
 0x9a0   :  { %18368 = vst [vmem:[#allocation59_spill] sm:$0xff] %v15436_v41  ;;  %10284 = vpow2.f32 %v5491_v15  ;;  %v6382_v10 = vpop.f32.mrb[5].mxu1 }
 0x9a1   :  { %v15438_v0 = vpop.eup %10274  ;;  %v5493_v3 = vmul.f32 1.442695, %v5423_v35  ;;  %v5495_v7 = vmul.f32 1.442695, %v5424_v18  ;;  %6545 = vmax.xlane.f32.xlu1 %v6544_v16  ;;  %v15447_v56 = vadd.f32 %v6382_v10, %v18213_v45  ;;  %v18372_v35 = vld [vmem:[#allocation174_spill] sm:$0xff]  ;;  %v18374_v45 = vld [vmem:[#allocation181_spill] sm:$0xff] }
 0x9a2   :  { %v15440_v12 = vpop.eup %10276  ;;  %v5335_v34 = vpop.xlane.xlu0 %5334  ;;  %v18375_v10 = vld [vmem:[#allocation212_spill] sm:$0xff] }
 0x9a3   :  { %10286 = vpow2.f32 %v5493_v3  ;;  %v5425_v21 = vsub.f32 %v15029_v8, %v5335_v34  ;;  %v5426_v36 = vsub.f32 %v15033_v13, %v5335_v34  ;;  %v15444_v17 = vpop.f32.mrb[6].mxu1  ;;  %18370 = vst [vmem:[#allocation195_spill] sm:$0xff] %v15447_v56  ;;  %v5609_v42 = vadd.f32 %v15440_v12, %v15438_v0  ;;  %v18371_v8 = vld [vmem:[#allocation175_spill] sm:$0xff] }
 0x9a4   :  { %18369 = vst [vmem:[#allocation216_spill] sm:$0xff] %v15444_v17  ;;  %10288 = vpow2.f32 %v5495_v7  ;;  %v6388_v15 = vpop.f32.mrb[7].mxu1  ;;  %v18373_v13 = vpack.c.bf16 %v18371_v8, %v18372_v35  ;;  %v18376_v3 = vpack.c.bf16 %v18374_v45, %v18375_v10 }
 0x9a5   :  { %v15451_v58 = vpop.eup %10278  ;;  %v5497_v16 = vmul.f32 1.442695, %v5425_v21  ;;  %v5499_v53 = vmul.f32 1.442695, %v5426_v36  ;;  %5610 = vadd.xlane.f32.xlu0 %v5609_v42  ;;  %v6547_v36 = vmax.f32 %v15436_v41, %v15447_v56  ;;  %v15470_v42 = vadd.f32 %v6388_v15, %v18214_v60 }
 0x9a6   :  { %v15453_v54 = vpop.eup %10280  ;;  %9086 = vmatmul.mubr.msk.bf16.gmra.mrb[228].mxu0 %vm85_vm0, %v18373_v13  ;;  %v5338_v18 = vpop.xlane.xlu1 %5337 }
 0x9a7   :  { %10290 = vpow2.f32 %v5497_v16  ;;  %9089 = vmatprep.mubr.msk.bf16.mxu0 %vm85_vm0, %v18376_v3  ;;  %v5427_v7 = vsub.f32 %v15038_v44, %v5338_v18  ;;  %v5428_v34 = vsub.f32 %v15042_v1, %v5338_v18  ;;  %v15465_v21 = vpop.f32.mrb[8].mxu1  ;;  %18378 = vst [vmem:[#allocation197_spill] sm:$0xff] %v15470_v42  ;;  %v5612_v16 = vadd.f32 %v15453_v54, %v15451_v58 }
 0x9a8   :  { %18377 = vst [vmem:[#allocation196_spill] sm:$0xff] %v15465_v21  ;;  %10292 = vpow2.f32 %v5499_v53  ;;  %v6394_v8 = vpop.f32.mrb[9].mxu1  ;;  %v6550_v15 = vmax.f32 %v15444_v17, %v15470_v42 }
 0x9a9   :  { %v15474_v35 = vpop.eup %10282  ;;  %v5501_v13 = vmul.f32 1.442695, %v5427_v7  ;;  %v5503_v45 = vmul.f32 1.442695, %v5428_v34  ;;  %5613 = vadd.xlane.f32.xlu1 %v5612_v16  ;;  %6548 = vmax.xlane.f32.xlu0 %v6547_v36  ;;  %v15485_v10 = vadd.f32 %v6394_v8, %v18216_v51 }
 0x9aa   :  { %v15476_v44 = vpop.eup %10284  ;;  %v5341_v1 = vpop.xlane.xlu0 %5340 }
 0x9ab   :  { %10294 = vpow2.f32 %v5501_v13  ;;  %v5429_v18 = vsub.f32 %v15047_v52, %v5341_v1  ;;  %v5430_v53 = vsub.f32 %v15051_v59, %v5341_v1  ;;  %v15480_v60 = vpop.f32.mrb[10].mxu1  ;;  %18379 = vst [vmem:[#allocation105_spill] sm:$0xff] %v15485_v10  ;;  %v5615_v7 = vadd.f32 %v15476_v44, %v15474_v35  ;;  %v18380_v13 = vld [vmem:[#allocation48_spill] sm:$0xff]  ;;  %v18381_v1 = vld [vmem:[#allocation182_spill] sm:$0xff] }
 0x9ac   :  { %10296 = vpow2.f32 %v5503_v45  ;;  %v6400_v3 = vpop.f32.mrb[11].mxu1  ;;  %v18382_v45 = vpack.c.bf16 %v18380_v13, %v18381_v1 }
 0x9ad   :  { %v15489_v34 = vpop.eup %10286  ;;  %v5505_v36 = vmul.f32 1.442695, %v5429_v18  ;;  %v5507_v16 = vmul.f32 1.442695, %v5430_v53  ;;  %6551 = vmax.xlane.f32.xlu1 %v6550_v15  ;;  %5616 = vadd.xlane.f32.xlu0 %v5615_v7  ;;  %v6553_v18 = vmax.f32 %v15465_v21, %v15485_v10  ;;  %v15504_v53 = vadd.f32 %v6400_v3, %v18219_v22 }
 0x9ae   :  { %v15491_v52 = vpop.eup %10288  ;;  %v5344_v59 = vpop.xlane.xlu1 %5343  ;;  %9090 = vmatmul.mubr.msk.bf16.gmra.mrb[232].mxu0 %vm85_vm0, %v18382_v45 }
 0x9af   :  { %10298 = vpow2.f32 %v5505_v36  ;;  %v5431_v51 = vsub.f32 %v15056_v40, %v5344_v59  ;;  %v5432_v8 = vsub.f32 %v15060_v30, %v5344_v59  ;;  %v15499_v42 = vpop.f32.mrb[12].mxu1  ;;  %18383 = vst [vmem:[#allocation217_spill] sm:$0xff] %v15504_v53  ;;  %v5618_v7 = vadd.f32 %v15491_v52, %v15489_v34 }
 0x9b0   :  { %10300 = vpow2.f32 %v5507_v16  ;;  %v6406_v15 = vpop.f32.mrb[13].mxu1  ;;  %v6556_v3 = vmax.f32 %v15480_v60, %v15504_v53 }
 0x9b1   :  { %v15508_v36 = vpop.eup %10290  ;;  %v5509_v13 = vmul.f32 1.442695, %v5431_v51  ;;  %v5511_v1 = vmul.f32 1.442695, %v5432_v8  ;;  %6554 = vmax.xlane.f32.xlu0 %v6553_v18  ;;  %5619 = vadd.xlane.f32.xlu1 %v5618_v7  ;;  %v15519_v45 = vadd.f32 %v6406_v15, %v18221_v2 }
 0x9b2   :  { %v15510_v40 = vpop.eup %10292  ;;  %v5347_v30 = vpop.xlane.xlu0 %5346 }
 0x9b3   :  { %10302 = vpow2.f32 %v5509_v13  ;;  %v5433_v59 = vsub.f32 %v15065_v33, %v5347_v30  ;;  %v5434_v16 = vsub.f32 %v15069_v23, %v5347_v30  ;;  %v15514_v22 = vpop.f32.mrb[14].mxu1  ;;  %18384 = vst [vmem:[#allocation198_spill] sm:$0xff] %v15519_v45  ;;  %v5621_v8 = vadd.f32 %v15510_v40, %v15508_v36 }
 0x9b4   :  { %10304 = vpow2.f32 %v5511_v1  ;;  %v6412_v51 = vpop.f32.mrb[15].mxu1  ;;  %v6559_v15 = vmax.f32 %v15499_v42, %v15519_v45 }
 0x9b5   :  { %v15523_v18 = vpop.eup %10294  ;;  %v5513_v7 = vmul.f32 1.442695, %v5433_v59  ;;  %v5515_v13 = vmul.f32 1.442695, %v5434_v16  ;;  %6557 = vmax.xlane.f32.xlu1 %v6556_v3  ;;  %5622 = vadd.xlane.f32.xlu0 %v5621_v8  ;;  %v15534_v53 = vadd.f32 %v6412_v51, %v18225_v46 }
 0x9b6   :  { %v15525_v33 = vpop.eup %10296  ;;  %v5350_v23 = vpop.xlane.xlu1 %5349 }
 0x9b7   :  { %10306 = vpow2.f32 %v5513_v7  ;;  %v5435_v30 = vsub.f32 %v15074_v57, %v5350_v23  ;;  %v5436_v1 = vsub.f32 %v15078_v48, %v5350_v23  ;;  %v15529_v2 = vpop.f32.mrb[16].mxu1  ;;  %18385 = vst [vmem:[#allocation199_spill] sm:$0xff] %v15534_v53  ;;  %v5624_v16 = vadd.f32 %v15525_v33, %v15523_v18  ;;  %v18386_v23 = vld [vmem:[#allocation170_spill] sm:$0xff] }
 0x9b8   :  { %10308 = vpow2.f32 %v5515_v13  ;;  %v6418_v59 = vpop.f32.mrb[17].mxu1  ;;  %v18387_v13 = vld [vmem:[#allocation171_spill] sm:$0xff]  ;;  %v6562_v51 = vmax.f32 %v15514_v22, %v15534_v53 }
 0x9b9   :  { %v15538_v3 = vpop.eup %10298  ;;  %v5517_v8 = vmul.f32 1.442695, %v5435_v30  ;;  %v5519_v7 = vmul.f32 1.442695, %v5436_v1  ;;  %5625 = vadd.xlane.f32.xlu1 %v5624_v16  ;;  %6560 = vmax.xlane.f32.xlu0 %v6559_v15  ;;  %v15549_v17 = vadd.f32 %v6418_v59, %v18228_v11 }
 0x9ba   :  { %v15540_v57 = vpop.eup %10300  ;;  %v5353_v48 = vpop.xlane.xlu0 %5352 }
 0x9bb   :  { %10310 = vpow2.f32 %v5517_v8  ;;  %v5437_v45 = vsub.f32 %v18386_v23, %v5353_v48  ;;  %v5438_v10 = vsub.f32 %v18387_v13, %v5353_v48  ;;  %v15544_v46 = vpop.f32.mrb[18].mxu1  ;;  %18388 = vst [vmem:[#allocation3_spill] sm:$0xff] %v15549_v17  ;;  %v5627_v1 = vadd.f32 %v15540_v57, %v15538_v3  ;;  %v18389_v13 = vld [vmem:[#allocation6_spill] sm:$0xff] }
 0x9bc   :  { %10312 = vpow2.f32 %v5519_v7  ;;  %v6424_v30 = vpop.f32.mrb[19].mxu1  ;;  %v18390_v7 = vld [vmem:[#allocation177_spill] sm:$0xff]  ;;  %v6565_v59 = vmax.f32 %v15529_v2, %v15549_v17 }
 0x9bd   :  { %v15553_v15 = vpop.eup %10302  ;;  %v5521_v16 = vmul.f32 1.442695, %v5437_v45  ;;  %v5523_v8 = vmul.f32 1.442695, %v5438_v10  ;;  %6563 = vmax.xlane.f32.xlu1 %v6562_v51  ;;  %5628 = vadd.xlane.f32.xlu0 %v5627_v1  ;;  %v15562_v41 = vadd.f32 %v6424_v30, %v18232_v63 }
 0x9be   :  { %v15555_v23 = vpop.eup %10304  ;;  %v5356_v48 = vpop.xlane.xlu1 %5355 }
 0x9bf   :  { %10314 = vpow2.f32 %v5521_v16  ;;  %v5439_v53 = vsub.f32 %v18389_v13, %v5356_v48  ;;  %v5440_v56 = vsub.f32 %v18390_v7, %v5356_v48  ;;  %v6428_v11 = vpop.f32.mrb[20].mxu1  ;;  %18391 = vst [vmem:[#allocation10_spill] sm:$0xff] %v15562_v41  ;;  %v5630_v10 = vadd.f32 %v15555_v23, %v15553_v15  ;;  %v18393_v7 = vld [vmem:[#allocation178_spill] sm:$0xff] }
 0x9c0   :  { %10316 = vpow2.f32 %v5523_v8  ;;  %v15564_v45 = vpop.f32.mrb[21].mxu1  ;;  %v6568_v29 = vmax.f32 %v15544_v46, %v15562_v41 }
 0x9c1   :  { %v15568_v51 = vpop.eup %10306  ;;  %v5525_v1 = vmul.f32 1.442695, %v5439_v53  ;;  %v5527_v16 = vmul.f32 1.442695, %v5440_v56  ;;  %5631 = vadd.xlane.f32.xlu1 %v5630_v10  ;;  %6566 = vmax.xlane.f32.xlu0 %v6565_v59  ;;  %v15579_v56 = vadd.f32 %v6428_v11, %v18240_v25 }
 0x9c2   :  { %18392 = vst [vmem:[#allocation86_spill] sm:$0xff] %v15568_v51  ;;  %v15570_v13 = vpop.eup %10308  ;;  %v5359_v48 = vpop.xlane.xlu0 %5358 }
 0x9c3   :  { %10318 = vpow2.f32 %v5525_v1  ;;  %v5441_v8 = vsub.f32 %v15099_v43, %v5359_v48  ;;  %v5442_v63 = vsub.f32 %v18393_v7, %v5359_v48  ;;  %v6434_v30 = vpop.f32.mrb[22].mxu1  ;;  %v5633_v17 = vadd.f32 %v15570_v13, %v15568_v51  ;;  %18394 = vst [vmem:[#allocation108_spill] sm:$0xff] %v15579_v56  ;;  %v18396_v7 = vld [vmem:[#allocation213_spill] sm:$0xff] }
 0x9c4   :  { %10320 = vpow2.f32 %v5527_v16  ;;  %v15581_v53 = vpop.f32.mrb[23].mxu1  ;;  %v6571_v11 = vmax.f32 %v15579_v56, %v15564_v45 }
 0x9c5   :  { %v15583_v59 = vpop.eup %10310  ;;  %v5529_v10 = vmul.f32 1.442695, %v5441_v8  ;;  %v5531_v1 = vmul.f32 1.442695, %v5442_v63  ;;  %6569 = vmax.xlane.f32.xlu1 %v6568_v29  ;;  %5634 = vadd.xlane.f32.xlu0 %v5633_v17  ;;  %v18398_v8 = vld [vmem:[#allocation155_spill] sm:$0xff] }
 0x9c6   :  { %18395 = vst [vmem:[#allocation82_spill] sm:$0xff] %v15583_v59  ;;  %v15585_v43 = vpop.eup %10312  ;;  %v5362_v48 = vpop.xlane.xlu1 %5361  ;;  %v15594_v63 = vadd.f32 %v6434_v30, %v18398_v8 }
 0x9c7   :  { %10322 = vpow2.f32 %v5529_v10  ;;  %v5443_v26 = vsub.f32 %v18396_v7, %v5362_v48  ;;  %v5444_v41 = vsub.f32 %v18397_v24, %v5362_v48  ;;  %v6440_v16 = vpop.f32.mrb[24].mxu1  ;;  %v5636_v25 = vadd.f32 %v15585_v43, %v15583_v59  ;;  %v18402_v48 = vld [vmem:[#allocation184_spill] sm:$0xff] }
 0x9c8   :  { %10324 = vpow2.f32 %v5531_v1  ;;  %18399 = vst [vmem:[#allocation64_spill] sm:$0xff] %v15594_v63  ;;  %v15596_v37 = vpop.f32.mrb[25].mxu1  ;;  %v6574_v8 = vmax.f32 %v15594_v63, %v15581_v53  ;;  %v18410_v63 = vld [vmem:[#allocation124_spill] sm:$0xff] }
 0x9c9   :  { %v15598_v29 = vpop.eup %10314  ;;  %v5533_v17 = vmul.f32 1.442695, %v5443_v26  ;;  %v5535_v10 = vmul.f32 1.442695, %v5444_v41  ;;  %5637 = vadd.xlane.f32.xlu1 %v5636_v25  ;;  %6572 = vmax.xlane.f32.xlu0 %v6571_v11  ;;  %v18404_v26 = vld [vmem:[#allocation157_spill] sm:$0xff] }
 0x9ca   :  { %18400 = vst [vmem:[#allocation31_spill] sm:$0xff] %v15598_v29  ;;  %v15600_v7 = vpop.eup %10316  ;;  %v5365_v24 = vpop.xlane.xlu0 %5364  ;;  %v15609_v41 = vadd.f32 %v6440_v16, %v18404_v26 }
 0x9cb   :  { %18401 = vst [vmem:[#allocation218_spill] sm:$0xff] %v15600_v7  ;;  %10326 = vpow2.f32 %v5533_v17  ;;  %v5445_v27 = vsub.f32 %v18402_v48, %v5365_v24  ;;  %v5446_v56 = vsub.f32 %v18403_v5, %v5365_v24  ;;  %v6446_v1 = vpop.f32.mrb[26].mxu1  ;;  %v5639_v30 = vadd.f32 %v15600_v7, %v15598_v29  ;;  %v18408_v5 = vld [vmem:[#allocation160_spill] sm:$0xff]  ;;  %v18411_v29 = vld [vmem:[#allocation123_spill] sm:$0xff] }
 0x9cc   :  { %10328 = vpow2.f32 %v5535_v10  ;;  %18405 = vst [vmem:[#allocation201_spill] sm:$0xff] %v15609_v41  ;;  %v15611_v49 = vpop.f32.mrb[27].mxu1  ;;  %v15618_v24 = vadd.f32 %v6446_v1, %v18408_v5 }
 0x9cd   :  { %v15613_v25 = vpop.eup %10318  ;;  %v5537_v11 = vmul.f32 1.442695, %v5445_v27  ;;  %v5539_v17 = vmul.f32 1.442695, %v5446_v56  ;;  %6575 = vmax.xlane.f32.xlu1 %v6574_v8  ;;  %5640 = vadd.xlane.f32.xlu0 %v5639_v30  ;;  %v6577_v27 = vmax.f32 %v15609_v41, %v15596_v37 }
 0x9ce   :  { %18406 = vst [vmem:[#allocation106_spill] sm:$0xff] %v15613_v25  ;;  %v15615_v48 = vpop.eup %10320  ;;  %18409 = vst [vmem:[#allocation9_spill] sm:$0xff] %v15618_v24  ;;  %v5368_v7 = vpop.xlane.xlu1 %5367 }
 0x9cf   :  { %18407 = vst [vmem:[#allocation17_spill] sm:$0xff] %v15615_v48  ;;  %10330 = vpow2.f32 %v5537_v11  ;;  %v5447_v10 = vsub.f32 %v18410_v63, %v5368_v7  ;;  %v5448_v16 = vsub.f32 %v18411_v29, %v5368_v7  ;;  %v6452_v26 = vpop.f32.mrb[28].mxu1  ;;  %v5642_v59 = vadd.f32 %v15615_v48, %v15613_v25  ;;  %v18415_v63 = vld [vmem:[#allocation23_spill] sm:$0xff]  ;;  %v18416_v7 = vld [vmem:[#allocation130_spill] sm:$0xff] }
 0x9d0   :  { %10332 = vpow2.f32 %v5539_v17  ;;  %v15626_v56 = vpop.f32.mrb[29].mxu1  ;;  %v6580_v48 = vmax.f32 %v15618_v24, %v15611_v49  ;;  %v18422_v24 = vld [vmem:[#allocation61_spill] sm:$0xff] }
 0x9d1   :  { %18412 = vst [vmem:[#allocation220_spill] sm:$0xff] %v15626_v56  ;;  %v15628_v1 = vpop.eup %10322  ;;  %v5541_v8 = vmul.f32 1.442695, %v5447_v10  ;;  %v5543_v30 = vmul.f32 1.442695, %v5448_v16  ;;  %v5371_v5 = vpop.xlane.xlu0 %5370  ;;  %5643 = vadd.xlane.f32.xlu1 %v5642_v59  ;;  %6578 = vmax.xlane.f32.xlu0 %v6577_v27  ;;  %v15639_v10 = vadd.f32 %v6452_v26, %v18264_v47 }
 0x9d2   :  { %18413 = vst [vmem:[#allocation202_spill] sm:$0xff] %v15628_v1  ;;  %v15630_v11 = vpop.eup %10324  ;;  %v5449_v29 = vsub.f32 %v18415_v63, %v5371_v5  ;;  %v5450_v51 = vsub.f32 %v18416_v7, %v5371_v5 }
 0x9d3   :  { %18414 = vst [vmem:[#allocation107_spill] sm:$0xff] %v15630_v11  ;;  %10334 = vpow2.f32 %v5541_v8  ;;  %v6458_v17 = vpop.f32.mrb[30].mxu1  ;;  %v5645_v41 = vadd.f32 %v15630_v11, %v15628_v1  ;;  %18417 = vst [vmem:[#allocation79_spill] sm:$0xff] %v15639_v10  ;;  %v18421_v8 = vld [vmem:[#allocation129_spill] sm:$0xff] }
 0x9d4   :  { %10336 = vpow2.f32 %v5543_v30  ;;  %v5545_v16 = vmul.f32 1.442695, %v5449_v29  ;;  %v5547_v25 = vmul.f32 1.442695, %v5450_v51  ;;  %v15641_v59 = vpop.f32.mrb[31].mxu1  ;;  %v6583_v51 = vmax.f32 %v15639_v10, %v15626_v56 }
 0x9d5   :  { %18418 = vst [vmem:[#allocation110_spill] sm:$0xff] %v15641_v59  ;;  %v15643_v27 = vpop.eup %10326  ;;  %v5374_v63 = vpop.xlane.xlu1 %5373  ;;  %6581 = vmax.xlane.f32.xlu1 %v6580_v48  ;;  %5646 = vadd.xlane.f32.xlu0 %v5645_v41  ;;  %v15656_v26 = vadd.f32 %v6458_v17, %v18267_v20 }
 0x9d6   :  { %18419 = vst [vmem:[#allocation150_spill] sm:$0xff] %v15643_v27  ;;  %v15645_v5 = vpop.eup %10328  ;;  %10338 = vpow2.f32 %v5545_v16  ;;  %v5451_v7 = vsub.f32 %v18421_v8, %v5374_v63  ;;  %v5452_v11 = vsub.f32 %v18422_v24, %v5374_v63 }
 0x9d7   :  { %18420 = vst [vmem:[#allocation148_spill] sm:$0xff] %v15645_v5  ;;  %10340 = vpow2.f32 %v5547_v25  ;;  %v15649_v30 = vpop.f32.mrb[32].mxu1  ;;  %v5648_v47 = vadd.f32 %v15645_v5, %v15643_v27  ;;  %18423 = vst [vmem:[#allocation88_spill] sm:$0xff] %v15656_v26  ;;  %v18426_v25 = vld [vmem:[#allocation214_spill] sm:$0xff]  ;;  %v18427_v5 = vld [vmem:[#allocation187_spill] sm:$0xff] }
 0x9d8   :  { %v5549_v29 = vmul.f32 1.442695, %v5451_v7  ;;  %v5551_v16 = vmul.f32 1.442695, %v5452_v11  ;;  %v15658_v48 = vpop.f32.mrb[33].mxu1  ;;  %v6586_v11 = vmax.f32 %v15656_v26, %v15641_v59 }
 0x9d9   :  { %v15660_v41 = vpop.eup %10330  ;;  %v5377_v8 = vpop.xlane.xlu0 %5376  ;;  %5649 = vadd.xlane.f32.xlu1 %v5648_v47  ;;  %6584 = vmax.xlane.f32.xlu0 %v6583_v51 }
 0x9da   :  { %18424 = vst [vmem:[#allocation69_spill] sm:$0xff] %v15660_v41  ;;  %v15662_v24 = vpop.eup %10332  ;;  %10342 = vpow2.f32 %v5549_v29  ;;  %v5453_v63 = vsub.f32 %v18426_v25, %v5377_v8  ;;  %v5454_v27 = vsub.f32 %v18427_v5, %v5377_v8  ;;  %v18431_v5 = vld [vmem:[#allocation188_spill] sm:$0xff]  ;;  %v18432_v8 = vld [vmem:[#allocation55_spill] sm:$0xff] }
 0x9db   :  { %18425 = vst [vmem:[#allocation219_spill] sm:$0xff] %v15662_v24  ;;  %10344 = vpow2.f32 %v5551_v16  ;;  %v15666_v10 = vpop.f32.mrb[34].mxu1  ;;  %v5651_v20 = vadd.f32 %v15662_v24, %v15660_v41 }
 0x9dc   :  { %v5553_v17 = vmul.f32 1.442695, %v5453_v63  ;;  %v5555_v7 = vmul.f32 1.442695, %v5454_v27  ;;  %v15672_v1 = vpop.f32.mrb[35].mxu1 }
 0x9dd   :  { %18428 = vst [vmem:[#allocation204_spill] sm:$0xff] %v15672_v1  ;;  %v15674_v29 = vpop.eup %10334  ;;  %v5380_v47 = vpop.xlane.xlu1 %5379  ;;  %6587 = vmax.xlane.f32.xlu1 %v6586_v11  ;;  %5652 = vadd.xlane.f32.xlu0 %v5651_v20  ;;  %v18436_v20 = vld [vmem:[#allocation140_spill] sm:$0xff] }
 0x9de   :  { %18429 = vst [vmem:[#allocation205_spill] sm:$0xff] %v15674_v29  ;;  %v15676_v51 = vpop.eup %10336  ;;  %10346 = vpow2.f32 %v5553_v17  ;;  %v5455_v16 = vsub.f32 %v18431_v5, %v5380_v47  ;;  %v5456_v25 = vsub.f32 %v18432_v8, %v5380_v47  ;;  %v18437_v47 = vld [vmem:[#allocation186_spill] sm:$0xff] }
 0x9df   :  { %18430 = vst [vmem:[#allocation100_spill] sm:$0xff] %v15676_v51  ;;  %10348 = vpow2.f32 %v5555_v7  ;;  %v15680_v24 = vpop.f32.mrb[36].mxu1  ;;  %v5654_v27 = vadd.f32 %v15676_v51, %v15674_v29 }
 0x9e0   :  { %v15684_v63 = vpop.eup %10338  ;;  %v5557_v26 = vmul.f32 1.442695, %v5455_v16  ;;  %v5559_v41 = vmul.f32 1.442695, %v5456_v25  ;;  %v15686_v59 = vpop.f32.mrb[37].mxu1 }
 0x9e1   :  { %18433 = vst [vmem:[#allocation73_spill] sm:$0xff] %v15684_v63  ;;  %18434 = vst [vmem:[#allocation77_spill] sm:$0xff] %v15686_v59  ;;  %v15688_v56 = vpop.eup %10340  ;;  %v5383_v11 = vpop.xlane.xlu0 %5382  ;;  %5655 = vadd.xlane.f32.xlu1 %v5654_v27  ;;  %v18439_v27 = vld [vmem:[#allocation35_spill] sm:$0xff] }
 0x9e2   :  { %18435 = vst [vmem:[#allocation7_spill] sm:$0xff] %v15688_v56  ;;  %10350 = vpow2.f32 %v5557_v26  ;;  %v5457_v17 = vsub.f32 %v18436_v20, %v5383_v11  ;;  %v5458_v7 = vsub.f32 %v18437_v47, %v5383_v11  ;;  %v5657_v8 = vadd.f32 %v15688_v56, %v15684_v63  ;;  %v18440_v11 = vld [vmem:[#allocation97_spill] sm:$0xff] }
 0x9e3   :  { %10352 = vpow2.f32 %v5559_v41  ;;  %v15692_v5 = vpop.f32.mrb[38].mxu1 }
 0x9e4   :  { %v15696_v51 = vpop.eup %10342  ;;  %v5561_v16 = vmul.f32 1.442695, %v5457_v17  ;;  %v5563_v25 = vmul.f32 1.442695, %v5458_v7  ;;  %v15698_v29 = vpop.f32.mrb[39].mxu1  ;;  %5658 = vadd.xlane.f32.xlu0 %v5657_v8 }
 0x9e5   :  { %18438 = vst [vmem:[#allocation121_spill] sm:$0xff] %v15698_v29  ;;  %v15700_v59 = vpop.eup %10344  ;;  %v5386_v26 = vpop.xlane.xlu1 %5385 }
 0x9e6   :  { %10354 = vpow2.f32 %v5561_v16  ;;  %v5459_v20 = vsub.f32 %v18439_v27, %v5386_v26  ;;  %v5460_v41 = vsub.f32 %v18440_v11, %v5386_v26  ;;  %v5660_v63 = vadd.f32 %v15700_v59, %v15696_v51 }
 0x9e7   :  { %10356 = vpow2.f32 %v5563_v25  ;;  %v15704_v47 = vpop.f32.mrb[40].mxu1 }
 0x9e8   :  { %18441 = vst [vmem:[#allocation36_spill] sm:$0xff] %v15704_v47  ;;  %v15708_v56 = vpop.eup %10346  ;;  %v15710_v17 = vpop.f32.mrb[41].mxu1  ;;  %v5565_v29 = vmul.f32 1.442695, %v5459_v20  ;;  %5661 = vadd.xlane.f32.xlu1 %v5660_v63  ;;  %v5567_v8 = vmul.f32 1.442695, %v5460_v41 }
 0x9e9   :  { %18442 = vst [vmem:[#allocation95_spill] sm:$0xff] %v15708_v56  ;;  %18443 = vst [vmem:[#allocation113_spill] sm:$0xff] %v15710_v17  ;;  %v15712_v7 = vpop.eup %10348  ;;  %v15726_v17 = vadd.f32 %v15649_v30, %v18274_v39 }
 0x9ea   :  { %18444 = vst [vmem:[#allocation117_spill] sm:$0xff] %v15712_v7  ;;  %v5663_v26 = vadd.f32 %v15712_v7, %v15708_v56  ;;  %10358 = vpow2.f32 %v5565_v29  ;;  %v18467_v7 = vld [vmem:[#allocation143_spill] sm:$0xff] }
 0x9eb   :  { %v15714_v16 = vpop.f32.mrb[42].mxu1  ;;  %10360 = vpow2.f32 %v5567_v8  ;;  %18449 = vst [vmem:[#allocation54_spill] sm:$0xff] %v15726_v17  ;;  %v6589_v29 = vmax.f32 %v15726_v17, %v15658_v48  ;;  %v15742_v8 = vadd.f32 %v15666_v10, %v18275_v61 }
 0x9ec   :  { %18445 = vst [vmem:[#allocation125_spill] sm:$0xff] %v15714_v16  ;;  %v15718_v25 = vpop.eup %10350  ;;  %v15720_v27 = vpop.f32.mrb[43].mxu1  ;;  %5664 = vadd.xlane.f32.xlu0 %v5663_v26 }
 0x9ed   :  { %18446 = vst [vmem:[#allocation90_spill] sm:$0xff] %v15718_v25  ;;  %18447 = vst [vmem:[#allocation51_spill] sm:$0xff] %v15720_v27  ;;  %v15722_v11 = vpop.eup %10352 }
 0x9ee   :  { %18448 = vst [vmem:[#allocation50_spill] sm:$0xff] %v15722_v11  ;;  %v5666_v20 = vadd.f32 %v15722_v11, %v15718_v25  ;;  %18454 = vst [vmem:[#allocation76_spill] sm:$0xff] %v15742_v8 }
 0x9ef   :  { %v15728_v63 = vpop.f32.mrb[44].mxu1 }
 0x9f0   :  { %18450 = vst [vmem:[#allocation58_spill] sm:$0xff] %v15728_v63  ;;  %v15732_v41 = vpop.eup %10354  ;;  %v15734_v47 = vpop.f32.mrb[45].mxu1  ;;  %5667 = vadd.xlane.f32.xlu1 %v5666_v20  ;;  %v6592_v20 = vmax.f32 %v15742_v8, %v15672_v1 }
 0x9f1   :  { %18451 = vst [vmem:[#allocation63_spill] sm:$0xff] %v15732_v41  ;;  %18452 = vst [vmem:[#allocation68_spill] sm:$0xff] %v15734_v47  ;;  %v15736_v16 = vpop.eup %10356 }
 0x9f2   :  { %18453 = vst [vmem:[#allocation72_spill] sm:$0xff] %v15736_v16  ;;  %v5669_v30 = vadd.f32 %v15736_v16, %v15732_v41  ;;  %v18465_v41 = vld [vmem:[#allocation215_spill] sm:$0xff] }
 0x9f3   :  { %v15744_v39 = vpop.f32.mrb[46].mxu1 }
 0x9f4   :  { %18455 = vst [vmem:[#allocation34_spill] sm:$0xff] %v15744_v39  ;;  %v15748_v26 = vpop.f32.mrb[47].mxu1  ;;  %6590 = vmax.xlane.f32.xlu1 %v6589_v29  ;;  %5670 = vadd.xlane.f32.xlu0 %v5669_v30  ;;  %v15750_v47 = vpop.eup %10358  ;;  %v18463_v29 = vld [vmem:[#allocation25_spill] sm:$0xff] }
 0x9f5   :  { %18456 = vst [vmem:[#allocation22_spill] sm:$0xff] %v15748_v26  ;;  %18457 = vst [vmem:[#allocation32_spill] sm:$0xff] %v15750_v47  ;;  %v15756_v17 = vpop.eup %10360  ;;  %v5389_v30 = vpop.xlane.xlu0 %5388 }
 0x9f6   :  { %18459 = vst [vmem:[#allocation49_spill] sm:$0xff] %v15756_v17  ;;  %v5672_v39 = vadd.f32 %v15756_v17, %v15750_v47  ;;  %v5461_v8 = vsub.f32 %v15216_v19, %v5389_v30  ;;  %v18464_v47 = vld [vmem:[#allocation104_spill] sm:$0xff] }
 0x9f7   :  { %v15754_v63 = vpop.f32.mrb[48].mxu1 }
 0x9f8   :  { %18458 = vst [vmem:[#allocation80_spill] sm:$0xff] %v15754_v63  ;;  %v15758_v61 = vpop.f32.mrb[49].mxu1  ;;  %6593 = vmax.xlane.f32.xlu1 %v6592_v20  ;;  %v5392_v20 = vpop.xlane.xlu1 %5391 }
 0x9f9   :  { %18460 = vst [vmem:[#allocation87_spill] sm:$0xff] %v15758_v61  ;;  %v5462_v61 = vsub.f32 %v15218_v28, %v5389_v30  ;;  %v5395_v63 = vpop.xlane.xlu0 %5394  ;;  %v5464_v56 = vsub.f32 %v18465_v41, %v5392_v20 }
 0x9fa   :  { %v5465_v27 = vsub.f32 %v15238_v32, %v5395_v63 }
 0x9fb   :  { %v15760_v10 = vpop.f32.mrb[50].mxu1  ;;  %v5571_v17 = vmul.f32 1.442695, %v5462_v61 }
 0x9fc   :  { %18461 = vst [vmem:[#allocation53_spill] sm:$0xff] %v15760_v10  ;;  %v15764_v26 = vpop.f32.mrb[51].mxu1  ;;  %5673 = vadd.xlane.f32.xlu1 %v5672_v39  ;;  %v5569_v10 = vmul.f32 1.442695, %v5461_v8  ;;  %v5398_v39 = vpop.xlane.xlu1 %5397 }
 0x9fd   :  { %18462 = vst [vmem:[#allocation94_spill] sm:$0xff] %v15764_v26  ;;  %v5466_v26 = vsub.f32 %v15240_v38, %v5395_v63  ;;  %v5401_v16 = vpop.xlane.xlu0 %5400  ;;  %v5467_v61 = vsub.f32 %v15245_v55, %v5398_v39  ;;  %v5575_v38 = vmul.f32 1.442695, %v5464_v56  ;;  %v18466_v63 = vld [vmem:[#allocation190_spill] sm:$0xff] }
 0x9fe   :  { %10362 = vpow2.f32 %v5569_v10  ;;  %v5469_v19 = vsub.f32 %v15260_v50, %v5401_v16  ;;  %v5470_v30 = vsub.f32 %v15262_v31, %v5401_v16  ;;  %v5468_v11 = vsub.f32 %v18466_v63, %v5398_v39  ;;  %v18468_v10 = vld [vmem:[#allocation102_spill] sm:$0xff]  ;;  %v18469_v16 = vld [vmem:[#allocation191_spill] sm:$0xff] }
 0x9ff   :  { %10364 = vpow2.f32 %v5571_v17  ;;  %v5579_v28 = vmul.f32 1.442695, %v5466_v26  ;;  %v5581_v31 = vmul.f32 1.442695, %v5467_v61  ;;  %v18470_v55 = vld [vmem:[#allocation142_spill] sm:$0xff] }
 0xa00   :  { %v5404_v8 = vpop.xlane.xlu1 %5403  ;;  %v18473_v61 = vld [vmem:[#allocation18_spill] sm:$0xff] }
 0xa01   :  { %v5407_v25 = vpop.xlane.xlu0 %5406  ;;  %v5472_v56 = vsub.f32 %v18470_v55, %v5404_v8 }
 0xa02   :  { %v5473_v41 = vsub.f32 %v18467_v7, %v5407_v25  ;;  %v5474_v50 = vsub.f32 %v18468_v10, %v5407_v25 }
 0xa04   :  { %v5593_v39 = vmul.f32 1.442695, %v5473_v41  ;;  %v5595_v7 = vmul.f32 1.442695, %v5474_v50 }
 0xa05   :  { %v5410_v17 = vpop.xlane.xlu1 %5409 }
 0xa08   :  { %v15786_v10 = vpop.eup %10362 }
 0xa09   :  { %v5413_v26 = vpop.xlane.xlu0 %5412 }
 0xa0a   :  { %7067 = vrot.lane.b32.xlu0 %v18463_v29, %s10675_s0  ;;  %v5463_v29 = vsub.f32 %v18464_v47, %v5392_v20  ;;  %v5585_v47 = vmul.f32 1.442695, %v5469_v19  ;;  %v5471_v20 = vsub.f32 %v18469_v16, %v5404_v8  ;;  %v5475_v16 = vsub.f32 %v18473_v61, %v5410_v17  ;;  %v18474_v8 = vld [vmem:[#allocation128_spill] sm:$0xff] }
 0xa0c   :  { %v5573_v32 = vmul.f32 1.442695, %v5463_v29  ;;  %v5583_v29 = vmul.f32 1.442695, %v5468_v11  ;;  %v5591_v11 = vmul.f32 1.442695, %v5472_v56 }
 0xa0d   :  { %7051 = vrot.lane.b32.xlu1 %v18302_v6, %s10675_s0  ;;  %v5577_v6 = vmul.f32 1.442695, %v5465_v27  ;;  %v5587_v27 = vmul.f32 1.442695, %v5470_v30  ;;  %v5416_v63 = vpop.xlane.xlu1 %5415 }
 0xa0f   :  { %10366 = vpow2.f32 %v5577_v6  ;;  %v18471_v6 = vld [vmem:[#allocation193_spill] sm:$0xff] }
 0xa10   :  { %10368 = vpow2.f32 %v5579_v28  ;;  %v5477_v19 = vsub.f32 %v18471_v6, %v5413_v26  ;;  %v18472_v28 = vld [vmem:[#allocation66_spill] sm:$0xff] }
 0xa11   :  { %10370 = vpow2.f32 %v5573_v32  ;;  %v5478_v30 = vsub.f32 %v18472_v28, %v5413_v26  ;;  %v5589_v32 = vmul.f32 1.442695, %v5471_v20  ;;  %v5597_v20 = vmul.f32 1.442695, %v5475_v16  ;;  %v18476_v28 = vld [vmem:[#allocation11_spill] sm:$0xff] }
 0xa12   :  { %10372 = vpow2.f32 %v5575_v38  ;;  %v6525_v25 = vpop.xlane.xlu0 %6524  ;;  %v15789_v38 = vpop.eup %10364  ;;  %v5601_v41 = vmul.f32 1.442695, %v5477_v19 }
 0xa13   :  { %10374 = vpow2.f32 %v5585_v47  ;;  %v5476_v47 = vsub.f32 %v18474_v8, %v5410_v17  ;;  %v5603_v50 = vmul.f32 1.442695, %v5478_v30  ;;  %v6620_v26 = vsub.f32 %v15334_v9, %v6525_v25 }
 0xa14   :  { %10376 = vpow2.f32 %v5587_v27  ;;  %v6619_v27 = vsub.f32 %v15330_v62, %v6525_v25  ;;  %v18475_v62 = vld [vmem:[#allocation172_spill] sm:$0xff]  ;;  %v5480_v30 = vsub.f32 %v18476_v28, %v5416_v63 }
 0xa15   :  { %10378 = vpow2.f32 %v5581_v31  ;;  %v5599_v17 = vmul.f32 1.442695, %v5476_v47  ;;  %v5479_v19 = vsub.f32 %v18475_v62, %v5416_v63  ;;  %v6685_v25 = vmul.f32 1.442695, %v6620_v26  ;;  %v18479_v26 = vld [vmem:[#allocation127_spill] sm:$0xff] }
 0xa16   :  { %10380 = vpow2.f32 %v5583_v29  ;;  %v6528_v55 = vpop.xlane.xlu1 %6527  ;;  %v5675_v29 = vadd.f32 %v15789_v38, %v15786_v10  ;;  %v6683_v9 = vmul.f32 1.442695, %v6619_v27 }
 0xa17   :  { %10382 = vpow2.f32 %v5593_v39  ;;  %v6621_v47 = vsub.f32 %v15339_v14, %v6528_v55  ;;  %v5605_v27 = vmul.f32 1.442695, %v5479_v19 }
 0xa18   :  { %10384 = vpow2.f32 %v5595_v7 }
 0xa19   :  { %v15796_v31 = vpop.eup %10366  ;;  %10386 = vpow2.f32 %v5589_v32 }
 0xa1a   :  { %v15794_v6 = vpop.xlane.xlu0 %6530  ;;  %v15800_v56 = vpop.eup %10368  ;;  %10388 = vpow2.f32 %v5591_v11 }
 0xa1b   :  { %v15802_v39 = vpop.eup %10370  ;;  %10390 = vpow2.f32 %v5601_v41  ;;  %v5681_v11 = vadd.f32 %v15800_v56, %v15796_v31 }
 0xa1c   :  { %v15805_v7 = vpop.eup %10372  ;;  %10392 = vpow2.f32 %v5603_v50  ;;  %v5607_v50 = vmul.f32 1.442695, %v5480_v30 }
 0xa1d   :  { %v15812_v16 = vpop.eup %10374  ;;  %10394 = vpow2.f32 %v5597_v20  ;;  %v5678_v14 = vadd.f32 %v15805_v7, %v15802_v39 }
 0xa1e   :  { %v15808_v32 = vpop.xlane.xlu1 %6533  ;;  %18477 = vst [vmem:[#allocation57_spill] sm:$0xff] %v15812_v16  ;;  %v15816_v8 = vpop.eup %10376  ;;  %10396 = vpow2.f32 %v5599_v17 }
 0xa1f   :  { %18478 = vst [vmem:[#allocation99_spill] sm:$0xff] %v15816_v8  ;;  %v15819_v41 = vpop.eup %10378  ;;  %10398 = vpow2.f32 %v6683_v9  ;;  %v5687_v17 = vadd.f32 %v15816_v8, %v15812_v16  ;;  %v6687_v9 = vmul.f32 1.442695, %v6621_v47 }
 0xa20   :  { %v15821_v63 = vpop.eup %10380  ;;  %10400 = vpow2.f32 %v6685_v25 }
 0xa21   :  { %v15828_v28 = vpop.eup %10382  ;;  %10402 = vpow2.f32 %v5605_v27  ;;  %v5684_v16 = vadd.f32 %v15821_v63, %v15819_v41 }
 0xa22   :  { %v15810_v61 = vpop.xlane.xlu0 %6536  ;;  %18481 = vst [vmem:[#allocation112_spill] sm:$0xff] %v15828_v28  ;;  %v15834_v19 = vpop.eup %10384  ;;  %10404 = vpow2.f32 %v5607_v50 }
 0xa23   :  { %18482 = vst [vmem:[#allocation67_spill] sm:$0xff] %v15834_v19  ;;  %v5693_v47 = vadd.f32 %v15834_v19, %v15828_v28  ;;  %10406 = vpow2.f32 %v6687_v9 }
 0xa26   :  { %v15824_v20 = vpop.xlane.xlu1 %6539 }
 0xa29   :  { %5676 = vadd.xlane.f32.xlu0 %v5675_v29  ;;  %v6622_v29 = vsub.f32 %v18479_v26, %v6528_v55 }
 0xa2a   :  { %v15826_v62 = vpop.xlane.xlu0 %6542 }
 0xa2b   :  { %18480 = vst [vmem:[#allocation62_spill] sm:$0xff] %v15826_v62  ;;  %v6689_v30 = vmul.f32 1.442695, %v6622_v29 }
 0xa2d   :  { %5682 = vadd.xlane.f32.xlu0 %v5681_v11  ;;  %v15836_v11 = vpop.eup %10386 }
 0xa2e   :  { %18483 = vst [vmem:[#allocation116_spill] sm:$0xff] %v15836_v11  ;;  %v15838_v55 = vpop.eup %10388  ;;  %v15840_v25 = vpop.xlane.xlu1 %6545 }
 0xa2f   :  { %18484 = vst [vmem:[#allocation71_spill] sm:$0xff] %v15840_v25  ;;  %v15842_v62 = vpop.eup %10390  ;;  %v5690_v25 = vadd.f32 %v15838_v55, %v15836_v11 }
 0xa30   :  { %18485 = vst [vmem:[#allocation75_spill] sm:$0xff] %v15842_v62  ;;  %v15848_v8 = vpop.eup %10392 }
 0xa31   :  { %5679 = vadd.xlane.f32.xlu1 %v5678_v14  ;;  %5688 = vadd.xlane.f32.xlu0 %v5687_v17  ;;  %18486 = vst [vmem:[#allocation43_spill] sm:$0xff] %v15848_v8  ;;  %v15850_v27 = vpop.eup %10394  ;;  %v5699_v9 = vadd.f32 %v15848_v8, %v15842_v62 }
 0xa32   :  { %v5611_v26 = vpop.xlane.xlu0 %5610  ;;  %18487 = vst [vmem:[#allocation20_spill] sm:$0xff] %v15850_v27  ;;  %v15852_v50 = vpop.eup %10396 }
 0xa33   :  { %10408 = vrcp.f32 %v5611_v26  ;;  %18488 = vst [vmem:[#allocation29_spill] sm:$0xff] %v15852_v50  ;;  %v15856_v17 = vpop.eup %10398 }
 0xa34   :  { %10410 = vpow2.f32 %v6689_v30  ;;  %18490 = vst [vmem:[#allocation85_spill] sm:$0xff] %v15856_v17  ;;  %v15862_v28 = vpop.eup %10400 }
 0xa35   :  { %5685 = vadd.xlane.f32.xlu1 %v5684_v16  ;;  %5694 = vadd.xlane.f32.xlu0 %v5693_v47  ;;  %18491 = vst [vmem:[#allocation92_spill] sm:$0xff] %v15862_v28  ;;  %v15866_v30 = vpop.eup %10402  ;;  %v5696_v47 = vadd.f32 %v15852_v50, %v15850_v27 }
 0xa36   :  { %v5614_v29 = vpop.xlane.xlu1 %5613  ;;  %v15854_v14 = vpop.xlane.xlu0 %6548 }
 0xa37   :  { %18489 = vst [vmem:[#allocation46_spill] sm:$0xff] %v15854_v14  ;;  %10412 = vrcp.f32 %v5614_v29  ;;  %v6811_v29 = vadd.f32 %v15862_v28, %v15856_v17  ;;  %v15872_v14 = vpop.eup %10404 }
 0xa38   :  { %v15874_v62 = vpop.eup %10406  ;;  %v5702_v27 = vadd.f32 %v15872_v14, %v15866_v30 }
 0xa39   :  { %5691 = vadd.xlane.f32.xlu1 %v5690_v25  ;;  %5700 = vadd.xlane.f32.xlu0 %v5699_v9 }
 0xa3a   :  { %v15864_v16 = vpop.xlane.xlu1 %6551  ;;  %v5617_v26 = vpop.xlane.xlu0 %5616 }
 0xa3b   :  { %18492 = vst [vmem:[#allocation98_spill] sm:$0xff] %v15864_v16  ;;  %10414 = vrcp.f32 %v5617_v26 }
 0xa3d   :  { %5697 = vadd.xlane.f32.xlu1 %v5696_v47  ;;  %6812 = vadd.xlane.f32.xlu0 %v6811_v29  ;;  %v10409_v9 = vpop.eup %10408 }
 0xa3e   :  { %v5620_v8 = vpop.xlane.xlu1 %5619  ;;  %v15876_v25 = vpop.xlane.xlu0 %6554  ;;  %v5737_v47 = vmul.f32 %v10409_v9, %v15438_v0  ;;  %v5738_v26 = vmul.f32 %v10409_v9, %v15440_v12 }
 0xa3f   :  { %18493 = vst [vmem:[#allocation111_spill] sm:$0xff] %v15876_v25  ;;  %v15882_v19 = vpop.eup %10410  ;;  %10416 = vrcp.f32 %v5620_v8 }
 0xa40   :  { %v6814_v21 = vadd.f32 %v15882_v19, %v15874_v62 }
 0xa41   :  { %v10413_v28 = vpop.eup %10412  ;;  %5703 = vadd.xlane.f32.xlu1 %v5702_v27 }
 0xa42   :  { %v5739_v29 = vmul.f32 %v10413_v28, %v15451_v58  ;;  %v15886_v17 = vpop.xlane.xlu1 %6557  ;;  %v5623_v50 = vpop.xlane.xlu0 %5622  ;;  %v5740_v11 = vmul.f32 %v10413_v28, %v15453_v54 }
 0xa43   :  { %10418 = vrcp.f32 %v5623_v50 }
 0xa44   :  { %v5802_v25 = vpack.c.bf16 %v5740_v11, %v5738_v26  ;;  %v5801_v8 = vpack.c.bf16 %v5739_v29, %v5737_v47 }
 0xa45   :  { %6815 = vadd.xlane.f32.xlu1 %v6814_v21  ;;  %v10415_v54 = vpop.eup %10414 }
 0xa46   :  { %v5626_v27 = vpop.xlane.xlu1 %5625  ;;  %5865 = vmatprep.mubr.bf16.mxu0 %v5802_v25  ;;  %v15894_v0 = vpop.xlane.xlu0 %6560  ;;  %v5742_v29 = vmul.f32 %v10415_v54, %v15476_v44 }
 0xa47   :  { %5866 = vmatmul.mubr.bf16.vlgmr.msra.gmra.mrb[236].mxu0 %v5801_v8  ;;  %10420 = vrcp.f32 %v5626_v27  ;;  %v5741_v8 = vmul.f32 %v10415_v54, %v15474_v35 }
 0xa48   :  { %v9063_v12 = vpop.f32.mrb[204].mxu0 }
 0xa49   :  { %4794 = vst.msk [vmem:[%s16921_s5 + $0x10] sm:$0xff] %vm85_vm0, %v9063_v12  ;;  %v4665_v28 = vpop.f32.mrb[205].mxu0  ;;  %v10417_v50 = vpop.eup %10416 }
 0xa4a   :  { %4792 = vst.msk [vmem:[%s16921_s5] sm:$0xff] %vm85_vm0, %v4665_v28  ;;  %v15906_v21 = vpop.xlane.xlu1 %6563  ;;  %v5629_v11 = vpop.xlane.xlu0 %5628  ;;  %v5744_v26 = vmul.f32 %v10417_v50, %v15491_v52  ;;  %v5743_v27 = vmul.f32 %v10417_v50, %v15489_v34 }
 0xa4b   :  { %v9064_v9 = vpop.f32.mrb[206].mxu0  ;;  %10422 = vrcp.f32 %v5629_v11 }
 0xa4c   :  { %4795 = vst.msk [vmem:[%s16921_s5 + $0x18] sm:$0xff] %vm85_vm0, %v9064_v9  ;;  %v4668_v47 = vpop.f32.mrb[207].mxu0  ;;  %v5804_v28 = vpack.c.bf16 %v5744_v26, %v5742_v29  ;;  %v5803_v58 = vpack.c.bf16 %v5743_v27, %v5741_v8 }
 0xa4d   :  { %4793 = vst.msk [vmem:[%s16921_s5 + $0x8] sm:$0xff] %vm85_vm0, %v4668_v47  ;;  %v10419_v9 = vpop.eup %10418 }
 0xa4e   :  { %v5632_v12 = vpop.xlane.xlu1 %5631  ;;  %v15922_v25 = vpop.xlane.xlu0 %6566  ;;  %5873 = vmatprep.mubr.bf16.mxu0 %v5804_v28  ;;  %v5746_v26 = vmul.f32 %v10419_v9, %v15510_v40  ;;  %v5745_v27 = vmul.f32 %v10419_v9, %v15508_v36  ;;  %v18495_v28 = vld [vmem:[#allocation56_spill] sm:$0xff]  ;;  %v18496_v36 = vld [vmem:[#allocation83_spill] sm:$0xff]  ;;  %v18507_v40 = vld [vmem:[#allocation17_spill] sm:$0xff] }
 0xa4f   :  { %10424 = vrcp.f32 %v5632_v12  ;;  %5874 = vmatmul.mubr.bf16.gmra.mrb[240].mxu0 %v5803_v58  ;;  %v18494_v58 = vld [vmem:[#allocation41_spill] sm:$0xff] }
 0xa50   :  { %v9067_v52 = vpop.f32.mrb[208].mxu0 }
 0xa51   :  { %4798 = vst.msk [vmem:[%s16921_s5 + $0x30] sm:$0xff] %vm85_vm0, %v9067_v52  ;;  %v4681_v35 = vpop.f32.mrb[209].mxu0  ;;  %v10421_v11 = vpop.eup %10420 }
 0xa52   :  { %4796 = vst.msk [vmem:[%s16921_s5 + $0x20] sm:$0xff] %vm85_vm0, %v4681_v35  ;;  %v15934_v34 = vpop.xlane.xlu1 %6569  ;;  %v5635_v54 = vpop.xlane.xlu0 %5634  ;;  %v5748_v8 = vmul.f32 %v10421_v11, %v15525_v33  ;;  %v5747_v12 = vmul.f32 %v10421_v11, %v15523_v18 }
 0xa53   :  { %v9068_v47 = vpop.f32.mrb[210].mxu0  ;;  %7069 = vrot.lane.b32.xlu0 %v18494_v58, %s10675_s0  ;;  %10426 = vrcp.f32 %v5635_v54 }
 0xa54   :  { %4799 = vst.msk [vmem:[%s16921_s5 + $0x38] sm:$0xff] %vm85_vm0, %v9068_v47  ;;  %v4684_v29 = vpop.f32.mrb[211].mxu0  ;;  %v5806_v35 = vpack.c.bf16 %v5748_v8, %v5746_v26  ;;  %v5805_v58 = vpack.c.bf16 %v5747_v12, %v5745_v27 }
 0xa55   :  { %4797 = vst.msk [vmem:[%s16921_s5 + $0x28] sm:$0xff] %vm85_vm0, %v4684_v29  ;;  %v10423_v33 = vpop.eup %10422 }
 0xa56   :  { %7053 = vrot.lane.b32.xlu1 %v18495_v28, %s10675_s0  ;;  %v5638_v52 = vpop.xlane.xlu1 %5637  ;;  %v15954_v47 = vpop.xlane.xlu0 %6572  ;;  %5881 = vmatprep.mubr.bf16.mxu0 %v5806_v35  ;;  %v5750_v12 = vmul.f32 %v10423_v33, %v15540_v57 }
 0xa57   :  { %7071 = vrot.lane.b32.xlu0 %v18496_v36, %s10675_s0  ;;  %10428 = vrcp.f32 %v5638_v52  ;;  %5882 = vmatmul.mubr.bf16.gmra.mrb[244].mxu0 %v5805_v58  ;;  %v5749_v52 = vmul.f32 %v10423_v33, %v15538_v3 }
 0xa58   :  { %v9071_v18 = vpop.f32.mrb[212].mxu0 }
 0xa59   :  { %4802 = vst.msk [vmem:[%s16921_s5 + $0x50] sm:$0xff] %vm85_vm0, %v9071_v18  ;;  %v4697_v9 = vpop.f32.mrb[213].mxu0  ;;  %v10425_v29 = vpop.eup %10424 }
 0xa5a   :  { %4800 = vst.msk [vmem:[%s16921_s5 + $0x40] sm:$0xff] %vm85_vm0, %v4697_v9  ;;  %v15968_v54 = vpop.xlane.xlu1 %6575  ;;  %v5641_v11 = vpop.xlane.xlu0 %5640  ;;  %v5752_v28 = vmul.f32 %v10425_v29, %v15555_v23  ;;  %v5751_v35 = vmul.f32 %v10425_v29, %v15553_v15  ;;  %v6623_v29 = vsub.f32 %v15356_v4, %v15794_v6  ;;  %v18499_v4 = vld [vmem:[#allocation28_spill] sm:$0xff] }
 0xa5b   :  { %v9072_v8 = vpop.f32.mrb[214].mxu0  ;;  %10430 = vrcp.f32 %v5641_v11 }
 0xa5c   :  { %4803 = vst.msk [vmem:[%s16921_s5 + $0x58] sm:$0xff] %vm85_vm0, %v9072_v8  ;;  %v4700_v27 = vpop.f32.mrb[215].mxu0  ;;  %v5808_v36 = vpack.c.bf16 %v5752_v28, %v5750_v12  ;;  %v5807_v9 = vpack.c.bf16 %v5751_v35, %v5749_v52  ;;  %v6691_v26 = vmul.f32 1.442695, %v6623_v29 }
 0xa5d   :  { %4801 = vst.msk [vmem:[%s16921_s5 + $0x48] sm:$0xff] %vm85_vm0, %v4700_v27  ;;  %v10427_v8 = vpop.eup %10426 }
 0xa5e   :  { %v5644_v58 = vpop.xlane.xlu1 %5643  ;;  %v15984_v18 = vpop.xlane.xlu0 %6578  ;;  %5889 = vmatprep.mubr.bf16.mxu0 %v5808_v36  ;;  %v5754_v52 = vmul.f32 %v10427_v8, %v15570_v13 }
 0xa5f   :  { %10432 = vrcp.f32 %v5644_v58  ;;  %5890 = vmatmul.mubr.bf16.gmra.mrb[248].mxu0 %v5807_v9  ;;  %v18497_v58 = vld [vmem:[#allocation86_spill] sm:$0xff] }
 0xa60   :  { %v9075_v23 = vpop.f32.mrb[216].mxu0  ;;  %v5753_v36 = vmul.f32 %v10427_v8, %v18497_v58  ;;  %v18498_v9 = vld [vmem:[#allocation82_spill] sm:$0xff] }
 0xa61   :  { %4806 = vst.msk [vmem:[%s16921_s5 + $0x70] sm:$0xff] %vm85_vm0, %v9075_v23  ;;  %v4713_v3 = vpop.f32.mrb[217].mxu0  ;;  %v10429_v11 = vpop.eup %10428  ;;  %v18506_v8 = vld [vmem:[#allocation218_spill] sm:$0xff] }
 0xa62   :  { %4804 = vst.msk [vmem:[%s16921_s5 + $0x60] sm:$0xff] %vm85_vm0, %v4713_v3  ;;  %v15996_v15 = vpop.xlane.xlu1 %6581  ;;  %v5647_v33 = vpop.xlane.xlu0 %5646  ;;  %v5756_v35 = vmul.f32 %v10429_v11, %v15585_v43  ;;  %v5755_v23 = vmul.f32 %v10429_v11, %v18498_v9  ;;  %v6624_v3 = vsub.f32 %v18499_v4, %v15794_v6  ;;  %v18500_v43 = vld [vmem:[#allocation220_spill] sm:$0xff] }
 0xa63   :  { %v9076_v12 = vpop.f32.mrb[218].mxu0  ;;  %10434 = vrcp.f32 %v5647_v33  ;;  %v18501_v33 = vld [vmem:[#allocation208_spill] sm:$0xff] }
 0xa64   :  { %4807 = vst.msk [vmem:[%s16921_s5 + $0x78] sm:$0xff] %vm85_vm0, %v9076_v12  ;;  %v4716_v28 = vpop.f32.mrb[219].mxu0  ;;  %v5810_v12 = vpack.c.bf16 %v5756_v35, %v5754_v52  ;;  %v5809_v13 = vpack.c.bf16 %v5755_v23, %v5753_v36  ;;  %v6693_v9 = vmul.f32 1.442695, %v6624_v3  ;;  %v18503_v36 = vld [vmem:[#allocation110_spill] sm:$0xff]  ;;  %v18508_v23 = vld [vmem:[#allocation180_spill] sm:$0xff] }
 0xa65   :  { %4805 = vst.msk [vmem:[%s16921_s5 + $0x68] sm:$0xff] %vm85_vm0, %v4716_v28  ;;  %v10431_v58 = vpop.eup %10430  ;;  %v6625_v28 = vsub.f32 %v18501_v33, %v15808_v32  ;;  %v16050_v44 = vadd.f32 %v15692_v5, %v18508_v23  ;;  %v18512_v23 = vld [vmem:[#allocation202_spill] sm:$0xff] }
 0xa66   :  { %v5650_v27 = vpop.xlane.xlu1 %5649  ;;  %v16016_v57 = vpop.xlane.xlu0 %6584  ;;  %5897 = vmatprep.mubr.bf16.mxu0 %v5810_v12  ;;  %v18504_v12 = vld [vmem:[#allocation31_spill] sm:$0xff] }
 0xa67   :  { %10436 = vrcp.f32 %v5650_v27  ;;  %5898 = vmatmul.mubr.bf16.gmra.mrb[252].mxu0 %v5809_v13  ;;  %v18502_v27 = vld [vmem:[#allocation19_spill] sm:$0xff]  ;;  %v5757_v13 = vmul.f32 %v10431_v58, %v18504_v12 }
 0xa68   :  { %v9079_v11 = vpop.f32.mrb[220].mxu0  ;;  %10438 = vpow2.f32 %v6691_v26  ;;  %v6626_v35 = vsub.f32 %v18502_v27, %v15808_v32  ;;  %v5758_v26 = vmul.f32 %v10431_v58, %v18506_v8  ;;  %v6695_v32 = vmul.f32 1.442695, %v6625_v28 }
 0xa69   :  { %4810 = vst.msk [vmem:[%s16921_s5 + $0x90] sm:$0xff] %vm85_vm0, %v9079_v11  ;;  %v4729_v6 = vpop.f32.mrb[221].mxu0  ;;  %v10433_v52 = vpop.eup %10432  ;;  %v18505_v11 = vld [vmem:[#allocation106_spill] sm:$0xff]  ;;  %10440 = vpow2.f32 %v6693_v9  ;;  %v18509_v9 = vld [vmem:[#allocation176_spill] sm:$0xff] }
 0xa6a   :  { %4808 = vst.msk [vmem:[%s16921_s5 + $0x80] sm:$0xff] %vm85_vm0, %v4729_v6  ;;  %v16030_v29 = vpop.xlane.xlu1 %6587  ;;  %v5653_v4 = vpop.xlane.xlu0 %5652  ;;  %v5759_v33 = vmul.f32 %v10433_v52, %v18505_v11  ;;  %v5760_v50 = vmul.f32 %v10433_v52, %v18507_v40  ;;  %v16062_v28 = vadd.f32 %v15680_v24, %v18509_v9  ;;  %v18511_v52 = vld [vmem:[#allocation121_spill] sm:$0xff]  ;;  %v18514_v24 = vld [vmem:[#allocation107_spill] sm:$0xff] }
 0xa6b   :  { %v9080_v3 = vpop.f32.mrb[222].mxu0  ;;  %10442 = vrcp.f32 %v5653_v4 }
 0xa6c   :  { %4811 = vst.msk [vmem:[%s16921_s5 + $0x98] sm:$0xff] %vm85_vm0, %v9080_v3  ;;  %v4732_v6 = vpop.f32.mrb[223].mxu0  ;;  %v5811_v27 = vpack.c.bf16 %v5759_v33, %v5757_v13  ;;  %v5812_v11 = vpack.c.bf16 %v5760_v50, %v5758_v26  ;;  %v6697_v3 = vmul.f32 1.442695, %v6626_v35  ;;  %18510 = vst [vmem:[#allocation115_spill] sm:$0xff] %v16062_v28  ;;  %v6598_v35 = vmax.f32 %v16050_v44, %v18511_v52  ;;  %v18513_v33 = vld [vmem:[#allocation150_spill] sm:$0xff] }
 0xa6d   :  { %4809 = vst.msk [vmem:[%s16921_s5 + $0x88] sm:$0xff] %vm85_vm0, %v4732_v6  ;;  %v10435_v16 = vpop.eup %10434  ;;  %v18527_v52 = vld [vmem:[#allocation95_spill] sm:$0xff] }
 0xa6e   :  { %v5656_v12 = vpop.xlane.xlu1 %5655  ;;  %5905 = vmatprep.mubr.bf16.mxu0 %v5812_v11  ;;  %v5761_v4 = vmul.f32 %v10435_v16, %v18512_v23  ;;  %v5762_v26 = vmul.f32 %v10435_v16, %v18514_v24 }
 0xa6f   :  { %10444 = vrcp.f32 %v5656_v12  ;;  %5906 = vmatmul.mubr.bf16.gmra.mrb[0].mxu0 %v5811_v27 }
 0xa70   :  { %10446 = vpow2.f32 %v6695_v32  ;;  %v18515_v32 = vld [vmem:[#allocation148_spill] sm:$0xff] }
 0xa71   :  { %v9083_v8 = vpop.f32.mrb[224].mxu0  ;;  %v5659_v40 = vpop.xlane.xlu0 %5658  ;;  %10448 = vpow2.f32 %v6697_v3 }
 0xa72   :  { %4814 = vst.msk [vmem:[%s16921_s5 + $0xb0] sm:$0xff] %vm85_vm0, %v9083_v8  ;;  %v4745_v58 = vpop.f32.mrb[225].mxu0  ;;  %v10437_v50 = vpop.eup %10436  ;;  %10450 = vrcp.f32 %v5659_v40  ;;  %v18516_v40 = vld [vmem:[#allocation77_spill] sm:$0xff] }
 0xa73   :  { %4812 = vst.msk [vmem:[%s16921_s5 + $0xa0] sm:$0xff] %vm85_vm0, %v4745_v58  ;;  %v9084_v5 = vpop.f32.mrb[226].mxu0  ;;  %v5763_v6 = vmul.f32 %v10437_v50, %v18513_v33  ;;  %v5764_v27 = vmul.f32 %v10437_v50, %v18515_v32  ;;  %v16078_v12 = vpop.eup %10438  ;;  %v6595_v9 = vmax.f32 %v16062_v28, %v18516_v40  ;;  %v18518_v32 = vld [vmem:[#allocation205_spill] sm:$0xff] }
 0xa74   :  { %4815 = vst.msk [vmem:[%s16921_s5 + $0xb8] sm:$0xff] %vm85_vm0, %v9084_v5  ;;  %v4748_v13 = vpop.f32.mrb[227].mxu0  ;;  %v16080_v58 = vpop.eup %10440 }
 0xa75   :  { %4813 = vst.msk [vmem:[%s16921_s5 + $0xa8] sm:$0xff] %vm85_vm0, %v4748_v13  ;;  %v5662_v11 = vpop.xlane.xlu1 %5661  ;;  %v5813_v3 = vpack.c.bf16 %v5763_v6, %v5761_v4  ;;  %v5814_v8 = vpack.c.bf16 %v5764_v27, %v5762_v26  ;;  %v10443_v5 = vpop.eup %10442  ;;  %v18517_v13 = vld [vmem:[#allocation69_spill] sm:$0xff]  ;;  %v6817_v24 = vadd.f32 %v16080_v58, %v16078_v12 }
 0xa76   :  { %10452 = vrcp.f32 %v5662_v11  ;;  %6599 = vmax.xlane.f32.xlu0 %v6598_v35  ;;  %v5765_v33 = vmul.f32 %v10443_v5, %v18517_v13  ;;  %v18519_v11 = vld [vmem:[#allocation219_spill] sm:$0xff] }
 0xa77   :  { %5913 = vmatprep.mubr.bf16.mxu0 %v5814_v8  ;;  %v18520_v8 = vld [vmem:[#allocation100_spill] sm:$0xff] }
 0xa78   :  { %5914 = vmatmul.mubr.bf16.gmra.mrb[4].mxu0 %v5813_v3  ;;  %v5766_v3 = vmul.f32 %v10443_v5, %v18519_v11  ;;  %v18521_v5 = vld [vmem:[#allocation7_spill] sm:$0xff] }
 0xa79   :  { %v9087_v23 = vpop.f32.mrb[228].mxu0  ;;  %v5665_v16 = vpop.xlane.xlu0 %5664 }
 0xa7a   :  { %4818 = vst.msk [vmem:[%s16921_s5 + $0xd0] sm:$0xff] %vm85_vm0, %v9087_v23  ;;  %v4761_v50 = vpop.f32.mrb[229].mxu0  ;;  %6596 = vmax.xlane.f32.xlu1 %v6595_v9  ;;  %v10445_v4 = vpop.eup %10444  ;;  %10454 = vrcp.f32 %v5665_v16 }
 0xa7b   :  { %4816 = vst.msk [vmem:[%s16921_s5 + $0xc0] sm:$0xff] %vm85_vm0, %v4761_v50  ;;  %v9088_v35 = vpop.f32.mrb[230].mxu0  ;;  %v16099_v26 = vpop.eup %10446  ;;  %v5767_v27 = vmul.f32 %v10445_v4, %v18518_v32  ;;  %v5768_v9 = vmul.f32 %v10445_v4, %v18520_v8 }
 0xa7c   :  { %4819 = vst.msk [vmem:[%s16921_s5 + $0xd8] sm:$0xff] %vm85_vm0, %v9088_v35  ;;  %v4764_v6 = vpop.f32.mrb[231].mxu0  ;;  %v16108_v23 = vpop.eup %10448 }
 0xa7d   :  { %4817 = vst.msk [vmem:[%s16921_s5 + $0xc8] sm:$0xff] %vm85_vm0, %v4764_v6  ;;  %v5668_v50 = vpop.xlane.xlu1 %5667  ;;  %v10451_v35 = vpop.eup %10450  ;;  %v5815_v13 = vpack.c.bf16 %v5767_v27, %v5765_v33  ;;  %v5816_v40 = vpack.c.bf16 %v5768_v9, %v5766_v3  ;;  %v6820_v16 = vadd.f32 %v16108_v23, %v16099_v26  ;;  %v18522_v9 = vld [vmem:[#allocation73_spill] sm:$0xff] }
 0xa7e   :  { %10456 = vrcp.f32 %v5668_v50  ;;  %6818 = vadd.xlane.f32.xlu1 %v6817_v24  ;;  %v5770_v11 = vmul.f32 %v10451_v35, %v18521_v5  ;;  %v5769_v50 = vmul.f32 %v10451_v35, %v18522_v9  ;;  %v18525_v9 = vld [vmem:[#allocation90_spill] sm:$0xff] }
 0xa7f   :  { %5921 = vmatprep.mubr.bf16.mxu0 %v5816_v40 }
 0xa80   :  { %v10453_v28 = vpop.eup %10452  ;;  %5922 = vmatmul.mubr.bf16.gmra.mrb[8].mxu0 %v5815_v13 }
 0xa81   :  { %v9091_v32 = vpop.f32.mrb[232].mxu0  ;;  %v16112_v6 = vpop.xlane.xlu1 %6590  ;;  %v5772_v4 = vmul.f32 %v10453_v28, %v15700_v59  ;;  %v5771_v27 = vmul.f32 %v10453_v28, %v15696_v51 }
 0xa82   :  { %4822 = vst.msk [vmem:[%s16921_s5 + $0xf0] sm:$0xff] %vm85_vm0, %v9091_v32  ;;  %v5671_v40 = vpop.xlane.xlu0 %5670  ;;  %v4777_v24 = vpop.f32.mrb[233].mxu0  ;;  %6821 = vadd.xlane.f32.xlu1 %v6820_v16 }
 0xa83   :  { %4820 = vst.msk [vmem:[%s16921_s5 + $0xe0] sm:$0xff] %vm85_vm0, %v4777_v24  ;;  %v9092_v3 = vpop.f32.mrb[234].mxu0  ;;  %v5818_v59 = vpack.c.bf16 %v5772_v4, %v5770_v11  ;;  %v5817_v32 = vpack.c.bf16 %v5771_v27, %v5769_v50  ;;  %v18523_v4 = vld [vmem:[#allocation117_spill] sm:$0xff]  ;;  %v18524_v24 = vld [vmem:[#allocation50_spill] sm:$0xff]  ;;  %10458 = vrcp.f32 %v5671_v40 }
 0xa84   :  { %4823 = vst.msk [vmem:[%s16921_s5 + $0xf8] sm:$0xff] %vm85_vm0, %v9092_v3  ;;  %v4780_v8 = vpop.f32.mrb[235].mxu0  ;;  %v10455_v28 = vpop.eup %10454  ;;  %v18528_v50 = vld [vmem:[#allocation65_spill] sm:$0xff] }
 0xa85   :  { %4821 = vst.msk [vmem:[%s16921_s5 + $0xe8] sm:$0xff] %vm85_vm0, %v4780_v8  ;;  %v16136_v51 = vpop.xlane.xlu1 %6593  ;;  %5929 = vmatprep.mubr.bf16.mxu0 %v5818_v59  ;;  %v5774_v35 = vmul.f32 %v10455_v28, %v18523_v4  ;;  %v18526_v59 = vld [vmem:[#allocation60_spill] sm:$0xff]  ;;  %v5773_v13 = vmul.f32 %v10455_v28, %v18527_v52 }
 0xa86   :  { %v7068_v16 = vpop.permute.xlu0 %7067  ;;  %v18533_v28 = vld [vmem:[#allocation72_spill] sm:$0xff] }
 0xa87   :  { %8873 = vmatprep.subr.bf16.mxu0 %v7068_v16  ;;  %v18529_v16 = vld [vmem:[#allocation89_spill] sm:$0xff] }
 0xa88   :  { %v10457_v5 = vpop.eup %10456  ;;  %5930 = vmatmul.mubr.bf16.gmra.mrb[12].mxu0 %v5817_v32  ;;  %v18530_v32 = vld [vmem:[#allocation96_spill] sm:$0xff] }
 0xa89   :  { %v5674_v11 = vpop.xlane.xlu1 %5673  ;;  %v5776_v3 = vmul.f32 %v10457_v5, %v18524_v24  ;;  %v5775_v8 = vmul.f32 %v10457_v5, %v18525_v9  ;;  %v18535_v9 = vld [vmem:[#allocation45_spill] sm:$0xff] }
 0xa8a   :  { %10460 = vrcp.f32 %v5674_v11  ;;  %v18531_v11 = vld [vmem:[#allocation63_spill] sm:$0xff] }
 0xa8b   :  { %v5820_v33 = vpack.c.bf16 %v5776_v3, %v5774_v35  ;;  %v5819_v27 = vpack.c.bf16 %v5775_v8, %v5773_v13  ;;  %v18532_v35 = vld [vmem:[#allocation32_spill] sm:$0xff]  ;;  %v6627_v8 = vsub.f32 %v18535_v9, %v15810_v61 }
 0xa8c   :  { %7055 = vrot.lane.b32.xlu0 %v18526_v59, %s10675_s0  ;;  %v18536_v59 = vld [vmem:[#allocation207_spill] sm:$0xff] }
 0xa8d   :  { %v7052_v1 = vpop.permute.xlu1 %7051  ;;  %5937 = vmatprep.mubr.bf16.mxu0 %v5820_v33  ;;  %v10459_v40 = vpop.eup %10458 }
 0xa8e   :  { %8874 = vmatpush3.bf16.msra.mxu0 %v7052_v1  ;;  %v5777_v4 = vmul.f32 %v10459_v40, %v18531_v11  ;;  %v5778_v33 = vmul.f32 %v10459_v40, %v18533_v28  ;;  %v18534_v1 = vld [vmem:[#allocation49_spill] sm:$0xff] }
 0xa8f   :  { %v18540_v28 = vld [vmem:[#allocation125_spill] sm:$0xff] }
 0xa90   :  { %7057 = vrot.lane.b32.xlu0 %v18528_v50, %s10675_s0  ;;  %5938 = vmatmul.mubr.bf16.gmra.mrb[16].mxu0 %v5819_v27  ;;  %v6628_v27 = vsub.f32 %v18536_v59, %v15810_v61  ;;  %v6699_v50 = vmul.f32 1.442695, %v6627_v8  ;;  %v18542_v61 = vld [vmem:[#allocation36_spill] sm:$0xff] }
 0xa92   :  { %v6701_v11 = vmul.f32 1.442695, %v6628_v27  ;;  %10462 = vpow2.f32 %v6699_v50 }
 0xa93   :  { %7073 = vrot.lane.b32.xlu1 %v18529_v16, %s10675_s0  ;;  %v18537_v16 = vld [vmem:[#allocation103_spill] sm:$0xff] }
 0xa94   :  { %7075 = vrot.lane.b32.xlu0 %v18530_v32, %s10675_s0  ;;  %v10461_v5 = vpop.eup %10460  ;;  %v6629_v32 = vsub.f32 %v18537_v16, %v15824_v20  ;;  %10464 = vpow2.f32 %v6701_v11 }
 0xa95   :  { %v5779_v52 = vmul.f32 %v10461_v5, %v18532_v35  ;;  %v5780_v13 = vmul.f32 %v10461_v5, %v18534_v1  ;;  %v18538_v35 = vld [vmem:[#allocation132_spill] sm:$0xff]  ;;  %v18541_v1 = vld [vmem:[#allocation185_spill] sm:$0xff] }
 0xa96   :  { %v6630_v40 = vsub.f32 %v18538_v35, %v15824_v20  ;;  %v6703_v5 = vmul.f32 1.442695, %v6629_v32  ;;  %v18545_v20 = vld [vmem:[#allocation113_spill] sm:$0xff] }
 0xa97   :  { %v5821_v24 = vpack.c.bf16 %v5779_v52, %v5777_v4  ;;  %v5822_v3 = vpack.c.bf16 %v5780_v13, %v5778_v33  ;;  %v18539_v52 = vld [vmem:[#allocation189_spill] sm:$0xff]  ;;  %v16170_v13 = vadd.f32 %v18542_v61, %v18541_v1 }
 0xa98   :  { %v6705_v4 = vmul.f32 1.442695, %v6630_v40  ;;  %v16166_v33 = vadd.f32 %v18540_v28, %v18539_v52  ;;  %10466 = vpow2.f32 %v6703_v5 }
 0xa99   :  { %5945 = vmatprep.mubr.bf16.mxu0 %v5822_v3  ;;  %v6601_v8 = vmax.f32 %v16170_v13, %v18545_v20 }
 0xa9a   :  { %5946 = vmatmul.mubr.bf16.gmra.mrb[20].mxu0 %v5821_v24  ;;  %10468 = vpow2.f32 %v6705_v4  ;;  %v18543_v24 = vld [vmem:[#allocation51_spill] sm:$0xff] }
 0xa9b   :  { %v6604_v3 = vmax.f32 %v16166_v33, %v18543_v24 }
 0xa9c   :  { %v16174_v9 = vpop.eup %10462 }
 0xa9d   :  { %18544 = vst [vmem:[#allocation14_spill] sm:$0xff] %v16174_v9 }
 0xa9e   :  { %v16178_v59 = vpop.eup %10464 }
 0xa9f   :  { %18546 = vst [vmem:[#allocation37_spill] sm:$0xff] %v16178_v59  ;;  %v6823_v16 = vadd.f32 %v16178_v59, %v16174_v9 }
 0xaa2   :  { %v16180_v50 = vpop.eup %10466 }
 0xaa3   :  { %18547 = vst [vmem:[#allocation39_spill] sm:$0xff] %v16180_v50 }
 0xaa4   :  { %v16184_v32 = vpop.eup %10468 }
 0xaa5   :  { %18548 = vst [vmem:[#allocation13_spill] sm:$0xff] %v16184_v32  ;;  %v6826_v35 = vadd.f32 %v16184_v32, %v16180_v50 }
 0xab3   :  { %6605 = vmax.xlane.f32.xlu0 %v6604_v3 }
 0xab6   :  { %v5677_v27 = vpop.xlane.xlu0 %5676 }
 0xab7   :  { %6602 = vmax.xlane.f32.xlu1 %v6601_v8  ;;  %10470 = vrcp.f32 %v5677_v27  ;;  %v18549_v8 = vld [vmem:[#allocation70_spill] sm:$0xff] }
 0xaba   :  { %v5683_v11 = vpop.xlane.xlu0 %5682 }
 0xabb   :  { %6824 = vadd.xlane.f32.xlu1 %v6823_v16 }
 0xabe   :  { %v5680_v40 = vpop.xlane.xlu1 %5679  ;;  %v5689_v5 = vpop.xlane.xlu0 %5688 }
 0xabf   :  { %10472 = vrcp.f32 %v5680_v40  ;;  %6827 = vadd.xlane.f32.xlu1 %v6826_v35 }
 0xac0   :  { %10474 = vrcp.f32 %v5683_v11 }
 0xac1   :  { %v10471_v61 = vpop.eup %10470 }
 0xac2   :  { %v5686_v4 = vpop.xlane.xlu1 %5685  ;;  %v5695_v52 = vpop.xlane.xlu0 %5694  ;;  %v5781_v27 = vmul.f32 %v10471_v61, %v15786_v10  ;;  %v5782_v11 = vmul.f32 %v10471_v61, %v15789_v38 }
 0xac3   :  { %10476 = vrcp.f32 %v5686_v4 }
 0xac4   :  { %10478 = vrcp.f32 %v5689_v5 }
 0xac6   :  { %v5692_v28 = vpop.xlane.xlu1 %5691  ;;  %v5701_v1 = vpop.xlane.xlu0 %5700 }
 0xac7   :  { %10480 = vrcp.f32 %v5692_v28  ;;  %v18550_v28 = vld [vmem:[#allocation74_spill] sm:$0xff] }
 0xac9   :  { %v10473_v3 = vpop.eup %10472  ;;  %7059 = vrot.lane.b32.xlu0 %v18549_v8, %s10675_s0 }
 0xaca   :  { %v5783_v16 = vmul.f32 %v10473_v3, %v15802_v39  ;;  %v5698_v9 = vpop.xlane.xlu1 %5697  ;;  %v6813_v40 = vpop.xlane.xlu0 %6812  ;;  %v5784_v35 = vmul.f32 %v10473_v3, %v15805_v7  ;;  %v18551_v7 = vld [vmem:[#allocation101_spill] sm:$0xff] }
 0xacb   :  { %v10475_v4 = vpop.eup %10474  ;;  %10482 = vrcp.f32 %v5698_v9 }
 0xacc   :  { %v5823_v5 = vpack.c.bf16 %v5783_v16, %v5781_v27  ;;  %v5824_v50 = vpack.c.bf16 %v5784_v35, %v5782_v11  ;;  %v5786_v10 = vmul.f32 %v10475_v4, %v15800_v56  ;;  %10484 = vrcp.f32 %v5695_v52  ;;  %v18552_v27 = vld [vmem:[#allocation114_spill] sm:$0xff]  ;;  %v18553_v52 = vld [vmem:[#allocation99_spill] sm:$0xff] }
 0xacd   :  { %v10477_v59 = vpop.eup %10476  ;;  %7061 = vrot.lane.b32.xlu0 %v18550_v28, %s10675_s0  ;;  %10486 = vrcp.f32 %v6813_v40  ;;  %v18554_v40 = vld [vmem:[#allocation116_spill] sm:$0xff] }
 0xace   :  { %v5704_v32 = vpop.xlane.xlu1 %5703  ;;  %5953 = vmatprep.mubr.bf16.mxu0 %v5824_v50  ;;  %v7070_v8 = vpop.permute.xlu0 %7069  ;;  %v5788_v39 = vmul.f32 %v10477_v59, %v15821_v63  ;;  %v5787_v9 = vmul.f32 %v10477_v59, %v15819_v41  ;;  %v5785_v63 = vmul.f32 %v10475_v4, %v15796_v31  ;;  %v18556_v4 = vld [vmem:[#allocation57_spill] sm:$0xff] }
 0xacf   :  { %5954 = vmatmul.mubr.bf16.gmra.mrb[24].mxu0 %v5823_v5  ;;  %8875 = vmatprep.subr.bf16.mxu0 %v7070_v8  ;;  %v10479_v38 = vpop.eup %10478 }
 0xad0   :  { %7077 = vrot.lane.b32.xlu1 %v18551_v7, %s10675_s0  ;;  %v5826_v61 = vpack.c.bf16 %v5788_v39, %v5786_v10  ;;  %v5790_v16 = vmul.f32 %v10479_v38, %v18553_v52  ;;  %v5825_v11 = vpack.c.bf16 %v5787_v9, %v5785_v63  ;;  %v5789_v39 = vmul.f32 %v10479_v38, %v18556_v4  ;;  %v18557_v7 = vld [vmem:[#allocation67_spill] sm:$0xff]  ;;  %v18561_v52 = vld [vmem:[#allocation138_spill] sm:$0xff] }
 0xad1   :  { %v10481_v3 = vpop.eup %10480  ;;  %7079 = vrot.lane.b32.xlu0 %v18552_v27, %s10675_s0  ;;  %v18558_v27 = vld [vmem:[#allocation85_spill] sm:$0xff]  ;;  %v18565_v4 = vld [vmem:[#allocation71_spill] sm:$0xff] }
 0xad2   :  { %v6816_v50 = vpop.xlane.xlu1 %6815  ;;  %5961 = vmatprep.mubr.bf16.mxu0 %v5826_v61  ;;  %v5792_v56 = vmul.f32 %v10481_v3, %v15838_v55  ;;  %v7072_v41 = vpop.permute.xlu0 %7071  ;;  %v5791_v8 = vmul.f32 %v10481_v3, %v18554_v40  ;;  %v18555_v55 = vld [vmem:[#allocation29_spill] sm:$0xff]  ;;  %v18560_v3 = vld [vmem:[#allocation62_spill] sm:$0xff] }
 0xad3   :  { %10488 = vrcp.f32 %v6816_v50 }
 0xad4   :  { %10490 = vrcp.f32 %v5704_v32  ;;  %v5828_v5 = vpack.c.bf16 %v5792_v56, %v5790_v16  ;;  %v5827_v9 = vpack.c.bf16 %v5791_v8, %v5789_v39  ;;  %v6631_v16 = vsub.f32 %v18561_v52, %v18560_v3  ;;  %v18566_v39 = vld [vmem:[#allocation179_spill] sm:$0xff]  ;;  %v18568_v52 = vld [vmem:[#allocation84_spill] sm:$0xff] }
 0xad5   :  { %v10483_v28 = vpop.eup %10482  ;;  %10492 = vrcp.f32 %v5701_v1 }
 0xad6   :  { %v7054_v35 = vpop.permute.xlu1 %7053  ;;  %v10485_v59 = vpop.eup %10484  ;;  %v5796_v10 = vmul.f32 %v10483_v28, %v18555_v55 }
 0xad7   :  { %5962 = vmatmul.mubr.bf16.gmra.mrb[28].mxu0 %v5825_v11  ;;  %v10487_v31 = vpop.eup %10486  ;;  %v5794_v61 = vmul.f32 %v10485_v59, %v18557_v7  ;;  %v6633_v7 = vsub.f32 %v18566_v39, %v18565_v4 }
 0xad8   :  { %8876 = vmatpush3.bf16.msra.mxu0 %v7054_v35  ;;  %5969 = vmatprep.mubr.bf16.mxu0 %v5828_v5  ;;  %v16211_v50 = vmul.f32 %v10487_v31, %v18558_v27  ;;  %v18562_v35 = vld [vmem:[#allocation38_spill] sm:$0xff] }
 0xad9   :  { %8877 = vmatprep.subr.bf16.mxu0 %v7072_v41  ;;  %v5830_v56 = vpack.c.bf16 %v5796_v10, %v5794_v61  ;;  %v6632_v5 = vsub.f32 %v18562_v35, %v18560_v3  ;;  %v18563_v41 = vld [vmem:[#allocation20_spill] sm:$0xff]  ;;  %v6707_v10 = vmul.f32 1.442695, %v6631_v16  ;;  %v18567_v61 = vld [vmem:[#allocation43_spill] sm:$0xff]  ;;  %v6711_v3 = vmul.f32 1.442695, %v6633_v7 }
 0xada   :  { %18559 = vst [vmem:[#allocation26_spill] sm:$0xff] %v16211_v50  ;;  %v5795_v40 = vmul.f32 %v10483_v28, %v18563_v41  ;;  %v18570_v16 = vld [vmem:[#allocation34_spill] sm:$0xff] }
 0xadb   :  { %v6709_v27 = vmul.f32 1.442695, %v6632_v5  ;;  %10494 = vpow2.f32 %v6707_v10  ;;  %v18571_v5 = vld [vmem:[#allocation75_spill] sm:$0xff]  ;;  %v18575_v10 = vld [vmem:[#allocation22_spill] sm:$0xff] }
 0xadd   :  { %v10489_v32 = vpop.eup %10488  ;;  %10496 = vpow2.f32 %v6709_v27 }
 0xade   :  { %v16214_v1 = vmul.f32 %v10489_v32, %v15874_v62  ;;  %v10491_v63 = vpop.eup %10490  ;;  %v18564_v62 = vld [vmem:[#allocation112_spill] sm:$0xff]  ;;  %v6942_v41 = vmul.f32 %v10489_v32, %v15882_v19  ;;  %10498 = vpow2.f32 %v6711_v3 }
 0xadf   :  { %5970 = vmatmul.mubr.bf16.gmra.mrb[32].mxu0 %v5827_v9  ;;  %v10493_v38 = vpop.eup %10492  ;;  %v5800_v8 = vmul.f32 %v10491_v63, %v15872_v14  ;;  %v5793_v55 = vmul.f32 %v10485_v59, %v18564_v62  ;;  %v5799_v28 = vmul.f32 %v10491_v63, %v15866_v30  ;;  %v18569_v59 = vld [vmem:[#allocation200_spill] sm:$0xff] }
 0xae0   :  { %5977 = vmatprep.mubr.bf16.mxu0 %v5830_v56  ;;  %v5798_v9 = vmul.f32 %v10493_v38, %v18567_v61  ;;  %v6634_v56 = vsub.f32 %v18568_v52, %v18565_v4  ;;  %v16233_v35 = vadd.f32 %v18570_v16, %v18569_v59  ;;  %v5797_v62 = vmul.f32 %v10493_v38, %v18571_v5  ;;  %v18572_v4 = vld [vmem:[#allocation92_spill] sm:$0xff]  ;;  %v18578_v52 = vld [vmem:[#allocation78_spill] sm:$0xff] }
 0xae1   :  { %v5829_v11 = vpack.c.bf16 %v5795_v40, %v5793_v55  ;;  %v6940_v40 = vmul.f32 %v10487_v31, %v18572_v4  ;;  %v18574_v55 = vld [vmem:[#allocation58_spill] sm:$0xff]  ;;  %v18577_v19 = vld [vmem:[#allocation68_spill] sm:$0xff]  ;;  %v18582_v4 = vld [vmem:[#allocation59_spill] sm:$0xff] }
 0xae2   :  { %v5832_v50 = vpack.c.bf16 %v5800_v8, %v5798_v9  ;;  %v6713_v14 = vmul.f32 1.442695, %v6634_v56  ;;  %v18573_v8 = vld [vmem:[#allocation192_spill] sm:$0xff]  ;;  %v6610_v30 = vmax.f32 %v16233_v35, %v18575_v10  ;;  %v18580_v59 = vld [vmem:[#allocation118_spill] sm:$0xff] }
 0xae3   :  { %v7004_v63 = vpack.c.bf16 %v6942_v41, %v6940_v40 }
 0xae4   :  { %10500 = vpow2.f32 %v6713_v14  ;;  %v18579_v14 = vld [vmem:[#allocation12_spill] sm:$0xff] }
 0xae5   :  { %v16244_v39 = vpop.eup %10494 }
 0xae6   :  { %18576 = vst [vmem:[#allocation33_spill] sm:$0xff] %v16244_v39 }
 0xae7   :  { %5978 = vmatmul.mubr.bf16.gmra.mrb[36].mxu0 %v5829_v11  ;;  %v5831_v11 = vpack.c.bf16 %v5799_v28, %v5797_v62  ;;  %v16248_v38 = vpop.eup %10496  ;;  %v18581_v62 = vld [vmem:[#allocation46_spill] sm:$0xff] }
 0xae8   :  { %5985 = vmatprep.mubr.bf16.mxu0 %v5832_v50  ;;  %v16240_v50 = vadd.f32 %v18574_v55, %v18573_v8  ;;  %v16250_v31 = vpop.eup %10498  ;;  %v6829_v7 = vadd.f32 %v16248_v38, %v16244_v39  ;;  %v6635_v40 = vsub.f32 %v18582_v4, %v18581_v62  ;;  %v18583_v8 = vld [vmem:[#allocation195_spill] sm:$0xff] }
 0xae9   :  { %v6636_v55 = vsub.f32 %v18583_v8, %v18581_v62 }
 0xaea   :  { %v6607_v32 = vmax.f32 %v16240_v50, %v18577_v19 }
 0xaee   :  { %v16254_v61 = vpop.eup %10500 }
 0xaef   :  { %5986 = vmatmul.mubr.bf16.gmra.mrb[40].mxu0 %v5831_v11  ;;  %v6832_v9 = vadd.f32 %v16254_v61, %v16250_v31 }
 0xaf0   :  { %6611 = vmax.xlane.f32.xlu0 %v6610_v30  ;;  %7131 = vmatprep.mubr.bf16.mxu0 %v7004_v63  ;;  %v6715_v63 = vmul.f32 1.442695, %v6635_v40  ;;  %v18587_v40 = vld [vmem:[#allocation111_spill] sm:$0xff] }
 0xaf4   :  { %6608 = vmax.xlane.f32.xlu1 %v6607_v32  ;;  %v18584_v32 = vld [vmem:[#allocation98_spill] sm:$0xff] }
 0xaf8   :  { %6830 = vadd.xlane.f32.xlu1 %v6829_v7  ;;  %v18585_v7 = vld [vmem:[#allocation216_spill] sm:$0xff] }
 0xafc   :  { %6833 = vadd.xlane.f32.xlu1 %v6832_v9  ;;  %v6637_v9 = vsub.f32 %v18585_v7, %v18584_v32 }
 0xafe   :  { %v6719_v7 = vmul.f32 1.442695, %v6637_v9  ;;  %v18594_v9 = vld [vmem:[#allocation198_spill] sm:$0xff] }
 0xaff   :  { %v6644_v39 = vsub.f32 %v18594_v9, %v15894_v0  ;;  %v18600_v9 = vld [vmem:[#allocation3_spill] sm:$0xff] }
 0xb03   :  { %v16258_v27 = vpop.xlane.xlu0 %6599 }
 0xb06   :  { %7063 = vrot.lane.b32.xlu0 %v18578_v52, %s10675_s0 }
 0xb07   :  { %v16262_v56 = vpop.xlane.xlu1 %6596  ;;  %v7056_v3 = vpop.permute.xlu0 %7055 }
 0xb08   :  { %8878 = vmatpush3.bf16.msra.mxu0 %v7056_v3  ;;  %v6717_v3 = vmul.f32 1.442695, %v6636_v55 }
 0xb0a   :  { %7065 = vrot.lane.b32.xlu0 %v18579_v14, %s10675_s0  ;;  %v18586_v14 = vld [vmem:[#allocation197_spill] sm:$0xff] }
 0xb0b   :  { %v6819_v28 = vpop.xlane.xlu1 %6818  ;;  %v7058_v16 = vpop.permute.xlu0 %7057 }
 0xb0c   :  { %10502 = vrcp.f32 %v6819_v28  ;;  %v6638_v28 = vsub.f32 %v18586_v14, %v18584_v32  ;;  %v18597_v14 = vld [vmem:[#allocation194_spill] sm:$0xff] }
 0xb0d   :  { %7081 = vrot.lane.b32.xlu1 %v18580_v59, %s10675_s0 }
 0xb0f   :  { %v6822_v41 = vpop.xlane.xlu1 %6821  ;;  %v7076_v11 = vpop.permute.xlu0 %7075 }
 0xb10   :  { %10504 = vrcp.f32 %v6822_v41 }
 0xb11   :  { %10506 = vpow2.f32 %v6715_v63 }
 0xb12   :  { %10508 = vpow2.f32 %v6717_v3  ;;  %v18595_v3 = vsub.f32 %v15480_v60, %v15886_v17  ;;  %v6648_v60 = vsub.f32 %v18600_v9, %v15922_v25 }
 0xb13   :  { %v7074_v5 = vpop.permute.xlu1 %7073  ;;  %10510 = vpow2.f32 %v6719_v7  ;;  %v6733_v7 = vmul.f32 1.442695, %v6644_v39  ;;  %v18604_v39 = vld [vmem:[#allocation87_spill] sm:$0xff] }
 0xb14   :  { %8879 = vmatprep.subr.bf16.mxu0 %v7074_v5  ;;  %v6741_v9 = vmul.f32 1.442695, %v6648_v60 }
 0xb15   :  { %8880 = vmatpush3.bf16.msra.mxu0 %v7058_v16 }
 0xb16   :  { %8881 = vmatprep.subr.bf16.mxu0 %v7076_v11  ;;  %v10503_v30 = vpop.eup %10502  ;;  %v18588_v11 = vld [vmem:[#allocation105_spill] sm:$0xff] }
 0xb17   :  { %v16277_v41 = vmul.f32 %v10503_v30, %v16078_v12  ;;  %v16283_v62 = vmul.f32 %v10503_v30, %v16080_v58  ;;  %v6640_v8 = vsub.f32 %v18588_v11, %v18587_v40  ;;  %v6721_v58 = vmul.f32 1.442695, %v6638_v28  ;;  %v18592_v11 = vld [vmem:[#allocation196_spill] sm:$0xff] }
 0xb18   :  { %v6727_v28 = vmul.f32 1.442695, %v18595_v3 }
 0xb19   :  { %v6725_v63 = vmul.f32 1.442695, %v6640_v8  ;;  %10512 = vpow2.f32 %v6721_v58  ;;  %v18599_v8 = vsub.f32 %v15499_v42, %v15894_v0  ;;  %v18601_v58 = vsub.f32 %v15514_v22, %v15906_v21 }
 0xb1a   :  { %v10505_v52 = vpop.eup %10504  ;;  %v8681_v59 = vpop.f32.mrb[236].mxu0 }
 0xb1b   :  { %v16280_v16 = vmul.f32 %v10505_v52, %v16099_v26  ;;  %v8682_v5 = vpop.f32.mrb[237].mxu0  ;;  %v16286_v4 = vmul.f32 %v10505_v52, %v16108_v23  ;;  %v18590_v23 = vld [vmem:[#allocation217_spill] sm:$0xff]  ;;  %v16328_v0 = vpop.eup %10506 }
 0xb1c   :  { %v16290_v55 = vadd.f32 %v8682_v5, %v8681_v59  ;;  %v8684_v32 = vpop.f32.mrb[238].mxu0  ;;  %v6642_v30 = vsub.f32 %v18590_v23, %v15886_v17  ;;  %v18593_v59 = vsub.f32 %v18592_v11, %v18587_v40  ;;  %v18598_v40 = vld [vmem:[#allocation80_spill] sm:$0xff] }
 0xb1d   :  { %v8685_v26 = vpop.f32.mrb[239].mxu0  ;;  %v16314_v11 = vadd.f32 %v18598_v40, %v18597_v14 }
 0xb1e   :  { %18589 = vst [vmem:[#allocation131_spill] sm:$0xff] %v16290_v55  ;;  %v16298_v52 = vadd.f32 %v8685_v26, %v8684_v32  ;;  %v6723_v5 = vmul.f32 1.442695, %v18593_v59  ;;  %v6729_v23 = vmul.f32 1.442695, %v6642_v30  ;;  %v18596_v32 = vld [vmem:[#allocation199_spill] sm:$0xff] }
 0xb1f   :  { %v6646_v26 = vsub.f32 %v18596_v32, %v15906_v21  ;;  %v6731_v59 = vmul.f32 1.442695, %v18599_v8  ;;  %v6735_v30 = vmul.f32 1.442695, %v18601_v58  ;;  %v18606_v21 = vld [vmem:[#allocation108_spill] sm:$0xff]  ;;  %v16337_v8 = vpop.eup %10508  ;;  %v18608_v58 = vsub.f32 %v15544_v46, %v15934_v34  ;;  %v18612_v46 = vld [vmem:[#allocation201_spill] sm:$0xff] }
 0xb20   :  { %18591 = vst [vmem:[#allocation134_spill] sm:$0xff] %v16298_v52  ;;  %10514 = vpow2.f32 %v6723_v5  ;;  %v18602_v5 = vld [vmem:[#allocation10_spill] sm:$0xff]  ;;  %v16352_v60 = vpop.eup %10510 }
 0xb21   :  { %10516 = vpow2.f32 %v6725_v63  ;;  %v6737_v14 = vmul.f32 1.442695, %v6646_v26  ;;  %v6650_v32 = vsub.f32 %v18602_v5, %v15934_v34  ;;  %v6613_v63 = vmax.f32 %v16314_v11, %v18604_v39 }
 0xb22   :  { %v8687_v17 = vpop.f32.mrb[240].mxu0  ;;  %10518 = vpow2.f32 %v6727_v28  ;;  %v18605_v28 = vsub.f32 %v15529_v2, %v15922_v25  ;;  %v18610_v2 = vld [vmem:[#allocation203_spill] sm:$0xff]  ;;  %v18611_v25 = vld [vmem:[#allocation53_spill] sm:$0xff]  ;;  %v6655_v34 = vsub.f32 %v18612_v46, %v15984_v18  ;;  %v18615_v46 = vld [vmem:[#allocation94_spill] sm:$0xff] }
 0xb23   :  { %v8688_v3 = vpop.f32.mrb[241].mxu0  ;;  %10520 = vpow2.f32 %v6729_v23  ;;  %v6651_v23 = vsub.f32 %v18606_v21, %v15954_v47  ;;  %v6745_v21 = vmul.f32 1.442695, %v6650_v32 }
 0xb24   :  { %v16326_v40 = vadd.f32 %v8688_v3, %v8687_v17  ;;  %v8690_v42 = vpop.f32.mrb[242].mxu0  ;;  %10522 = vpow2.f32 %v6731_v59  ;;  %v6739_v22 = vmul.f32 1.442695, %v18605_v28  ;;  %v6743_v3 = vmul.f32 1.442695, %v18608_v58  ;;  %v18609_v59 = vld [vmem:[#allocation64_spill] sm:$0xff] }
 0xb25   :  { %v8691_v26 = vpop.f32.mrb[243].mxu0  ;;  %10524 = vpow2.f32 %v6733_v7  ;;  %v6653_v5 = vsub.f32 %v18609_v59, %v15968_v54  ;;  %v16348_v28 = vadd.f32 %v18611_v25, %v18610_v2 }
 0xb26   :  { %18603 = vst [vmem:[#allocation137_spill] sm:$0xff] %v16326_v40  ;;  %v16339_v17 = vadd.f32 %v8691_v26, %v8690_v42  ;;  %10526 = vpow2.f32 %v6735_v30  ;;  %v6747_v30 = vmul.f32 1.442695, %v6651_v23  ;;  %v6835_v42 = vadd.f32 %v16337_v8, %v16328_v0 }
 0xb27   :  { %10528 = vpow2.f32 %v6737_v14  ;;  %v18613_v14 = vsub.f32 %v15564_v45, %v15954_v47  ;;  %v6751_v59 = vmul.f32 1.442695, %v6653_v5  ;;  %v6616_v7 = vmax.f32 %v16348_v28, %v18615_v46 }
 0xb28   :  { %18607 = vst [vmem:[#allocation139_spill] sm:$0xff] %v16339_v17  ;;  %10530 = vpow2.f32 %v6739_v22  ;;  %v18614_v22 = vld [vmem:[#allocation9_spill] sm:$0xff]  ;;  %v18616_v45 = vsub.f32 %v15581_v53, %v15968_v54  ;;  %v6755_v5 = vmul.f32 1.442695, %v6655_v34  ;;  %v18619_v53 = vsub.f32 %v15596_v37, %v15984_v18  ;;  %v18621_v34 = vld [vmem:[#allocation88_spill] sm:$0xff] }
 0xb29   :  { %6614 = vmax.xlane.f32.xlu0 %v6613_v63  ;;  %v16358_v63 = vpop.eup %10512  ;;  %10532 = vpow2.f32 %v6741_v9  ;;  %v6749_v32 = vmul.f32 1.442695, %v18613_v14  ;;  %v6657_v23 = vsub.f32 %v18614_v22, %v15996_v15  ;;  %v18618_v22 = vld [vmem:[#allocation79_spill] sm:$0xff] }
 0xb2a   :  { %v8693_v26 = vpop.f32.mrb[244].mxu0  ;;  %v16363_v58 = vpop.eup %10514  ;;  %10534 = vpow2.f32 %v6743_v3  ;;  %v6753_v47 = vmul.f32 1.442695, %v18616_v45  ;;  %v6838_v40 = vadd.f32 %v16358_v63, %v16352_v60  ;;  %v6757_v54 = vmul.f32 1.442695, %v18619_v53 }
 0xb2b   :  { %v8694_v2 = vpop.f32.mrb[245].mxu0  ;;  %v16367_v25 = vpop.eup %10516  ;;  %10536 = vpow2.f32 %v6745_v21 }
 0xb2c   :  { %v16374_v9 = vadd.f32 %v8694_v2, %v8693_v26  ;;  %v8696_v14 = vpop.f32.mrb[246].mxu0  ;;  %v16376_v3 = vpop.eup %10518  ;;  %10538 = vpow2.f32 %v6747_v30  ;;  %v6759_v30 = vmul.f32 1.442695, %v6657_v23  ;;  %v6661_v2 = vsub.f32 %v18621_v34, %v16030_v29 }
 0xb2d   :  { %6836 = vadd.xlane.f32.xlu0 %v6835_v42  ;;  %v6659_v42 = vsub.f32 %v18618_v22, %v16016_v57  ;;  %v8697_v12 = vpop.f32.mrb[247].mxu0  ;;  %v16382_v17 = vpop.eup %10520  ;;  %10540 = vpow2.f32 %v6749_v32  ;;  %v18622_v32 = vsub.f32 %v15611_v49, %v15996_v15  ;;  %v6841_v18 = vadd.f32 %v16367_v25, %v16363_v58 }
 0xb2e   :  { %18617 = vst [vmem:[#allocation141_spill] sm:$0xff] %v16374_v9  ;;  %v16387_v21 = vadd.f32 %v8697_v12, %v8696_v14  ;;  %v16389_v26 = vpop.eup %10522  ;;  %10542 = vpow2.f32 %v6751_v59  ;;  %v6844_v23 = vadd.f32 %v16382_v17, %v16376_v3  ;;  %v18624_v49 = vsub.f32 %v18500_v43, %v16016_v57 }
 0xb2f   :  { %v16393_v45 = vpop.eup %10524  ;;  %10544 = vpow2.f32 %v6753_v47  ;;  %v6761_v22 = vmul.f32 1.442695, %v18622_v32  ;;  %v6763_v59 = vmul.f32 1.442695, %v6659_v42  ;;  %v6767_v34 = vmul.f32 1.442695, %v6661_v2 }
 0xb30   :  { %18620 = vst [vmem:[#allocation144_spill] sm:$0xff] %v16387_v21  ;;  %v16402_v12 = vpop.eup %10526  ;;  %10546 = vpow2.f32 %v6755_v5  ;;  %v6765_v15 = vmul.f32 1.442695, %v18624_v49  ;;  %v18625_v5 = vld [vmem:[#allocation76_spill] sm:$0xff] }
 0xb31   :  { %6617 = vmax.xlane.f32.xlu1 %v6616_v7  ;;  %6839 = vadd.xlane.f32.xlu0 %v6838_v40  ;;  %v18623_v7 = vld [vmem:[#allocation54_spill] sm:$0xff]  ;;  %v16408_v47 = vpop.eup %10528  ;;  %10548 = vpow2.f32 %v6757_v54  ;;  %v6665_v42 = vsub.f32 %v18625_v5, %v16136_v51  ;;  %v18626_v54 = vsub.f32 %v18503_v36, %v16030_v29  ;;  %v18628_v29 = vsub.f32 %v15658_v48, %v16112_v6 }
 0xb32   :  { %v6663_v40 = vsub.f32 %v18623_v7, %v16112_v6  ;;  %v8699_v14 = vpop.f32.mrb[248].mxu0  ;;  %v16413_v53 = vpop.eup %10530  ;;  %10550 = vpow2.f32 %v6759_v30  ;;  %v6847_v30 = vadd.f32 %v16393_v45, %v16389_v26 }
 0xb33   :  { %v8700_v32 = vpop.f32.mrb[249].mxu0  ;;  %v16417_v7 = vpop.eup %10532  ;;  %10552 = vpow2.f32 %v6761_v22  ;;  %v6769_v37 = vmul.f32 1.442695, %v18626_v54  ;;  %v6850_v22 = vadd.f32 %v16408_v47, %v16402_v12  ;;  %v6773_v36 = vmul.f32 1.442695, %v18628_v29 }
 0xb34   :  { %v16422_v57 = vadd.f32 %v8700_v32, %v8699_v14  ;;  %v8702_v43 = vpop.f32.mrb[250].mxu0  ;;  %v16426_v2 = vpop.eup %10534  ;;  %10554 = vpow2.f32 %v6763_v59  ;;  %v6771_v49 = vmul.f32 1.442695, %v6663_v40  ;;  %v18629_v14 = vld [vmem:[#allocation121_spill] sm:$0xff]  ;;  %v18631_v40 = vld [vmem:[#allocation115_spill] sm:$0xff] }
 0xb35   :  { %6845 = vadd.xlane.f32.xlu1 %v6844_v23  ;;  %6842 = vadd.xlane.f32.xlu0 %v6841_v18  ;;  %v6669_v18 = vsub.f32 %v16050_v44, %v16258_v27  ;;  %v8703_v23 = vpop.f32.mrb[251].mxu0  ;;  %v16432_v5 = vpop.eup %10536  ;;  %10556 = vpow2.f32 %v6765_v15  ;;  %v6670_v32 = vsub.f32 %v18629_v14, %v16258_v27  ;;  %v6775_v44 = vmul.f32 1.442695, %v6665_v42  ;;  %v18632_v15 = vld [vmem:[#allocation204_spill] sm:$0xff]  ;;  %v18634_v27 = vld [vmem:[#allocation77_spill] sm:$0xff] }
 0xb36   :  { %18627 = vst [vmem:[#allocation146_spill] sm:$0xff] %v16422_v57  ;;  %v16439_v54 = vadd.f32 %v8703_v23, %v8702_v43  ;;  %v16441_v59 = vpop.eup %10538  ;;  %10558 = vpow2.f32 %v6767_v34  ;;  %v6667_v9 = vsub.f32 %v18631_v40, %v16262_v56  ;;  %v18633_v48 = vsub.f32 %v18632_v15, %v16136_v51 }
 0xb37   :  { %v16445_v21 = vpop.eup %10540  ;;  %10560 = vpow2.f32 %v6769_v37  ;;  %v6668_v43 = vsub.f32 %v18634_v27, %v16262_v56  ;;  %v6783_v42 = vmul.f32 1.442695, %v6669_v18  ;;  %v6853_v37 = vadd.f32 %v16417_v7, %v16413_v53 }
 0xb38   :  { %18630 = vst [vmem:[#allocation149_spill] sm:$0xff] %v16439_v54  ;;  %v6777_v6 = vmul.f32 1.442695, %v18633_v48  ;;  %v16454_v34 = vpop.eup %10542  ;;  %10562 = vpow2.f32 %v6771_v49  ;;  %v6785_v51 = vmul.f32 1.442695, %v6670_v32 }
 0xb39   :  { %6851 = vadd.xlane.f32.xlu1 %v6850_v22  ;;  %6848 = vadd.xlane.f32.xlu0 %v6847_v30  ;;  %v6856_v30 = vadd.f32 %v16432_v5, %v16426_v2  ;;  %v16460_v22 = vpop.eup %10544  ;;  %10564 = vpow2.f32 %v6773_v36  ;;  %v6779_v56 = vmul.f32 1.442695, %v6667_v9  ;;  %v6781_v18 = vmul.f32 1.442695, %v6668_v43 }
 0xb3a   :  { %v8705_v29 = vpop.f32.mrb[252].mxu0  ;;  %v16462_v14 = vpop.eup %10546  ;;  %10566 = vpow2.f32 %v6775_v44  ;;  %v6862_v32 = vadd.f32 %v16460_v22, %v16454_v34  ;;  %v6859_v9 = vadd.f32 %v16445_v21, %v16441_v59 }
 0xb3b   :  { %v8706_v40 = vpop.f32.mrb[253].mxu0  ;;  %v16464_v49 = vpop.eup %10548  ;;  %10568 = vpow2.f32 %v6777_v6 }
 0xb3c   :  { %v16466_v15 = vadd.f32 %v8706_v40, %v8705_v29  ;;  %v8708_v48 = vpop.f32.mrb[254].mxu0  ;;  %v16468_v27 = vpop.eup %10550  ;;  %10570 = vpow2.f32 %v6783_v42 }
 0xb3d   :  { %6857 = vadd.xlane.f32.xlu1 %v6856_v30  ;;  %6854 = vadd.xlane.f32.xlu0 %v6853_v37  ;;  %v8709_v36 = vpop.f32.mrb[255].mxu0  ;;  %v16474_v44 = vpop.eup %10552  ;;  %10572 = vpow2.f32 %v6785_v51 }
 0xb3e   :  { %18635 = vst [vmem:[#allocation135_spill] sm:$0xff] %v16466_v15  ;;  %v16476_v30 = vadd.f32 %v8709_v36, %v8708_v48  ;;  %v16478_v43 = vpop.eup %10554  ;;  %10574 = vpow2.f32 %v6779_v56  ;;  %v6868_v36 = vadd.f32 %v16474_v44, %v16468_v27 }
 0xb3f   :  { %v16482_v29 = vpop.eup %10556  ;;  %10576 = vpow2.f32 %v6781_v18 }
 0xb40   :  { %18636 = vst [vmem:[#allocation122_spill] sm:$0xff] %v16476_v30  ;;  %v6606_v6 = vpop.xlane.xlu0 %6605  ;;  %v16486_v23 = vpop.eup %10558 }
 0xb41   :  { %v6673_v37 = vsub.f32 %v16166_v33, %v6606_v6  ;;  %v6674_v42 = vsub.f32 %v18543_v24, %v6606_v6  ;;  %6863 = vadd.xlane.f32.xlu1 %v6862_v32  ;;  %6860 = vadd.xlane.f32.xlu0 %v6859_v9  ;;  %v6865_v33 = vadd.f32 %v16464_v49, %v16462_v14  ;;  %v16492_v56 = vpop.eup %10560 }
 0xb42   :  { %v8711_v24 = vpop.f32.mrb[0].mxu0  ;;  %v16494_v9 = vpop.eup %10562 }
 0xb43   :  { %v6791_v51 = vmul.f32 1.442695, %v6673_v37  ;;  %v6793_v48 = vmul.f32 1.442695, %v6674_v42  ;;  %18637 = vst [vmem:[#allocation153_spill] sm:$0xff] %v16494_v9  ;;  %v8712_v18 = vpop.f32.mrb[1].mxu0  ;;  %v16498_v42 = vpop.eup %10564 }
 0xb44   :  { %v6603_v32 = vpop.xlane.xlu1 %6602  ;;  %v7060_v37 = vpop.permute.xlu0 %7059  ;;  %18638 = vst [vmem:[#allocation151_spill] sm:$0xff] %v16498_v42  ;;  %v16500_v15 = vadd.f32 %v8712_v18, %v8711_v24 }
 0xb45   :  { %10578 = vpow2.f32 %v6791_v51  ;;  %v6671_v6 = vsub.f32 %v16170_v13, %v6603_v32  ;;  %v6672_v40 = vsub.f32 %v18545_v20, %v6603_v32  ;;  %6869 = vadd.xlane.f32.xlu1 %v6868_v36  ;;  %6866 = vadd.xlane.f32.xlu0 %v6865_v33  ;;  %v8714_v30 = vpop.f32.mrb[2].mxu0  ;;  %v16502_v57 = vpop.eup %10566  ;;  %v6874_v13 = vadd.f32 %v16492_v56, %v16486_v23 }
 0xb46   :  { %10580 = vpow2.f32 %v6793_v48  ;;  %18639 = vst [vmem:[#allocation152_spill] sm:$0xff] %v16500_v15  ;;  %8882 = vmatpush3.bf16.msra.mxu0 %v7060_v37  ;;  %18640 = vst [vmem:[#allocation209_spill] sm:$0xff] %v16502_v57  ;;  %v8715_v51 = vpop.f32.mrb[3].mxu0  ;;  %v6871_v20 = vadd.f32 %v16482_v29, %v16478_v43  ;;  %v16508_v36 = vpop.eup %10568 }
 0xb47   :  { %v6787_v54 = vmul.f32 1.442695, %v6671_v6  ;;  %v6789_v55 = vmul.f32 1.442695, %v6672_v40  ;;  %18641 = vst [vmem:[#allocation126_spill] sm:$0xff] %v16508_v36  ;;  %v16510_v33 = vadd.f32 %v8715_v51, %v8714_v30  ;;  %v16514_v24 = vpop.eup %10570  ;;  %v6880_v6 = vadd.f32 %v16508_v36, %v16502_v57 }
 0xb48   :  { %v16512_v48 = vpop.xlane.xlu1 %6824  ;;  %18643 = vst [vmem:[#allocation158_spill] sm:$0xff] %v16514_v24  ;;  %v16516_v32 = vpop.eup %10572  ;;  %v6877_v30 = vadd.f32 %v16498_v42, %v16494_v9 }
 0xb49   :  { %18642 = vst [vmem:[#allocation159_spill] sm:$0xff] %v16510_v33  ;;  %10582 = vpow2.f32 %v6787_v54  ;;  %6875 = vadd.xlane.f32.xlu1 %v6874_v13  ;;  %6872 = vadd.xlane.f32.xlu0 %v6871_v20  ;;  %v16520_v18 = vpop.eup %10574  ;;  %v7062_v13 = vpop.permute.xlu0 %7061  ;;  %v6886_v9 = vadd.f32 %v16516_v32, %v16514_v24 }
 0xb4a   :  { %10584 = vpow2.f32 %v6789_v55  ;;  %18644 = vst [vmem:[#allocation161_spill] sm:$0xff] %v16520_v18  ;;  %v16526_v37 = vpop.eup %10576 }
 0xb4b   :  { %v8717_v51 = vpop.f32.mrb[4].mxu0  ;;  %v6883_v52 = vadd.f32 %v16526_v37, %v16520_v18 }
 0xb4c   :  { %v16528_v54 = vpop.xlane.xlu1 %6827  ;;  %v8718_v20 = vpop.f32.mrb[5].mxu0 }
 0xb4d   :  { %6881 = vadd.xlane.f32.xlu1 %v6880_v6  ;;  %6878 = vadd.xlane.f32.xlu0 %v6877_v30  ;;  %v16530_v55 = vadd.f32 %v8718_v20, %v8717_v51  ;;  %v8720_v40 = vpop.f32.mrb[6].mxu0  ;;  %v7080_v51 = vpop.permute.xlu0 %7079 }
 0xb4e   :  { %v8721_v33 = vpop.f32.mrb[7].mxu0 }
 0xb4f   :  { %18645 = vst [vmem:[#allocation210_spill] sm:$0xff] %v16530_v55  ;;  %v16532_v15 = vpop.eup %10578  ;;  %v16540_v36 = vadd.f32 %v8721_v33, %v8720_v40 }
 0xb50   :  { %18646 = vst [vmem:[#allocation211_spill] sm:$0xff] %v16532_v15  ;;  %v16538_v57 = vpop.eup %10580  ;;  %v7078_v42 = vpop.permute.xlu1 %7077 }
 0xb51   :  { %18647 = vst [vmem:[#allocation162_spill] sm:$0xff] %v16538_v57  ;;  %18648 = vst [vmem:[#allocation163_spill] sm:$0xff] %v16540_v36  ;;  %6884 = vadd.xlane.f32.xlu0 %v6883_v52  ;;  %6887 = vadd.xlane.f32.xlu1 %v6886_v9  ;;  %v6892_v20 = vadd.f32 %v16538_v57, %v16532_v15 }
 0xb52   :  { %8883 = vmatprep.subr.bf16.mxu0 %v7078_v42 }
 0xb53   :  { %v16544_v30 = vpop.eup %10582  ;;  %8884 = vmatpush3.bf16.msra.mxu0 %v7062_v13  ;;  %v8723_v24 = vpop.f32.mrb[8].mxu0 }
 0xb54   :  { %18649 = vst [vmem:[#allocation166_spill] sm:$0xff] %v16544_v30  ;;  %v16548_v18 = vpop.eup %10584  ;;  %8885 = vmatprep.subr.bf16.mxu0 %v7080_v51  ;;  %v8724_v33 = vpop.f32.mrb[9].mxu0 }
 0xb55   :  { %18650 = vst [vmem:[#allocation165_spill] sm:$0xff] %v16548_v18  ;;  %6893 = vadd.xlane.f32.xlu1 %v6892_v20  ;;  %v6889_v52 = vadd.f32 %v16548_v18, %v16544_v30  ;;  %v16552_v9 = vadd.f32 %v8724_v33, %v8723_v24  ;;  %v8726_v40 = vpop.f32.mrb[10].mxu0 }
 0xb56   :  { %v8727_v42 = vpop.f32.mrb[11].mxu0 }
 0xb57   :  { %18651 = vst [vmem:[#allocation164_spill] sm:$0xff] %v16552_v9  ;;  %6890 = vadd.xlane.f32.xlu0 %v6889_v52  ;;  %v16554_v6 = vadd.f32 %v8727_v42, %v8726_v40 }
 0xb59   :  { %18652 = vst [vmem:[#allocation169_spill] sm:$0xff] %v16554_v6 }
 0xb5b   :  { %v8729_v55 = vpop.f32.mrb[12].mxu0 }
 0xb5c   :  { %v8730_v36 = vpop.f32.mrb[13].mxu0 }
 0xb5d   :  { %v16558_v15 = vadd.f32 %v8730_v36, %v8729_v55  ;;  %v8732_v51 = vpop.f32.mrb[14].mxu0 }
 0xb5e   :  { %v8733_v57 = vpop.f32.mrb[15].mxu0 }
 0xb5f   :  { %18653 = vst [vmem:[#allocation173_spill] sm:$0xff] %v16558_v15  ;;  %v16560_v20 = vadd.f32 %v8733_v57, %v8732_v51 }
 0xb61   :  { %18654 = vst [vmem:[#allocation109_spill] sm:$0xff] %v16560_v20 }
 0xb63   :  { %v8735_v33 = vpop.f32.mrb[16].mxu0 }
 0xb64   :  { %v8736_v30 = vpop.f32.mrb[17].mxu0 }
 0xb65   :  { %v16564_v18 = vadd.f32 %v8736_v30, %v8735_v33  ;;  %v8738_v52 = vpop.f32.mrb[18].mxu0 }
 0xb66   :  { %v8739_v40 = vpop.f32.mrb[19].mxu0 }
 0xb67   :  { %18655 = vst [vmem:[#allocation47_spill] sm:$0xff] %v16564_v18  ;;  %v16566_v42 = vadd.f32 %v8739_v40, %v8738_v52 }
 0xb6d   :  { %v8741_v36 = vpop.f32.mrb[20].mxu0 }
 0xb6e   :  { %v8742_v55 = vpop.f32.mrb[21].mxu0 }
 0xb6f   :  { %v16570_v9 = vadd.f32 %v8742_v55, %v8741_v36  ;;  %v8744_v57 = vpop.f32.mrb[22].mxu0 }
 0xb70   :  { %v8745_v51 = vpop.f32.mrb[23].mxu0 }
 0xb71   :  { %v16572_v6 = vadd.f32 %v8745_v51, %v8744_v57 }
 0xb7d   :  { %v6612_v30 = vpop.xlane.xlu0 %6611 }
 0xb7e   :  { %v6677_v33 = vsub.f32 %v16233_v35, %v6612_v30  ;;  %v6678_v52 = vsub.f32 %v18575_v10, %v6612_v30 }
 0xb80   :  { %v6799_v40 = vmul.f32 1.442695, %v6677_v33  ;;  %v6801_v15 = vmul.f32 1.442695, %v6678_v52 }
 0xb81   :  { %v6609_v20 = vpop.xlane.xlu1 %6608  ;;  %v7064_v13 = vpop.permute.xlu0 %7063 }
 0xb82   :  { %10586 = vpow2.f32 %v6799_v40  ;;  %v6675_v36 = vsub.f32 %v16240_v50, %v6609_v20  ;;  %v6676_v55 = vsub.f32 %v18577_v19, %v6609_v20  ;;  %8886 = vmatpush3.bf16.msra.mxu0 %v7064_v13  ;;  %v18658_v40 = vpack.c.bf16 %v16286_v4, %v16283_v62  ;;  %v18663_v62 = vld [vmem:[#allocation14_spill] sm:$0xff] }
 0xb83   :  { %10588 = vpow2.f32 %v6801_v15 }
 0xb84   :  { %v6795_v57 = vmul.f32 1.442695, %v6675_v36  ;;  %v6797_v51 = vmul.f32 1.442695, %v6676_v55  ;;  %v18659_v55 = vld [vmem:[#allocation13_spill] sm:$0xff] }
 0xb85   :  { %v6831_v18 = vpop.xlane.xlu1 %6830  ;;  %v7066_v50 = vpop.permute.xlu0 %7065 }
 0xb86   :  { %10590 = vpow2.f32 %v6795_v57 }
 0xb87   :  { %10592 = vpow2.f32 %v6797_v51  ;;  %v18660_v51 = vld [vmem:[#allocation37_spill] sm:$0xff] }
 0xb88   :  { %10594 = vrcp.f32 %v16528_v54 }
 0xb89   :  { %v6834_v35 = vpop.xlane.xlu1 %6833  ;;  %10596 = vrcp.f32 %v16512_v48  ;;  %v18656_v48 = vld [vmem:[#allocation26_spill] sm:$0xff] }
 0xb8a   :  { %10598 = vrcp.f32 %v6834_v35  ;;  %v18657_v20 = vpack.c.bf16 %v16214_v1, %v18656_v48 }
 0xb8b   :  { %10600 = vrcp.f32 %v6831_v18  ;;  %v18661_v18 = vpack.c.bf16 %v16280_v16, %v16277_v41 }
 0xb8c   :  { %v16582_v10 = vpop.eup %10586 }
 0xb8d   :  { %v16584_v30 = vpop.eup %10588  ;;  %v7082_v33 = vpop.permute.xlu1 %7081 }
 0xb8e   :  { %8887 = vmatprep.subr.bf16.mxu0 %v7082_v33  ;;  %v6898_v19 = vadd.f32 %v16584_v30, %v16582_v10 }
 0xb8f   :  { %8888 = vmatpush3.bf16.msra.mxu0 %v7066_v50 }
 0xb90   :  { %v16588_v15 = vpop.eup %10590  ;;  %6899 = vadd.xlane.f32.xlu1 %v6898_v19  ;;  %v18662_v19 = vld [vmem:[#allocation39_spill] sm:$0xff] }
 0xb91   :  { %v16590_v13 = vpop.eup %10592 }
 0xb92   :  { %v10595_v54 = vpop.eup %10594  ;;  %7132 = vmatmul.mubr.bf16.vlgmr.msra.gmra.mrb[44].mxu0 %v18657_v20  ;;  %v6895_v52 = vadd.f32 %v16590_v13, %v16588_v15 }
 0xb93   :  { %7139 = vmatprep.mubr.bf16.mxu0 %v18658_v40  ;;  %v10597_v36 = vpop.eup %10596  ;;  %v6950_v57 = vmul.f32 %v10595_v54, %v18659_v55  ;;  %v6949_v48 = vmul.f32 %v10595_v54, %v18662_v19 }
 0xb94   :  { %6896 = vadd.xlane.f32.xlu0 %v6895_v52  ;;  %v6948_v35 = vmul.f32 %v10597_v36, %v18660_v51  ;;  %v10599_v50 = vpop.eup %10598  ;;  %v6947_v4 = vmul.f32 %v10597_v36, %v18663_v62 }
 0xb95   :  { %v10601_v1 = vpop.eup %10600  ;;  %v6954_v20 = vmul.f32 %v10599_v50, %v16254_v61  ;;  %v6953_v51 = vmul.f32 %v10599_v50, %v16250_v31 }
 0xb96   :  { %v7008_v33 = vpack.c.bf16 %v6950_v57, %v6948_v35  ;;  %v6952_v52 = vmul.f32 %v10601_v1, %v16248_v38  ;;  %v7007_v40 = vpack.c.bf16 %v6949_v48, %v6947_v4 }
 0xb98   :  { %v7010_v55 = vpack.c.bf16 %v6954_v20, %v6952_v52 }
 0xb9a   :  { %7140 = vmatmul.mubr.bf16.gmra.mrb[48].mxu0 %v18661_v18 }
 0xb9b   :  { %7147 = vmatprep.mubr.bf16.mxu0 %v7008_v33  ;;  %v18664_v33 = vld [vmem:[#allocation33_spill] sm:$0xff] }
 0xb9c   :  { %v6951_v54 = vmul.f32 %v10601_v1, %v18664_v33 }
 0xb9e   :  { %v7009_v61 = vpack.c.bf16 %v6953_v51, %v6951_v54 }
 0xba2   :  { %v8747_v24 = vpop.f32.mrb[24].mxu0  ;;  %7148 = vmatmul.mubr.bf16.gmra.mrb[52].mxu0 %v7007_v40 }
 0xba3   :  { %v8748_v57 = vpop.f32.mrb[25].mxu0  ;;  %7155 = vmatprep.mubr.bf16.mxu0 %v7010_v55 }
 0xba4   :  { %v16610_v41 = vadd.f32 %v8748_v57, %v8747_v24  ;;  %v8750_v16 = vpop.f32.mrb[26].mxu0 }
 0xba5   :  { %v8751_v35 = vpop.f32.mrb[27].mxu0 }
 0xba6   :  { %v16613_v18 = vadd.f32 %v8751_v35, %v8750_v16 }
 0xba8   :  { %v6005_v38 = vpack.c.bf16 %v16613_v18, %v16610_v41 }
 0xbaa   :  { %v8753_v36 = vpop.f32.mrb[28].mxu0  ;;  %7156 = vmatmul.mubr.bf16.gmra.mrb[56].mxu0 %v7009_v61 }
 0xbab   :  { %v8754_v19 = vpop.f32.mrb[29].mxu0 }
 0xbac   :  { %v16617_v48 = vadd.f32 %v8754_v19, %v8753_v36  ;;  %v8756_v20 = vpop.f32.mrb[30].mxu0 }
 0xbad   :  { %v8757_v62 = vpop.f32.mrb[31].mxu0 }
 0xbae   :  { %v16619_v31 = vadd.f32 %v8757_v62, %v8756_v20 }
 0xbb2   :  { %v8759_v50 = vpop.f32.mrb[32].mxu0 }
 0xbb3   :  { %v8760_v1 = vpop.f32.mrb[33].mxu0 }
 0xbb4   :  { %v16623_v4 = vadd.f32 %v8760_v1, %v8759_v50  ;;  %v8762_v52 = vpop.f32.mrb[34].mxu0 }
 0xbb5   :  { %v8763_v40 = vpop.f32.mrb[35].mxu0 }
 0xbb6   :  { %v16625_v55 = vadd.f32 %v8763_v40, %v8762_v52  ;;  %v6615_v57 = vpop.xlane.xlu0 %6614 }
 0xbb7   :  { %v6679_v51 = vsub.f32 %v16314_v11, %v6615_v57  ;;  %v6680_v16 = vsub.f32 %v18604_v39, %v6615_v57 }
 0xbb9   :  { %v6803_v33 = vmul.f32 1.442695, %v6679_v51  ;;  %v6805_v54 = vmul.f32 1.442695, %v6680_v16 }
 0xbba   :  { %v8765_v61 = vpop.f32.mrb[36].mxu0  ;;  %v6837_v36 = vpop.xlane.xlu0 %6836 }
 0xbbb   :  { %10602 = vpow2.f32 %v6803_v33  ;;  %v8766_v19 = vpop.f32.mrb[37].mxu0 }
 0xbbc   :  { %10604 = vpow2.f32 %v6805_v54  ;;  %v16631_v20 = vadd.f32 %v8766_v19, %v8765_v61  ;;  %v8768_v62 = vpop.f32.mrb[38].mxu0 }
 0xbbd   :  { %10606 = vrcp.f32 %v6837_v36  ;;  %v8769_v50 = vpop.f32.mrb[39].mxu0 }
 0xbbe   :  { %v16633_v1 = vadd.f32 %v8769_v50, %v8768_v62  ;;  %v6618_v11 = vpop.xlane.xlu1 %6617  ;;  %v6840_v52 = vpop.xlane.xlu0 %6839 }
 0xbbf   :  { %v6681_v39 = vsub.f32 %v16348_v28, %v6618_v11  ;;  %v6682_v40 = vsub.f32 %v18615_v46, %v6618_v11  ;;  %10608 = vrcp.f32 %v6840_v52 }
 0xbc1   :  { %v6807_v51 = vmul.f32 1.442695, %v6681_v39  ;;  %v6809_v16 = vmul.f32 1.442695, %v6682_v40 }
 0xbc2   :  { %v6846_v33 = vpop.xlane.xlu1 %6845  ;;  %v8771_v54 = vpop.f32.mrb[40].mxu0 }
 0xbc3   :  { %10610 = vpow2.f32 %v6807_v51  ;;  %v6843_v61 = vpop.xlane.xlu0 %6842  ;;  %v8772_v36 = vpop.f32.mrb[41].mxu0 }
 0xbc4   :  { %10612 = vpow2.f32 %v6809_v16  ;;  %v16639_v19 = vadd.f32 %v8772_v36, %v8771_v54  ;;  %v8774_v62 = vpop.f32.mrb[42].mxu0 }
 0xbc5   :  { %v16641_v50 = vpop.eup %10602  ;;  %10614 = vrcp.f32 %v6846_v33  ;;  %v8775_v28 = vpop.f32.mrb[43].mxu0 }
 0xbc6   :  { %v16643_v46 = vpop.eup %10604  ;;  %10616 = vrcp.f32 %v6843_v61  ;;  %v16645_v11 = vadd.f32 %v8775_v28, %v8774_v62  ;;  %v6852_v52 = vpop.xlane.xlu1 %6851 }
 0xbc7   :  { %v10607_v39 = vpop.eup %10606  ;;  %10618 = vrcp.f32 %v6852_v52  ;;  %v6849_v40 = vpop.xlane.xlu0 %6848  ;;  %v6901_v51 = vadd.f32 %v16643_v46, %v16641_v50 }
 0xbc8   :  { %10620 = vrcp.f32 %v6849_v40  ;;  %v6955_v33 = vmul.f32 %v10607_v39, %v16328_v0  ;;  %v6956_v62 = vmul.f32 %v10607_v39, %v16337_v8 }
 0xbc9   :  { %v10609_v54 = vpop.eup %10608  ;;  %6902 = vadd.xlane.f32.xlu0 %v6901_v51 }
 0xbca   :  { %v6957_v36 = vmul.f32 %v10609_v54, %v16352_v60  ;;  %v6858_v61 = vpop.xlane.xlu1 %6857  ;;  %v6958_v28 = vmul.f32 %v10609_v54, %v16358_v63 }
 0xbcb   :  { %v6855_v52 = vpop.xlane.xlu0 %6854  ;;  %10622 = vrcp.f32 %v6858_v61 }
 0xbcc   :  { %v7011_v57 = vpack.c.bf16 %v6957_v36, %v6955_v33  ;;  %v7012_v35 = vpack.c.bf16 %v6958_v28, %v6956_v62  ;;  %10624 = vrcp.f32 %v6855_v52 }
 0xbcd   :  { %v16655_v24 = vpop.eup %10610 }
 0xbce   :  { %v16657_v16 = vpop.eup %10612  ;;  %7163 = vmatprep.mubr.bf16.mxu0 %v7012_v35  ;;  %v6864_v54 = vpop.xlane.xlu1 %6863 }
 0xbcf   :  { %v10615_v40 = vpop.eup %10614  ;;  %7164 = vmatmul.mubr.bf16.gmra.mrb[60].mxu0 %v7011_v57  ;;  %v6904_v0 = vadd.f32 %v16657_v16, %v16655_v24  ;;  %v6861_v61 = vpop.xlane.xlu0 %6860  ;;  %10626 = vrcp.f32 %v6864_v54 }
 0xbd0   :  { %v10617_v60 = vpop.eup %10616  ;;  %v6962_v8 = vmul.f32 %v10615_v40, %v16382_v17  ;;  %v6961_v63 = vmul.f32 %v10615_v40, %v16376_v3  ;;  %10628 = vrcp.f32 %v6861_v61 }
 0xbd1   :  { %v10619_v39 = vpop.eup %10618  ;;  %v6959_v51 = vmul.f32 %v10617_v60, %v16363_v58  ;;  %6905 = vadd.xlane.f32.xlu1 %v6904_v0  ;;  %v6960_v33 = vmul.f32 %v10617_v60, %v16367_v25 }
 0xbd2   :  { %v10621_v36 = vpop.eup %10620  ;;  %v6966_v35 = vmul.f32 %v10619_v39, %v16408_v47  ;;  %v6965_v58 = vmul.f32 %v10619_v39, %v16402_v12  ;;  %v6870_v40 = vpop.xlane.xlu1 %6869 }
 0xbd3   :  { %v7014_v57 = vpack.c.bf16 %v6962_v8, %v6960_v33  ;;  %v6964_v62 = vmul.f32 %v10621_v36, %v16393_v45  ;;  %v7013_v28 = vpack.c.bf16 %v6961_v63, %v6959_v51  ;;  %v6963_v25 = vmul.f32 %v10621_v36, %v16389_v26  ;;  %v6867_v0 = vpop.xlane.xlu0 %6866 }
 0xbd4   :  { %10630 = vrcp.f32 %v6870_v40 }
 0xbd5   :  { %7171 = vmatprep.mubr.bf16.mxu0 %v7014_v57  ;;  %v10623_v17 = vpop.eup %10622  ;;  %v7016_v52 = vpack.c.bf16 %v6966_v35, %v6964_v62  ;;  %v7015_v45 = vpack.c.bf16 %v6965_v58, %v6963_v25  ;;  %10632 = vrcp.f32 %v6867_v0 }
 0xbd6   :  { %v10625_v3 = vpop.eup %10624  ;;  %v6970_v60 = vmul.f32 %v10623_v17, %v16432_v5  ;;  %v6969_v54 = vmul.f32 %v10623_v17, %v16426_v2  ;;  %v6876_v39 = vpop.xlane.xlu1 %6875 }
 0xbd7   :  { %7172 = vmatmul.mubr.bf16.gmra.mrb[64].mxu0 %v7013_v28  ;;  %v6968_v47 = vmul.f32 %v10625_v3, %v16417_v7  ;;  %v6967_v12 = vmul.f32 %v10625_v3, %v16413_v53  ;;  %v6873_v26 = vpop.xlane.xlu0 %6872  ;;  %10634 = vrcp.f32 %v6876_v39 }
 0xbd8   :  { %7179 = vmatprep.mubr.bf16.mxu0 %v7016_v52  ;;  %10636 = vrcp.f32 %v6873_v26 }
 0xbd9   :  { %v10627_v8 = vpop.eup %10626  ;;  %v7018_v63 = vpack.c.bf16 %v6970_v60, %v6968_v47  ;;  %v7017_v5 = vpack.c.bf16 %v6969_v54, %v6967_v12  ;;  %v18666_v54 = vld [vmem:[#allocation126_spill] sm:$0xff] }
 0xbda   :  { %v10629_v51 = vpop.eup %10628  ;;  %v6974_v7 = vmul.f32 %v10627_v8, %v16460_v22  ;;  %v6973_v57 = vmul.f32 %v10627_v8, %v16454_v34  ;;  %v6882_v62 = vpop.xlane.xlu1 %6881 }
 0xbdb   :  { %v6972_v33 = vmul.f32 %v10629_v51, %v16445_v21  ;;  %v6971_v2 = vmul.f32 %v10629_v51, %v16441_v59  ;;  %v6879_v53 = vpop.xlane.xlu0 %6878  ;;  %10638 = vrcp.f32 %v6882_v62  ;;  %v18669_v62 = vld [vmem:[#allocation158_spill] sm:$0xff] }
 0xbdc   :  { %10640 = vrcp.f32 %v6879_v53 }
 0xbdd   :  { %v7020_v61 = vpack.c.bf16 %v6974_v7, %v6972_v33  ;;  %v7019_v22 = vpack.c.bf16 %v6973_v57, %v6971_v2  ;;  %v18667_v33 = vld [vmem:[#allocation209_spill] sm:$0xff] }
 0xbde   :  { %v10631_v36 = vpop.eup %10630  ;;  %v6888_v25 = vpop.xlane.xlu1 %6887 }
 0xbdf   :  { %7180 = vmatmul.mubr.bf16.gmra.mrb[68].mxu0 %v7015_v45  ;;  %v10633_v35 = vpop.eup %10632  ;;  %v6978_v21 = vmul.f32 %v10631_v36, %v16474_v44  ;;  %v6977_v58 = vmul.f32 %v10631_v36, %v16468_v27  ;;  %v6885_v59 = vpop.xlane.xlu0 %6884  ;;  %10642 = vrcp.f32 %v6888_v25  ;;  %v18674_v25 = vld [vmem:[#allocation166_spill] sm:$0xff] }
 0xbe0   :  { %7187 = vmatprep.mubr.bf16.mxu0 %v7018_v63  ;;  %v6976_v28 = vmul.f32 %v10633_v35, %v16464_v49  ;;  %v6975_v34 = vmul.f32 %v10633_v35, %v16462_v14  ;;  %10644 = vrcp.f32 %v6885_v59  ;;  %v18665_v63 = vld [vmem:[#allocation151_spill] sm:$0xff] }
 0xbe1   :  { %v10635_v17 = vpop.eup %10634 }
 0xbe2   :  { %v7022_v52 = vpack.c.bf16 %v6978_v21, %v6976_v28  ;;  %v10637_v3 = vpop.eup %10636  ;;  %v6982_v49 = vmul.f32 %v10635_v17, %v16492_v56  ;;  %v7021_v44 = vpack.c.bf16 %v6977_v58, %v6975_v34  ;;  %v6981_v45 = vmul.f32 %v10635_v17, %v16486_v23  ;;  %v6894_v8 = vpop.xlane.xlu1 %6893  ;;  %v18670_v28 = vld [vmem:[#allocation161_spill] sm:$0xff] }
 0xbe3   :  { %v6980_v40 = vmul.f32 %v10637_v3, %v16482_v29  ;;  %v6979_v27 = vmul.f32 %v10637_v3, %v16478_v43  ;;  %10646 = vrcp.f32 %v6894_v8 }
 0xbe4   :  { %v6891_v14 = vpop.xlane.xlu0 %6890 }
 0xbe5   :  { %v10639_v0 = vpop.eup %10638  ;;  %v7024_v47 = vpack.c.bf16 %v6982_v49, %v6980_v40  ;;  %v7023_v56 = vpack.c.bf16 %v6981_v45, %v6979_v27  ;;  %10648 = vrcp.f32 %v6891_v14 }
 0xbe6   :  { %v10641_v60 = vpop.eup %10640  ;;  %v6986_v29 = vmul.f32 %v10639_v0, %v18666_v54  ;;  %v6985_v7 = vmul.f32 %v10639_v0, %v18667_v33 }
 0xbe7   :  { %7188 = vmatmul.mubr.bf16.gmra.mrb[72].mxu0 %v7017_v5  ;;  %v6984_v51 = vmul.f32 %v10641_v60, %v18665_v63  ;;  %v18668_v5 = vld [vmem:[#allocation153_spill] sm:$0xff] }
 0xbe8   :  { %7195 = vmatprep.mubr.bf16.mxu0 %v7020_v61  ;;  %v6983_v23 = vmul.f32 %v10641_v60, %v18668_v5 }
 0xbe9   :  { %v10643_v12 = vpop.eup %10642  ;;  %v7026_v39 = vpack.c.bf16 %v6986_v29, %v6984_v51 }
 0xbea   :  { %v10645_v26 = vpop.eup %10644  ;;  %v6990_v36 = vmul.f32 %v10643_v12, %v16516_v32  ;;  %v7025_v61 = vpack.c.bf16 %v6985_v7, %v6983_v23  ;;  %v6989_v53 = vmul.f32 %v10643_v12, %v18669_v62 }
 0xbeb   :  { %v6988_v43 = vmul.f32 %v10645_v26, %v16526_v37  ;;  %v6987_v21 = vmul.f32 %v10645_v26, %v18670_v28  ;;  %v18673_v37 = vld [vmem:[#allocation211_spill] sm:$0xff] }
 0xbed   :  { %v10647_v35 = vpop.eup %10646  ;;  %v7028_v57 = vpack.c.bf16 %v6990_v36, %v6988_v43  ;;  %v7027_v58 = vpack.c.bf16 %v6989_v53, %v6987_v21 }
 0xbee   :  { %v6993_v32 = vmul.f32 %v10647_v35, %v18673_v37 }
 0xbef   :  { %7196 = vmatmul.mubr.bf16.gmra.mrb[76].mxu0 %v7019_v22  ;;  %v10649_v2 = vpop.eup %10648  ;;  %v18671_v22 = vld [vmem:[#allocation165_spill] sm:$0xff] }
 0xbf0   :  { %7203 = vmatprep.mubr.bf16.mxu0 %v7022_v52  ;;  %v6992_v17 = vmul.f32 %v10649_v2, %v18671_v22  ;;  %v18672_v52 = vld [vmem:[#allocation162_spill] sm:$0xff]  ;;  %v6991_v59 = vmul.f32 %v10649_v2, %v18674_v25  ;;  %v18676_v22 = vld [vmem:[#allocation183_spill] sm:$0xff] }
 0xbf1   :  { %v6994_v3 = vmul.f32 %v10647_v35, %v18672_v52 }
 0xbf2   :  { %v7029_v40 = vpack.c.bf16 %v6993_v32, %v6991_v59 }
 0xbf3   :  { %v7030_v34 = vpack.c.bf16 %v6994_v3, %v6992_v17 }
 0xbf7   :  { %7204 = vmatmul.mubr.bf16.gmra.mrb[80].mxu0 %v7021_v44 }
 0xbf8   :  { %7211 = vmatprep.mubr.bf16.mxu0 %v7024_v47 }
 0xbff   :  { %7212 = vmatmul.mubr.bf16.gmra.mrb[84].mxu0 %v7023_v56 }
 0xc00   :  { %7219 = vmatprep.mubr.bf16.mxu0 %v7026_v39 }
 0xc07   :  { %7220 = vmatmul.mubr.bf16.gmra.mrb[88].mxu0 %v7025_v61 }
 0xc08   :  { %7227 = vmatprep.mubr.bf16.mxu0 %v7028_v57 }
 0xc0f   :  { %7228 = vmatmul.mubr.bf16.gmra.mrb[92].mxu0 %v7027_v58 }
 0xc10   :  { %7235 = vmatprep.mubr.bf16.mxu0 %v7030_v34 }
 0xc17   :  { %7236 = vmatmul.mubr.bf16.gmra.mrb[96].mxu0 %v7029_v40 }
 0xc1d   :  { %v6900_v49 = vpop.xlane.xlu1 %6899 }
 0xc1e   :  { %10650 = vrcp.f32 %v6900_v49 }
 0xc21   :  { %v6897_v44 = vpop.xlane.xlu0 %6896 }
 0xc22   :  { %10652 = vrcp.f32 %v6897_v44 }
 0xc28   :  { %v10651_v0 = vpop.eup %10650 }
 0xc29   :  { %v6997_v60 = vmul.f32 %v10651_v0, %v16582_v10  ;;  %v6998_v8 = vmul.f32 %v10651_v0, %v16584_v30 }
 0xc2c   :  { %v10653_v47 = vpop.eup %10652 }
 0xc2d   :  { %v6995_v45 = vmul.f32 %v10653_v47, %v16588_v15  ;;  %v6996_v27 = vmul.f32 %v10653_v47, %v16590_v13 }
 0xc2f   :  { %v7031_v14 = vpack.c.bf16 %v6997_v60, %v6995_v45  ;;  %v7032_v63 = vpack.c.bf16 %v6998_v8, %v6996_v27 }
 0xc31   :  { %7243 = vmatprep.mubr.bf16.mxu0 %v7032_v63 }
 0xc32   :  { %7244 = vmatmul.mubr.bf16.gmra.mrb[100].mxu0 %v7031_v14 }
 0xc56   :  { %v6903_v51 = vpop.xlane.xlu0 %6902 }
 0xc57   :  { %10654 = vrcp.f32 %v6903_v51 }
 0xc5e   :  { %v6906_v54 = vpop.xlane.xlu1 %6905 }
 0xc5f   :  { %10656 = vrcp.f32 %v6906_v54 }
 0xc61   :  { %v10655_v12 = vpop.eup %10654 }
 0xc62   :  { %v6999_v13 = vmul.f32 %v10655_v12, %v16641_v50  ;;  %v7000_v7 = vmul.f32 %v10655_v12, %v16643_v46  ;;  %v18675_v46 = vld [vmem:[#allocation42_spill] sm:$0xff] }
 0xc65   :  { %v8889_v29 = vpop.f32.mrb[44].mxu0 }
 0xc66   :  { %v8890_v56 = vpop.f32.mrb[45].mxu0 }
 0xc67   :  { %v8891_v39 = vadd.f32 %v8890_v56, %v8889_v29  ;;  %v8892_v26 = vpop.f32.mrb[46].mxu0 }
 0xc68   :  { %v8893_v10 = vpop.f32.mrb[47].mxu0 }
 0xc69   :  { %v10657_v33 = vpop.eup %10656  ;;  %v8894_v15 = vadd.f32 %v8893_v10, %v8892_v26 }
 0xc6a   :  { %v7001_v30 = vmul.f32 %v10657_v33, %v16655_v24  ;;  %v7002_v5 = vmul.f32 %v10657_v33, %v16657_v16 }
 0xc6b   :  { %v7260_v23 = vpack.c.bf16 %v8894_v15, %v8891_v39 }
 0xc6c   :  { %v7033_v43 = vpack.c.bf16 %v7001_v30, %v6999_v13  ;;  %v7034_v36 = vpack.c.bf16 %v7002_v5, %v7000_v7 }
 0xc6d   :  { %v8895_v61 = vpop.f32.mrb[48].mxu0  ;;  %9097 = vmatprep.mubr.msk.bf16.mxu1 %vm85_vm0, %v7260_v23 }
 0xc6e   :  { %7251 = vmatprep.mubr.bf16.mxu0 %v7034_v36  ;;  %v8896_v35 = vpop.f32.mrb[49].mxu0 }
 0xc6f   :  { %v8897_v57 = vadd.f32 %v8896_v35, %v8895_v61  ;;  %7252 = vmatmul.mubr.bf16.gmra.mrb[104].mxu0 %v7033_v43  ;;  %v8898_v2 = vpop.f32.mrb[50].mxu0 }
 0xc70   :  { %v8899_v62 = vpop.f32.mrb[51].mxu0 }
 0xc71   :  { %v8900_v53 = vadd.f32 %v8899_v62, %v8898_v2 }
 0xc73   :  { %v7261_v50 = vpack.c.bf16 %v8900_v53, %v8897_v57 }
 0xc75   :  { %v8901_v28 = vpop.f32.mrb[52].mxu0  ;;  %9098 = vmatmul.mubr.msk.bf16.vlgmr.msra.gmra.mrb[52].mxu1 %vm85_vm0, %v7261_v50 }
 0xc76   :  { %v8902_v24 = vpop.f32.mrb[53].mxu0  ;;  %9130 = vmatpush3.bf16.msra.mxu1 %v18675_v46 }
 0xc77   :  { %v8903_v16 = vadd.f32 %v8902_v24, %v8901_v28  ;;  %v8904_v21 = vpop.f32.mrb[54].mxu0  ;;  %9131 = vmatprep.subr.bf16.mxu1 %v18676_v22 }
 0xc78   :  { %v8905_v17 = vpop.f32.mrb[55].mxu0 }
 0xc79   :  { %v8906_v52 = vadd.f32 %v8905_v17, %v8904_v21 }
 0xc7a   :  { %9132 = vmatpush3.bf16.msra.mxu1 %v18676_v22 }
 0xc7b   :  { %v7262_v3 = vpack.c.bf16 %v8906_v52, %v8903_v16 }
 0xc7d   :  { %v8907_v58 = vpop.f32.mrb[56].mxu0  ;;  %9101 = vmatprep.mubr.msk.bf16.mxu1 %vm85_vm0, %v7262_v3 }
 0xc7e   :  { %v8908_v34 = vpop.f32.mrb[57].mxu0 }
 0xc7f   :  { %v8909_v37 = vadd.f32 %v8908_v34, %v8907_v58  ;;  %v8910_v32 = vpop.f32.mrb[58].mxu0 }
 0xc80   :  { %v8911_v25 = vpop.f32.mrb[59].mxu0 }
 0xc81   :  { %v8912_v59 = vadd.f32 %v8911_v25, %v8910_v32 }
 0xc83   :  { %v7263_v40 = vpack.c.bf16 %v8912_v59, %v8909_v37 }
 0xc85   :  { %9102 = vmatmul.mubr.msk.bf16.gmra.mrb[56].mxu1 %vm85_vm0, %v7263_v40 }
 0xca2   :  { %v8913_v49 = vpop.f32.mrb[60].mxu0 }
 0xca3   :  { %v8914_v44 = vpop.f32.mrb[61].mxu0 }
 0xca4   :  { %v8915_v0 = vadd.f32 %v8914_v44, %v8913_v49  ;;  %v8916_v47 = vpop.f32.mrb[62].mxu0 }
 0xca5   :  { %v8917_v60 = vpop.f32.mrb[63].mxu0 }
 0xca6   :  { %v8918_v45 = vadd.f32 %v8917_v60, %v8916_v47 }
 0xca8   :  { %v7264_v27 = vpack.c.bf16 %v8918_v45, %v8915_v0 }
 0xcaa   :  { %v8919_v8 = vpop.f32.mrb[64].mxu0  ;;  %9105 = vmatprep.mubr.msk.bf16.mxu1 %vm85_vm0, %v7264_v27 }
 0xcab   :  { %v8920_v14 = vpop.f32.mrb[65].mxu0 }
 0xcac   :  { %v8921_v63 = vadd.f32 %v8920_v14, %v8919_v8  ;;  %v8922_v51 = vpop.f32.mrb[66].mxu0 }
 0xcad   :  { %v8923_v54 = vpop.f32.mrb[67].mxu0 }
 0xcae   :  { %v8924_v29 = vadd.f32 %v8923_v54, %v8922_v51 }
 0xcb0   :  { %v7265_v56 = vpack.c.bf16 %v8924_v29, %v8921_v63 }
 0xcb2   :  { %v8925_v12 = vpop.f32.mrb[68].mxu0  ;;  %9106 = vmatmul.mubr.msk.bf16.gmra.mrb[60].mxu1 %vm85_vm0, %v7265_v56 }
 0xcb3   :  { %v8926_v39 = vpop.f32.mrb[69].mxu0 }
 0xcb4   :  { %v8927_v26 = vadd.f32 %v8926_v39, %v8925_v12  ;;  %v8928_v10 = vpop.f32.mrb[70].mxu0 }
 0xcb5   :  { %v8929_v33 = vpop.f32.mrb[71].mxu0 }
 0xcb6   :  { %v8930_v15 = vadd.f32 %v8929_v33, %v8928_v10 }
 0xcb8   :  { %v7266_v13 = vpack.c.bf16 %v8930_v15, %v8927_v26 }
 0xcba   :  { %v8931_v30 = vpop.f32.mrb[72].mxu0  ;;  %9109 = vmatprep.mubr.msk.bf16.mxu1 %vm85_vm0, %v7266_v13 }
 0xcbb   :  { %v8932_v7 = vpop.f32.mrb[73].mxu0 }
 0xcbc   :  { %v8933_v5 = vadd.f32 %v8932_v7, %v8931_v30  ;;  %v8934_v23 = vpop.f32.mrb[74].mxu0 }
 0xcbd   :  { %v8935_v43 = vpop.f32.mrb[75].mxu0 }
 0xcbe   :  { %v8936_v36 = vadd.f32 %v8935_v43, %v8934_v23 }
 0xcc0   :  { %v7267_v61 = vpack.c.bf16 %v8936_v36, %v8933_v5 }
 0xcc2   :  { %v8937_v35 = vpop.f32.mrb[76].mxu0  ;;  %9110 = vmatmul.mubr.msk.bf16.gmra.mrb[64].mxu1 %vm85_vm0, %v7267_v61 }
 0xcc3   :  { %v8938_v57 = vpop.f32.mrb[77].mxu0 }
 0xcc4   :  { %v8939_v2 = vadd.f32 %v8938_v57, %v8937_v35  ;;  %v8940_v62 = vpop.f32.mrb[78].mxu0 }
 0xcc5   :  { %v8941_v53 = vpop.f32.mrb[79].mxu0 }
 0xcc6   :  { %v8942_v50 = vadd.f32 %v8941_v53, %v8940_v62 }
 0xcc8   :  { %v7268_v28 = vpack.c.bf16 %v8942_v50, %v8939_v2 }
 0xcca   :  { %v8943_v24 = vpop.f32.mrb[80].mxu0  ;;  %9113 = vmatprep.mubr.msk.bf16.mxu1 %vm85_vm0, %v7268_v28  ;;  %v18677_v28 = vld [vmem:[#allocation134_spill] sm:$0xff] }
 0xccb   :  { %v8944_v46 = vpop.f32.mrb[81].mxu0 }
 0xccc   :  { %v8945_v16 = vadd.f32 %v8944_v46, %v8943_v24  ;;  %v8946_v21 = vpop.f32.mrb[82].mxu0  ;;  %v18678_v24 = vld [vmem:[#allocation131_spill] sm:$0xff] }
 0xccd   :  { %v8947_v22 = vpop.f32.mrb[83].mxu0  ;;  %v18679_v46 = vpack.c.bf16 %v18677_v28, %v18678_v24 }
 0xcce   :  { %v8948_v17 = vadd.f32 %v8947_v22, %v8946_v21  ;;  %v18681_v21 = vld [vmem:[#allocation137_spill] sm:$0xff] }
 0xcd0   :  { %v7269_v52 = vpack.c.bf16 %v8948_v17, %v8945_v16  ;;  %v18680_v16 = vld [vmem:[#allocation139_spill] sm:$0xff]  ;;  %v18683_v17 = vld [vmem:[#allocation144_spill] sm:$0xff] }
 0xcd1   :  { %v18682_v22 = vpack.c.bf16 %v18680_v16, %v18681_v21 }
 0xcd2   :  { %v8949_v3 = vpop.f32.mrb[84].mxu0  ;;  %9114 = vmatmul.mubr.msk.bf16.gmra.mrb[68].mxu1 %vm85_vm0, %v7269_v52  ;;  %v18684_v52 = vld [vmem:[#allocation141_spill] sm:$0xff] }
 0xcd3   :  { %v8950_v58 = vpop.f32.mrb[85].mxu0 }
 0xcd4   :  { %v8951_v34 = vadd.f32 %v8950_v58, %v8949_v3  ;;  %v8952_v37 = vpop.f32.mrb[86].mxu0  ;;  %v18685_v3 = vpack.c.bf16 %v18683_v17, %v18684_v52  ;;  %v18686_v58 = vld [vmem:[#allocation149_spill] sm:$0xff] }
 0xcd5   :  { %v8953_v32 = vpop.f32.mrb[87].mxu0 }
 0xcd6   :  { %v8954_v25 = vadd.f32 %v8953_v32, %v8952_v37  ;;  %v18689_v32 = vld [vmem:[#allocation122_spill] sm:$0xff] }
 0xcd8   :  { %v7270_v59 = vpack.c.bf16 %v8954_v25, %v8951_v34  ;;  %v18687_v34 = vld [vmem:[#allocation146_spill] sm:$0xff]  ;;  %v18690_v25 = vld [vmem:[#allocation135_spill] sm:$0xff] }
 0xcd9   :  { %v18688_v37 = vpack.c.bf16 %v18686_v58, %v18687_v34 }
 0xcda   :  { %v8955_v40 = vpop.f32.mrb[88].mxu0  ;;  %9117 = vmatprep.mubr.msk.bf16.mxu1 %vm85_vm0, %v7270_v59  ;;  %v18691_v59 = vpack.c.bf16 %v18689_v32, %v18690_v25 }
 0xcdb   :  { %v8956_v49 = vpop.f32.mrb[89].mxu0 }
 0xcdc   :  { %v8957_v44 = vadd.f32 %v8956_v49, %v8955_v40  ;;  %v8958_v0 = vpop.f32.mrb[90].mxu0  ;;  %v18692_v40 = vld [vmem:[#allocation159_spill] sm:$0xff]  ;;  %v18693_v49 = vld [vmem:[#allocation152_spill] sm:$0xff] }
 0xcdd   :  { %v8959_v47 = vpop.f32.mrb[91].mxu0 }
 0xcde   :  { %v8960_v60 = vadd.f32 %v8959_v47, %v8958_v0  ;;  %v18695_v0 = vld [vmem:[#allocation163_spill] sm:$0xff]  ;;  %v18696_v47 = vld [vmem:[#allocation210_spill] sm:$0xff] }
 0xce0   :  { %v7271_v45 = vpack.c.bf16 %v8960_v60, %v8957_v44  ;;  %v18694_v44 = vpack.c.bf16 %v18692_v40, %v18693_v49  ;;  %v18697_v60 = vpack.c.bf16 %v18695_v0, %v18696_v47 }
 0xce2   :  { %v8961_v27 = vpop.f32.mrb[92].mxu0  ;;  %9118 = vmatmul.mubr.msk.bf16.gmra.mrb[72].mxu1 %vm85_vm0, %v7271_v45  ;;  %v18698_v45 = vld [vmem:[#allocation169_spill] sm:$0xff] }
 0xce3   :  { %v8962_v8 = vpop.f32.mrb[93].mxu0 }
 0xce4   :  { %v8963_v14 = vadd.f32 %v8962_v8, %v8961_v27  ;;  %v8964_v63 = vpop.f32.mrb[94].mxu0  ;;  %v18699_v27 = vld [vmem:[#allocation164_spill] sm:$0xff] }
 0xce5   :  { %v8965_v51 = vpop.f32.mrb[95].mxu0  ;;  %v18700_v8 = vpack.c.bf16 %v18698_v45, %v18699_v27 }
 0xce6   :  { %v8966_v54 = vadd.f32 %v8965_v51, %v8964_v63  ;;  %v18702_v63 = vld [vmem:[#allocation173_spill] sm:$0xff] }
 0xce8   :  { %v7272_v29 = vpack.c.bf16 %v8966_v54, %v8963_v14  ;;  %v18701_v14 = vld [vmem:[#allocation109_spill] sm:$0xff]  ;;  %v18704_v54 = vld [vmem:[#allocation47_spill] sm:$0xff] }
 0xce9   :  { %v18703_v51 = vpack.c.bf16 %v18701_v14, %v18702_v63 }
 0xcea   :  { %v8967_v56 = vpop.f32.mrb[96].mxu0  ;;  %9121 = vmatprep.mubr.msk.bf16.mxu1 %vm85_vm0, %v7272_v29  ;;  %v18705_v29 = vpack.c.bf16 %v16566_v42, %v18704_v54  ;;  %v18708_v42 = vpack.c.bf16 %v16625_v55, %v16623_v4 }
 0xceb   :  { %v8968_v12 = vpop.f32.mrb[97].mxu0 }
 0xcec   :  { %v8969_v39 = vadd.f32 %v8968_v12, %v8967_v56  ;;  %v8970_v26 = vpop.f32.mrb[98].mxu0  ;;  %v18706_v56 = vpack.c.bf16 %v16572_v6, %v16570_v9  ;;  %v18707_v12 = vpack.c.bf16 %v16619_v31, %v16617_v48  ;;  %v18709_v6 = vpack.c.bf16 %v16633_v1, %v16631_v20 }
 0xced   :  { %v8971_v10 = vpop.f32.mrb[99].mxu0  ;;  %v18710_v9 = vpack.c.bf16 %v16645_v11, %v16639_v19 }
 0xcee   :  { %v8972_v33 = vadd.f32 %v8971_v10, %v8970_v26 }
 0xcf0   :  { %v7273_v15 = vpack.c.bf16 %v8972_v33, %v8969_v39 }
 0xcf2   :  { %9122 = vmatmul.mubr.msk.bf16.gmra.mrb[76].mxu1 %vm85_vm0, %v7273_v15 }
 0xd05   :  { %v8973_v13 = vpop.f32.mrb[100].mxu0 }
 0xd06   :  { %v8974_v30 = vpop.f32.mrb[101].mxu0 }
 0xd07   :  { %v8975_v7 = vadd.f32 %v8974_v30, %v8973_v13  ;;  %v8976_v5 = vpop.f32.mrb[102].mxu0 }
 0xd08   :  { %v8977_v23 = vpop.f32.mrb[103].mxu0 }
 0xd09   :  { %v8978_v43 = vadd.f32 %v8977_v23, %v8976_v5 }
 0xd0b   :  { %v7274_v36 = vpack.c.bf16 %v8978_v43, %v8975_v7 }
 0xd0d   :  { %9125 = vmatprep.mubr.msk.bf16.mxu1 %vm85_vm0, %v7274_v36 }
 0xd42   :  { %v8979_v61 = vpop.f32.mrb[104].mxu0 }
 0xd43   :  { %v8980_v35 = vpop.f32.mrb[105].mxu0 }
 0xd44   :  { %v8981_v57 = vadd.f32 %v8980_v35, %v8979_v61  ;;  %v8982_v2 = vpop.f32.mrb[106].mxu0 }
 0xd45   :  { %v8983_v62 = vpop.f32.mrb[107].mxu0 }
 0xd46   :  { %v8984_v53 = vadd.f32 %v8983_v62, %v8982_v2 }
 0xd48   :  { %v7275_v50 = vpack.c.bf16 %v8984_v53, %v8981_v57 }
 0xd4a   :  { %9126 = vmatmul.mubr.msk.bf16.gmra.mrb[80].mxu1 %vm85_vm0, %v7275_v50 }
 0xd4b   :  { %9133 = vmatprep.mubr.msk.bf16.mxu1 %vm85_vm0, %v18679_v46 }
 0xd52   :  { %9134 = vmatmul.mubr.msk.bf16.vlgmr.msra.gmra.mrb[52].mxu1 %vm85_vm0, %v18682_v22 }
 0xd53   :  { %9137 = vmatprep.mubr.msk.bf16.mxu1 %vm85_vm0, %v18685_v3 }
 0xd5a   :  { %9138 = vmatmul.mubr.msk.bf16.gmra.mrb[56].mxu1 %vm85_vm0, %v18688_v37 }
 0xd5b   :  { %9141 = vmatprep.mubr.msk.bf16.mxu1 %vm85_vm0, %v18691_v59 }
 0xd62   :  { %9142 = vmatmul.mubr.msk.bf16.gmra.mrb[60].mxu1 %vm85_vm0, %v18694_v44 }
 0xd63   :  { %9145 = vmatprep.mubr.msk.bf16.mxu1 %vm85_vm0, %v18697_v60 }
 0xd6a   :  { %9146 = vmatmul.mubr.msk.bf16.gmra.mrb[64].mxu1 %vm85_vm0, %v18700_v8 }
 0xd6b   :  { %9149 = vmatprep.mubr.msk.bf16.mxu1 %vm85_vm0, %v18703_v51 }
 0xd72   :  { %9150 = vmatmul.mubr.msk.bf16.gmra.mrb[68].mxu1 %vm85_vm0, %v18705_v29 }
 0xd73   :  { %9153 = vmatprep.mubr.msk.bf16.mxu1 %vm85_vm0, %v18706_v56 }
 0xd7a   :  { %9154 = vmatmul.mubr.msk.bf16.gmra.mrb[72].mxu1 %vm85_vm0, %v6005_v38 }
 0xd7b   :  { %9157 = vmatprep.mubr.msk.bf16.mxu1 %vm85_vm0, %v18707_v12 }
 0xd82   :  { %9158 = vmatmul.mubr.msk.bf16.gmra.mrb[76].mxu1 %vm85_vm0, %v18708_v42 }
 0xd83   :  { %9161 = vmatprep.mubr.msk.bf16.mxu1 %vm85_vm0, %v18709_v6 }
 0xd8a   :  { %9162 = vmatmul.mubr.msk.bf16.gmra.mrb[80].mxu1 %vm85_vm0, %v18710_v9 }
 0xe25   :  { %v9135_v41 = vpop.f32.mrb[52].mxu1 }
 0xe26   :  { %8087 = vst.msk [vmem:[%s16921_s5 + $0x110] sm:$0xff] %vm85_vm0, %v9135_v41  ;;  %v7567_v18 = vpop.f32.mrb[53].mxu1 }
 0xe27   :  { %8085 = vst.msk [vmem:[%s16921_s5 + $0x100] sm:$0xff] %vm85_vm0, %v7567_v18  ;;  %v9136_v38 = vpop.f32.mrb[54].mxu1 }
 0xe28   :  { %8088 = vst.msk [vmem:[%s16921_s5 + $0x118] sm:$0xff] %vm85_vm0, %v9136_v38  ;;  %v7570_v48 = vpop.f32.mrb[55].mxu1 }
 0xe29   :  { %8086 = vst.msk [vmem:[%s16921_s5 + $0x108] sm:$0xff] %vm85_vm0, %v7570_v48 }
 0xe2d   :  { %v9139_v31 = vpop.f32.mrb[56].mxu1 }
 0xe2e   :  { %8091 = vst.msk [vmem:[%s16921_s5 + $0x130] sm:$0xff] %vm85_vm0, %v9139_v31  ;;  %v7583_v4 = vpop.f32.mrb[57].mxu1 }
 0xe2f   :  { %8089 = vst.msk [vmem:[%s16921_s5 + $0x120] sm:$0xff] %vm85_vm0, %v7583_v4  ;;  %v9140_v55 = vpop.f32.mrb[58].mxu1 }
 0xe30   :  { %8092 = vst.msk [vmem:[%s16921_s5 + $0x138] sm:$0xff] %vm85_vm0, %v9140_v55  ;;  %v7586_v20 = vpop.f32.mrb[59].mxu1 }
 0xe31   :  { %8090 = vst.msk [vmem:[%s16921_s5 + $0x128] sm:$0xff] %vm85_vm0, %v7586_v20 }
 0xe35   :  { %v9143_v1 = vpop.f32.mrb[60].mxu1 }
 0xe36   :  { %8095 = vst.msk [vmem:[%s16921_s5 + $0x150] sm:$0xff] %vm85_vm0, %v9143_v1  ;;  %v7599_v19 = vpop.f32.mrb[61].mxu1 }
 0xe37   :  { %8093 = vst.msk [vmem:[%s16921_s5 + $0x140] sm:$0xff] %vm85_vm0, %v7599_v19  ;;  %v9144_v11 = vpop.f32.mrb[62].mxu1 }
 0xe38   :  { %8096 = vst.msk [vmem:[%s16921_s5 + $0x158] sm:$0xff] %vm85_vm0, %v9144_v11  ;;  %v7602_v39 = vpop.f32.mrb[63].mxu1 }
 0xe39   :  { %8094 = vst.msk [vmem:[%s16921_s5 + $0x148] sm:$0xff] %vm85_vm0, %v7602_v39 }
 0xe3d   :  { %v9147_v26 = vpop.f32.mrb[64].mxu1 }
 0xe3e   :  { %8099 = vst.msk [vmem:[%s16921_s5 + $0x170] sm:$0xff] %vm85_vm0, %v9147_v26  ;;  %v7615_v10 = vpop.f32.mrb[65].mxu1 }
 0xe3f   :  { %8097 = vst.msk [vmem:[%s16921_s5 + $0x160] sm:$0xff] %vm85_vm0, %v7615_v10  ;;  %v9148_v33 = vpop.f32.mrb[66].mxu1 }
 0xe40   :  { %8100 = vst.msk [vmem:[%s16921_s5 + $0x178] sm:$0xff] %vm85_vm0, %v9148_v33  ;;  %v7618_v15 = vpop.f32.mrb[67].mxu1 }
 0xe41   :  { %8098 = vst.msk [vmem:[%s16921_s5 + $0x168] sm:$0xff] %vm85_vm0, %v7618_v15 }
 0xe45   :  { %v9151_v13 = vpop.f32.mrb[68].mxu1 }
 0xe46   :  { %8103 = vst.msk [vmem:[%s16921_s5 + $0x190] sm:$0xff] %vm85_vm0, %v9151_v13  ;;  %v7631_v30 = vpop.f32.mrb[69].mxu1 }
 0xe47   :  { %8101 = vst.msk [vmem:[%s16921_s5 + $0x180] sm:$0xff] %vm85_vm0, %v7631_v30  ;;  %v9152_v7 = vpop.f32.mrb[70].mxu1 }
 0xe48   :  { %8104 = vst.msk [vmem:[%s16921_s5 + $0x198] sm:$0xff] %vm85_vm0, %v9152_v7  ;;  %v7634_v5 = vpop.f32.mrb[71].mxu1 }
 0xe49   :  { %8102 = vst.msk [vmem:[%s16921_s5 + $0x188] sm:$0xff] %vm85_vm0, %v7634_v5 }
 0xe4d   :  { %v9155_v23 = vpop.f32.mrb[72].mxu1 }
 0xe4e   :  { %8107 = vst.msk [vmem:[%s16921_s5 + $0x1b0] sm:$0xff] %vm85_vm0, %v9155_v23  ;;  %v7647_v43 = vpop.f32.mrb[73].mxu1 }
 0xe4f   :  { %8105 = vst.msk [vmem:[%s16921_s5 + $0x1a0] sm:$0xff] %vm85_vm0, %v7647_v43  ;;  %v9156_v36 = vpop.f32.mrb[74].mxu1 }
 0xe50   :  { %8108 = vst.msk [vmem:[%s16921_s5 + $0x1b8] sm:$0xff] %vm85_vm0, %v9156_v36  ;;  %v7650_v61 = vpop.f32.mrb[75].mxu1 }
 0xe51   :  { %8106 = vst.msk [vmem:[%s16921_s5 + $0x1a8] sm:$0xff] %vm85_vm0, %v7650_v61 }
 0xe55   :  { %v9159_v35 = vpop.f32.mrb[76].mxu1 }
 0xe56   :  { %8111 = vst.msk [vmem:[%s16921_s5 + $0x1d0] sm:$0xff] %vm85_vm0, %v9159_v35  ;;  %v7663_v57 = vpop.f32.mrb[77].mxu1 }
 0xe57   :  { %8109 = vst.msk [vmem:[%s16921_s5 + $0x1c0] sm:$0xff] %vm85_vm0, %v7663_v57  ;;  %v9160_v2 = vpop.f32.mrb[78].mxu1 }
 0xe58   :  { %8112 = vst.msk [vmem:[%s16921_s5 + $0x1d8] sm:$0xff] %vm85_vm0, %v9160_v2  ;;  %v7666_v62 = vpop.f32.mrb[79].mxu1 }
 0xe59   :  { %8110 = vst.msk [vmem:[%s16921_s5 + $0x1c8] sm:$0xff] %vm85_vm0, %v7666_v62 }
 0xe5d   :  { %v9163_v53 = vpop.f32.mrb[80].mxu1 }
 0xe5e   :  { %8115 = vst.msk [vmem:[%s16921_s5 + $0x1f0] sm:$0xff] %vm85_vm0, %v9163_v53  ;;  %v7679_v50 = vpop.f32.mrb[81].mxu1 }
 0xe5f   :  { %8113 = vst.msk [vmem:[%s16921_s5 + $0x1e0] sm:$0xff] %vm85_vm0, %v7679_v50  ;;  %v9164_v28 = vpop.f32.mrb[82].mxu1 }
 0xe60   :  { %8116 = vst.msk [vmem:[%s16921_s5 + $0x1f8] sm:$0xff] %vm85_vm0, %v9164_v28  ;;  %v7682_v24 = vpop.f32.mrb[83].mxu1 }
 0xe61   :  { %8114 = vst.msk [vmem:[%s16921_s5 + $0x1e8] sm:$0xff] %vm85_vm0, %v7682_v24 }

</bundles_post_ra>
